<compile_context>
chip_gen: v7x
topology: tpu7x:2x2x1
jax: 0.10.0
libtpu: 0.0.40
codegen_flags: <defaults>
</compile_context>

<pallas_src>
import functools

import jax
import jax.numpy as jnp
from jax.experimental import pallas as pl
from jax.experimental.pallas import tpu as pltpu


_ALIGN = 16  # sublane alignment that also satisfies bf16 (16,128) packing


def _round_up(x, m):
    return ((x + m - 1) // m) * m


# ----------------------------- Pallas kernel ------------------------------- #

def _resblock_kernel(*refs, Wp, W, M, store_off, R, has_projection):
    """Fused residual block for one image (stride == 1).

    Flat-pixel layout: pixel (h, w) of the (zero-channel-padded) image sits at
    flat row store_off + h*Wp + w of both the input slab and the ypad slab
    (Wp = W + 2; the 2 rightmost flat columns per row are zero padding /
    garbage and are dropped by the wrapper).
    """
    if has_projection:
        (x_ref, w1_ref, b1_ref, w2_ref, b2_ref, ws_ref, bsc_ref,
         o_ref, ypad_ref) = refs
    else:
        (x_ref, w1_ref, b1_ref, w2_ref, b2_ref, o_ref, ypad_ref) = refs
        ws_ref = bsc_ref = None

    read_base = store_off - (Wp + 1)
    cpo = ypad_ref.shape[1]

    def im2col(slab):
        # 9 shifted views of the resident slab (each a full 128-lane multiple
        # wide), concatenated along lanes at 128-aligned offsets -> one deep-K
        # matmul operand.  im2col lives in VMEM only.
        taps = []
        for kh in range(3):
            for kw in range(3):
                s = read_base + kh * Wp + kw
                taps.append(slab[s:s + M, :])
        return jnp.concatenate(taps, axis=-1)            # (M, 9*C)

    x_f32 = x_ref[...]                                    # (R, Cpi) f32, read once
    x_bf = x_f32.astype(jnp.bfloat16)

    # ---- conv1 (+ folded BN1 scale) as ONE MXU matmul
    acc1 = jnp.dot(im2col(x_bf), w1_ref[...],
                   preferred_element_type=jnp.float32)    # (M, Cpo) f32

    # valid-column mask computed in-kernel (zero the 2 garbage cols per row)
    col = jax.lax.broadcasted_iota(jnp.int32, (M, 1), 0) % Wp
    mask = (col < W).astype(jnp.float32)
    y1 = jnp.maximum(acc1 + b1_ref[...], 0.0) * mask      # BN1 bias + ReLU

    # ---- stage y1 into the zero-padded bf16 flat slab (VMEM only) for conv2.
    # Only the halo rows are zeroed; the interior is fully overwritten.
    ypad_ref[0:store_off, :] = jnp.zeros((store_off, cpo), jnp.bfloat16)
    ypad_ref[store_off + M:R, :] = jnp.zeros((R - store_off - M, cpo),
                                             jnp.bfloat16)
    ypad_ref[store_off:store_off + M, :] = y1.astype(jnp.bfloat16)

    # ---- conv2 (+ folded BN2 scale) as ONE MXU matmul
    ypad = ypad_ref[...]                                   # (R, Cpo) bf16
    acc2 = jnp.dot(im2col(ypad), w2_ref[...],
                   preferred_element_type=jnp.float32) + b2_ref[...]

    # ---- shortcut
    if has_projection:
        # 1x1 conv (BN scale folded) on the interior pixels (aligned slice)
        sc = jnp.dot(x_bf[store_off:store_off + M, :], ws_ref[...],
                     preferred_element_type=jnp.float32) + bsc_ref[...]
    else:
        # identity fast path: exact f32 residual add (aligned slice)
        sc = x_f32[store_off:store_off + M, :]

    o_ref[...] = jnp.maximum(acc2 + sc, 0.0)


# ------------------------------- JAX wrapper -------------------------------- #

def _fold_bn(gamma, beta, mean, var, eps):
    s = gamma / jnp.sqrt(var + eps)
    return s, beta - mean * s


@functools.partial(jax.jit, static_argnames=("stride", "eps"))
def residual_block_forward(x_nchw, params, stride=1, eps=1e-5):
    if stride != 1:
        # TODO(synk): stride != 1 (strided conv1 / strided 1x1 shortcut) is not
        # implemented in the fused Pallas path.
        raise NotImplementedError("Pallas ResidualBlock path supports stride=1 only")

    N, Cin, H, W = x_nchw.shape
    Cout = params["w2"].shape[-1]
    Cpi = _round_up(Cin, 128)                   # lane-dense channel quanta
    Cpo = _round_up(Cout, 128)
    Wp = W + 2                                  # padded flat row width
    M = H * Wp                                  # flat output rows (2 garbage cols/row)
    store_off = _round_up(Wp + 1, _ALIGN)       # aligned interior offset
    R = _round_up(store_off + M + Wp + 1, _ALIGN)   # rows of the padded flat slabs

    # input: NCHW -> NHWC, pad W->Wp and channels->Cpi with zeros, flatten and
    # add aligned top/bottom halo rows; f32 (exact identity residual), one HBM read.
    x = jnp.transpose(x_nchw, (0, 2, 3, 1)).astype(jnp.float32)
    x = jnp.pad(x, ((0, 0), (0, 0), (0, Wp - W), (0, Cpi - Cin)))   # (N,H,Wp,Cpi)
    x = x.reshape(N, M, Cpi)
    x_flat = jnp.pad(x, ((0, 0), (store_off, R - store_off - M), (0, 0)))  # (N,R,Cpi)

    # fold BN scales into the conv weights, zero-pad to the lane quanta and
    # flatten the 3x3 taps into the contraction dim (kh, kw, cin ordering).
    s1, b1 = _fold_bn(params["gamma1"], params["beta1"],
                      params["mean1"], params["var1"], eps)
    s2, b2 = _fold_bn(params["gamma2"], params["beta2"],
                      params["mean2"], params["var2"], eps)
    w1 = jnp.zeros((3, 3, Cpi, Cpo), jnp.float32)
    w1 = w1.at[:, :, :Cin, :Cout].set(params["w1"] * s1)
    w1 = w1.reshape(9 * Cpi, Cpo).astype(jnp.bfloat16)
    w2 = jnp.zeros((3, 3, Cpo, Cpo), jnp.float32)
    w2 = w2.at[:, :, :Cout, :Cout].set(params["w2"] * s2)
    w2 = w2.reshape(9 * Cpo, Cpo).astype(jnp.bfloat16)
    b1p = jnp.zeros((1, Cpo), jnp.float32).at[0, :Cout].set(b1)
    b2p = jnp.zeros((1, Cpo), jnp.float32).at[0, :Cout].set(b2)

    has_projection = Cin != Cout                # stride == 1 here
    inputs = [x_flat, w1, b1p, w2, b2p]
    in_specs = [
        pl.BlockSpec((None, R, Cpi), lambda n: (n, 0, 0)),
        pl.BlockSpec((9 * Cpi, Cpo), lambda n: (0, 0)),
        pl.BlockSpec((1, Cpo), lambda n: (0, 0)),
        pl.BlockSpec((9 * Cpo, Cpo), lambda n: (0, 0)),
        pl.BlockSpec((1, Cpo), lambda n: (0, 0)),
    ]
    if has_projection:
        ssc, bsc = _fold_bn(params["gamma_sc"], params["beta_sc"],
                            params["mean_sc"], params["var_sc"], eps)
        ws = jnp.zeros((Cpi, Cpo), jnp.float32)
        ws = ws.at[:Cin, :Cout].set(params["w_sc"] * ssc).astype(jnp.bfloat16)
        bscp = jnp.zeros((1, Cpo), jnp.float32).at[0, :Cout].set(bsc)
        inputs += [ws, bscp]
        in_specs += [pl.BlockSpec((Cpi, Cpo), lambda n: (0, 0)),
                     pl.BlockSpec((1, Cpo), lambda n: (0, 0))]

    kernel = functools.partial(_resblock_kernel, Wp=Wp, W=W, M=M,
                               store_off=store_off, R=R,
                               has_projection=has_projection)
    out_flat = pl.pallas_call(
        kernel,
        out_shape=jax.ShapeDtypeStruct((N, M, Cpo), jnp.float32),
        grid=(N,),
        in_specs=in_specs,
        out_specs=pl.BlockSpec((None, M, Cpo), lambda n: (n, 0, 0)),
        scratch_shapes=[pltpu.VMEM((R, Cpo), jnp.bfloat16)],
        compiler_params=pltpu.CompilerParams(
            dimension_semantics=("parallel",),
            vmem_limit_bytes=32 * 1024 * 1024),
    )(*inputs)

    # drop the 2 garbage flat columns per row and the channel padding, -> NCHW
    out = out_flat.reshape(N, H, Wp, Cpo)[:, :, :W, :Cout]
    return jnp.transpose(out, (0, 3, 1, 2))


# ---------------------------- pure-JAX reference ---------------------------- #

def _reference(x_nchw, params, stride=1, eps=1e-5):
    def conv(x, w_hwio, s, k):
        return jax.lax.conv_general_dilated(
            x, w_hwio, window_strides=(s, s), padding=[(k // 2, k // 2)] * 2,
            dimension_numbers=("NHWC", "HWIO", "NHWC"),
            precision=jax.lax.Precision.HIGHEST)

    def bn(y, g, b, m, v):
        return (y - m) / jnp.sqrt(v + eps) * g + b

    x = jnp.transpose(x_nchw, (0, 2, 3, 1)).astype(jnp.float32)
    Cin = x.shape[-1]
    Cout = params["w2"].shape[-1]
    y = jax.nn.relu(bn(conv(x, params["w1"], stride, 3),
                       params["gamma1"], params["beta1"],
                       params["mean1"], params["var1"]))
    y = bn(conv(y, params["w2"], 1, 3),
           params["gamma2"], params["beta2"], params["mean2"], params["var2"])
    if stride != 1 or Cin != Cout:
        sc = bn(conv(x, params["w_sc"].reshape(1, 1, Cin, Cout), stride, 1),
                params["gamma_sc"], params["beta_sc"],
                params["mean_sc"], params["var_sc"])
    else:
        sc = x
    return jnp.transpose(jax.nn.relu(y + sc), (0, 3, 1, 2))


# ----------------------------------- main ----------------------------------- #

def _make_params(key, cin, cout, projection):
    keys = jax.random.split(key, 16)
    params = {
        "w1": jax.random.normal(keys[0], (3, 3, cin, cout), jnp.float32) * 0.1,
        "gamma1": jax.random.uniform(keys[1], (cout,), jnp.float32, 0.5, 1.5),
        "beta1": jax.random.normal(keys[2], (cout,), jnp.float32) * 0.1,
        "mean1": jax.random.normal(keys[3], (cout,), jnp.float32) * 0.1,
        "var1": jax.random.uniform(keys[4], (cout,), jnp.float32, 0.5, 1.5),

        "w2": jax.random.normal(keys[5], (3, 3, cout, cout), jnp.float32) * 0.1,
        "gamma2": jax.random.uniform(keys[6], (cout,), jnp.float32, 0.5, 1.5),
        "beta2": jax.random.normal(keys[7], (cout,), jnp.float32) * 0.1,
        "mean2": jax.random.normal(keys[8], (cout,), jnp.float32) * 0.1,
        "var2": jax.random.uniform(keys[9], (cout,), jnp.float32, 0.5, 1.5),
    }
    if projection:
        params.update({
            "w_sc": jax.random.normal(keys[10], (cin, cout), jnp.float32) * 0.1,
            "gamma_sc": jax.random.uniform(keys[11], (cout,), jnp.float32, 0.5, 1.5),
            "beta_sc": jax.random.normal(keys[12], (cout,), jnp.float32) * 0.1,
            "mean_sc": jax.random.normal(keys[13], (cout,), jnp.float32) * 0.1,
            "var_sc": jax.random.uniform(keys[14], (cout,), jnp.float32, 0.5, 1.5),
        })
    return params


if __name__ == "__main__":
    N, H, W = 2, 16, 16
    root = jax.random.PRNGKey(0)
    k_proj, k_id, kx1, kx2 = jax.random.split(root, 4)

    # 1) projection-shortcut block (Cin != Cout), stride = 1
    Cin, Cout = 4, 8
    params_p = _make_params(k_proj, Cin, Cout, projection=True)
    x1 = jax.random.normal(kx1, (N, Cin, H, W), jnp.float32)
    out1 = jax.block_until_ready(residual_block_forward(x1, params_p, stride=1))
    ref1 = jax.block_until_ready(_reference(x1, params_p, stride=1))
    assert out1.shape == (N, Cout, H, W), out1.shape
    # bf16 MXU operands vs f32 HIGHEST reference -> expect ~1e-2 abs error
    assert jnp.allclose(out1, ref1, rtol=3e-2, atol=3e-2), float(
        jnp.max(jnp.abs(out1 - ref1)))

    # 2) identity-shortcut block (Cin == Cout), stride = 1
    C = 8
    params_i = _make_params(k_id, C, C, projection=False)
    x2 = jax.random.normal(kx2, (N, C, H, W), jnp.float32)
    out2 = jax.block_until_ready(residual_block_forward(x2, params_i, stride=1))
    ref2 = jax.block_until_ready(_reference(x2, params_i, stride=1))
    assert out2.shape == (N, C, H, W), out2.shape
    assert jnp.allclose(out2, ref2, rtol=3e-2, atol=3e-2), float(
        jnp.max(jnp.abs(out2 - ref2)))

    print("KERNEL_OK")
</pallas_src>

<mosaic_0001>
module attributes {stable_mosaic.version = 11 : i64} {
  func.func @_resblock_kernel(%arg0: i32, %arg1: memref<1x352x128xf32, #tpu.memory_space<vmem>>, %arg2: memref<1152x128xbf16, #tpu.memory_space<vmem>>, %arg3: memref<1x128xf32, #tpu.memory_space<vmem>>, %arg4: memref<1152x128xbf16, #tpu.memory_space<vmem>>, %arg5: memref<1x128xf32, #tpu.memory_space<vmem>>, %arg6: memref<128x128xbf16, #tpu.memory_space<vmem>>, %arg7: memref<1x128xf32, #tpu.memory_space<vmem>>, %arg8: memref<1x288x128xf32, #tpu.memory_space<vmem>>, %arg9: memref<352x128xbf16, #tpu.memory_space<vmem>>) attributes {dimension_semantics = [#tpu.dimension_semantics<parallel>], iteration_bounds = array<i64: 2>, scalar_prefetch = 0 : i64, scratch_operands = 1 : i64, tpu.core_type = #tpu.core_type<tc>, window_params = [{transform_indices = @transform_0, window_bounds = array<i64: 1, 352, 128>}, {pipeline_mode = #tpu.pipeline_mode<synchronous>, transform_indices = @transform_1, window_bounds = array<i64: 1152, 128>}, {pipeline_mode = #tpu.pipeline_mode<synchronous>, transform_indices = @transform_2, window_bounds = array<i64: 1, 128>}, {pipeline_mode = #tpu.pipeline_mode<synchronous>, transform_indices = @transform_3, window_bounds = array<i64: 1152, 128>}, {pipeline_mode = #tpu.pipeline_mode<synchronous>, transform_indices = @transform_4, window_bounds = array<i64: 1, 128>}, {pipeline_mode = #tpu.pipeline_mode<synchronous>, transform_indices = @transform_5, window_bounds = array<i64: 128, 128>}, {pipeline_mode = #tpu.pipeline_mode<synchronous>, transform_indices = @transform_6, window_bounds = array<i64: 1, 128>}, {transform_indices = @transform_7, window_bounds = array<i64: 1, 288, 128>}]} {
    %c0 = arith.constant 0 : index
    %c0_0 = arith.constant 0 : index
    %c0_1 = arith.constant 0 : index
    %0 = vector.load %arg1[%c0, %c0_0, %c0_1] : memref<1x352x128xf32, #tpu.memory_space<vmem>>, vector<1x352x128xf32>
    %1 = vector.shape_cast %0 : vector<1x352x128xf32> to vector<352x128xf32>
    %2 = arith.truncf %1 : vector<352x128xf32> to vector<352x128xbf16>
    %3 = vector.extract_strided_slice %2 {offsets = [13, 0], sizes = [288, 128], strides = [1, 1]} : vector<352x128xbf16> to vector<288x128xbf16>
    %4 = vector.extract_strided_slice %2 {offsets = [14, 0], sizes = [288, 128], strides = [1, 1]} : vector<352x128xbf16> to vector<288x128xbf16>
    %5 = vector.extract_strided_slice %2 {offsets = [15, 0], sizes = [288, 128], strides = [1, 1]} : vector<352x128xbf16> to vector<288x128xbf16>
    %6 = vector.extract_strided_slice %2 {offsets = [31, 0], sizes = [288, 128], strides = [1, 1]} : vector<352x128xbf16> to vector<288x128xbf16>
    %7 = vector.extract_strided_slice %2 {offsets = [32, 0], sizes = [288, 128], strides = [1, 1]} : vector<352x128xbf16> to vector<288x128xbf16>
    %8 = vector.extract_strided_slice %2 {offsets = [33, 0], sizes = [288, 128], strides = [1, 1]} : vector<352x128xbf16> to vector<288x128xbf16>
    %9 = vector.extract_strided_slice %2 {offsets = [49, 0], sizes = [288, 128], strides = [1, 1]} : vector<352x128xbf16> to vector<288x128xbf16>
    %10 = vector.extract_strided_slice %2 {offsets = [50, 0], sizes = [288, 128], strides = [1, 1]} : vector<352x128xbf16> to vector<288x128xbf16>
    %11 = vector.extract_strided_slice %2 {offsets = [51, 0], sizes = [288, 128], strides = [1, 1]} : vector<352x128xbf16> to vector<288x128xbf16>
    %12 = tpu.concatenate %3, %4, %5, %6, %7, %8, %9, %10, %11 in 1 : vector<288x128xbf16>, vector<288x128xbf16>, vector<288x128xbf16>, vector<288x128xbf16>, vector<288x128xbf16>, vector<288x128xbf16>, vector<288x128xbf16>, vector<288x128xbf16>, vector<288x128xbf16> -> vector<288x1152xbf16>
    %c0_2 = arith.constant 0 : index
    %c0_3 = arith.constant 0 : index
    %13 = vector.load %arg2[%c0_2, %c0_3] : memref<1152x128xbf16, #tpu.memory_space<vmem>>, vector<1152x128xbf16>
    %cst = arith.constant dense<0.000000e+00> : vector<288x128xf32>
    %14 = tpu.matmul %12, %13, %cst {dimension_numbers = #tpu.dot_dimension_numbers<[1], [0], [0], [1], [0, 0, 1, 1], [], []>} : vector<288x1152xbf16>, vector<1152x128xbf16>, vector<288x128xf32> -> vector<288x128xf32>
    %15 = tpu.iota {dimensions = array<i32: 0>} : vector<288x1xi32>
    %c18_i32 = arith.constant 18 : i32
    %c0_i32 = arith.constant 0 : i32
    %16 = arith.cmpi eq, %c18_i32, %c0_i32 : i32
    %c1_i32 = arith.constant 1 : i32
    %17 = arith.select %16, %c1_i32, %c18_i32 : i32
    %18 = vector.broadcast %17 : i32 to vector<288x1xi32>
    %19 = arith.remsi %15, %18 : vector<288x1xi32>
    %c0_i32_4 = arith.constant 0 : i32
    %20 = vector.broadcast %c0_i32_4 : i32 to vector<288x1xi32>
    %21 = arith.cmpi ne, %19, %20 : vector<288x1xi32>
    %c0_i32_5 = arith.constant 0 : i32
    %22 = vector.broadcast %c0_i32_5 : i32 to vector<288x1xi32>
    %23 = arith.cmpi slt, %19, %22 : vector<288x1xi32>
    %c0_i32_6 = arith.constant 0 : i32
    %24 = arith.cmpi slt, %17, %c0_i32_6 : i32
    %25 = vector.broadcast %24 : i1 to vector<288x1xi1>
    %26 = vector.broadcast %25 : vector<288x1xi1> to vector<288x1xi1>
    %27 = arith.xori %23, %26 : vector<288x1xi1>
    %28 = arith.andi %27, %21 : vector<288x1xi1>
    %29 = vector.broadcast %17 : i32 to vector<288x1xi32>
    %30 = arith.addi %19, %29 : vector<288x1xi32>
    %31 = arith.select %28, %30, %19 : vector<288x1xi1>, vector<288x1xi32>
    %c16_i32 = arith.constant 16 : i32
    %32 = vector.broadcast %c16_i32 : i32 to vector<288x1xi32>
    %33 = arith.cmpi slt, %31, %32 : vector<288x1xi32>
    %34 = arith.extui %33 : vector<288x1xi1> to vector<288x1xi32>
    %35 = arith.sitofp %34 : vector<288x1xi32> to vector<288x1xf32>
    %c0_7 = arith.constant 0 : index
    %c0_8 = arith.constant 0 : index
    %36 = vector.load %arg3[%c0_7, %c0_8] : memref<1x128xf32, #tpu.memory_space<vmem>>, vector<1x128xf32>
    %37 = vector.broadcast %36 : vector<1x128xf32> to vector<288x128xf32>
    %38 = arith.addf %14, %37 : vector<288x128xf32>
    %cst_9 = arith.constant 0.000000e+00 : f32
    %39 = vector.broadcast %cst_9 : f32 to vector<288x128xf32>
    %40 = arith.maximumf %38, %39 : vector<288x128xf32>
    %41 = vector.broadcast %35 : vector<288x1xf32> to vector<288x128xf32>
    %42 = arith.mulf %40, %41 : vector<288x128xf32>
    %cst_10 = arith.constant 0.000000e+00 : bf16
    %43 = vector.broadcast %cst_10 : bf16 to vector<32x128xbf16>
    %c0_11 = arith.constant 0 : index
    %c0_12 = arith.constant 0 : index
    %44 = vector.load %arg9[%c0_11, %c0_12] : memref<352x128xbf16, #tpu.memory_space<vmem>>, vector<32x128xbf16>
    tpu.vector_store %arg9[%c0_11, %c0_12], %43 {strides = array<i32>} : memref<352x128xbf16, #tpu.memory_space<vmem>>, vector<32x128xbf16>,
    %cst_13 = arith.constant 0.000000e+00 : bf16
    %45 = vector.broadcast %cst_13 : bf16 to vector<32x128xbf16>
    %c320 = arith.constant 320 : index
    %c0_14 = arith.constant 0 : index
    %46 = vector.load %arg9[%c320, %c0_14] : memref<352x128xbf16, #tpu.memory_space<vmem>>, vector<32x128xbf16>
    tpu.vector_store %arg9[%c320, %c0_14], %45 {strides = array<i32>} : memref<352x128xbf16, #tpu.memory_space<vmem>>, vector<32x128xbf16>,
    %47 = arith.truncf %42 : vector<288x128xf32> to vector<288x128xbf16>
    %c32 = arith.constant 32 : index
    %c0_15 = arith.constant 0 : index
    %48 = vector.load %arg9[%c32, %c0_15] : memref<352x128xbf16, #tpu.memory_space<vmem>>, vector<288x128xbf16>
    tpu.vector_store %arg9[%c32, %c0_15], %47 {strides = array<i32>} : memref<352x128xbf16, #tpu.memory_space<vmem>>, vector<288x128xbf16>,
    %c0_16 = arith.constant 0 : index
    %c0_17 = arith.constant 0 : index
    %49 = vector.load %arg9[%c0_16, %c0_17] : memref<352x128xbf16, #tpu.memory_space<vmem>>, vector<352x128xbf16>
    %50 = vector.extract_strided_slice %49 {offsets = [13, 0], sizes = [288, 128], strides = [1, 1]} : vector<352x128xbf16> to vector<288x128xbf16>
    %51 = vector.extract_strided_slice %49 {offsets = [14, 0], sizes = [288, 128], strides = [1, 1]} : vector<352x128xbf16> to vector<288x128xbf16>
    %52 = vector.extract_strided_slice %49 {offsets = [15, 0], sizes = [288, 128], strides = [1, 1]} : vector<352x128xbf16> to vector<288x128xbf16>
    %53 = vector.extract_strided_slice %49 {offsets = [31, 0], sizes = [288, 128], strides = [1, 1]} : vector<352x128xbf16> to vector<288x128xbf16>
    %54 = vector.extract_strided_slice %49 {offsets = [32, 0], sizes = [288, 128], strides = [1, 1]} : vector<352x128xbf16> to vector<288x128xbf16>
    %55 = vector.extract_strided_slice %49 {offsets = [33, 0], sizes = [288, 128], strides = [1, 1]} : vector<352x128xbf16> to vector<288x128xbf16>
    %56 = vector.extract_strided_slice %49 {offsets = [49, 0], sizes = [288, 128], strides = [1, 1]} : vector<352x128xbf16> to vector<288x128xbf16>
    %57 = vector.extract_strided_slice %49 {offsets = [50, 0], sizes = [288, 128], strides = [1, 1]} : vector<352x128xbf16> to vector<288x128xbf16>
    %58 = vector.extract_strided_slice %49 {offsets = [51, 0], sizes = [288, 128], strides = [1, 1]} : vector<352x128xbf16> to vector<288x128xbf16>
    %59 = tpu.concatenate %50, %51, %52, %53, %54, %55, %56, %57, %58 in 1 : vector<288x128xbf16>, vector<288x128xbf16>, vector<288x128xbf16>, vector<288x128xbf16>, vector<288x128xbf16>, vector<288x128xbf16>, vector<288x128xbf16>, vector<288x128xbf16>, vector<288x128xbf16> -> vector<288x1152xbf16>
    %c0_18 = arith.constant 0 : index
    %c0_19 = arith.constant 0 : index
    %60 = vector.load %arg4[%c0_18, %c0_19] : memref<1152x128xbf16, #tpu.memory_space<vmem>>, vector<1152x128xbf16>
    %cst_20 = arith.constant dense<0.000000e+00> : vector<288x128xf32>
    %61 = tpu.matmul %59, %60, %cst_20 {dimension_numbers = #tpu.dot_dimension_numbers<[1], [0], [0], [1], [0, 0, 1, 1], [], []>} : vector<288x1152xbf16>, vector<1152x128xbf16>, vector<288x128xf32> -> vector<288x128xf32>
    %c0_21 = arith.constant 0 : index
    %c0_22 = arith.constant 0 : index
    %62 = vector.load %arg5[%c0_21, %c0_22] : memref<1x128xf32, #tpu.memory_space<vmem>>, vector<1x128xf32>
    %63 = vector.broadcast %62 : vector<1x128xf32> to vector<288x128xf32>
    %64 = arith.addf %61, %63 : vector<288x128xf32>
    %65 = vector.extract_strided_slice %2 {offsets = [32, 0], sizes = [288, 128], strides = [1, 1]} : vector<352x128xbf16> to vector<288x128xbf16>
    %c0_23 = arith.constant 0 : index
    %c0_24 = arith.constant 0 : index
    %66 = vector.load %arg6[%c0_23, %c0_24] : memref<128x128xbf16, #tpu.memory_space<vmem>>, vector<128x128xbf16>
    %cst_25 = arith.constant dense<0.000000e+00> : vector<288x128xf32>
    %67 = tpu.matmul %65, %66, %cst_25 {dimension_numbers = #tpu.dot_dimension_numbers<[1], [0], [0], [1], [0, 0, 1, 1], [], []>} : vector<288x128xbf16>, vector<128x128xbf16>, vector<288x128xf32> -> vector<288x128xf32>
    %c0_26 = arith.constant 0 : index
    %c0_27 = arith.constant 0 : index
    %68 = vector.load %arg7[%c0_26, %c0_27] : memref<1x128xf32, #tpu.memory_space<vmem>>, vector<1x128xf32>
    %69 = vector.broadcast %68 : vector<1x128xf32> to vector<288x128xf32>
    %70 = arith.addf %67, %69 : vector<288x128xf32>
    %71 = arith.addf %64, %70 : vector<288x128xf32>
    %cst_28 = arith.constant 0.000000e+00 : f32
    %72 = vector.broadcast %cst_28 : f32 to vector<288x128xf32>
    %73 = arith.maximumf %71, %72 : vector<288x128xf32>
    %c0_29 = arith.constant 0 : index
    %c0_30 = arith.constant 0 : index
    %c0_31 = arith.constant 0 : index
    %74 = vector.load %arg8[%c0_29, %c0_30, %c0_31] : memref<1x288x128xf32, #tpu.memory_space<vmem>>, vector<1x288x128xf32>
    %75 = vector.shape_cast %74 : vector<1x288x128xf32> to vector<288x128xf32>
    %76 = vector.shape_cast %73 : vector<288x128xf32> to vector<1x288x128xf32>
    tpu.vector_store %arg8[%c0_29, %c0_30, %c0_31], %76 {strides = array<i32>} : memref<1x288x128xf32, #tpu.memory_space<vmem>>, vector<1x288x128xf32>,
    return
  }
  func.func @transform_0(%arg0: i32) -> (i32, i32, i32) {
    %c0_i32 = arith.constant 0 : i32
    %c0_i32_0 = arith.constant 0 : i32
    %c0_i32_1 = arith.constant 0 : i32
    return %arg0, %c0_i32, %c0_i32_0 : i32, i32, i32
  }
  func.func @transform_1(%arg0: i32) -> (i32, i32) {
    %c0_i32 = arith.constant 0 : i32
    %c0_i32_0 = arith.constant 0 : i32
    %c0_i32_1 = arith.constant 0 : i32
    return %c0_i32, %c0_i32_0 : i32, i32
  }
  func.func @transform_2(%arg0: i32) -> (i32, i32) {
    %c0_i32 = arith.constant 0 : i32
    %c0_i32_0 = arith.constant 0 : i32
    %c0_i32_1 = arith.constant 0 : i32
    return %c0_i32, %c0_i32_0 : i32, i32
  }
  func.func @transform_3(%arg0: i32) -> (i32, i32) {
    %c0_i32 = arith.constant 0 : i32
    %c0_i32_0 = arith.constant 0 : i32
    %c0_i32_1 = arith.constant 0 : i32
    return %c0_i32, %c0_i32_0 : i32, i32
  }
  func.func @transform_4(%arg0: i32) -> (i32, i32) {
    %c0_i32 = arith.constant 0 : i32
    %c0_i32_0 = arith.constant 0 : i32
    %c0_i32_1 = arith.constant 0 : i32
    return %c0_i32, %c0_i32_0 : i32, i32
  }
  func.func @transform_5(%arg0: i32) -> (i32, i32) {
    %c0_i32 = arith.constant 0 : i32
    %c0_i32_0 = arith.constant 0 : i32
    %c0_i32_1 = arith.constant 0 : i32
    return %c0_i32, %c0_i32_0 : i32, i32
  }
  func.func @transform_6(%arg0: i32) -> (i32, i32) {
    %c0_i32 = arith.constant 0 : i32
    %c0_i32_0 = arith.constant 0 : i32
    %c0_i32_1 = arith.constant 0 : i32
    return %c0_i32, %c0_i32_0 : i32, i32
  }
  func.func @transform_7(%arg0: i32) -> (i32, i32, i32) {
    %c0_i32 = arith.constant 0 : i32
    %c0_i32_0 = arith.constant 0 : i32
    %c0_i32_1 = arith.constant 0 : i32
    return %arg0, %c0_i32, %c0_i32_0 : i32, i32, i32
  }
}

</mosaic_0001>

<bundles_post_ra>
// kernel: residual_block_forward.1
= control target key start
LH: loop header
LB: loop body
LE: loop exit
PB: predicated region body
PF: predicated region fallthrough
CT: control target
= control target key end

     0   :  { %s9219_s24 = smov 0   ;;  %s13079_s0 = inlined_call_operand.vmem [shape: f32[2,352,128], index: 0, kind: input, shape index: {}]   ;;  %s13080_s1 = inlined_call_operand.vmem [shape: bf16[1152,128], index: 1, kind: input, shape index: {}]   ;;  %s13081_s2 = inlined_call_operand.vmem [shape: f32[1,128], index: 2, kind: input, shape index: {}]   ;;  %s13082_s3 = inlined_call_operand.vmem [shape: bf16[1152,128], index: 3, kind: input, shape index: {}]   ;;  %s13083_s4 = inlined_call_operand.vmem [shape: f32[1,128], index: 4, kind: input, shape index: {}]   ;;  %s13084_s5 = inlined_call_operand.vmem [shape: bf16[128,128], index: 5, kind: input, shape index: {}]   ;;  %s13085_s6 = inlined_call_operand.vmem [shape: f32[1,128], index: 6, kind: input, shape index: {}]   ;;  %s13086_s7 = inlined_call_operand.vmem [shape: f32[2,288,128], index: 7, kind: output, shape index: {}]  }
   0x1 LB: > { %s7975_s25 = sadd.s32 4294967295, %s9175_s24   ;;  %p7979_p0 = scmp.ge.s32.totalorder %s9175_s24, 1  ;;  %s9175_s24 = sphi %s9219_s24, %s17_s24  }
   0x2   : > { %p237_p1 = scmp.lt.s32.totalorder %s9175_s24, 3 }
   0x4   : > { %p238_p2 = pnand %p7979_p0, %p237_p1 }
   0x6   : > { %241 = sbr.rel (%p238_p2) target bundleno = 1596 (0x63c), region = 48 }
   0xd   : > { %v9013_v0 = vld [vmem:[%s13080_s1] sm:$0xff]   ;;  %v13087_v1 = vmov 0   ;;  %p269_p3 = scmp.lt.s32.totalorder %s7975_s25, 1  ;;  %v9014_v2 = vld [vmem:[%s13080_s1 + $0x8] sm:$0xff]   ;;  %v9015_v3 = vld [vmem:[%s13080_s1 + $0x10] sm:$0xff]   ;;  %vm13168_vm2 = vcmask 1046528  }
   0xe   : > { %3367 = vmatprep.subr.bf16.mxu0 %v13087_v1  ;;  %v9016_v4 = vld [vmem:[%s13080_s1 + $0x18] sm:$0xff]   ;;  %v9017_v5 = vld [vmem:[%s13080_s1 + $0x20] sm:$0xff]   ;;  %v9018_v13 = vld [vmem:[%s13080_s1 + $0x28] sm:$0xff]   ;;  %vm346_vm0 = vsmask.f32 7424  ;;  %vm13167_vm3 = vcmask 1045504  }
   0xf   : > { %3368 = vmatpush1.bf16.msra.mxu0 %v9013_v0  ;;  %s13791_s25 = smov (!%p269_p3, %s7975_s25), 1  ;;  %v9019_v21 = vld [vmem:[%s13080_s1 + $0x30] sm:$0xff]   ;;  %v9020_v27 = vld [vmem:[%s13080_s1 + $0x38] sm:$0xff]   ;;  %v9021_v38 = vld [vmem:[%s13080_s1 + $0x40] sm:$0xff]   ;;  %vm1673_vm1 = vsmask.f32 1280 }
  0x10   : > { %3369 = vmatprep.subr.bf16.mxu0 %v13087_v1  ;;  %s8929_s9 = smul.u32 352, %s13791_s25  ;;  %v9022_v44 = vld [vmem:[%s13080_s1 + $0x48] sm:$0xff]   ;;  %v9023_v46 = vld [vmem:[%s13080_s1 + $0x50] sm:$0xff]   ;;  %v9024_v51 = vld [vmem:[%s13080_s1 + $0x58] sm:$0xff]   ;;  %vm13166_vm4 = vsmask.f32 6400 }
  0x11   : > { %v9025_v55 = vld [vmem:[%s13080_s1 + $0x60] sm:$0xff]   ;;  %v9026_v61 = vld [vmem:[%s13080_s1 + $0x68] sm:$0xff]   ;;  %vm13169_vm5 = vcmask 1044480   ;;  %vm13162_vm6 = vsmask.f32 5376  ;;  %s8930_s16 = smul.u32 288, %s13791_s25 }
  0x12   : > { %s9249_s14 = scalar_lea.vmem %s13079_s0, %s8929_s9 }
  0x13   : > { %3370 = vmatpush1.bf16.msra.mxu0 %v9014_v2  ;;  %v280_v6 = vld [vmem:[%s9249_s14] sm:$0xff]  ;;  %v281_v7 = vld [vmem:[%s9249_s14 + $0x8] sm:$0xff]  ;;  %v282_v8 = vld [vmem:[%s9249_s14 + $0x10] sm:$0xff]  ;;  %s12847_s19 = scalar_lea.vmem %s13086_s7, %s8930_s16 }
  0x14   : > { %3371 = vmatprep.subr.bf16.mxu0 %v13087_v1  ;;  %v283_v9 = vld [vmem:[%s9249_s14 + $0x18] sm:$0xff]  ;;  %v284_v10 = vld [vmem:[%s9249_s14 + $0x20] sm:$0xff]  ;;  %v285_v11 = vld [vmem:[%s9249_s14 + $0x28] sm:$0xff]  ;;  %v9261_v12 = vpack.c.bf16 %v281_v7, %v280_v6 }
  0x15   : > { %v9266_v14 = vpack.c.bf16 %v283_v9, %v282_v8  ;;  %v9268_v15 = vpack.c.bf16 %v285_v11, %v284_v10  ;;  %v286_v41 = vld [vmem:[%s9249_s14 + $0x30] sm:$0xff]  ;;  %v287_v42 = vld [vmem:[%s9249_s14 + $0x38] sm:$0xff]  ;;  %v288_v49 = vld [vmem:[%s9249_s14 + $0x40] sm:$0xff] }
  0x16   : > { %v348_v16 = vshrl.u32 %v9261_v12, 16  ;;  %v350_v17 = vshll.u32 %v9261_v12, 16  ;;  %v9311_v45 = vpack.c.bf16 %v287_v42, %v286_v41  ;;  %v289_v50 = vld [vmem:[%s9249_s14 + $0x48] sm:$0xff]  ;;  %v290_v56 = vld [vmem:[%s9249_s14 + $0x50] sm:$0xff]  ;;  %v291_v60 = vld [vmem:[%s9249_s14 + $0x58] sm:$0xff] }
  0x17   : > { %3372 = vmatpush1.bf16.msra.mxu0 %v9015_v3  ;;  %13234 = vst [vmem:[#allocation3_spill] sm:$0xff] %v9268_v15  ;;  %v355_v18 = vshll.u32 %v9266_v14, 16  ;;  %v359_v19 = vshrl.u32 %v9266_v14, 16  ;;  %v9276_v20 = vshll.u32 %v9268_v15, 16  ;;  %v9318_v47 = vshrl.u32 %v9268_v15, 16  ;;  %v292_v10 = vld [vmem:[%s9249_s14 + $0x60] sm:$0xff] }
  0x18   : > { %3373 = vmatprep.subr.bf16.mxu0 %v13087_v1  ;;  %v352_v22 = vrot.slane %v350_v17, 1  ;;  %13235 = vst [vmem:[#allocation4_spill] sm:$0xff] %v9311_v45  ;;  %v9321_v48 = vshll.u32 %v9311_v45, 16  ;;  %v9331_v54 = vpack.c.bf16 %v289_v50, %v288_v49  ;;  %v9340_v58 = vshrl.u32 %v9311_v45, 16 }
  0x19   : > { %v357_v23 = vrot.slane %v355_v18, 1  ;;  %v365_v24 = vrot.slane %v9276_v20, 1  ;;  %v9352_v3 = vpack.c.bf16 %v291_v60, %v290_v56  ;;  %v1675_v6 = vrot.slane %v350_v17, 7  ;;  %v293_v17 = vld [vmem:[%s9249_s14 + $0x68] sm:$0xff] }
  0x1a   : > { %v353_v25 = vor.u32 %v352_v22, %v348_v16  ;;  %v373_v53 = vrot.slane %v9321_v48, 1  ;;  %13236 = vst [vmem:[#allocation5_spill] sm:$0xff] %v9331_v54  ;;  %v9343_v59 = vshll.u32 %v9331_v54, 16  ;;  %v1677_v7 = vrot.slane %v359_v19, 6 }
  0x1b   : > { %3374 = vmatpush1.bf16.msra.mxu0 %v9016_v4  ;;  %v361_v26 = vor.u32 %v359_v19, %v357_v23  ;;  %v369_v52 = vor.u32 %v9318_v47, %v365_v24  ;;  %13237 = vst [vmem:[#allocation6_spill] sm:$0xff] %v9352_v3  ;;  %v9027_v4 = vld [vmem:[%s13080_s1 + $0x70] sm:$0xff]   ;;  %v1678_v8 = vrot.slane %v355_v18, 7  ;;  %v9028_v18 = vld [vmem:[%s13080_s1 + $0x78] sm:$0xff]  }
  0x1c   : > { %3375 = vmatprep.subr.bf16.mxu0 %v13087_v1  ;;  %v358_v28 = vsel %vm346_vm0, %v353_v25, %v357_v23  ;;  %v377_v0 = vor.u32 %v9340_v58, %v373_v53  ;;  %v381_v2 = vrot.slane %v9343_v59, 1 }
  0x1d   : > { %v366_v29 = vsel %vm346_vm0, %v361_v26, %v365_v24  ;;  %v1682_v30 = vshrl.u32 %v358_v28, 16  ;;  %v1685_v31 = vshll.u32 %v358_v28, 16  ;;  %v374_v57 = vsel %vm346_vm0, %v369_v52, %v373_v53  ;;  %v9031_v52 = vld [vmem:[%s13080_s1 + $0x90] sm:$0xff]  }
  0x1e   : > { %v1690_v32 = vshrl.u32 %v366_v29, 16  ;;  %v1693_v33 = vshll.u32 %v366_v29, 16  ;;  %v1814_v62 = vshrl.u32 %v374_v57, 16  ;;  %v1817_v63 = vshll.u32 %v374_v57, 16  ;;  %v9029_v29 = vld [vmem:[%s13080_s1 + $0x80] sm:$0xff]  }
  0x1f   : > { %3376 = vmatpush1.bf16.msra.mxu0 %v9017_v5  ;;  %v1684_v34 = vrot.slane %v1682_v30, 6  ;;  %v1687_v35 = vrot.slane %v1685_v31, 7  ;;  %v1674_v5 = vrot.slane %v348_v16, 6  ;;  %v9372_v16 = vshll.u32 %v9352_v3, 16 }
  0x20   : > { %3377 = vmatprep.subr.bf16.mxu0 %v13087_v1  ;;  %v1692_v36 = vrot.slane %v1690_v32, 6  ;;  %v1695_v37 = vrot.slane %v1693_v33, 7  ;;  %v1816_v9 = vrot.slane %v1814_v62, 6  ;;  %v1819_v11 = vrot.slane %v1817_v63, 7 }
  0x21   : > { %v1688_v39 = vor.u32 %v1687_v35, %v1684_v34  ;;  %13238 = vst [vmem:[#allocation7_spill] sm:$0xff] %v9372_v16  ;;  %v1676_v19 = vor.u32 %v1675_v6, %v1674_v5  ;;  %v1679_v22 = vor.u32 %v1678_v8, %v1677_v7  ;;  %v9378_v24 = vpack.c.bf16 %v293_v17, %v292_v10  ;;  %v294_v35 = vld [vmem:[%s9249_s14 + $0x70] sm:$0xff]  ;;  %v9032_v6 = vld [vmem:[%s13080_s1 + $0x98] sm:$0xff]  }
  0x22   : > { %v9301_v40 = vor.u32 %v1695_v37, %v1692_v36  ;;  %v1820_v25 = vor.u32 %v1819_v11, %v1816_v9  ;;  %v389_v28 = vrot.slane %v9372_v16, 1  ;;  %v1809_v30 = vrot.slane %v9318_v47, 6  ;;  %v295_v36 = vld [vmem:[%s9249_s14 + $0x78] sm:$0xff] }
  0x23   : > { %3378 = vmatpush1.bf16.msra.mxu0 %v9018_v13  ;;  %v382_v13 = vsel %vm346_vm0, %v377_v0, %v381_v2  ;;  %13239 = vst [vmem:[#allocation8_spill] sm:$0xff] %v9378_v24  ;;  %v1810_v31 = vrot.slane %v9276_v20, 7  ;;  %v1680_v32 = vsel %vm1673_vm1, %v1676_v19, %v1679_v22  ;;  %v9390_v33 = vshrl.u32 %v9352_v3, 16 }
  0x24   : > { %3379 = vmatprep.subr.bf16.mxu0 %v13087_v1  ;;  %v1697_v43 = vsel %vm1673_vm1, %v1688_v39, %v9301_v40  ;;  %v1873_v23 = vshrl.u32 %v382_v13, 16  ;;  %v1876_v26 = vshll.u32 %v382_v13, 16  ;;  %v9393_v34 = vshll.u32 %v9378_v24, 16 }
  0x25   : > { %3399 = vmatprep.mubr.bf16.mxu0 %v1697_v43  ;;  %v1821_v37 = vsel %vm1673_vm1, %v9301_v40, %v1820_v25  ;;  %v1811_v42 = vor.u32 %v1810_v31, %v1809_v30  ;;  %v9030_v43 = vld [vmem:[%s13080_s1 + $0x88] sm:$0xff]   ;;  %v393_v50 = vor.u32 %v9390_v33, %v389_v28  ;;  %v1868_v53 = vrot.slane %v9340_v58, 6  ;;  %v299_v31 = vld [vmem:[%s9249_s14 + $0x98] sm:$0xff] }
  0x26   : > { %v1878_v39 = vrot.slane %v1876_v26, 7  ;;  %v9416_v60 = vshrl.u32 %v9378_v24, 16  ;;  %v1927_v17 = vrot.slane %v9343_v59, 7  ;;  %v298_v26 = vld [vmem:[%s9249_s14 + $0x90] sm:$0xff] }
  0x27   : > { %3380 = vmatpush1.bf16.msra.mxu0 %v9019_v21  ;;  %v9369_v21 = vshrl.u32 %v9331_v54, 16  ;;  %v1812_v56 = vsel %vm1673_vm1, %v1679_v22, %v1811_v42 }
  0x28   : > { %3381 = vmatprep.subr.bf16.mxu0 %v13087_v1 }
  0x29   : > { %v1926_v22 = vrot.slane %v9369_v21, 6 }
  0x2b   : > { %3382 = vmatpush1.bf16.msra.mxu0 %v9020_v27  ;;  %v385_v27 = vor.u32 %v9369_v21, %v381_v2  ;;  %v296_v2 = vld [vmem:[%s9249_s14 + $0x80] sm:$0xff] }
  0x2c   : > { %3383 = vmatprep.subr.bf16.mxu0 %v13087_v1 }
  0x2d   : > { %v390_v41 = vsel %vm346_vm0, %v385_v27, %v389_v28 }
  0x2e   : > { %v1934_v40 = vshll.u32 %v390_v41, 16 }
  0x2f   : > { %3384 = vmatpush1.bf16.msra.mxu0 %v9021_v38  ;;  %v1875_v38 = vrot.slane %v1873_v23, 6 }
  0x30   : > { %3385 = vmatprep.subr.bf16.mxu0 %v13087_v1  ;;  %v1936_v62 = vrot.slane %v1934_v40, 7  ;;  %v1985_v40 = vrot.slane %v9372_v16, 7 }
  0x31   : > { %v1879_v49 = vor.u32 %v1878_v39, %v1875_v38 }
  0x33   : > { %3386 = vmatpush1.bf16.msra.mxu0 %v9022_v44  ;;  %v1931_v44 = vshrl.u32 %v390_v41, 16 }
  0x34   : > { %3387 = vmatprep.subr.bf16.mxu0 %v13087_v1 }
  0x35   : > { %v1933_v57 = vrot.slane %v1931_v44, 6  ;;  %v301_v44 = vld [vmem:[%s9249_s14 + $0xa8] sm:$0xff] }
  0x37   : > { %3388 = vmatpush1.bf16.msra.mxu0 %v9023_v46  ;;  %v9404_v46 = vpack.c.bf16 %v295_v36, %v294_v35  ;;  %v1937_v9 = vor.u32 %v1936_v62, %v1933_v57  ;;  %v1928_v35 = vor.u32 %v1927_v17, %v1926_v22  ;;  %v2042_v22 = vrot.slane %v9416_v60, 6 }
  0x38   : > { %3389 = vmatprep.subr.bf16.mxu0 %v13087_v1 }
  0x39   : > { %13240 = vst [vmem:[#allocation9_spill] sm:$0xff] %v9404_v46  ;;  %v9422_v0 = vshll.u32 %v9404_v46, 16  ;;  %v9441_v23 = vshrl.u32 %v9404_v46, 16  ;;  %v1938_v27 = vsel %vm1673_vm1, %v1879_v49, %v1937_v9 }
  0x3b   : > { %3390 = vmatpush1.bf16.msra.mxu0 %v9024_v51  ;;  %v397_v51 = vrot.slane %v9393_v34, 1  ;;  %13241 = vst [vmem:[#allocation10_spill] sm:$0xff] %v9422_v0  ;;  %v405_v13 = vrot.slane %v9422_v0, 1 }
  0x3c   : > { %3391 = vmatprep.subr.bf16.mxu0 %v13087_v1 }
  0x3d   : > { %v398_v63 = vsel %vm346_vm0, %v393_v50, %v397_v51  ;;  %v401_v11 = vor.u32 %v9416_v60, %v397_v51 }
  0x3e   : > { %v1989_v7 = vshrl.u32 %v398_v63, 16  ;;  %v1992_v10 = vshll.u32 %v398_v63, 16  ;;  %v9036_v63 = vld [vmem:[%s13080_s1 + $0xb8] sm:$0xff]  }
  0x3f   : > { %3392 = vmatpush1.bf16.msra.mxu0 %v9025_v55  ;;  %v1869_v55 = vrot.slane %v9321_v48, 7  ;;  %v406_v30 = vsel %vm346_vm0, %v401_v11, %v405_v13 }
  0x40   : > { %3393 = vmatprep.subr.bf16.mxu0 %v13087_v1  ;;  %v1991_v28 = vrot.slane %v1989_v7, 6  ;;  %v2047_v36 = vshrl.u32 %v406_v30, 16  ;;  %v2050_v41 = vshll.u32 %v406_v30, 16 }
  0x41   : > { %v1870_v5 = vor.u32 %v1869_v55, %v1868_v53  ;;  %v9035_v53 = vld [vmem:[%s13080_s1 + $0xb0] sm:$0xff]  }
  0x42   : > { %v2049_v51 = vrot.slane %v2047_v36, 6  ;;  %v2052_v57 = vrot.slane %v2050_v41, 7 }
  0x43   : > { %3394 = vmatpush1.bf16.msra.mxu0 %v9026_v61  ;;  %v1880_v61 = vsel %vm1673_vm1, %v1820_v25, %v1879_v49  ;;  %v1871_v19 = vsel %vm1673_vm1, %v1811_v42, %v1870_v5  ;;  %v9457_v42 = vpack.c.bf16 %v299_v31, %v298_v26  ;;  %v1984_v49 = vrot.slane %v9390_v33, 6  ;;  %v9037_v31 = vld [vmem:[%s13080_s1 + $0xc0] sm:$0xff]  }
  0x44   : > { %3395 = vmatprep.subr.bf16.mxu0 %v13087_v1  ;;  %v1929_v50 = vsel %vm1673_vm1, %v1870_v5, %v1928_v35  ;;  %v2053_v11 = vor.u32 %v2052_v57, %v2049_v51  ;;  %v2043_v26 = vrot.slane %v9393_v34, 7  ;;  %v2100_v57 = vrot.slane %v9441_v23, 6 }
  0x45   : > { %13243 = vst [vmem:[#allocation12_spill] sm:$0xff] %v9457_v42  ;;  %v9476_v62 = vshll.u32 %v9457_v42, 16  ;;  %v1986_v5 = vor.u32 %v1985_v40, %v1984_v49  ;;  %v9038_v49 = vld [vmem:[%s13080_s1 + $0xc8] sm:$0xff]  }
  0x46   : > { %v2044_v41 = vor.u32 %v2043_v26, %v2042_v22 }
  0x47   : > { %3396 = vmatpush1.bf16.msra.mxu0 %v9027_v4  ;;  %v297_v4 = vld [vmem:[%s9249_s14 + $0x88] sm:$0xff]  ;;  %13245 = vst [vmem:[#allocation14_spill] sm:$0xff] %v9476_v62  ;;  %v421_v17 = vrot.slane %v9476_v62, 1 }
  0x48   : > { %3397 = vmatprep.subr.bf16.mxu0 %v13087_v1  ;;  %v9429_v8 = vpack.c.bf16 %v297_v4, %v296_v2  ;;  %v302_v2 = vld [vmem:[%s9249_s14 + $0xb0] sm:$0xff]  ;;  %v303_v4 = vld [vmem:[%s9249_s14 + $0xb8] sm:$0xff] }
  0x4a   : > { %13242 = vst [vmem:[#allocation11_spill] sm:$0xff] %v9429_v8  ;;  %v9444_v25 = vshll.u32 %v9429_v8, 16 }
  0x4b   : > { %3398 = vmatpush1.bf16.msra.mxu0 %v9028_v18  ;;  %v9033_v18 = vld [vmem:[%s13080_s1 + $0xa0] sm:$0xff]  }
  0x4c   : > { %3544 = vmatprep.subr.bf16.mxu0 %v13087_v1  ;;  %v413_v38 = vrot.slane %v9444_v25, 1 }
  0x4e   : > { %3400 = vmatmul.mubr.bf16.vlgmr.msra.gmra.mrb[0].mxu0 %v1680_v32  ;;  %v9034_v32 = vld [vmem:[%s13080_s1 + $0xa8] sm:$0xff]  }
  0x4f   : > { %3545 = vmatpush1.bf16.msra.mxu0 %v9029_v29  ;;  %3407 = vmatprep.mubr.bf16.mxu0 %v1821_v37  ;;  %v1994_v29 = vrot.slane %v1992_v10, 7  ;;  %v409_v37 = vor.u32 %v9441_v23, %v405_v13 }
  0x50   : > { %3546 = vmatprep.subr.bf16.mxu0 %v13087_v1 }
  0x51   : > { %v1995_v39 = vor.u32 %v1994_v29, %v1991_v28 }
  0x53   : > { %3547 = vmatpush1.bf16.msra.mxu0 %v9030_v43  ;;  %v300_v43 = vld [vmem:[%s9249_s14 + $0xa0] sm:$0xff] }
  0x54   : > { %3548 = vmatprep.subr.bf16.mxu0 %v13087_v1  ;;  %v9468_v55 = vpack.c.bf16 %v301_v44, %v300_v43  ;;  %v305_v43 = vld [vmem:[%s9249_s14 + $0xc8] sm:$0xff] }
  0x56   : > { %3408 = vmatmul.mubr.bf16.gmra.mrb[4].mxu0 %v1812_v56  ;;  %13244 = vst [vmem:[#allocation13_spill] sm:$0xff] %v9468_v55  ;;  %v1996_v56 = vsel %vm1673_vm1, %v1937_v9, %v1995_v39  ;;  %v9484_v9 = vshrl.u32 %v9457_v42, 16  ;;  %v9487_v10 = vshll.u32 %v9468_v55, 16  ;;  %v9505_v36 = vshrl.u32 %v9468_v55, 16 }
  0x57   : > { %3415 = vmatprep.mubr.bf16.mxu0 %v1880_v61  ;;  %3549 = vmatpush1.bf16.msra.mxu0 %v9031_v52  ;;  %v414_v52 = vsel %vm346_vm0, %v409_v37, %v413_v38  ;;  %v9473_v61 = vshrl.u32 %v9429_v8, 16 }
  0x58   : > { %3550 = vmatprep.subr.bf16.mxu0 %v13087_v1  ;;  %v2108_v7 = vshll.u32 %v414_v52, 16  ;;  %13246 = vst [vmem:[#allocation15_spill] sm:$0xff] %v9487_v10  ;;  %v425_v29 = vor.u32 %v9484_v9, %v421_v17  ;;  %v429_v30 = vrot.slane %v9487_v10, 1  ;;  %13248 = vst [vmem:[#allocation17_spill] sm:$0xff] %v9505_v36 }
  0x59   : > { %v417_v13 = vor.u32 %v9473_v61, %v413_v38  ;;  %v304_v38 = vld [vmem:[%s9249_s14 + $0xc0] sm:$0xff] }
  0x5a   : > { %v2110_v28 = vrot.slane %v2108_v7, 7  ;;  %v433_v51 = vor.u32 %v9505_v36, %v429_v30  ;;  %v9039_v7 = vld [vmem:[%s13080_s1 + $0xd0] sm:$0xff]  }
  0x5b   : > { %3551 = vmatpush1.bf16.msra.mxu0 %v9032_v6  ;;  %v2105_v6 = vshrl.u32 %v414_v52, 16 }
  0x5c   : > { %3552 = vmatprep.subr.bf16.mxu0 %v13087_v1 }
  0x5e   : > { %3416 = vmatmul.mubr.bf16.gmra.mrb[8].mxu0 %v1871_v19  ;;  %v1987_v19 = vsel %vm1673_vm1, %v1928_v35, %v1986_v5  ;;  %v422_v35 = vsel %vm346_vm0, %v417_v13, %v421_v17  ;;  %v2158_v13 = vrot.slane %v9473_v61, 6  ;;  %v2159_v17 = vrot.slane %v9444_v25, 7 }
  0x5f   : > { %3423 = vmatprep.mubr.bf16.mxu0 %v1938_v27  ;;  %3553 = vmatpush1.bf16.msra.mxu0 %v9033_v18  ;;  %v9492_v18 = vpack.c.bf16 %v303_v4, %v302_v2  ;;  %v2107_v27 = vrot.slane %v2105_v6, 6  ;;  %v2163_v44 = vshrl.u32 %v422_v35, 16  ;;  %v306_v4 = vld [vmem:[%s9249_s14 + $0xd0] sm:$0xff]  ;;  %v307_v6 = vld [vmem:[%s9249_s14 + $0xd8] sm:$0xff] }
  0x60   : > { %3554 = vmatprep.subr.bf16.mxu0 %v13087_v1 }
  0x61   : > { %13247 = vst [vmem:[#allocation16_spill] sm:$0xff] %v9492_v18  ;;  %v9508_v37 = vshll.u32 %v9492_v18, 16  ;;  %v2111_v40 = vor.u32 %v2110_v28, %v2107_v27  ;;  %v2165_v26 = vrot.slane %v2163_v44, 6 }
  0x63   : > { %3555 = vmatpush1.bf16.msra.mxu0 %v9034_v32  ;;  %v2054_v32 = vsel %vm1673_vm1, %v1995_v39, %v2053_v11  ;;  %13249 = vst [vmem:[#allocation18_spill] sm:$0xff] %v9508_v37  ;;  %v430_v39 = vsel %vm346_vm0, %v425_v29, %v429_v30  ;;  %v437_v52 = vrot.slane %v9508_v37, 1  ;;  %v2216_v29 = vrot.slane %v9484_v9, 6 }
  0x64   : > { %3556 = vmatprep.subr.bf16.mxu0 %v13087_v1  ;;  %v2221_v2 = vshrl.u32 %v430_v39, 16 }
  0x65   : > { %v438_v28 = vsel %vm346_vm0, %v433_v51, %v437_v52 }
  0x66   : > { %3424 = vmatmul.mubr.bf16.gmra.mrb[12].mxu0 %v1929_v50  ;;  %v2166_v50 = vshll.u32 %v422_v35, 16  ;;  %v2223_v35 = vrot.slane %v2221_v2, 6  ;;  %v2282_v51 = vshll.u32 %v438_v28, 16  ;;  %v9041_v2 = vld [vmem:[%s13080_s1 + $0xe0] sm:$0xff]  }
  0x67   : > { %3431 = vmatprep.mubr.bf16.mxu0 %v1996_v56  ;;  %3557 = vmatpush1.bf16.msra.mxu0 %v9035_v53  ;;  %v9520_v53 = vpack.c.bf16 %v305_v43, %v304_v38  ;;  %v2045_v56 = vsel %vm1673_vm1, %v1986_v5, %v2044_v41  ;;  %v2112_v5 = vsel %vm1673_vm1, %v2053_v11, %v2111_v40  ;;  %v9040_v11 = vld [vmem:[%s13080_s1 + $0xd8] sm:$0xff]  }
  0x68   : > { %3558 = vmatprep.subr.bf16.mxu0 %v13087_v1  ;;  %v2168_v27 = vrot.slane %v2166_v50, 7 }
  0x69   : > { %13250 = vst [vmem:[#allocation19_spill] sm:$0xff] %v9520_v53 }
  0x6a   : > { %v2169_v50 = vor.u32 %v2168_v27, %v2165_v26  ;;  %v2284_v26 = vrot.slane %v2282_v51, 7 }
  0x6b   : > { %3559 = vmatpush1.bf16.msra.mxu0 %v9036_v63  ;;  %v2101_v63 = vrot.slane %v9422_v0, 7 }
  0x6c   : > { %3560 = vmatprep.subr.bf16.mxu0 %v13087_v1 }
  0x6d   : > { %v2102_v43 = vor.u32 %v2101_v63, %v2100_v57  ;;  %v9558_v63 = vshrl.u32 %v9520_v53, 16 }
  0x6e   : > { %3432 = vmatmul.mubr.bf16.gmra.mrb[16].mxu0 %v1987_v19  ;;  %v2224_v19 = vshll.u32 %v430_v39, 16  ;;  %v2279_v39 = vshrl.u32 %v438_v28, 16 }
  0x6f   : > { %3439 = vmatprep.mubr.bf16.mxu0 %v2054_v32  ;;  %3561 = vmatpush1.bf16.msra.mxu0 %v9037_v31  ;;  %v9539_v31 = vshrl.u32 %v9492_v18, 16  ;;  %v9542_v32 = vshll.u32 %v9520_v53, 16  ;;  %v2103_v57 = vsel %vm1673_vm1, %v2044_v41, %v2102_v43  ;;  %13253 = vst [vmem:[#allocation22_spill] sm:$0xff] %v9558_v63 }
  0x70   : > { %3562 = vmatprep.subr.bf16.mxu0 %v13087_v1  ;;  %v2226_v44 = vrot.slane %v2224_v19, 7  ;;  %v309_v19 = vld [vmem:[%s9249_s14 + $0xe8] sm:$0xff]  ;;  %v2281_v41 = vrot.slane %v2279_v39, 6  ;;  %v9043_v39 = vld [vmem:[%s13080_s1 + $0xf0] sm:$0xff]  }
  0x71   : > { %13251 = vst [vmem:[#allocation20_spill] sm:$0xff] %v9539_v31  ;;  %v441_v30 = vor.u32 %v9539_v31, %v437_v52 }
  0x73   : > { %3563 = vmatpush1.bf16.msra.mxu0 %v9038_v49  ;;  %v9548_v49 = vpack.c.bf16 %v307_v6, %v306_v4  ;;  %v2170_v6 = vsel %vm1673_vm1, %v2111_v40, %v2169_v50  ;;  %v2227_v40 = vor.u32 %v2226_v44, %v2223_v35 }
  0x74   : > { %3564 = vmatprep.subr.bf16.mxu0 %v13087_v1 }
  0x75   : > { %13252 = vst [vmem:[#allocation21_spill] sm:$0xff] %v9548_v49  ;;  %v9561_v4 = vshll.u32 %v9548_v49, 16  ;;  %v2228_v35 = vsel %vm1673_vm1, %v2169_v50, %v2227_v40  ;;  %v13258_v50 = vrot.slane %v9476_v62, 7 }
  0x76   : > { %3440 = vmatmul.mubr.bf16.gmra.mrb[20].mxu0 %v2045_v56  ;;  %v445_v56 = vrot.slane %v9542_v32, 1 }
  0x77   : > { %3447 = vmatprep.mubr.bf16.mxu0 %v2112_v5  ;;  %3565 = vmatpush1.bf16.msra.mxu0 %v9039_v7  ;;  %13254 = vst [vmem:[#allocation23_spill] sm:$0xff] %v9561_v4  ;;  %v308_v7 = vld [vmem:[%s9249_s14 + $0xe0] sm:$0xff]  ;;  %v9042_v5 = vld [vmem:[%s13080_s1 + $0xe8] sm:$0xff]  }
  0x78   : > { %3566 = vmatprep.subr.bf16.mxu0 %v13087_v1  ;;  %v446_v52 = vsel %vm346_vm0, %v441_v30, %v445_v56  ;;  %v453_v30 = vrot.slane %v9561_v4, 1  ;;  %v449_v22 = vor.u32 %v9558_v63, %v445_v56  ;;  %v9579_v51 = vpack.c.bf16 %v309_v19, %v308_v7  ;;  %v310_v7 = vld [vmem:[%s9249_s14 + $0xf0] sm:$0xff] }
  0x79   : > { %v2337_v38 = vshrl.u32 %v446_v52, 16  ;;  %v2218_v19 = vor.u32 %v13258_v50, %v2216_v29 }
  0x7a   : > { %13255 = vst [vmem:[#allocation24_spill] sm:$0xff] %v9579_v51  ;;  %v454_v44 = vsel %vm346_vm0, %v449_v22, %v453_v30  ;;  %v2285_v22 = vor.u32 %v2284_v26, %v2281_v41  ;;  %v2390_v41 = vrot.slane %v9558_v63, 6  ;;  %v2449_v26 = vrot.slane %v9561_v4, 7 }
  0x7b   : > { %3567 = vmatpush1.bf16.msra.mxu0 %v9040_v11  ;;  %v2160_v11 = vor.u32 %v2159_v17, %v2158_v13  ;;  %v2340_v13 = vshll.u32 %v446_v52, 16  ;;  %v2339_v56 = vrot.slane %v2337_v38, 6  ;;  %v9044_v52 = vld [vmem:[%s13080_s1 + $0xf8] sm:$0xff]   ;;  %v2395_v38 = vshrl.u32 %v454_v44, 16 }
  0x7c   : > { %3568 = vmatprep.subr.bf16.mxu0 %v13087_v1  ;;  %v2398_v17 = vshll.u32 %v454_v44, 16  ;;  %v9614_v44 = vshrl.u32 %v9579_v51, 16 }
  0x7e   : > { %3448 = vmatmul.mubr.bf16.gmra.mrb[24].mxu0 %v2103_v57  ;;  %v2161_v57 = vsel %vm1673_vm1, %v2102_v43, %v2160_v11  ;;  %v311_v43 = vld [vmem:[%s9249_s14 + $0xf8] sm:$0xff]  ;;  %13262 = vst [vmem:[#allocation28_spill] sm:$0xff] %v9614_v44  ;;  %v2400_v50 = vrot.slane %v2398_v17, 7  ;;  %v13266_v17 = vrot.slane %v9539_v31, 6 }
  0x7f   : > { %3455 = vmatprep.mubr.bf16.mxu0 %v2170_v6  ;;  %3569 = vmatpush1.bf16.msra.mxu0 %v9041_v2  ;;  %v9587_v2 = vshrl.u32 %v9548_v49, 16  ;;  %v9590_v6 = vshll.u32 %v9579_v51, 16  ;;  %v9602_v27 = vpack.c.bf16 %v311_v43, %v310_v7  ;;  %v313_v7 = vld [vmem:[%s9249_s14 + $0x108] sm:$0xff] }
  0x80   : > { %3570 = vmatprep.subr.bf16.mxu0 %v13087_v1 }
  0x81   : > { %13256 = vst [vmem:[#allocation25_spill] sm:$0xff] %v9587_v2  ;;  %13257 = vst [vmem:[#allocation26_spill] sm:$0xff] %v9590_v6  ;;  %v461_v28 = vrot.slane %v9590_v6, 1  ;;  %v457_v29 = vor.u32 %v9587_v2, %v453_v30  ;;  %v312_v30 = vld [vmem:[%s9249_s14 + $0x100] sm:$0xff] }
  0x82   : > { %13259 = vst [vmem:[#allocation27_spill] sm:$0xff] %v9602_v27  ;;  %v9626_v63 = vpack.c.bf16 %v313_v7, %v312_v30 }
  0x83   : > { %3571 = vmatpush1.bf16.msra.mxu0 %v9042_v5  ;;  %v2342_v5 = vrot.slane %v2340_v13, 7  ;;  %v465_v4 = vor.u32 %v9614_v44, %v461_v28 }
  0x84   : > { %3572 = vmatprep.subr.bf16.mxu0 %v13087_v1  ;;  %13264 = vst [vmem:[#allocation30_spill] sm:$0xff] %v9626_v63 }
  0x85   : > { %v2343_v43 = vor.u32 %v2342_v5, %v2339_v56  ;;  %v9629_v56 = vshrl.u32 %v9602_v27, 16  ;;  %v13267_v5 = vrot.slane %v9508_v37, 7  ;;  %v317_v37 = vld [vmem:[%s9249_s14 + $0x128] sm:$0xff] }
  0x86   : > { %3456 = vmatmul.mubr.bf16.gmra.mrb[28].mxu0 %v2161_v57  ;;  %v2219_v57 = vsel %vm1673_vm1, %v2160_v11, %v2218_v19  ;;  %v13260_v11 = vrot.slane %v9505_v36, 6 }
  0x87   : > { %3463 = vmatprep.mubr.bf16.mxu0 %v2228_v35  ;;  %3573 = vmatpush1.bf16.msra.mxu0 %v9043_v39  ;;  %v2286_v35 = vsel %vm1673_vm1, %v2227_v40, %v2285_v22  ;;  %v13261_v39 = vrot.slane %v9487_v10, 7  ;;  %v9617_v40 = vshll.u32 %v9602_v27, 16  ;;  %13265 = vst [vmem:[#allocation31_spill] sm:$0xff] %v9629_v56 }
  0x88   : > { %3574 = vmatprep.subr.bf16.mxu0 %v13087_v1 }
  0x89   : > { %v2276_v13 = vor.u32 %v13261_v39, %v13260_v11  ;;  %13263 = vst [vmem:[#allocation29_spill] sm:$0xff] %v9617_v40  ;;  %v469_v11 = vrot.slane %v9617_v40, 1  ;;  %v2344_v39 = vsel %vm1673_vm1, %v2285_v22, %v2343_v43  ;;  %v9639_v22 = vshll.u32 %v9626_v63, 16 }
  0x8b   : > { %3575 = vmatpush1.bf16.msra.mxu0 %v9044_v52  ;;  %v2397_v52 = vrot.slane %v2395_v38, 6  ;;  %v314_v38 = vld [vmem:[%s9249_s14 + $0x110] sm:$0xff]  ;;  %13268 = vst [vmem:[#allocation32_spill] sm:$0xff] %v9639_v22 }
  0x8c   : > { %3721 = vmatprep.subr.bf16.mxu0 %v13087_v1 }
  0x8d   : > { %v2401_v36 = vor.u32 %v2400_v50, %v2397_v52  ;;  %v13270_v50 = vrot.slane %v9542_v32, 7 }
  0x8e   : > { %3464 = vmatmul.mubr.bf16.gmra.mrb[32].mxu0 %v2219_v57  ;;  %v462_v57 = vsel %vm346_vm0, %v457_v29, %v461_v28  ;;  %v315_v29 = vld [vmem:[%s9249_s14 + $0x118] sm:$0xff]  ;;  %v470_v28 = vsel %vm346_vm0, %v465_v4, %v469_v11  ;;  %v477_v4 = vrot.slane %v9639_v22, 1 }
  0x8f   : > { %3471 = vmatprep.mubr.bf16.mxu0 %v2286_v35  ;;  %v2277_v35 = vsel %vm1673_vm1, %v2218_v19, %v2276_v13  ;;  %v2453_v1 = vshrl.u32 %v462_v57, 16  ;;  %v2456_v10 = vshll.u32 %v462_v57, 16  ;;  %v2334_v19 = vor.u32 %v13267_v5, %v13266_v17 }
  0x90   : > { %v2511_v57 = vshrl.u32 %v470_v28, 16  ;;  %v2448_v17 = vrot.slane %v9587_v2, 6  ;;  %v2514_v52 = vshll.u32 %v470_v28, 16  ;;  %v2392_v5 = vor.u32 %v13270_v50, %v2390_v41 }
  0x91   : > { %v2455_v62 = vrot.slane %v2453_v1, 6  ;;  %v2335_v30 = vsel %vm1673_vm1, %v2276_v13, %v2334_v19  ;;  %v2458_v7 = vrot.slane %v2456_v10, 7  ;;  %v2507_v1 = vrot.slane %v9590_v6, 7  ;;  %v316_v10 = vld [vmem:[%s9249_s14 + $0x120] sm:$0xff] }
  0x92   : > { %v473_v13 = vor.u32 %v9629_v56, %v469_v11  ;;  %v2516_v28 = vrot.slane %v2514_v52, 7  ;;  %v9659_v6 = vshrl.u32 %v9626_v63, 16  ;;  %v9662_v41 = vpack.c.bf16 %v317_v37, %v316_v10 }
  0x93   : > { %v2459_v31 = vor.u32 %v2458_v7, %v2455_v62  ;;  %v2506_v11 = vrot.slane %v9614_v44, 6  ;;  %v2450_v50 = vor.u32 %v2449_v26, %v2448_v17 }
  0x94   : > { %13272 = vst [vmem:[#allocation35_spill] sm:$0xff] %v9659_v6  ;;  %13273 = vst [vmem:[#allocation36_spill] sm:$0xff] %v9662_v41  ;;  %v9671_v2 = vshll.u32 %v9662_v41, 16 }
  0x95   : > { %v2508_v26 = vor.u32 %v2507_v1, %v2506_v11  ;;  %v9684_v11 = vshrl.u32 %v9662_v41, 16 }
  0x96   : > { %3472 = vmatmul.mubr.bf16.gmra.mrb[36].mxu0 %v2277_v35  ;;  %v2402_v35 = vsel %vm1673_vm1, %v2343_v43, %v2401_v36  ;;  %v2513_v43 = vrot.slane %v2511_v57, 6 }
  0x97   : > { %3479 = vmatprep.mubr.bf16.mxu0 %v2344_v39  ;;  %v9643_v39 = vpack.c.bf16 %v315_v29, %v314_v38  ;;  %v2393_v29 = vsel %vm1673_vm1, %v2334_v19, %v2392_v5  ;;  %v481_v19 = vor.u32 %v9659_v6, %v477_v4  ;;  %v2509_v44 = vsel %vm1673_vm1, %v2450_v50, %v2508_v26 }
  0x98   : > { %v2517_v52 = vor.u32 %v2516_v28, %v2513_v43  ;;  %v493_v43 = vrot.slane %v9671_v2, 1  ;;  %13275 = vst [vmem:[#allocation38_spill] sm:$0xff] %v9684_v11 }
  0x99   : > { %13269 = vst [vmem:[#allocation33_spill] sm:$0xff] %v9643_v39  ;;  %v9654_v38 = vshll.u32 %v9643_v39, 16 }
  0x9b   : > { %13271 = vst [vmem:[#allocation34_spill] sm:$0xff] %v9654_v38  ;;  %v485_v57 = vrot.slane %v9654_v38, 1 }
  0x9e   : > { %3480 = vmatmul.mubr.bf16.gmra.mrb[40].mxu0 %v2335_v30  ;;  %v478_v30 = vsel %vm346_vm0, %v473_v13, %v477_v4  ;;  %v9668_v13 = vshrl.u32 %v9643_v39, 16 }
  0x9f   : > { %3487 = vmatprep.mubr.bf16.mxu0 %v2402_v35  ;;  %v2460_v35 = vsel %vm1673_vm1, %v2401_v36, %v2459_v31  ;;  %v2569_v62 = vshrl.u32 %v478_v30, 16  ;;  %v2572_v7 = vshll.u32 %v478_v30, 16  ;;  %v2451_v36 = vsel %vm1673_vm1, %v2392_v5, %v2450_v50 }
  0xa0   : > { %13274 = vst [vmem:[#allocation37_spill] sm:$0xff] %v9668_v13  ;;  %v2518_v30 = vsel %vm1673_vm1, %v2459_v31, %v2517_v52  ;;  %v489_v28 = vor.u32 %v9668_v13, %v485_v57  ;;  %v2564_v5 = vrot.slane %v9629_v56, 6 }
  0xa1   : > { %v2571_v37 = vrot.slane %v2569_v62, 6  ;;  %v2574_v10 = vrot.slane %v2572_v7, 7  ;;  %v2565_v62 = vrot.slane %v9617_v40, 7 }
  0xa3   : > { %v2575_v17 = vor.u32 %v2574_v10, %v2571_v37  ;;  %v2566_v1 = vor.u32 %v2565_v62, %v2564_v5 }
  0xa5   : > { %v2576_v7 = vsel %vm1673_vm1, %v2517_v52, %v2575_v17  ;;  %v2567_v50 = vsel %vm1673_vm1, %v2508_v26, %v2566_v1  ;;  %v497_v52 = vor.u32 %v9684_v11, %v493_v43  ;;  %v521_v26 = vrot.slane %v9268_v15, 1 }
  0xa6   : > { %3488 = vmatmul.mubr.bf16.gmra.mrb[44].mxu0 %v2393_v29  ;;  %v486_v29 = vsel %vm346_vm0, %v481_v19, %v485_v57 }
  0xa7   : > { %3495 = vmatprep.mubr.bf16.mxu0 %v2460_v35  ;;  %v2627_v35 = vshrl.u32 %v486_v29, 16  ;;  %v2630_v4 = vshll.u32 %v486_v29, 16  ;;  %v2622_v29 = vrot.slane %v9659_v6, 6  ;;  %v2743_v5 = vshrl.u32 %v497_v52, 16 }
  0xa8   : > { %v2746_v62 = vshll.u32 %v497_v52, 16 }
  0xa9   : > { %v2629_v19 = vrot.slane %v2627_v35, 6  ;;  %v2632_v31 = vrot.slane %v2630_v4, 7 }
  0xab   : > { %v2633_v37 = vor.u32 %v2632_v31, %v2629_v19  ;;  %v519_v19 = vrot.slane %v9266_v14, 1  ;;  %v523_v31 = vrot.slane %v9311_v45, 1 }
  0xad   : > { %v2634_v35 = vsel %vm1673_vm1, %v2575_v17, %v2633_v37  ;;  %v2680_v17 = vrot.slane %v9668_v13, 6  ;;  %v525_v13 = vrot.slane %v9331_v54, 1 }
  0xae   : > { %3496 = vmatmul.mubr.bf16.gmra.mrb[48].mxu0 %v2451_v36  ;;  %v494_v36 = vsel %vm346_vm0, %v489_v28, %v493_v43 }
  0xaf   : > { %3503 = vmatprep.mubr.bf16.mxu0 %v2518_v30  ;;  %v2685_v57 = vshrl.u32 %v494_v36, 16  ;;  %v2688_v10 = vshll.u32 %v494_v36, 16  ;;  %v2623_v30 = vrot.slane %v9639_v22, 7  ;;  %v2681_v36 = vrot.slane %v9654_v38, 7 }
  0xb1   : > { %v2687_v4 = vrot.slane %v2685_v57, 6  ;;  %v2624_v28 = vor.u32 %v2623_v30, %v2622_v29  ;;  %v2745_v57 = vrot.slane %v2743_v5, 6  ;;  %v522_v29 = vsel %vm13168_vm2, %v519_v19, %v521_v26 }
  0xb2   : > { %v524_v30 = vsel %vm13168_vm2, %v521_v26, %v523_v31  ;;  %v2682_v14 = vor.u32 %v2681_v36, %v2680_v17  ;;  %v2738_v5 = vrot.slane %v9684_v11, 6  ;;  %v2739_v26 = vrot.slane %v9671_v2, 7 }
  0xb3   : > { %v2625_v43 = vsel %vm1673_vm1, %v2566_v1, %v2624_v28  ;;  %v1716_v38 = vshrl.u32 %v524_v30, 16  ;;  %v1719_v1 = vshll.u32 %v524_v30, 16 }
  0xb6   : > { %3504 = vmatmul.mubr.bf16.gmra.mrb[52].mxu0 %v2509_v44  ;;  %v2690_v44 = vrot.slane %v2688_v10, 7  ;;  %v2748_v10 = vrot.slane %v2746_v62, 7 }
  0xb7   : > { %3511 = vmatprep.mubr.bf16.mxu0 %v2576_v7 }
  0xb8   : > { %v2691_v7 = vor.u32 %v2690_v44, %v2687_v4  ;;  %v2749_v52 = vor.u32 %v2748_v10, %v2745_v57  ;;  %v1707_v4 = vshrl.u32 %v522_v29, 16  ;;  %v1710_v44 = vshll.u32 %v522_v29, 16 }
  0xb9   : > { %v1718_v57 = vrot.slane %v1716_v38, 6  ;;  %v526_v10 = vsel %vm13168_vm2, %v523_v31, %v525_v13 }
  0xba   : > { %v2750_v62 = vsel %vm1673_vm1, %v2691_v7, %v2749_v52  ;;  %v1709_v36 = vrot.slane %v1707_v4, 6  ;;  %v1712_v17 = vrot.slane %v1710_v44, 7  ;;  %v1826_v6 = vshll.u32 %v526_v10, 16 }
  0xbc   : > { %v1713_v11 = vor.u32 %v1712_v17, %v1709_v36  ;;  %v1828_v44 = vrot.slane %v1826_v6, 7 }
  0xbe   : > { %3512 = vmatmul.mubr.bf16.gmra.mrb[56].mxu0 %v2567_v50  ;;  %v2692_v50 = vsel %vm1673_vm1, %v2633_v37, %v2691_v7  ;;  %v2683_v37 = vsel %vm1673_vm1, %v2624_v28, %v2682_v14  ;;  %v1823_v28 = vshrl.u32 %v526_v10, 16  ;;  %v527_v7 = vrot.slane %v9352_v3, 1 }
  0xbf   : > { %3519 = vmatprep.mubr.bf16.mxu0 %v2634_v35  ;;  %v518_v35 = vrot.slane %v9261_v12, 1  ;;  %v1721_v12 = vrot.slane %v1719_v1, 7 }
  0xc0   : > { %v1825_v4 = vrot.slane %v1823_v28, 6  ;;  %v528_v31 = vsel %vm13168_vm2, %v525_v13, %v527_v7 }
  0xc1   : > { %v1722_v22 = vor.u32 %v1721_v12, %v1718_v57  ;;  %v9046_v57 = vld [vmem:[%s13080_s1 + $0x108] sm:$0xff]   ;;  %v13276_v12 = vmov 0  }
  0xc3   : > { %v1723_v38 = vsel %vm1673_vm1, %v1713_v11, %v1722_v22 }
  0xc6   : > { %3520 = vmatmul.mubr.bf16.gmra.mrb[60].mxu0 %v2625_v43  ;;  %v520_v43 = vsel %vm13168_vm2, %v518_v35, %v519_v19 }
  0xc7   : > { %3527 = vmatprep.mubr.bf16.mxu0 %v2692_v50  ;;  %v2740_v50 = vor.u32 %v2739_v26, %v2738_v5  ;;  %v1699_v29 = vshrl.u32 %v520_v43, 16  ;;  %v1702_v30 = vshll.u32 %v520_v43, 16  ;;  %v1829_v5 = vor.u32 %v1828_v44, %v1825_v4 }
  0xc8   : > { %v529_v26 = vrot.slane %v9378_v24, 1 }
  0xc9   : > { %v2741_v52 = vsel %vm1673_vm1, %v2682_v14, %v2740_v50  ;;  %v1701_v19 = vrot.slane %v1699_v29, 6  ;;  %v1704_v35 = vrot.slane %v1702_v30, 7  ;;  %v9045_v14 = vld [vmem:[%s13080_s1 + $0x100] sm:$0xff]   ;;  %v1830_v36 = vsel %vm1673_vm1, %v1722_v22, %v1829_v5  ;;  %v9047_v22 = vld [vmem:[%s13080_s1 + $0x110] sm:$0xff]  }
  0xca   : > { %v530_v13 = vsel %vm13168_vm2, %v527_v7, %v529_v26  ;;  %v531_v29 = vrot.slane %v9404_v46, 1 }
  0xcb   : > { %v1705_v1 = vor.u32 %v1704_v35, %v1701_v19  ;;  %v1940_v10 = vshrl.u32 %v530_v13, 16  ;;  %v1943_v50 = vshll.u32 %v530_v13, 16  ;;  %v9048_v19 = vld [vmem:[%s13080_s1 + $0x118] sm:$0xff]   ;;  %v9051_v13 = vld [vmem:[%s13080_s1 + $0x130] sm:$0xff]  }
  0xcd   : > { %v1714_v43 = vsel %vm1673_vm1, %v1705_v1, %v1713_v11  ;;  %v1942_v28 = vrot.slane %v1940_v10, 6  ;;  %v1945_v7 = vrot.slane %v1943_v50, 7  ;;  %v9049_v1 = vld [vmem:[%s13080_s1 + $0x120] sm:$0xff]   ;;  %v9052_v50 = vld [vmem:[%s13080_s1 + $0x138] sm:$0xff]  }
  0xce   : > { %3528 = vmatmul.mubr.bf16.gmra.mrb[64].mxu0 %v2683_v37  ;;  %v1882_v37 = vshrl.u32 %v528_v31, 16 }
  0xcf   : > { %3535 = vmatprep.mubr.bf16.mxu0 %v2750_v62  ;;  %v1885_v62 = vshll.u32 %v528_v31, 16  ;;  %v1946_v35 = vor.u32 %v1945_v7, %v1942_v28  ;;  %v533_v31 = vrot.slane %v9429_v8, 1  ;;  %v537_v7 = vrot.slane %v9468_v55, 1 }
  0xd0   : > { %v1884_v17 = vrot.slane %v1882_v37, 6 }
  0xd1   : > { %v1887_v6 = vrot.slane %v1885_v62, 7  ;;  %v534_v62 = vsel %vm13168_vm2, %v531_v29, %v533_v31 }
  0xd3   : > { %v1888_v11 = vor.u32 %v1887_v6, %v1884_v17  ;;  %v2059_v17 = vshll.u32 %v534_v62, 16  ;;  %v535_v6 = vrot.slane %v9457_v42, 1 }
  0xd5   : > { %v1889_v30 = vsel %vm1673_vm1, %v1829_v5, %v1888_v11  ;;  %v536_v10 = vsel %vm13168_vm2, %v533_v31, %v535_v6 }
  0xd6   : > { %3536 = vmatmul.mubr.bf16.gmra.mrb[68].mxu0 %v2741_v52  ;;  %v532_v52 = vsel %vm13168_vm2, %v529_v26, %v531_v29  ;;  %v9050_v26 = vld [vmem:[%s13080_s1 + $0x128] sm:$0xff]   ;;  %v2117_v28 = vshll.u32 %v536_v10, 16 }
  0xd7   : > { %3576 = vmatprep.mubr.bf16.mxu0 %v1723_v38  ;;  %v1998_v4 = vshrl.u32 %v532_v52, 16  ;;  %v2001_v44 = vshll.u32 %v532_v52, 16  ;;  %v9053_v52 = vld [vmem:[%s13080_s1 + $0x140] sm:$0xff]  }
  0xd9   : > { %v2000_v5 = vrot.slane %v1998_v4, 6  ;;  %v2003_v37 = vrot.slane %v2001_v44, 7  ;;  %v538_v4 = vsel %vm13168_vm2, %v535_v6, %v537_v7  ;;  %v9054_v44 = vld [vmem:[%s13080_s1 + $0x148] sm:$0xff]  }
  0xde   : > { %3577 = vmatmul.mubr.bf16.vlgmr.msra.gmra.mrb[0].mxu0 %v1714_v43  ;;  %v2004_v43 = vor.u32 %v2003_v37, %v2000_v5  ;;  %v2175_v5 = vshll.u32 %v538_v4, 16  ;;  %v539_v37 = vrot.slane %v9492_v18, 1 }
  0xdf   : > { %3722 = vmatpush1.bf16.msra.mxu0 %v9045_v14  ;;  %3584 = vmatprep.mubr.bf16.mxu0 %v1830_v36  ;;  %v2056_v14 = vshrl.u32 %v534_v62, 16  ;;  %v9055_v62 = vld [vmem:[%s13080_s1 + $0x150] sm:$0xff]  }
  0xe0   : > { %3723 = vmatprep.subr.bf16.mxu0 %v13276_v12 }
  0xe3   : > { %3724 = vmatpush1.bf16.msra.mxu0 %v9046_v57  ;;  %v2058_v57 = vrot.slane %v2056_v14, 6  ;;  %v540_v14 = vsel %vm13168_vm2, %v537_v7, %v539_v37 }
  0xe4   : > { %3725 = vmatprep.subr.bf16.mxu0 %v13276_v12 }
  0xe6   : > { %3585 = vmatmul.mubr.bf16.gmra.mrb[4].mxu0 %v1723_v38  ;;  %v1947_v38 = vsel %vm1673_vm1, %v1888_v11, %v1946_v35  ;;  %v2061_v11 = vrot.slane %v2059_v17, 7  ;;  %v9056_v17 = vld [vmem:[%s13080_s1 + $0x158] sm:$0xff]  }
  0xe7   : > { %3592 = vmatprep.mubr.bf16.mxu0 %v1889_v30  ;;  %3726 = vmatpush1.bf16.msra.mxu0 %v9047_v22  ;;  %v2114_v22 = vshrl.u32 %v536_v10, 16  ;;  %v9057_v10 = vld [vmem:[%s13080_s1 + $0x160] sm:$0xff]  }
  0xe8   : > { %3727 = vmatprep.subr.bf16.mxu0 %v13276_v12  ;;  %v2062_v29 = vor.u32 %v2061_v11, %v2058_v57  ;;  %v2233_v57 = vshll.u32 %v540_v14, 16  ;;  %v541_v11 = vrot.slane %v9520_v53, 1 }
  0xeb   : > { %3728 = vmatpush1.bf16.msra.mxu0 %v9048_v19  ;;  %v2116_v19 = vrot.slane %v2114_v22, 6  ;;  %v542_v22 = vsel %vm13168_vm2, %v539_v37, %v541_v11 }
  0xec   : > { %3729 = vmatprep.subr.bf16.mxu0 %v13276_v12 }
  0xee   : > { %3593 = vmatmul.mubr.bf16.gmra.mrb[8].mxu0 %v1830_v36  ;;  %v2005_v36 = vsel %vm1673_vm1, %v1946_v35, %v2004_v43  ;;  %v2119_v35 = vrot.slane %v2117_v28, 7  ;;  %v9058_v28 = vld [vmem:[%s13080_s1 + $0x168] sm:$0xff]  }
  0xef   : > { %3600 = vmatprep.mubr.bf16.mxu0 %v1947_v38  ;;  %3730 = vmatpush1.bf16.msra.mxu0 %v9049_v1  ;;  %v2172_v1 = vshrl.u32 %v538_v4, 16  ;;  %v9059_v4 = vld [vmem:[%s13080_s1 + $0x170] sm:$0xff]  }
  0xf0   : > { %3731 = vmatprep.subr.bf16.mxu0 %v13276_v12  ;;  %v2120_v31 = vor.u32 %v2119_v35, %v2116_v19  ;;  %v2291_v19 = vshll.u32 %v542_v22, 16  ;;  %v543_v35 = vrot.slane %v9548_v49, 1 }
  0xf3   : > { %3732 = vmatpush1.bf16.msra.mxu0 %v9050_v26  ;;  %v2174_v26 = vrot.slane %v2172_v1, 6  ;;  %v544_v1 = vsel %vm13168_vm2, %v541_v11, %v543_v35 }
  0xf4   : > { %3733 = vmatprep.subr.bf16.mxu0 %v13276_v12 }
  0xf6   : > { %3601 = vmatmul.mubr.bf16.gmra.mrb[12].mxu0 %v1889_v30  ;;  %v2063_v30 = vsel %vm1673_vm1, %v2004_v43, %v2062_v29  ;;  %v2177_v43 = vrot.slane %v2175_v5, 7  ;;  %v9060_v5 = vld [vmem:[%s13080_s1 + $0x178] sm:$0xff]  }
  0xf7   : > { %3608 = vmatprep.mubr.bf16.mxu0 %v2005_v36  ;;  %3734 = vmatpush1.bf16.msra.mxu0 %v9051_v13  ;;  %v2230_v13 = vshrl.u32 %v540_v14, 16 }
  0xf8   : > { %3735 = vmatprep.subr.bf16.mxu0 %v13276_v12  ;;  %v2178_v6 = vor.u32 %v2177_v43, %v2174_v26  ;;  %v2349_v26 = vshll.u32 %v544_v1, 16  ;;  %v545_v43 = vrot.slane %v9579_v51, 1 }
  0xfb   : > { %3736 = vmatpush1.bf16.msra.mxu0 %v9052_v50  ;;  %v2232_v50 = vrot.slane %v2230_v13, 6 }
  0xfc   : > { %3737 = vmatprep.subr.bf16.mxu0 %v13276_v12 }
  0xfe   : > { %3609 = vmatmul.mubr.bf16.gmra.mrb[16].mxu0 %v1947_v38  ;;  %v2121_v38 = vsel %vm1673_vm1, %v2062_v29, %v2120_v31  ;;  %v2235_v29 = vrot.slane %v2233_v57, 7 }
  0xff   : > { %3616 = vmatprep.mubr.bf16.mxu0 %v2063_v30  ;;  %3738 = vmatpush1.bf16.msra.mxu0 %v9053_v52  ;;  %v2288_v52 = vshrl.u32 %v542_v22, 16 }
 0x100   : > { %3739 = vmatprep.subr.bf16.mxu0 %v13276_v12  ;;  %v2236_v7 = vor.u32 %v2235_v29, %v2232_v50 }
 0x103   : > { %3740 = vmatpush1.bf16.msra.mxu0 %v9054_v44  ;;  %v2290_v44 = vrot.slane %v2288_v52, 6 }
 0x104   : > { %3741 = vmatprep.subr.bf16.mxu0 %v13276_v12 }
 0x106   : > { %3617 = vmatmul.mubr.bf16.gmra.mrb[20].mxu0 %v2005_v36  ;;  %v2179_v36 = vsel %vm1673_vm1, %v2120_v31, %v2178_v6  ;;  %v2293_v31 = vrot.slane %v2291_v19, 7 }
 0x107   : > { %3624 = vmatprep.mubr.bf16.mxu0 %v2121_v38  ;;  %3742 = vmatpush1.bf16.msra.mxu0 %v9055_v62  ;;  %v2346_v62 = vshrl.u32 %v544_v1, 16 }
 0x108   : > { %3743 = vmatprep.subr.bf16.mxu0 %v13276_v12  ;;  %v2294_v37 = vor.u32 %v2293_v31, %v2290_v44 }
 0x10a   : > { %v2295_v14 = vsel %vm1673_vm1, %v2236_v7, %v2294_v37 }
 0x10b   : > { %3744 = vmatpush1.bf16.msra.mxu0 %v9056_v17  ;;  %v2348_v17 = vrot.slane %v2346_v62, 6 }
 0x10c   : > { %3745 = vmatprep.subr.bf16.mxu0 %v13276_v12 }
 0x10e   : > { %3625 = vmatmul.mubr.bf16.gmra.mrb[24].mxu0 %v2063_v30  ;;  %v2237_v30 = vsel %vm1673_vm1, %v2178_v6, %v2236_v7  ;;  %v2351_v6 = vrot.slane %v2349_v26, 7 }
 0x10f   : > { %3632 = vmatprep.mubr.bf16.mxu0 %v2179_v36  ;;  %3746 = vmatpush1.bf16.msra.mxu0 %v9057_v10  ;;  %v547_v10 = vrot.slane %v9602_v27, 1 }
 0x110   : > { %3747 = vmatprep.subr.bf16.mxu0 %v13276_v12  ;;  %v2352_v13 = vor.u32 %v2351_v6, %v2348_v17 }
 0x112   : > { %v2353_v50 = vsel %vm1673_vm1, %v2294_v37, %v2352_v13 }
 0x113   : > { %3748 = vmatpush1.bf16.msra.mxu0 %v9058_v28  ;;  %v548_v28 = vsel %vm13168_vm2, %v545_v43, %v547_v10 }
 0x114   : > { %3749 = vmatprep.subr.bf16.mxu0 %v13276_v12  ;;  %v2462_v52 = vshrl.u32 %v548_v28, 16  ;;  %v2465_v19 = vshll.u32 %v548_v28, 16 }
 0x116   : > { %3633 = vmatmul.mubr.bf16.gmra.mrb[28].mxu0 %v2121_v38  ;;  %v546_v38 = vsel %vm13168_vm2, %v543_v35, %v545_v43  ;;  %v549_v35 = vrot.slane %v9626_v63, 1  ;;  %v2467_v44 = vrot.slane %v2465_v19, 7 }
 0x117   : > { %3640 = vmatprep.mubr.bf16.mxu0 %v2237_v30  ;;  %3750 = vmatpush1.bf16.msra.mxu0 %v9059_v4  ;;  %v2404_v57 = vshrl.u32 %v546_v38, 16  ;;  %v2407_v11 = vshll.u32 %v546_v38, 16  ;;  %v2464_v4 = vrot.slane %v2462_v52, 6 }
 0x118   : > { %3751 = vmatprep.subr.bf16.mxu0 %v13276_v12  ;;  %v550_v31 = vsel %vm13168_vm2, %v547_v10, %v549_v35 }
 0x119   : > { %v2406_v29 = vrot.slane %v2404_v57, 6  ;;  %v2409_v22 = vrot.slane %v2407_v11, 7  ;;  %v2468_v1 = vor.u32 %v2467_v44, %v2464_v4  ;;  %v2523_v37 = vshll.u32 %v550_v31, 16  ;;  %v318_v57 = vld [vmem:[%s9249_s14 + $0x130] sm:$0xff]  ;;  %v319_v11 = vld [vmem:[%s9249_s14 + $0x138] sm:$0xff] }
 0x11a   : > { %v9817_v28 = vpack.c.bf16 %v319_v11, %v318_v57  ;;  %v9829_v57 = vrot.slane %v9311_v45, 2 }
 0x11b   : > { %3752 = vmatpush1.bf16.msra.mxu0 %v9060_v5  ;;  %v2410_v7 = vor.u32 %v2409_v22, %v2406_v29  ;;  %v2520_v5 = vshrl.u32 %v550_v31, 16  ;;  %v2525_v43 = vrot.slane %v2523_v37, 7 }
 0x11c   : > { %3898 = vmatprep.subr.bf16.mxu0 %v13276_v12  ;;  %13277 = vst [vmem:[#allocation39_spill] sm:$0xff] %v9817_v28  ;;  %13278 = vst [vmem:[#allocation40_spill] sm:$0xff] %v9829_v57 }
 0x11d   : > { %v2469_v62 = vsel %vm1673_vm1, %v2410_v7, %v2468_v1  ;;  %v2522_v26 = vrot.slane %v2520_v5, 6 }
 0x11e   : > { %3641 = vmatmul.mubr.bf16.gmra.mrb[32].mxu0 %v2179_v36  ;;  %v2411_v36 = vsel %vm1673_vm1, %v2352_v13, %v2410_v7 }
 0x11f   : > { %3648 = vmatprep.mubr.bf16.mxu0 %v2295_v14  ;;  %v2526_v6 = vor.u32 %v2525_v43, %v2522_v26 }
 0x121   : > { %v2527_v10 = vsel %vm1673_vm1, %v2468_v1, %v2526_v6 }
 0x126   : > { %3649 = vmatmul.mubr.bf16.gmra.mrb[36].mxu0 %v2237_v30  ;;  %v551_v30 = vrot.slane %v9643_v39, 1 }
 0x127   : > { %3656 = vmatprep.mubr.bf16.mxu0 %v2353_v50 }
 0x128   : > { %v552_v17 = vsel %vm13168_vm2, %v549_v35, %v551_v30  ;;  %v556_v35 = vrot.slane %v9817_v28, 1 }
 0x129   : > { %v2578_v38 = vshrl.u32 %v552_v17, 16  ;;  %v2581_v13 = vshll.u32 %v552_v17, 16 }
 0x12b   : > { %v2580_v29 = vrot.slane %v2578_v38, 6  ;;  %v2583_v22 = vrot.slane %v2581_v13, 7  ;;  %v2761_v38 = vshrl.u32 %v556_v35, 16  ;;  %v637_v13 = vrot.slane %v9268_v15, 2 }
 0x12d   : > { %v2584_v52 = vor.u32 %v2583_v22, %v2580_v29  ;;  %v2763_v11 = vrot.slane %v2761_v38, 6  ;;  %v559_v22 = vrot.slane %v9318_v47, 1  ;;  %v9074_v47 = vld [vmem:[%s13080_s1 + $0x200] sm:$0xff]  }
 0x12e   : > { %3657 = vmatmul.mubr.bf16.gmra.mrb[40].mxu0 %v2295_v14  ;;  %v553_v14 = vrot.slane %v9662_v41, 1  ;;  %8253 = vmatprep.subr.bf16.mxu1 %v9074_v47 }
 0x12f   : > { %3664 = vmatprep.mubr.bf16.mxu0 %v2411_v36  ;;  %v2585_v4 = vsel %vm1673_vm1, %v2526_v6, %v2584_v52  ;;  %v2764_v6 = vshll.u32 %v556_v35, 16  ;;  %8254 = vmatpush3.bf16.msra.mxu1 %v9074_v47 }
 0x130   : > { %v554_v7 = vsel %vm13168_vm2, %v551_v30, %v553_v14  ;;  %v557_v5 = vsel %vm13168_vm2, %v553_v14, %v556_v35  ;;  %v2755_v35 = vshll.u32 %v553_v14, 16 }
 0x131   : > { %v2639_v19 = vshll.u32 %v554_v7, 16  ;;  %v2694_v1 = vshrl.u32 %v557_v5, 16  ;;  %v2697_v37 = vshll.u32 %v557_v5, 16  ;;  %v2766_v29 = vrot.slane %v2764_v6, 7 }
 0x132   : > { %v1745_v5 = vshll.u32 %v637_v13, 16 }
 0x133   : > { %v2641_v31 = vrot.slane %v2639_v19, 7  ;;  %v2696_v30 = vrot.slane %v2694_v1, 6  ;;  %v2752_v19 = vshrl.u32 %v553_v14, 16 }
 0x134   : > { %v1747_v6 = vrot.slane %v1745_v5, 7 }
 0x135   : > { %v2754_v38 = vrot.slane %v2752_v19, 6  ;;  %v9075_v19 = vld [vmem:[%s13080_s1 + $0x208] sm:$0xff]  }
 0x136   : > { %3665 = vmatmul.mubr.bf16.gmra.mrb[44].mxu0 %v2353_v50  ;;  %v2636_v50 = vshrl.u32 %v554_v7, 16  ;;  %v560_v7 = vrot.slane %v9276_v20, 2  ;;  %8255 = vmatprep.subr.bf16.mxu1 %v9075_v19 }
 0x137   : > { %3672 = vmatprep.mubr.bf16.mxu0 %v2469_v62  ;;  %8256 = vmatpush3.bf16.msra.mxu1 %v9075_v19  ;;  %v575_v19 = vrot.slane %v9393_v34, 2 }
 0x138   : > { %v2638_v44 = vrot.slane %v2636_v50, 6  ;;  %v639_v50 = vsel %vm13167_vm3, %v637_v13, %v9829_v57 }
 0x139   : > { %v1750_v1 = vshrl.u32 %v639_v50, 16  ;;  %v1753_v20 = vshll.u32 %v639_v50, 16 }
 0x13a   : > { %v9823_v26 = vor.u32 %v2641_v31, %v2638_v44  ;;  %v2767_v44 = vor.u32 %v2766_v29, %v2763_v11  ;;  %v1742_v31 = vshrl.u32 %v637_v13, 16  ;;  %v567_v13 = vrot.slane %v9343_v59, 2 }
 0x13b   : > { %v1752_v29 = vrot.slane %v1750_v1, 6  ;;  %v1755_v15 = vrot.slane %v1753_v20, 7 }
 0x13c   : > { %v2643_v43 = vsel %vm1673_vm1, %v2584_v52, %v9823_v26  ;;  %v563_v52 = vrot.slane %v9321_v48, 2  ;;  %v1744_v14 = vrot.slane %v1742_v31, 6 }
 0x13d   : > { %v1756_v47 = vor.u32 %v1755_v15, %v1752_v29 }
 0x13e   : > { %3673 = vmatmul.mubr.bf16.gmra.mrb[48].mxu0 %v2411_v36  ;;  %v2699_v36 = vrot.slane %v2697_v37, 7  ;;  %v561_v37 = vor.u32 %v560_v7, %v559_v22 }
 0x13f   : > { %3680 = vmatprep.mubr.bf16.mxu0 %v2527_v10 }
 0x140   : > { %v2700_v17 = vor.u32 %v2699_v36, %v2696_v30  ;;  %v640_v36 = vrot.slane %v9331_v54, 2  ;;  %v1728_v50 = vshll.u32 %v561_v37, 16 }
 0x142   : > { %v2768_v11 = vsel %vm1673_vm1, %v2700_v17, %v2767_v44  ;;  %v641_v7 = vsel %vm13167_vm3, %v9829_v57, %v640_v36  ;;  %v9077_v44 = vld [vmem:[%s13080_s1 + $0x210] sm:$0xff]  }
 0x143   : > { %v1767_v1 = vshrl.u32 %v641_v7, 16  ;;  %v1770_v20 = vshll.u32 %v641_v7, 16  ;;  %8257 = vmatprep.subr.bf16.mxu1 %v9077_v44 }
 0x144   : > { %8258 = vmatpush3.bf16.msra.mxu1 %v9077_v44  ;;  %v644_v44 = vrot.slane %v9378_v24, 2 }
 0x145   : > { %v1769_v29 = vrot.slane %v1767_v1, 6 }
 0x146   : > { %3681 = vmatmul.mubr.bf16.gmra.mrb[52].mxu0 %v2469_v62  ;;  %v2701_v62 = vsel %vm1673_vm1, %v9823_v26, %v2700_v17 }
 0x147   : > { %3688 = vmatprep.mubr.bf16.mxu0 %v2585_v4 }
 0x14e   : > { %3689 = vmatmul.mubr.bf16.gmra.mrb[56].mxu0 %v2527_v10  ;;  %v562_v10 = vrot.slane %v9340_v58, 1 }
 0x14f   : > { %3696 = vmatprep.mubr.bf16.mxu0 %v2643_v43 }
 0x150   : > { %v564_v30 = vor.u32 %v563_v52, %v562_v10  ;;  %v1725_v52 = vshrl.u32 %v561_v37, 16 }
 0x152   : > { %v565_v22 = vsel %vm13166_vm4, %v561_v37, %v564_v30  ;;  %v570_v37 = vrot.slane %v9390_v33, 1 }
 0x153   : > { %v1733_v31 = vshrl.u32 %v565_v22, 16  ;;  %v1736_v5 = vshll.u32 %v565_v22, 16  ;;  %v1772_v22 = vrot.slane %v1770_v20, 7 }
 0x156   : > { %3697 = vmatmul.mubr.bf16.gmra.mrb[60].mxu0 %v2585_v4  ;;  %v2757_v4 = vrot.slane %v2755_v35, 7  ;;  %v1748_v35 = vor.u32 %v1747_v6, %v1744_v14  ;;  %v1727_v14 = vrot.slane %v1725_v52, 6  ;;  %v1730_v6 = vrot.slane %v1728_v50, 7  ;;  %v9078_v52 = vld [vmem:[%s13080_s1 + $0x218] sm:$0xff]  }
 0x157   : > { %3704 = vmatprep.mubr.bf16.mxu0 %v2701_v62  ;;  %v566_v62 = vrot.slane %v9369_v21, 1  ;;  %8259 = vmatprep.subr.bf16.mxu1 %v9078_v52 }
 0x158   : > { %v2758_v10 = vor.u32 %v2757_v4, %v2754_v38  ;;  %v571_v38 = vrot.slane %v9372_v16, 2  ;;  %v574_v16 = vrot.slane %v9416_v60, 1  ;;  %8260 = vmatpush3.bf16.msra.mxu1 %v9078_v52 }
 0x159   : > { %v568_v17 = vor.u32 %v567_v13, %v566_v62  ;;  %v1735_v62 = vrot.slane %v1733_v31, 6  ;;  %v1738_v13 = vrot.slane %v1736_v5, 7  ;;  %v9871_v5 = vor.u32 %v1772_v22, %v1769_v29  ;;  %v9081_v22 = vld [vmem:[%s13080_s1 + $0x228] sm:$0xff]  }
 0x15a   : > { %v2759_v4 = vsel %vm1673_vm1, %v9823_v26, %v2758_v10  ;;  %v572_v57 = vor.u32 %v571_v38, %v570_v37  ;;  %v9875_v20 = vor.u32 %v575_v19, %v574_v16 }
 0x15b   : > { %v569_v15 = vsel %vm13166_vm4, %v564_v30, %v568_v17  ;;  %v1731_v30 = vor.u32 %v1730_v6, %v1727_v14  ;;  %v1739_v50 = vor.u32 %v1738_v13, %v1735_v62  ;;  %13279 = vst [vmem:[#allocation41_spill] sm:$0xff] %v9871_v5  ;;  %v9061_v14 = vld [vmem:[%s13080_s1 + $0x180] sm:$0xff]   ;;  %v1840_v13 = vsel %vm1673_vm1, %v1756_v47, %v9871_v5 }
 0x15c   : > { %v1832_v26 = vshrl.u32 %v569_v15, 16  ;;  %v1835_v10 = vshll.u32 %v569_v15, 16  ;;  %v573_v1 = vsel %vm13166_vm4, %v568_v17, %v572_v57  ;;  %v577_v17 = vsel %vm13166_vm4, %v572_v57, %v9875_v20  ;;  %v9082_v57 = vld [vmem:[%s13080_s1 + $0x230] sm:$0xff]  }
 0x15d   : > { %v1891_v15 = vshrl.u32 %v573_v1, 16  ;;  %v1949_v52 = vshrl.u32 %v577_v17, 16 }
 0x15e   : > { %3705 = vmatmul.mubr.bf16.gmra.mrb[64].mxu0 %v2643_v43  ;;  %v642_v43 = vrot.slane %v9352_v3, 2  ;;  %v1834_v37 = vrot.slane %v1832_v26, 6  ;;  %v1837_v38 = vrot.slane %v1835_v10, 7 }
 0x15f   : > { %3712 = vmatprep.mubr.bf16.mxu0 %v2768_v11  ;;  %v1757_v11 = vsel %vm1673_vm1, %v1748_v35, %v1756_v47  ;;  %v9062_v47 = vld [vmem:[%s13080_s1 + $0x188] sm:$0xff]   ;;  %v1893_v26 = vrot.slane %v1891_v15, 6 }
 0x160   : > { %v643_v7 = vsel %vm13167_vm3, %v640_v36, %v642_v43  ;;  %v9080_v36 = vld [vmem:[%s13080_s1 + $0x220] sm:$0xff]   ;;  %v645_v16 = vsel %vm13167_vm3, %v642_v43, %v644_v44  ;;  %v9886_v29 = vor.u32 %v1837_v38, %v1834_v37  ;;  %v1952_v38 = vshll.u32 %v577_v17, 16 }
 0x161   : > { %v1842_v35 = vshrl.u32 %v643_v7, 16  ;;  %v1845_v31 = vshll.u32 %v643_v7, 16  ;;  %8261 = vmatprep.subr.bf16.mxu1 %v9080_v36  ;;  %v1900_v43 = vshrl.u32 %v645_v16, 16  ;;  %v1903_v19 = vshll.u32 %v645_v16, 16 }
 0x162   : > { %8262 = vmatpush3.bf16.msra.mxu1 %v9080_v36  ;;  %v764_v36 = vrot.slane %v9311_v45, 3  ;;  %v1839_v37 = vsel %vm1673_vm1, %v1739_v50, %v9886_v29  ;;  %v1954_v45 = vrot.slane %v1952_v38, 7 }
 0x163   : > { %v1844_v6 = vrot.slane %v1842_v35, 6  ;;  %v1847_v62 = vrot.slane %v1845_v31, 7  ;;  %8263 = vmatprep.subr.bf16.mxu1 %v9081_v22  ;;  %v578_v35 = vrot.slane %v9441_v23, 1  ;;  %v579_v31 = vrot.slane %v9422_v0, 2 }
 0x164   : > { %v1793_v15 = vshrl.u32 %v764_v36, 16 }
 0x165   : > { %v9894_v7 = vor.u32 %v1847_v62, %v1844_v6  ;;  %v1902_v6 = vrot.slane %v1900_v43, 6  ;;  %v1905_v62 = vrot.slane %v1903_v19, 7  ;;  %v9084_v43 = vld [vmem:[%s13080_s1 + $0x238] sm:$0xff]  }
 0x166   : > { %3713 = vmatmul.mubr.bf16.gmra.mrb[68].mxu0 %v2759_v4  ;;  %v1740_v4 = vsel %vm1673_vm1, %v1731_v30, %v1739_v50  ;;  %v646_v30 = vrot.slane %v9404_v46, 2  ;;  %8264 = vmatpush3.bf16.msra.mxu1 %v9081_v22  ;;  %v1951_v22 = vrot.slane %v1949_v52, 6  ;;  %v1795_v19 = vrot.slane %v1793_v15, 6 }
 0x167   : > { %3753 = vmatprep.mubr.bf16.mxu0 %v1757_v11  ;;  %v1894_v11 = vshll.u32 %v573_v1, 16  ;;  %v765_v1 = vrot.slane %v9331_v54, 3  ;;  %8265 = vmatprep.subr.bf16.mxu1 %v9082_v57  ;;  %v767_v52 = vrot.slane %v9352_v3, 3 }
 0x168   : > { %v647_v50 = vsel %vm13167_vm3, %v644_v44, %v646_v30  ;;  %v9064_v44 = vld [vmem:[%s13080_s1 + $0x198] sm:$0xff]  }
 0x169   : > { %v1896_v10 = vrot.slane %v1894_v11, 7  ;;  %v1796_v11 = vshll.u32 %v764_v36, 16 }
 0x16a   : > { %8266 = vmatpush3.bf16.msra.mxu1 %v9082_v57 }
 0x16b   : > { %v1897_v17 = vor.u32 %v1896_v10, %v1893_v26  ;;  %v1958_v26 = vshrl.u32 %v647_v50, 16  ;;  %v1961_v10 = vshll.u32 %v647_v50, 16  ;;  %8267 = vmatprep.subr.bf16.mxu1 %v9084_v43  ;;  %v9936_v50 = vor.u32 %v1954_v45, %v1951_v22 }
 0x16c   : > { %v586_v22 = vrot.slane %v9484_v9, 1 }
 0x16d   : > { %v1963_v15 = vrot.slane %v1961_v10, 7 }
 0x16e   : > { %3754 = vmatmul.mubr.bf16.vlgmr.msra.gmra.mrb[0].mxu0 %v1740_v4  ;;  %v9910_v4 = vsel %vm1673_vm1, %v9871_v5, %v9894_v7  ;;  %v1798_v5 = vrot.slane %v1796_v11, 7  ;;  %8268 = vmatpush3.bf16.msra.mxu1 %v9084_v43  ;;  %v13281_v43 = vld [vmem:[#allocation14_spill] sm:$0xff] }
 0x16f   : > { %3899 = vmatpush1.bf16.msra.mxu0 %v9061_v14  ;;  %3761 = vmatprep.mubr.bf16.mxu0 %v1840_v13  ;;  %v9063_v14 = vld [vmem:[%s13080_s1 + $0x190] sm:$0xff]   ;;  %v766_v13 = vsel %vm13169_vm5, %v764_v36, %v765_v1  ;;  %v583_v36 = vrot.slane %v9444_v25, 2 }
 0x170   : > { %3900 = vmatprep.subr.bf16.mxu0 %v13276_v12  ;;  %v1801_v16 = vshrl.u32 %v766_v13, 16  ;;  %v1804_v54 = vshll.u32 %v766_v13, 16  ;;  %6679 = vmatprep.subr.bf16.mxu1 %v13276_v12 }
 0x172   : > { %v1803_v0 = vrot.slane %v1801_v16, 6  ;;  %v1806_v57 = vrot.slane %v1804_v54, 7  ;;  %v1898_v54 = vsel %vm1673_vm1, %v9886_v29, %v1897_v17 }
 0x173   : > { %3901 = vmatpush1.bf16.msra.mxu0 %v9062_v47  ;;  %v580_v47 = vor.u32 %v579_v31, %v578_v35  ;;  %v1906_v35 = vor.u32 %v1905_v62, %v1902_v6  ;;  %v582_v31 = vrot.slane %v9473_v61, 1  ;;  %v768_v6 = vsel %vm13169_vm5, %v765_v1, %v767_v52 }
 0x174   : > { %3902 = vmatprep.subr.bf16.mxu0 %v13276_v12  ;;  %v1807_v13 = vor.u32 %v1806_v57, %v1803_v0  ;;  %v1960_v62 = vrot.slane %v1958_v26, 6  ;;  %v1860_v11 = vshrl.u32 %v768_v6, 16  ;;  %v1863_v1 = vshll.u32 %v768_v6, 16 }
 0x175   : > { %v581_v38 = vsel %vm13166_vm4, %v9875_v20, %v580_v47  ;;  %v9946_v0 = vsel %vm1673_vm1, %v9894_v7, %v1906_v35  ;;  %v584_v29 = vor.u32 %v583_v36, %v582_v31  ;;  %v13127_v7 = vrot.slane %v9457_v42, 2  ;;  %v9066_v31 = vld [vmem:[%s13080_s1 + $0x1a8] sm:$0xff]  }
 0x176   : > { %3762 = vmatmul.mubr.bf16.gmra.mrb[4].mxu0 %v1839_v37  ;;  %v1799_v37 = vor.u32 %v1798_v5, %v1795_v19  ;;  %v9065_v5 = vld [vmem:[%s13080_s1 + $0x1a0] sm:$0xff]   ;;  %13280 = vst [vmem:[#allocation42_spill] sm:$0xff] %v9946_v0  ;;  %v2007_v45 = vshrl.u32 %v581_v38, 16  ;;  %v587_v19 = vrot.slane %v13281_v43, 2  ;;  %v2010_v26 = vshll.u32 %v581_v38, 16 }
 0x177   : > { %3769 = vmatprep.mubr.bf16.mxu0 %v9910_v4  ;;  %3903 = vmatpush1.bf16.msra.mxu0 %v9063_v14  ;;  %v648_v14 = vrot.slane %v9429_v8, 2  ;;  %v1865_v10 = vrot.slane %v1863_v1, 7  ;;  %v1964_v57 = vor.u32 %v1963_v15, %v1960_v62  ;;  %v1956_v38 = vsel %vm1673_vm1, %v1897_v17, %v9936_v50  ;;  %v9067_v17 = vld [vmem:[%s13080_s1 + $0x1b0] sm:$0xff]  }
 0x178   : > { %3904 = vmatprep.subr.bf16.mxu0 %v13276_v12  ;;  %v1808_v20 = vsel %vm1673_vm1, %v1799_v37, %v1807_v13  ;;  %v585_v37 = vsel %vm13166_vm4, %v580_v47, %v584_v29  ;;  %v769_v62 = vrot.slane %v9378_v24, 3  ;;  %v2012_v15 = vrot.slane %v2010_v26, 7 }
 0x179   : > { %8269 = vmatprep.mubr.bf16.mxu1 %v1808_v20  ;;  %v649_v16 = vsel %vm13167_vm3, %v646_v30, %v648_v14  ;;  %v9963_v20 = vor.u32 %v587_v19, %v586_v22  ;;  %v13130_v47 = vrot.slane %v9404_v46, 3  ;;  %v9972_v1 = vsel %vm1673_vm1, %v1906_v35, %v1964_v57 }
 0x17a   : > { %v2016_v36 = vshrl.u32 %v649_v16, 16  ;;  %v2019_v30 = vshll.u32 %v649_v16, 16  ;;  %13282 = vst [vmem:[#allocation14_spill] sm:$0xff] %v9972_v1  ;;  %v2065_v16 = vshrl.u32 %v585_v37, 16 }
 0x17b   : > { %3905 = vmatpush1.bf16.msra.mxu0 %v9064_v44  ;;  %v1862_v44 = vrot.slane %v1860_v11, 6  ;;  %v589_v35 = vsel %vm13166_vm4, %v584_v29, %v9963_v20 }
 0x17c   : > { %3906 = vmatprep.subr.bf16.mxu0 %v13276_v12  ;;  %v2018_v22 = vrot.slane %v2016_v36, 6  ;;  %v2021_v19 = vrot.slane %v2019_v30, 7  ;;  %v9068_v30 = vld [vmem:[%s13080_s1 + $0x1b8] sm:$0xff]   ;;  %v2123_v3 = vshrl.u32 %v589_v35, 16 }
 0x17d   : > { %v1866_v6 = vor.u32 %v1865_v10, %v1862_v44  ;;  %v2068_v44 = vshll.u32 %v585_v37, 16  ;;  %v772_v10 = vsel %vm13169_vm5, %v769_v62, %v13130_v47 }
 0x17e   : > { %3770 = vmatmul.mubr.bf16.gmra.mrb[8].mxu0 %v1898_v54  ;;  %v2009_v54 = vrot.slane %v2007_v45, 6  ;;  %v770_v45 = vsel %vm13169_vm5, %v767_v52, %v769_v62  ;;  %v2067_v52 = vrot.slane %v2065_v16, 6  ;;  %v1979_v29 = vshll.u32 %v772_v10, 16 }
 0x17f   : > { %3777 = vmatprep.mubr.bf16.mxu0 %v9946_v0  ;;  %3907 = vmatpush1.bf16.msra.mxu0 %v9065_v5  ;;  %v651_v5 = vsel %vm13167_vm3, %v648_v14, %v13127_v7  ;;  %v1867_v11 = vsel %vm1673_vm1, %v1807_v13, %v1866_v6  ;;  %v1918_v14 = vshrl.u32 %v770_v45, 16  ;;  %v1921_v13 = vshll.u32 %v770_v45, 16 }
 0x180   : > { %3908 = vmatprep.subr.bf16.mxu0 %v13276_v12  ;;  %8270 = vmatmul.mubr.bf16.vlgmr.msra.gmra.mrb[0].mxu1 %v1867_v11  ;;  %v2074_v26 = vshrl.u32 %v651_v5, 16  ;;  %v2077_v37 = vshll.u32 %v651_v5, 16  ;;  %v2070_v36 = vrot.slane %v2068_v44, 7  ;;  %v1976_v45 = vshrl.u32 %v772_v10, 16  ;;  %v13283_v44 = vld [vmem:[#allocation17_spill] sm:$0xff] }
 0x181   : > { %v1920_v11 = vrot.slane %v1918_v14, 6  ;;  %v1923_v7 = vrot.slane %v1921_v13, 7  ;;  %v2022_v24 = vor.u32 %v2021_v19, %v2018_v22  ;;  %v652_v62 = vrot.slane %v9468_v55, 2  ;;  %v13284_v13 = vld [vmem:[#allocation15_spill] sm:$0xff] }
 0x182   : > { %v1978_v5 = vrot.slane %v1976_v45, 6  ;;  %v1981_v14 = vrot.slane %v1979_v29, 7  ;;  %v2079_v16 = vrot.slane %v2077_v37, 7  ;;  %v591_v47 = vrot.slane %v13284_v13, 2  ;;  %v9069_v19 = vld [vmem:[%s13080_s1 + $0x1c0] sm:$0xff]   ;;  %v13287_v29 = vld [vmem:[#allocation20_spill] sm:$0xff] }
 0x183   : > { %3909 = vmatpush1.bf16.msra.mxu0 %v9066_v31  ;;  %v2013_v31 = vor.u32 %v2012_v15, %v2009_v54  ;;  %v2076_v54 = vrot.slane %v2074_v26, 6  ;;  %v2126_v15 = vshll.u32 %v589_v35, 16  ;;  %v10001_v26 = vsel %vm1673_vm1, %v1964_v57, %v2022_v24 }
 0x184   : > { %3910 = vmatprep.subr.bf16.mxu0 %v13276_v12  ;;  %13285 = vst [vmem:[#allocation17_spill] sm:$0xff] %v10001_v26  ;;  %v13286_v35 = vrot.slane %v9457_v42, 2  ;;  %v654_v45 = vrot.slane %v9492_v18, 2 }
 0x185   : > { %v2014_v22 = vsel %vm1673_vm1, %v9936_v50, %v2013_v31  ;;  %v10009_v37 = vor.u32 %v2079_v16, %v2076_v54  ;;  %v13135_v16 = vrot.slane %v9457_v42, 3 }
 0x186   : > { %3778 = vmatmul.mubr.bf16.gmra.mrb[12].mxu0 %v1956_v38  ;;  %v1924_v38 = vor.u32 %v1923_v7, %v1920_v11  ;;  %v9998_v7 = vor.u32 %v1981_v14, %v1978_v5  ;;  %v653_v10 = vsel %vm13167_vm3, %v13286_v35, %v652_v62  ;;  %v2125_v11 = vrot.slane %v2123_v3, 6  ;;  %v13288_v14 = vld [vmem:[#allocation18_spill] sm:$0xff] }
 0x187   : > { %3785 = vmatprep.mubr.bf16.mxu0 %v9972_v1  ;;  %3911 = vmatpush1.bf16.msra.mxu0 %v9067_v17  ;;  %v590_v17 = vrot.slane %v13283_v44, 1  ;;  %v2132_v57 = vshrl.u32 %v653_v10, 16  ;;  %v594_v5 = vrot.slane %v13287_v29, 1  ;;  %v595_v35 = vrot.slane %v13288_v14, 2 }
 0x188   : > { %3912 = vmatprep.subr.bf16.mxu0 %v13276_v12  ;;  %v1925_v1 = vsel %vm1673_vm1, %v1866_v6, %v1924_v38  ;;  %v2071_v6 = vor.u32 %v2070_v36, %v2067_v52  ;;  %v1983_v50 = vsel %vm1673_vm1, %v1924_v38, %v9998_v7  ;;  %v9070_v52 = vld [vmem:[%s13080_s1 + $0x1c8] sm:$0xff]   ;;  %v2135_v36 = vshll.u32 %v653_v10, 16 }
 0x189   : > { %8273 = vmatprep.mubr.bf16.mxu1 %v1925_v1  ;;  %v2128_v1 = vrot.slane %v2126_v15, 7  ;;  %v10023_v38 = vsel %vm1673_vm1, %v2022_v24, %v10009_v37  ;;  %v13290_v24 = vrot.slane %v9404_v46, 3 }
 0x18a   : > { %8274 = vmatmul.mubr.bf16.gmra.mrb[4].mxu1 %v1983_v50  ;;  %v2072_v3 = vsel %vm1673_vm1, %v2013_v31, %v2071_v6  ;;  %13289 = vst [vmem:[#allocation15_spill] sm:$0xff] %v10023_v38  ;;  %v9071_v31 = vld [vmem:[%s13080_s1 + $0x1d0] sm:$0xff]   ;;  %v2137_v50 = vrot.slane %v2135_v36, 7 }
 0x18b   : > { %3913 = vmatpush1.bf16.msra.mxu0 %v9068_v30  ;;  %v592_v30 = vor.u32 %v591_v47, %v590_v17  ;;  %v773_v47 = vrot.slane %v9429_v8, 3  ;;  %v10025_v54 = vor.u32 %v2128_v1, %v2125_v11  ;;  %v2134_v17 = vrot.slane %v2132_v57, 6 }
 0x18c   : > { %3914 = vmatprep.subr.bf16.mxu0 %v13276_v12 }
 0x18d   : > { %v593_v15 = vsel %vm13166_vm4, %v9963_v20, %v592_v30  ;;  %v774_v10 = vsel %vm13169_vm5, %v13290_v24, %v773_v47  ;;  %v656_v24 = vrot.slane %v9520_v53, 2 }
 0x18e   : > { %3786 = vmatmul.mubr.bf16.gmra.mrb[16].mxu0 %v2014_v22  ;;  %v655_v22 = vsel %vm13167_vm3, %v652_v62, %v654_v45  ;;  %v2034_v20 = vshrl.u32 %v774_v10, 16  ;;  %v2037_v11 = vshll.u32 %v774_v10, 16  ;;  %v776_v62 = vsel %vm13169_vm5, %v773_v47, %v13135_v16  ;;  %v9072_v47 = vld [vmem:[%s13080_s1 + $0x1d8] sm:$0xff]  }
 0x18f   : > { %3793 = vmatprep.mubr.bf16.mxu0 %v10001_v26  ;;  %3915 = vmatpush1.bf16.msra.mxu0 %v9069_v19  ;;  %v10031_v19 = vor.u32 %v595_v35, %v594_v5  ;;  %v2181_v1 = vshrl.u32 %v593_v15, 16  ;;  %v2184_v57 = vshll.u32 %v593_v15, 16  ;;  %v2092_v5 = vshrl.u32 %v776_v62, 16 }
 0x190   : > { %3916 = vmatprep.subr.bf16.mxu0 %v13276_v12  ;;  %v2095_v35 = vshll.u32 %v776_v62, 16  ;;  %v2193_v8 = vshll.u32 %v655_v22, 16  ;;  %v2036_v26 = vrot.slane %v2034_v20, 6  ;;  %v2039_v46 = vrot.slane %v2037_v11, 7  ;;  %v13291_v62 = vld [vmem:[#allocation22_spill] sm:$0xff] }
 0x191   : > { %v597_v36 = vsel %vm13166_vm4, %v592_v30, %v10031_v19  ;;  %v2094_v15 = vrot.slane %v2092_v5, 6  ;;  %v2183_v11 = vrot.slane %v2181_v1, 6  ;;  %v598_v16 = vrot.slane %v13291_v62, 1 }
 0x192   : > { %v2097_v10 = vrot.slane %v2095_v35, 7  ;;  %v2040_v20 = vor.u32 %v2039_v46, %v2036_v26  ;;  %v599_v30 = vrot.slane %v9542_v32, 2  ;;  %v2239_v14 = vshrl.u32 %v597_v36, 16  ;;  %v9073_v46 = vld [vmem:[%s13080_s1 + $0x1e0] sm:$0xff]  }
 0x193   : > { %3917 = vmatpush1.bf16.msra.mxu0 %v9070_v52  ;;  %v2190_v52 = vshrl.u32 %v655_v22, 16  ;;  %v2138_v22 = vor.u32 %v2137_v50, %v2134_v17  ;;  %v2242_v29 = vshll.u32 %v597_v36, 16  ;;  %v2195_v0 = vrot.slane %v2193_v8, 7  ;;  %v13293_v50 = vld [vmem:[#allocation25_spill] sm:$0xff] }
 0x194   : > { %3918 = vmatprep.subr.bf16.mxu0 %v13276_v12  ;;  %v2041_v5 = vsel %vm1673_vm1, %v9998_v7, %v2040_v20  ;;  %v600_v7 = vor.u32 %v599_v30, %v598_v16  ;;  %v602_v1 = vrot.slane %v13293_v50, 1  ;;  %v658_v16 = vrot.slane %v9548_v49, 2 }
 0x195   : > { %v2192_v35 = vrot.slane %v2190_v52, 6  ;;  %8277 = vmatprep.mubr.bf16.mxu1 %v2041_v5  ;;  %v10067_v17 = vsel %vm1673_vm1, %v10009_v37, %v2138_v22  ;;  %v9076_v37 = vld [vmem:[%s13080_s1 + $0x1e8] sm:$0xff]  }
 0x196   : > { %3794 = vmatmul.mubr.bf16.gmra.mrb[20].mxu0 %v2072_v3  ;;  %v2130_v3 = vsel %vm1673_vm1, %v2071_v6, %v10025_v54  ;;  %v657_v6 = vsel %vm13167_vm3, %v654_v45, %v656_v24  ;;  %13292 = vst [vmem:[#allocation22_spill] sm:$0xff] %v10067_v17 }
 0x197   : > { %3801 = vmatprep.mubr.bf16.mxu0 %v10023_v38  ;;  %3919 = vmatpush1.bf16.msra.mxu0 %v9071_v31  ;;  %v10055_v38 = vor.u32 %v2097_v10, %v2094_v15  ;;  %v2186_v31 = vrot.slane %v2184_v57, 7  ;;  %v2248_v8 = vshrl.u32 %v657_v6, 16  ;;  %v2251_v45 = vshll.u32 %v657_v6, 16  ;;  %v13294_v57 = vld [vmem:[#allocation23_spill] sm:$0xff] }
 0x198   : > { %3920 = vmatprep.subr.bf16.mxu0 %v13276_v12  ;;  %v603_v52 = vrot.slane %v13294_v57, 2  ;;  %v2241_v15 = vrot.slane %v2239_v14, 6  ;;  %v2244_v10 = vrot.slane %v2242_v29, 7 }
 0x199   : > { %v2099_v26 = vsel %vm1673_vm1, %v2040_v20, %v10055_v38  ;;  %v2187_v36 = vor.u32 %v2186_v31, %v2183_v11  ;;  %v777_v20 = vrot.slane %v9468_v55, 3  ;;  %v2250_v30 = vrot.slane %v2248_v8, 6 }
 0x19a   : > { %8278 = vmatmul.mubr.bf16.gmra.mrb[8].mxu1 %v2099_v26  ;;  %v2253_v5 = vrot.slane %v2251_v45, 7  ;;  %v604_v11 = vor.u32 %v603_v52, %v602_v1  ;;  %v2245_v31 = vor.u32 %v2244_v10, %v2241_v15 }
 0x19b   : > { %3921 = vmatpush1.bf16.msra.mxu0 %v9072_v47  ;;  %v2196_v47 = vor.u32 %v2195_v0, %v2192_v35  ;;  %v13139_v0 = vrot.slane %v9492_v18, 3  ;;  %v2188_v29 = vsel %vm1673_vm1, %v10025_v54, %v2187_v36  ;;  %v9079_v35 = vld [vmem:[%s13080_s1 + $0x1f0] sm:$0xff]  }
 0x19c   : > { %3922 = vmatprep.subr.bf16.mxu0 %v13276_v12  ;;  %v2254_v15 = vor.u32 %v2253_v5, %v2250_v30  ;;  %v605_v10 = vsel %vm13166_vm4, %v600_v7, %v604_v11  ;;  %v13298_v30 = vld [vmem:[#allocation26_spill] sm:$0xff] }
 0x19d   : > { %v10085_v14 = vsel %vm1673_vm1, %v2138_v22, %v2196_v47  ;;  %v780_v54 = vsel %vm13169_vm5, %v777_v20, %v13139_v0  ;;  %v607_v5 = vrot.slane %v13298_v30, 2 }
 0x19e   : > { %3802 = vmatmul.mubr.bf16.gmra.mrb[24].mxu0 %v2130_v3  ;;  %v601_v3 = vsel %vm13166_vm4, %v10031_v19, %v600_v7  ;;  %13295 = vst [vmem:[#allocation25_spill] sm:$0xff] %v10085_v14  ;;  %v13296_v19 = vrot.slane %v9457_v42, 3  ;;  %v2208_v1 = vshrl.u32 %v780_v54, 16  ;;  %v2211_v52 = vshll.u32 %v780_v54, 16  ;;  %v13297_v54 = vld [vmem:[#allocation28_spill] sm:$0xff] }
 0x19f   : > { %3809 = vmatprep.mubr.bf16.mxu0 %v10067_v17  ;;  %3923 = vmatpush1.bf16.msra.mxu0 %v9073_v46  ;;  %v659_v46 = vsel %vm13167_vm3, %v656_v24, %v658_v16  ;;  %v2297_v22 = vshrl.u32 %v601_v3, 16  ;;  %v2300_v45 = vshll.u32 %v601_v3, 16  ;;  %v660_v3 = vrot.slane %v9579_v51, 2 }
 0x1a0   : > { %3924 = vmatprep.subr.bf16.mxu0 %v13276_v12  ;;  %v778_v6 = vsel %vm13169_vm5, %v13296_v19, %v777_v20  ;;  %v2306_v24 = vshrl.u32 %v659_v46, 16  ;;  %v2309_v55 = vshll.u32 %v659_v46, 16  ;;  %v2210_v20 = vrot.slane %v2208_v1, 6 }
 0x1a1   : > { %v2150_v26 = vshrl.u32 %v778_v6, 16  ;;  %v2153_v8 = vshll.u32 %v778_v6, 16  ;;  %v9083_v6 = vld [vmem:[%s13080_s1 + $0x1f8] sm:$0xff]   ;;  %v2213_v0 = vrot.slane %v2211_v52, 7  ;;  %v2355_v42 = vshrl.u32 %v605_v10, 16 }
 0x1a2   : > { %v2246_v1 = vsel %vm1673_vm1, %v2187_v36, %v2245_v31  ;;  %v2308_v52 = vrot.slane %v2306_v24, 6  ;;  %v2311_v17 = vrot.slane %v2309_v55, 7  ;;  %v662_v36 = vrot.slane %v9602_v27, 2 }
 0x1a3   : > { %3925 = vmatpush1.bf16.msra.mxu0 %v9076_v37  ;;  %v2152_v37 = vrot.slane %v2150_v26, 6  ;;  %v2155_v19 = vrot.slane %v2153_v8, 7  ;;  %v2299_v26 = vrot.slane %v2297_v22, 6  ;;  %v2302_v8 = vrot.slane %v2300_v45, 7 }
 0x1a4   : > { %3926 = vmatprep.subr.bf16.mxu0 %v13276_v12  ;;  %v10107_v46 = vor.u32 %v2213_v0, %v2210_v20  ;;  %v661_v22 = vsel %vm13167_vm3, %v658_v16, %v660_v3  ;;  %v610_v55 = vrot.slane %v9629_v56, 1  ;;  %v781_v20 = vrot.slane %v9520_v53, 3  ;;  %v13303_v53 = vld [vmem:[#allocation32_spill] sm:$0xff] }
 0x1a5   : > { %v2156_v7 = vor.u32 %v2155_v19, %v2152_v37  ;;  %v10115_v37 = vsel %vm1673_vm1, %v2196_v47, %v2254_v15  ;;  %v2303_v45 = vor.u32 %v2302_v8, %v2299_v26  ;;  %v2312_v19 = vor.u32 %v2311_v17, %v2308_v52 }
 0x1a6   : > { %3810 = vmatmul.mubr.bf16.gmra.mrb[28].mxu0 %v2188_v29  ;;  %v606_v29 = vrot.slane %v13297_v54, 1  ;;  %13299 = vst [vmem:[#allocation23_spill] sm:$0xff] %v10115_v37  ;;  %v2364_v24 = vshrl.u32 %v661_v22, 16  ;;  %v2367_v47 = vshll.u32 %v661_v22, 16  ;;  %v13301_v17 = vrot.slane %v9492_v18, 3 }
 0x1a7   : > { %3817 = vmatprep.mubr.bf16.mxu0 %v10085_v14  ;;  %3927 = vmatpush1.bf16.msra.mxu0 %v9079_v35  ;;  %v2358_v35 = vshll.u32 %v605_v10, 16  ;;  %v2157_v14 = vsel %vm1673_vm1, %v10055_v38, %v2156_v7  ;;  %v2215_v30 = vsel %vm1673_vm1, %v2156_v7, %v10107_v46  ;;  %v2357_v10 = vrot.slane %v2355_v42, 6 }
 0x1a8   : > { %3928 = vmatprep.subr.bf16.mxu0 %v13276_v12  ;;  %8281 = vmatprep.mubr.bf16.mxu1 %v2157_v14  ;;  %v608_v0 = vor.u32 %v607_v5, %v606_v29  ;;  %v611_v14 = vrot.slane %v9617_v40, 2  ;;  %v2304_v16 = vsel %vm1673_vm1, %v2245_v31, %v2303_v45  ;;  %v663_v29 = vsel %vm13167_vm3, %v660_v3, %v662_v36 }
 0x1a9   : > { %8282 = vmatmul.mubr.bf16.gmra.mrb[12].mxu1 %v2215_v30  ;;  %v2360_v38 = vrot.slane %v2358_v35, 7  ;;  %v13147_v5 = vrot.slane %v9548_v49, 3  ;;  %v10128_v7 = vsel %vm1673_vm1, %v2254_v15, %v2312_v19  ;;  %v2366_v26 = vrot.slane %v2364_v24, 6 }
 0x1aa   : > { %v612_v30 = vor.u32 %v611_v14, %v610_v55  ;;  %13300 = vst [vmem:[#allocation28_spill] sm:$0xff] %v10128_v7  ;;  %v782_v35 = vsel %vm13169_vm5, %v13301_v17, %v781_v20  ;;  %v2422_v22 = vshrl.u32 %v663_v29, 16  ;;  %v2425_v15 = vshll.u32 %v663_v29, 16  ;;  %v13302_v17 = vld [vmem:[#allocation35_spill] sm:$0xff] }
 0x1ab   : > { %3929 = vmatpush1.bf16.msra.mxu0 %v9083_v6  ;;  %v609_v6 = vsel %vm13166_vm4, %v604_v11, %v608_v0  ;;  %v2361_v42 = vor.u32 %v2360_v38, %v2357_v10  ;;  %v2369_v11 = vrot.slane %v2367_v47, 7  ;;  %v2269_v31 = vshll.u32 %v782_v35, 16 }
 0x1ac   : > { %v2413_v8 = vshrl.u32 %v609_v6, 16  ;;  %v784_v52 = vsel %vm13169_vm5, %v781_v20, %v13147_v5  ;;  %v2416_v3 = vshll.u32 %v609_v6, 16  ;;  %v613_v55 = vsel %vm13166_vm4, %v608_v0, %v612_v30 }
 0x1ad   : > { %v2324_v10 = vshrl.u32 %v784_v52, 16  ;;  %v2327_v38 = vshll.u32 %v784_v52, 16  ;;  %v2271_v24 = vrot.slane %v2269_v31, 7  ;;  %v614_v47 = vrot.slane %v13302_v17, 1 }
 0x1ae   : > { %3818 = vmatmul.mubr.bf16.gmra.mrb[32].mxu0 %v2246_v1  ;;  %v2266_v1 = vshrl.u32 %v782_v35, 16  ;;  %v615_v35 = vrot.slane %v13303_v53, 2  ;;  %v2370_v40 = vor.u32 %v2369_v11, %v2366_v26  ;;  %v2415_v20 = vrot.slane %v2413_v8, 6 }
 0x1af   : > { %3825 = vmatprep.mubr.bf16.mxu0 %v10115_v37  ;;  %v2326_v18 = vrot.slane %v2324_v10, 6  ;;  %v2329_v37 = vrot.slane %v2327_v38, 7  ;;  %v664_v6 = vrot.slane %v9626_v63, 2  ;;  %v2418_v52 = vrot.slane %v2416_v3, 7  ;;  %v13305_v3 = vld [vmem:[#allocation37_spill] sm:$0xff] }
 0x1b0   : > { %v2268_v14 = vrot.slane %v2266_v1, 6  ;;  %v2474_v29 = vshll.u32 %v613_v55, 16  ;;  %v2362_v0 = vsel %vm1673_vm1, %v2303_v45, %v2361_v42  ;;  %v2424_v31 = vrot.slane %v2422_v22, 6 }
 0x1b1   : > { %v10141_v56 = vor.u32 %v2329_v37, %v2326_v18  ;;  %v616_v53 = vor.u32 %v615_v35, %v614_v47  ;;  %v10149_v8 = vsel %vm1673_vm1, %v2312_v19, %v2370_v40  ;;  %v665_v11 = vsel %vm13167_vm3, %v662_v36, %v664_v6  ;;  %v13306_v37 = vld [vmem:[#allocation34_spill] sm:$0xff] }
 0x1b2   : > { %v2272_v5 = vor.u32 %v2271_v24, %v2268_v14  ;;  %13304 = vst [vmem:[#allocation35_spill] sm:$0xff] %v10149_v8  ;;  %v618_v18 = vrot.slane %v13305_v3, 1  ;;  %v619_v10 = vrot.slane %v13306_v37, 2  ;;  %v2419_v45 = vor.u32 %v2418_v52, %v2415_v20 }
 0x1b3   : > { %v666_v22 = vrot.slane %v9643_v39, 2  ;;  %v617_v19 = vsel %vm13166_vm4, %v612_v30, %v616_v53  ;;  %v785_v47 = vrot.slane %v9579_v51, 3 }
 0x1b4   : > { %v2273_v1 = vsel %vm1673_vm1, %v10107_v46, %v2272_v5  ;;  %v2331_v26 = vsel %vm1673_vm1, %v2272_v5, %v10141_v56  ;;  %v2476_v46 = vrot.slane %v2474_v29, 7  ;;  %v2480_v5 = vshrl.u32 %v665_v11, 16 }
 0x1b5   : > { %8285 = vmatprep.mubr.bf16.mxu1 %v2273_v1  ;;  %v620_v14 = vor.u32 %v619_v10, %v618_v18  ;;  %v2420_v36 = vsel %vm1673_vm1, %v2361_v42, %v2419_v45  ;;  %v2529_v35 = vshrl.u32 %v617_v19, 16  ;;  %v2532_v20 = vshll.u32 %v617_v19, 16 }
 0x1b6   : > { %3826 = vmatmul.mubr.bf16.gmra.mrb[36].mxu0 %v2304_v16  ;;  %v2471_v16 = vshrl.u32 %v613_v55, 16  ;;  %8286 = vmatmul.mubr.bf16.gmra.mrb[16].mxu1 %v2331_v26  ;;  %v2483_v55 = vshll.u32 %v665_v11, 16  ;;  %v667_v52 = vsel %vm13167_vm3, %v664_v6, %v666_v22  ;;  %v13308_v1 = vrot.slane %v9548_v49, 3  ;;  %v13309_v49 = vld [vmem:[#allocation38_spill] sm:$0xff] }
 0x1b7   : > { %3833 = vmatprep.mubr.bf16.mxu0 %v10128_v7  ;;  %v2427_v7 = vrot.slane %v2425_v15, 7  ;;  %v621_v42 = vsel %vm13166_vm4, %v616_v53, %v620_v14  ;;  %v2538_v6 = vshrl.u32 %v667_v52, 16  ;;  %v2541_v18 = vshll.u32 %v667_v52, 16 }
 0x1b8   : > { %v2473_v38 = vrot.slane %v2471_v16, 6  ;;  %v13153_v16 = vrot.slane %v9602_v27, 3  ;;  %v786_v30 = vsel %vm13169_vm5, %v13308_v1, %v785_v47  ;;  %v2587_v1 = vshrl.u32 %v621_v42, 16 }
 0x1b9   : > { %v2428_v15 = vor.u32 %v2427_v7, %v2424_v31  ;;  %v2482_v7 = vrot.slane %v2480_v5, 6  ;;  %v2382_v31 = vshrl.u32 %v786_v30, 16  ;;  %v2385_v26 = vshll.u32 %v786_v30, 16 }
 0x1ba   : > { %v2477_v24 = vor.u32 %v2476_v46, %v2473_v38  ;;  %v788_v11 = vsel %vm13169_vm5, %v785_v47, %v13153_v16  ;;  %v2534_v46 = vrot.slane %v2532_v20, 7  ;;  %v668_v30 = vrot.slane %v9662_v41, 2 }
 0x1bb   : > { %v10162_v29 = vsel %vm1673_vm1, %v2370_v40, %v2428_v15  ;;  %v2440_v10 = vshrl.u32 %v788_v11, 16  ;;  %v2443_v38 = vshll.u32 %v788_v11, 16  ;;  %v2531_v40 = vrot.slane %v2529_v35, 6 }
 0x1bc   : > { %13307 = vst [vmem:[#allocation37_spill] sm:$0xff] %v10162_v29  ;;  %v2384_v5 = vrot.slane %v2382_v31, 6  ;;  %v623_v47 = vrot.slane %v9671_v2, 2  ;;  %v2540_v16 = vrot.slane %v2538_v6, 6  ;;  %v2543_v11 = vrot.slane %v2541_v18, 7 }
 0x1bd   : > { %v2442_v53 = vrot.slane %v2440_v10, 6  ;;  %v2445_v51 = vrot.slane %v2443_v38, 7  ;;  %v13155_v20 = vshrl.u32 %v9817_v28, 16  ;;  %v13154_v31 = vshll.u32 %v9817_v28, 16 }
 0x1be   : > { %3834 = vmatmul.mubr.bf16.gmra.mrb[40].mxu0 %v2362_v0  ;;  %v2485_v0 = vrot.slane %v2483_v55, 7  ;;  %v2387_v55 = vrot.slane %v2385_v26, 7  ;;  %v2535_v18 = vor.u32 %v2534_v46, %v2531_v40  ;;  %v2544_v10 = vor.u32 %v2543_v11, %v2540_v16 }
 0x1bf   : > { %3841 = vmatprep.mubr.bf16.mxu0 %v10149_v8  ;;  %v622_v8 = vrot.slane %v13309_v49, 1  ;;  %v10175_v35 = vor.u32 %v2445_v51, %v2442_v53  ;;  %v669_v51 = vsel %vm13167_vm3, %v666_v22, %v668_v30  ;;  %v2589_v38 = vrot.slane %v2587_v1, 6  ;;  %v320_v53 = vld [vmem:[%s9249_s14 + $0x140] sm:$0xff]  ;;  %v321_v22 = vld [vmem:[%s9249_s14 + $0x148] sm:$0xff] }
 0x1c0   : > { %v2486_v19 = vor.u32 %v2485_v0, %v2482_v7  ;;  %v2388_v52 = vor.u32 %v2387_v55, %v2384_v5  ;;  %v2478_v0 = vsel %vm1673_vm1, %v2419_v45, %v2477_v24  ;;  %v629_v45 = vrot.slane %v13155_v20, 1 }
 0x1c1   : > { %v632_v55 = vrot.slane %v13154_v31, 2  ;;  %v2536_v16 = vsel %vm1673_vm1, %v2477_v24, %v2535_v18 }
 0x1c2   : > { %v2389_v7 = vsel %vm1673_vm1, %v10141_v56, %v2388_v52  ;;  %v2447_v26 = vsel %vm1673_vm1, %v2388_v52, %v10175_v35  ;;  %v10185_v6 = vsel %vm1673_vm1, %v2428_v15, %v2486_v19  ;;  %v670_v56 = vrot.slane %v9817_v28, 2 }
 0x1c3   : > { %8289 = vmatprep.mubr.bf16.mxu1 %v2389_v7  ;;  %13310 = vst [vmem:[#allocation34_spill] sm:$0xff] %v10185_v6  ;;  %v2596_v15 = vshrl.u32 %v669_v51, 16  ;;  %v10199_v46 = vsel %vm1673_vm1, %v2486_v19, %v2544_v10  ;;  %v10203_v11 = vor.u32 %v632_v55, %v629_v45  ;;  %v791_v7 = vrot.slane %v9643_v39, 3 }
 0x1c4   : > { %8290 = vmatmul.mubr.bf16.gmra.mrb[20].mxu1 %v2447_v26  ;;  %v671_v52 = vsel %vm13167_vm3, %v668_v30, %v670_v56 }
 0x1c5   : > { %v2654_v20 = vshrl.u32 %v671_v52, 16  ;;  %v2657_v30 = vshll.u32 %v671_v52, 16 }
 0x1c6   : > { %3842 = vmatmul.mubr.bf16.gmra.mrb[44].mxu0 %v2420_v36  ;;  %v2590_v36 = vshll.u32 %v621_v42, 16  ;;  %v624_v42 = vor.u32 %v623_v47, %v622_v8  ;;  %v2599_v8 = vshll.u32 %v669_v51, 16  ;;  %v789_v47 = vrot.slane %v9626_v63, 3 }
 0x1c7   : > { %3849 = vmatprep.mubr.bf16.mxu0 %v10162_v29  ;;  %v2659_v29 = vrot.slane %v2657_v30, 7 }
 0x1c8   : > { %v2592_v5 = vrot.slane %v2590_v36, 7  ;;  %v625_v40 = vsel %vm13166_vm4, %v620_v14, %v624_v42  ;;  %v10205_v36 = vpack.c.bf16 %v321_v22, %v320_v53  ;;  %v13311_v14 = vrot.slane %v9602_v27, 3 }
 0x1c9   : > { %v2645_v26 = vshrl.u32 %v625_v40, 16  ;;  %v2648_v51 = vshll.u32 %v625_v40, 16  ;;  %v2601_v19 = vrot.slane %v2599_v8, 7  ;;  %v634_v53 = vsel %vm13166_vm4, %v624_v42, %v10203_v11 }
 0x1ca   : > { %v2593_v1 = vor.u32 %v2592_v5, %v2589_v38  ;;  %v790_v24 = vsel %vm13169_vm5, %v13311_v14, %v789_v47  ;;  %v792_v5 = vsel %vm13169_vm5, %v789_v47, %v791_v7  ;;  %v2656_v27 = vrot.slane %v2654_v20, 6 }
 0x1cb   : > { %v2498_v31 = vshrl.u32 %v790_v24, 16  ;;  %v2501_v38 = vshll.u32 %v790_v24, 16  ;;  %v2556_v45 = vshrl.u32 %v792_v5, 16  ;;  %v2559_v55 = vshll.u32 %v792_v5, 16 }
 0x1cc   : > { %v2594_v8 = vsel %vm1673_vm1, %v2535_v18, %v2593_v1  ;;  %v2647_v47 = vrot.slane %v2645_v26, 6  ;;  %v2650_v63 = vrot.slane %v2648_v51, 7  ;;  %v2703_v5 = vshrl.u32 %v634_v53, 16 }
 0x1cd   : > { %v2500_v22 = vrot.slane %v2498_v31, 6  ;;  %v2503_v40 = vrot.slane %v2501_v38, 7  ;;  %v2558_v14 = vrot.slane %v2556_v45, 6  ;;  %v2561_v24 = vrot.slane %v2559_v55, 7 }
 0x1ce   : > { %3850 = vmatmul.mubr.bf16.gmra.mrb[48].mxu0 %v2478_v0  ;;  %v2598_v0 = vrot.slane %v2596_v15, 6  ;;  %v672_v15 = vrot.slane %v10205_v36, 2  ;;  %v678_v42 = vrot.slane %v9340_v58, 2  ;;  %v679_v38 = vrot.slane %v9321_v48, 3 }
 0x1cf   : > { %3857 = vmatprep.mubr.bf16.mxu0 %v10185_v6  ;;  %v2504_v52 = vor.u32 %v2503_v40, %v2500_v22  ;;  %v2562_v6 = vor.u32 %v2561_v24, %v2558_v14  ;;  %v682_v26 = vrot.slane %v9343_v59, 3  ;;  %v2705_v58 = vrot.slane %v2703_v5, 6  ;;  %v13312_v14 = vld [vmem:[#allocation7_spill] sm:$0xff] }
 0x1d0   : > { %v2602_v39 = vor.u32 %v2601_v19, %v2598_v0  ;;  %v673_v31 = vsel %vm13167_vm3, %v670_v56, %v672_v15  ;;  %v681_v0 = vrot.slane %v9369_v21, 2  ;;  %v2651_v19 = vor.u32 %v2650_v63, %v2647_v47 }
 0x1d1   : > { %v2505_v18 = vsel %vm1673_vm1, %v10175_v35, %v2504_v52  ;;  %v2563_v20 = vsel %vm1673_vm1, %v2504_v52, %v2562_v6  ;;  %v2660_v56 = vor.u32 %v2659_v29, %v2656_v27  ;;  %v2712_v45 = vshrl.u32 %v673_v31, 16 }
 0x1d2   : > { %8293 = vmatprep.mubr.bf16.mxu1 %v2505_v18  ;;  %v10228_v51 = vsel %vm1673_vm1, %v2544_v10, %v2602_v39  ;;  %v2715_v48 = vshll.u32 %v673_v31, 16  ;;  %v680_v35 = vor.u32 %v679_v38, %v678_v42  ;;  %v683_v21 = vor.u32 %v682_v26, %v681_v0 }
 0x1d3   : > { %8294 = vmatmul.mubr.bf16.gmra.mrb[24].mxu1 %v2563_v20  ;;  %v2652_v59 = vsel %vm1673_vm1, %v2593_v1, %v2651_v19  ;;  %v793_v55 = vrot.slane %v9662_v41, 3  ;;  %v10234_v10 = vsel %vm1673_vm1, %v2602_v39, %v2660_v56  ;;  %v2714_v63 = vrot.slane %v2712_v45, 6 }
 0x1d4   : > { %v795_v27 = vrot.slane %v9817_v28, 3  ;;  %v2717_v29 = vrot.slane %v2715_v48, 7  ;;  %v684_v22 = vsel %vm13162_vm6, %v680_v35, %v683_v21  ;;  %v685_v40 = vrot.slane %v9390_v33, 2 }
 0x1d5   : > { %v686_v24 = vrot.slane %v13312_v14, 3  ;;  %v2770_v52 = vshrl.u32 %v10203_v11, 16  ;;  %v2773_v5 = vshll.u32 %v10203_v11, 16  ;;  %v1776_v42 = vshrl.u32 %v680_v35, 16 }
 0x1d6   : > { %3858 = vmatmul.mubr.bf16.gmra.mrb[52].mxu0 %v2536_v16  ;;  %v2706_v16 = vshll.u32 %v634_v53, 16  ;;  %v796_v39 = vsel %vm13169_vm5, %v793_v55, %v795_v27  ;;  %v1779_v18 = vshll.u32 %v680_v35, 16  ;;  %v1787_v0 = vshll.u32 %v684_v22, 16 }
 0x1d7   : > { %3865 = vmatprep.mubr.bf16.mxu0 %v10199_v46  ;;  %v2675_v31 = vshll.u32 %v796_v39, 16 }
 0x1d8   : > { %v2708_v30 = vrot.slane %v2706_v16, 7  ;;  %v2672_v16 = vshrl.u32 %v796_v39, 16  ;;  %v1781_v14 = vrot.slane %v1779_v18, 7  ;;  %v323_v18 = vld [vmem:[%s9249_s14 + $0x158] sm:$0xff] }
 0x1d9   : > { %v2677_v20 = vrot.slane %v2675_v31, 7 }
 0x1da   : > { %v2709_v53 = vor.u32 %v2708_v30, %v2705_v58  ;;  %v2674_v26 = vrot.slane %v2672_v16, 6  ;;  %v10247_v58 = vor.u32 %v2717_v29, %v2714_v63  ;;  %v687_v30 = vor.u32 %v686_v24, %v685_v40  ;;  %v13313_v24 = vld [vmem:[#allocation40_spill] sm:$0xff] }
 0x1db   : > { %v689_v29 = vrot.slane %v9416_v60, 2  ;;  %v690_v40 = vrot.slane %v9393_v34, 3  ;;  %v1759_v39 = vshrl.u32 %v13313_v24, 16  ;;  %v797_v34 = vrot.slane %v10205_v36, 3 }
 0x1dc   : > { %v2710_v48 = vsel %vm1673_vm1, %v2651_v19, %v2709_v53  ;;  %v2678_v11 = vor.u32 %v2677_v20, %v2674_v26  ;;  %v10254_v63 = vsel %vm1673_vm1, %v2660_v56, %v10247_v58  ;;  %v688_v19 = vsel %vm13162_vm6, %v683_v21, %v687_v30 }
 0x1dd   : > { %v1851_v31 = vshrl.u32 %v688_v19, 16  ;;  %v1854_v56 = vshll.u32 %v688_v19, 16  ;;  %v691_v21 = vor.u32 %v690_v40, %v689_v29 }
 0x1de   : > { %3866 = vmatmul.mubr.bf16.gmra.mrb[56].mxu0 %v2594_v8  ;;  %v794_v8 = vsel %vm13169_vm5, %v791_v7, %v793_v55  ;;  %v1784_v7 = vshrl.u32 %v684_v22, 16  ;;  %v2772_v55 = vrot.slane %v2770_v52, 6  ;;  %v1762_v52 = vshll.u32 %v13313_v24, 16 }
 0x1df   : > { %3873 = vmatprep.mubr.bf16.mxu0 %v10228_v51  ;;  %v2614_v47 = vshrl.u32 %v794_v8, 16  ;;  %v2617_v1 = vshll.u32 %v794_v8, 16  ;;  %v2775_v8 = vrot.slane %v2773_v5, 7  ;;  %v1853_v20 = vrot.slane %v1851_v31, 6 }
 0x1e1   : > { %v2616_v33 = vrot.slane %v2614_v47, 6  ;;  %v2619_v38 = vrot.slane %v2617_v1, 7  ;;  %v1786_v47 = vrot.slane %v1784_v7, 6  ;;  %v1789_v1 = vrot.slane %v1787_v0, 7 }
 0x1e2   : > { %v1764_v7 = vrot.slane %v1762_v52, 7 }
 0x1e3   : > { %v2620_v45 = vor.u32 %v2619_v38, %v2616_v33  ;;  %v1790_v16 = vor.u32 %v1789_v1, %v1786_v47  ;;  %v1761_v38 = vrot.slane %v1759_v39, 6 }
 0x1e5   : > { %v2621_v35 = vsel %vm1673_vm1, %v2562_v6, %v2620_v45  ;;  %v2679_v22 = vsel %vm1673_vm1, %v2620_v45, %v2678_v11  ;;  %v2776_v6 = vor.u32 %v2775_v8, %v2772_v55  ;;  %v1856_v45 = vrot.slane %v1854_v56, 7 }
 0x1e6   : > { %3874 = vmatmul.mubr.bf16.gmra.mrb[60].mxu0 %v2652_v59  ;;  %v1778_v59 = vrot.slane %v1776_v42, 6  ;;  %8297 = vmatprep.mubr.bf16.mxu1 %v2621_v35  ;;  %v322_v42 = vld [vmem:[%s9249_s14 + $0x150] sm:$0xff]  ;;  %v692_v55 = vsel %vm13162_vm6, %v687_v30, %v691_v21  ;;  %v1765_v40 = vor.u32 %v1764_v7, %v1761_v38 }
 0x1e7   : > { %3881 = vmatprep.mubr.bf16.mxu0 %v10234_v10  ;;  %8298 = vmatmul.mubr.bf16.gmra.mrb[28].mxu1 %v2679_v22  ;;  %v10264_v33 = vpack.c.bf16 %v323_v18, %v322_v42  ;;  %v2777_v60 = vsel %vm1673_vm1, %v2709_v53, %v2776_v6  ;;  %v693_v53 = vrot.slane %v9441_v23, 2  ;;  %v1909_v39 = vshrl.u32 %v692_v55, 16  ;;  %v13315_v23 = vld [vmem:[#allocation41_spill] sm:$0xff] }
 0x1e8   : > { %v1782_v5 = vor.u32 %v1781_v14, %v1778_v59  ;;  %v13314_v14 = vld [vmem:[#allocation10_spill] sm:$0xff]  ;;  %v1912_v30 = vshll.u32 %v692_v55, 16  ;;  %v1774_v42 = vsel %vm1673_vm1, %v1765_v40, %v13315_v23  ;;  %v706_v40 = vrot.slane %v13284_v13, 3  ;;  %v13317_v23 = vld [vmem:[#allocation20_spill] sm:$0xff] }
 0x1e9   : > { %v799_v0 = vrot.slane %v10264_v33, 3  ;;  %v694_v47 = vrot.slane %v13314_v14, 3 }
 0x1ea   : > { %v1791_v26 = vsel %vm1673_vm1, %v1782_v5, %v1790_v16  ;;  %v1914_v38 = vrot.slane %v1912_v30, 7  ;;  %v9088_v30 = vld [vmem:[%s13082_s3 + $0x18] sm:$0xff]  }
 0x1eb   : > { %v800_v35 = vsel %vm13169_vm5, %v797_v34, %v799_v0  ;;  %v695_v5 = vor.u32 %v694_v47, %v693_v53  ;;  %v697_v0 = vrot.slane %v9473_v61, 2  ;;  %v9086_v47 = vld [vmem:[%s13082_s3 + $0x8] sm:$0xff]  }
 0x1ec   : > { %v2797_v1 = vshrl.u32 %v800_v35, 16  ;;  %v2800_v22 = vshll.u32 %v800_v35, 16  ;;  %v701_v35 = vrot.slane %v9484_v9, 2 }
 0x1ed   : > { %v696_v7 = vsel %vm13162_vm6, %v691_v21, %v695_v5  ;;  %v702_v21 = vrot.slane %v13281_v43, 3 }
 0x1ee   : > { %3882 = vmatmul.mubr.bf16.gmra.mrb[64].mxu0 %v2710_v48  ;;  %v798_v48 = vsel %vm13169_vm5, %v795_v27, %v797_v34  ;;  %v2799_v6 = vrot.slane %v2797_v1, 6  ;;  %v2802_v24 = vrot.slane %v2800_v22, 7  ;;  %v1857_v27 = vor.u32 %v1856_v45, %v1853_v20  ;;  %v9087_v22 = vld [vmem:[%s13082_s3 + $0x10] sm:$0xff]  }
 0x1ef   : > { %3889 = vmatprep.mubr.bf16.mxu0 %v10254_v63  ;;  %v2730_v8 = vshrl.u32 %v798_v48, 16  ;;  %v2733_v59 = vshll.u32 %v798_v48, 16  ;;  %v1967_v20 = vshrl.u32 %v696_v7, 16  ;;  %v1970_v45 = vshll.u32 %v696_v7, 16 }
 0x1f0   : > { %v2803_v31 = vor.u32 %v2802_v24, %v2799_v6  ;;  %v1858_v34 = vsel %vm1673_vm1, %v1790_v16, %v1857_v27  ;;  %v703_v1 = vor.u32 %v702_v21, %v701_v35  ;;  %v13316_v6 = vld [vmem:[#allocation42_spill] sm:$0xff]  ;;  %v13320_v35 = vld [vmem:[#allocation17_spill] sm:$0xff] }
 0x1f1   : > { %v2732_v19 = vrot.slane %v2730_v8, 6  ;;  %v2735_v29 = vrot.slane %v2733_v59, 7  ;;  %v1969_v8 = vrot.slane %v1967_v20, 6  ;;  %v1972_v59 = vrot.slane %v1970_v45, 7 }
 0x1f3   : > { %v2736_v52 = vor.u32 %v2735_v29, %v2732_v19  ;;  %v1973_v61 = vor.u32 %v1972_v59, %v1969_v8  ;;  %v705_v29 = vrot.slane %v13283_v44, 2  ;;  %v713_v59 = vrot.slane %v13291_v62, 2 }
 0x1f5   : > { %v2737_v56 = vsel %vm1673_vm1, %v2678_v11, %v2736_v52  ;;  %v2804_v18 = vsel %vm1673_vm1, %v2736_v52, %v2803_v31  ;;  %v707_v52 = vor.u32 %v706_v40, %v705_v29  ;;  %v9089_v31 = vld [vmem:[%s13082_s3 + $0x20] sm:$0xff]  }
 0x1f6   : > { %3890 = vmatmul.mubr.bf16.gmra.mrb[68].mxu0 %v2777_v60  ;;  %8301 = vmatprep.mubr.bf16.mxu1 %v2737_v56  ;;  %v1911_v60 = vrot.slane %v1909_v39, 6 }
 0x1f7   : > { %3930 = vmatprep.mubr.bf16.mxu0 %v1791_v26  ;;  %8302 = vmatmul.mubr.bf16.gmra.mrb[32].mxu1 %v2804_v18  ;;  %v698_v26 = vrot.slane %v9444_v25, 3  ;;  %v9085_v25 = vld [vmem:[%s13082_s3] sm:$0xff]   ;;  %v708_v56 = vsel %vm13162_vm6, %v703_v1, %v707_v52  ;;  %v13318_v18 = vld [vmem:[#allocation18_spill] sm:$0xff] }
 0x1f8   : > { %v1915_v11 = vor.u32 %v1914_v38, %v1911_v60  ;;  %6680 = vmatpush1.bf16.msra.mxu1 %v9085_v25  ;;  %v13319_v60 = vld [vmem:[#allocation14_spill] sm:$0xff]  ;;  %v2141_v7 = vshrl.u32 %v708_v56, 16 }
 0x1f9   : > { %v699_v48 = vor.u32 %v698_v26, %v697_v0  ;;  %6681 = vmatprep.subr.bf16.mxu1 %v13276_v12  ;;  %v2144_v0 = vshll.u32 %v708_v56, 16  ;;  %v9090_v26 = vld [vmem:[%s13082_s3 + $0x28] sm:$0xff]  }
 0x1fa   : > { %v1916_v55 = vsel %vm1673_vm1, %v1857_v27, %v1915_v11  ;;  %v1974_v9 = vsel %vm1673_vm1, %v1915_v11, %v1973_v61  ;;  %v2143_v45 = vrot.slane %v2141_v7, 6 }
 0x1fb   : > { %v700_v16 = vsel %vm13162_vm6, %v695_v5, %v699_v48  ;;  %v704_v19 = vsel %vm13162_vm6, %v699_v48, %v703_v1  ;;  %v2146_v48 = vrot.slane %v2144_v0, 7  ;;  %v9093_v1 = vld [vmem:[%s13082_s3 + $0x40] sm:$0xff]  }
 0x1fc   : > { %v2025_v53 = vshrl.u32 %v700_v16, 16  ;;  %v2028_v14 = vshll.u32 %v700_v16, 16  ;;  %6682 = vmatpush1.bf16.msra.mxu1 %v9086_v47  ;;  %v2083_v27 = vshrl.u32 %v704_v19, 16  ;;  %v2086_v39 = vshll.u32 %v704_v19, 16 }
 0x1fd   : > { %6683 = vmatprep.subr.bf16.mxu1 %v13276_v12  ;;  %v714_v16 = vrot.slane %v9542_v32, 3  ;;  %v2147_v21 = vor.u32 %v2146_v48, %v2143_v45 }
 0x1fe   : > { %3931 = vmatmul.mubr.bf16.vlgmr.msra.gmra.mrb[0].mxu0 %v1774_v42  ;;  %v2027_v43 = vrot.slane %v2025_v53, 6  ;;  %v2085_v5 = vrot.slane %v2083_v27, 6  ;;  %v2088_v13 = vrot.slane %v2086_v39, 7  ;;  %v709_v42 = vrot.slane %v13317_v23, 2  ;;  %v9092_v53 = vld [vmem:[%s13082_s3 + $0x38] sm:$0xff]  }
 0x1ff   : > { %3938 = vmatprep.mubr.bf16.mxu0 %v1858_v34  ;;  %v710_v34 = vrot.slane %v13318_v18, 3 }
 0x200   : > { %6684 = vmatpush1.bf16.msra.mxu1 %v9087_v22  ;;  %v2089_v38 = vor.u32 %v2088_v13, %v2085_v5  ;;  %v13321_v22 = vld [vmem:[#allocation15_spill] sm:$0xff]  ;;  %v13323_v5 = vld [vmem:[#allocation22_spill] sm:$0xff] }
 0x201   : > { %6685 = vmatprep.subr.bf16.mxu1 %v13276_v12  ;;  %v711_v11 = vor.u32 %v710_v34, %v709_v42 }
 0x202   : > { %v2148_v62 = vsel %vm1673_vm1, %v2089_v38, %v2147_v21 }
 0x203   : > { %v712_v8 = vsel %vm13162_vm6, %v707_v52, %v711_v11  ;;  %v13322_v52 = vld [vmem:[#allocation26_spill] sm:$0xff] }
 0x204   : > { %6686 = vmatpush1.bf16.msra.mxu1 %v9088_v30  ;;  %v2199_v25 = vshrl.u32 %v712_v8, 16  ;;  %v721_v30 = vrot.slane %v13297_v54, 2  ;;  %v13325_v54 = vld [vmem:[#allocation29_spill] sm:$0xff] }
 0x205   : > { %6687 = vmatprep.subr.bf16.mxu1 %v13276_v12  ;;  %v726_v0 = vrot.slane %v13325_v54, 3 }
 0x206   : > { %3939 = vmatmul.mubr.bf16.gmra.mrb[4].mxu0 %v9910_v4  ;;  %v2030_v4 = vrot.slane %v2028_v14, 7  ;;  %v715_v14 = vor.u32 %v714_v16, %v713_v59  ;;  %v2201_v47 = vrot.slane %v2199_v25, 6 }
 0x207   : > { %3946 = vmatprep.mubr.bf16.mxu0 %v1916_v55  ;;  %v9091_v55 = vld [vmem:[%s13082_s3 + $0x30] sm:$0xff]  }
 0x208   : > { %v2031_v24 = vor.u32 %v2030_v4, %v2027_v43  ;;  %6688 = vmatpush1.bf16.msra.mxu1 %v9089_v31  ;;  %v717_v43 = vrot.slane %v13293_v50, 2  ;;  %v718_v4 = vrot.slane %v13294_v57, 3 }
 0x209   : > { %6689 = vmatprep.subr.bf16.mxu1 %v13276_v12 }
 0x20a   : > { %v2032_v44 = vsel %vm1673_vm1, %v1973_v61, %v2031_v24  ;;  %v2090_v20 = vsel %vm1673_vm1, %v2031_v24, %v2089_v38  ;;  %v2202_v61 = vshll.u32 %v712_v8, 16  ;;  %v719_v24 = vor.u32 %v718_v4, %v717_v43  ;;  %v13324_v38 = vld [vmem:[#allocation31_spill] sm:$0xff] }
 0x20b   : > { %v725_v7 = vrot.slane %v13324_v38, 2  ;;  %v733_v4 = vrot.slane %v13305_v3, 2  ;;  %v13330_v3 = vld [vmem:[#allocation35_spill] sm:$0xff]  ;;  %v746_v38 = vshrl.u32 %v10205_v36, 16 }
 0x20c   : > { %6690 = vmatpush1.bf16.msra.mxu1 %v9090_v26  ;;  %v2204_v32 = vrot.slane %v2202_v61, 7  ;;  %v720_v39 = vsel %vm13162_vm6, %v715_v14, %v719_v24  ;;  %v13326_v26 = vld [vmem:[#allocation25_spill] sm:$0xff]  ;;  %v13328_v61 = vld [vmem:[#allocation23_spill] sm:$0xff] }
 0x20d   : > { %6691 = vmatprep.subr.bf16.mxu1 %v13276_v12  ;;  %v2315_v31 = vshrl.u32 %v720_v39, 16  ;;  %v2318_v56 = vshll.u32 %v720_v39, 16  ;;  %v727_v48 = vor.u32 %v726_v0, %v725_v7  ;;  %v737_v39 = vrot.slane %v13309_v49, 2 }
 0x20e   : > { %3947 = vmatmul.mubr.bf16.gmra.mrb[8].mxu0 %v13316_v6  ;;  %v2205_v19 = vor.u32 %v2204_v32, %v2201_v47  ;;  %v9094_v6 = vld [vmem:[%s13082_s3 + $0x48] sm:$0xff]   ;;  %v749_v7 = vshll.u32 %v10205_v36, 16  ;;  %v945_v0 = vlaneseq }
 0x20f   : > { %3954 = vmatprep.mubr.bf16.mxu0 %v1974_v9  ;;  %v716_v9 = vsel %vm13162_vm6, %v711_v11, %v715_v14  ;;  %v2317_v18 = vrot.slane %v2315_v31, 6  ;;  %v2320_v34 = vrot.slane %v2318_v56, 7 }
 0x210   : > { %6692 = vmatpush1.bf16.msra.mxu1 %v9091_v55  ;;  %v2257_v29 = vshrl.u32 %v716_v9, 16  ;;  %v2260_v40 = vshll.u32 %v716_v9, 16  ;;  %v2206_v50 = vsel %vm1673_vm1, %v2147_v21, %v2205_v19  ;;  %v13327_v21 = vld [vmem:[#allocation32_spill] sm:$0xff] }
 0x211   : > { %6693 = vmatprep.subr.bf16.mxu1 %v13276_v12  ;;  %v2321_v11 = vor.u32 %v2320_v34, %v2317_v18  ;;  %v730_v25 = vrot.slane %v13327_v21, 3  ;;  %v13332_v18 = vshll.u32 %v9817_v28, 16  ;;  %v10400_v21 = vshrl.u32 %v945_v0, 7 }
 0x212   : > { %v2259_v27 = vrot.slane %v2257_v29, 6  ;;  %v2262_v57 = vrot.slane %v2260_v40, 7 }
 0x213   : > { %v742_v34 = vrot.slane %v13332_v18, 3 }
 0x214   : > { %6694 = vmatpush1.bf16.msra.mxu1 %v9092_v53  ;;  %v2263_v13 = vor.u32 %v2262_v57, %v2259_v27 }
 0x215   : > { %6695 = vmatprep.subr.bf16.mxu1 %v13276_v12 }
 0x216   : > { %3955 = vmatmul.mubr.bf16.gmra.mrb[12].mxu0 %v13319_v60  ;;  %v2264_v42 = vsel %vm1673_vm1, %v2205_v19, %v2263_v13  ;;  %v2322_v55 = vsel %vm1673_vm1, %v2263_v13, %v2321_v11  ;;  %v9095_v13 = vld [vmem:[%s13082_s3 + $0x50] sm:$0xff]  }
 0x217   : > { %3962 = vmatprep.mubr.bf16.mxu0 %v2032_v44  ;;  %v722_v44 = vrot.slane %v13322_v52, 3 }
 0x218   : > { %6696 = vmatpush1.bf16.msra.mxu1 %v9093_v1 }
 0x219   : > { %6697 = vmatprep.subr.bf16.mxu1 %v13276_v12  ;;  %v723_v23 = vor.u32 %v722_v44, %v721_v30  ;;  %v738_v30 = vrot.slane %v9671_v2, 3  ;;  %v13331_v2 = vshrl.u32 %v9817_v28, 16 }
 0x21b   : > { %v724_v60 = vsel %vm13162_vm6, %v719_v24, %v723_v23  ;;  %v728_v16 = vsel %vm13162_vm6, %v723_v23, %v727_v48 }
 0x21c   : > { %6698 = vmatpush1.bf16.msra.mxu1 %v9094_v6  ;;  %v2376_v45 = vshll.u32 %v724_v60, 16  ;;  %v2431_v14 = vshrl.u32 %v728_v16, 16 }
 0x21d   : > { %6699 = vmatprep.subr.bf16.mxu1 %v13276_v12 }
 0x21e   : > { %3963 = vmatmul.mubr.bf16.gmra.mrb[16].mxu0 %v13320_v35  ;;  %v2378_v59 = vrot.slane %v2376_v45, 7  ;;  %v729_v35 = vrot.slane %v13302_v17, 2  ;;  %v2433_v1 = vrot.slane %v2431_v14, 6  ;;  %v13329_v17 = vld [vmem:[#allocation28_spill] sm:$0xff] }
 0x21f   : > { %3970 = vmatprep.mubr.bf16.mxu0 %v2090_v20  ;;  %v2373_v20 = vshrl.u32 %v724_v60, 16  ;;  %v13333_v60 = vld [vmem:[#allocation37_spill] sm:$0xff] }
 0x220   : > { %v731_v47 = vor.u32 %v730_v25, %v729_v35  ;;  %6700 = vmatpush1.bf16.msra.mxu1 %v9095_v13  ;;  %v751_v35 = vrot.slane %v749_v7, 3  ;;  %v9097_v25 = vld [vmem:[%s13082_s3 + $0x60] sm:$0xff]  }
 0x221   : > { %v2375_v8 = vrot.slane %v2373_v20, 6  ;;  %6701 = vmatprep.subr.bf16.mxu1 %v13276_v12 }
 0x222   : > { %v732_v43 = vsel %vm13162_vm6, %v727_v48, %v731_v47 }
 0x223   : > { %v2379_v53 = vor.u32 %v2378_v59, %v2375_v8  ;;  %v2489_v29 = vshrl.u32 %v732_v43, 16  ;;  %v2492_v40 = vshll.u32 %v732_v43, 16  ;;  %v758_v43 = vshll.u32 %v10264_v33, 16 }
 0x225   : > { %v2380_v32 = vsel %vm1673_vm1, %v2321_v11, %v2379_v53  ;;  %v2494_v27 = vrot.slane %v2492_v40, 7 }
 0x226   : > { %3971 = vmatmul.mubr.bf16.gmra.mrb[20].mxu0 %v13321_v22  ;;  %v734_v22 = vrot.slane %v13306_v37, 3 }
 0x227   : > { %3978 = vmatprep.mubr.bf16.mxu0 %v2148_v62  ;;  %v2434_v62 = vshll.u32 %v728_v16, 16  ;;  %v748_v16 = vrot.slane %v746_v38, 2  ;;  %v9103_v38 = vld [vmem:[%s13082_s3 + $0x210] sm:$0xff]  }
 0x228   : > { %v735_v6 = vor.u32 %v734_v22, %v733_v4  ;;  %v9098_v4 = vld [vmem:[%s13082_s3 + $0x68] sm:$0xff]   ;;  %v9099_v22 = vld [vmem:[%s13082_s3 + $0x200] sm:$0xff]  }
 0x229   : > { %v2436_v9 = vrot.slane %v2434_v62, 7  ;;  %8305 = vmatprep.subr.bf16.mxu0 %v9099_v22 }
 0x22a   : > { %v736_v57 = vsel %vm13162_vm6, %v731_v47, %v735_v6  ;;  %v13334_v47 = vld [vmem:[#allocation34_spill] sm:$0xff]  ;;  %8306 = vmatpush3.bf16.msra.mxu0 %v9099_v22  ;;  %v10485_v22 = vadd.s32 40, %v10400_v21 }
 0x22b   : > { %v2437_v19 = vor.u32 %v2436_v9, %v2433_v1  ;;  %v2547_v52 = vshrl.u32 %v736_v57, 16  ;;  %v2550_v44 = vshll.u32 %v736_v57, 16  ;;  %v10409_v1 = vadd.s32 8, %v10400_v21 }
 0x22c   : > { %v755_v9 = vshrl.u32 %v10264_v33, 16 }
 0x22d   : > { %v2438_v24 = vsel %vm1673_vm1, %v2379_v53, %v2437_v19  ;;  %v2549_v56 = vrot.slane %v2547_v52, 6  ;;  %v2552_v23 = vrot.slane %v2550_v44, 7  ;;  %v9100_v44 = vld [vmem:[%s13082_s3 + $0x70] sm:$0xff]  }
 0x22e   : > { %3979 = vmatmul.mubr.bf16.gmra.mrb[24].mxu0 %v13323_v5  ;;  %v739_v5 = vor.u32 %v738_v30, %v737_v39  ;;  %v757_v30 = vrot.slane %v755_v9, 2 }
 0x22f   : > { %3986 = vmatprep.mubr.bf16.mxu0 %v2206_v50  ;;  %v2491_v50 = vrot.slane %v2489_v29, 6  ;;  %v2553_v20 = vor.u32 %v2552_v23, %v2549_v56 }
 0x230   : > { %v740_v49 = vsel %vm13162_vm6, %v735_v6, %v739_v5  ;;  %v10421_v40 = vmul.u32.u64.low 3817748708, %v10400_v21  ;;  %v10422_v6 = vmul.u32.u64.high 3817748708, %v10400_v21, %v10421_v40 }
 0x231   : > { %v2495_v37 = vor.u32 %v2494_v27, %v2491_v50  ;;  %v2605_v45 = vshrl.u32 %v740_v49, 16  ;;  %v2608_v48 = vshll.u32 %v740_v49, 16 }
 0x232   : > { %v10428_v27 = vmul.u32.u64.low 3817748708, %v10409_v1  ;;  %v10429_v57 = vmul.u32.u64.high 3817748708, %v10409_v1, %v10428_v27 }
 0x233   : > { %v2496_v31 = vsel %vm1673_vm1, %v2437_v19, %v2495_v37  ;;  %v2607_v53 = vrot.slane %v2605_v45, 6  ;;  %v2610_v14 = vrot.slane %v2608_v48, 7 }
 0x234   : > { %v999_v45 = vshrl.u32 %v10429_v57, 4 }
 0x236   : > { %3987 = vmatmul.mubr.bf16.gmra.mrb[28].mxu0 %v13326_v26  ;;  %v9096_v26 = vld [vmem:[%s13082_s3 + $0x58] sm:$0xff]  }
 0x237   : > { %3994 = vmatprep.mubr.bf16.mxu0 %v2264_v42  ;;  %v741_v42 = vrot.slane %v13331_v2, 2  ;;  %6702 = vmatpush1.bf16.msra.mxu1 %v9096_v26 }
 0x238   : > { %6703 = vmatprep.subr.bf16.mxu1 %v13276_v12 }
 0x239   : > { %v743_v8 = vor.u32 %v742_v34, %v741_v42 }
 0x23b   : > { %v744_v62 = vsel %vm13162_vm6, %v739_v5, %v743_v8  ;;  %6704 = vmatpush1.bf16.msra.mxu1 %v9097_v25  ;;  %v9101_v5 = vld [vmem:[%s13082_s3 + $0x208] sm:$0xff]  }
 0x23c   : > { %6705 = vmatprep.subr.bf16.mxu1 %v13276_v12  ;;  %v2663_v19 = vshrl.u32 %v744_v62, 16  ;;  %v2666_v29 = vshll.u32 %v744_v62, 16  ;;  %8307 = vmatprep.subr.bf16.mxu0 %v9101_v5 }
 0x23d   : > { %8308 = vmatpush3.bf16.msra.mxu0 %v9101_v5 }
 0x23e   : > { %3995 = vmatmul.mubr.bf16.gmra.mrb[32].mxu0 %v13328_v61  ;;  %v2554_v61 = vsel %vm1673_vm1, %v2495_v37, %v2553_v20  ;;  %v10435_v37 = vadd.s32 16, %v10400_v21  ;;  %v2668_v56 = vrot.slane %v2666_v29, 7  ;;  %8309 = vmatprep.subr.bf16.mxu0 %v9103_v38 }
 0x23f   : > { %4002 = vmatprep.mubr.bf16.mxu0 %v2322_v55  ;;  %6706 = vmatpush1.bf16.msra.mxu1 %v9098_v4  ;;  %v9106_v4 = vld [vmem:[%s13082_s3 + $0x220] sm:$0xff]  }
 0x240   : > { %6707 = vmatprep.subr.bf16.mxu1 %v13276_v12  ;;  %v10451_v18 = vmul.u32.u64.low 3817748708, %v10435_v37  ;;  %v10452_v34 = vmul.u32.u64.high 3817748708, %v10435_v37, %v10451_v18 }
 0x241   : > { %8310 = vmatpush3.bf16.msra.mxu0 %v9103_v38 }
 0x242   : > { %v1010_v9 = vshrl.u32 %v10452_v34, 4 }
 0x243   : > { %6708 = vmatpush1.bf16.msra.mxu1 %v9100_v44  ;;  %v10506_v44 = vadd.s32 48, %v10400_v21 }
 0x244   : > { %6709 = vmatprep.subr.bf16.mxu1 %v13276_v12  ;;  %v1011_v57 = vmul.u32 18, %v1010_v9 }
 0x246   : > { %4003 = vmatmul.mubr.bf16.gmra.mrb[36].mxu0 %v13329_v17  ;;  %v2611_v17 = vor.u32 %v2610_v14, %v2607_v53  ;;  %v10525_v18 = vsub.s32 %v10435_v37, %v1011_v57  ;;  %v9109_v37 = vld [vmem:[%s13082_s3 + $0x230] sm:$0xff]  }
 0x247   : > { %4010 = vmatprep.mubr.bf16.mxu0 %v2380_v32  ;;  %v752_v32 = vor.u32 %v751_v35, %v748_v16 }
 0x248   : > { %v2612_v13 = vsel %vm1673_vm1, %v2553_v20, %v2611_v17  ;;  %v988_v20 = vshrl.u32 %v10422_v6, 4  ;;  %vm1380_vm13 = vcmp.ne.s32.totalorder %v10525_v18, 0  ;;  %vm1416_vm14 = vcmp.lt.s32.totalorder %v10525_v18, 0 }
 0x249   : > { %v753_v50 = vsel %vm13162_vm6, %v743_v8, %v752_v32  ;;  %v9105_v8 = vld [vmem:[%s13082_s3 + $0x218] sm:$0xff]  }
 0x24a   : > { %v2721_v49 = vshrl.u32 %v753_v50, 16  ;;  %v2724_v2 = vshll.u32 %v753_v50, 16  ;;  %v989_v53 = vmul.u32 18, %v988_v20  ;;  %8311 = vmatprep.subr.bf16.mxu0 %v9105_v8 }
 0x24b   : > { %8312 = vmatpush3.bf16.msra.mxu0 %v9105_v8 }
 0x24c   : > { %v2723_v0 = vrot.slane %v2721_v49, 6  ;;  %v2726_v26 = vrot.slane %v2724_v2, 7  ;;  %8313 = vmatprep.subr.bf16.mxu0 %v9106_v4 }
 0x24e   : > { %4011 = vmatmul.mubr.bf16.gmra.mrb[40].mxu0 %v13330_v3  ;;  %v760_v3 = vrot.slane %v758_v43, 3  ;;  %v10479_v43 = vadd.s32 32, %v10400_v21 }
 0x24f   : > { %4018 = vmatprep.mubr.bf16.mxu0 %v2438_v24  ;;  %8314 = vmatpush3.bf16.msra.mxu0 %v9106_v4  ;;  %v1488_v4 = vadd.s32 18, %v10525_v18 }
 0x250   : > { %v761_v42 = vor.u32 %v760_v3, %v757_v30  ;;  %v10502_v30 = vmul.u32.u64.low 3817748708, %v10479_v43  ;;  %v10503_v3 = vmul.u32.u64.high 3817748708, %v10479_v43, %v10502_v30 }
 0x252   : > { %v762_v48 = vsel %vm13162_vm6, %v752_v32, %v761_v42  ;;  %v1000_v32 = vmul.u32 18, %v999_v45 }
 0x253   : > { %v10388_v54 = vpop.f32.mrb[0].mxu1  ;;  %v2788_v14 = vshrl.u32 %v762_v48, 16  ;;  %v2791_v62 = vshll.u32 %v762_v48, 16 }
 0x254   : > { %v10393_v11 = vpop.f32.mrb[1].mxu1  ;;  %v10497_v50 = vsub.s32 %v10409_v1, %v1000_v32  ;;  %v9110_v32 = vld [vmem:[%s13082_s3 + $0x238] sm:$0xff]  }
 0x255   : > { %v10395_v55 = vpop.f32.mrb[2].mxu1  ;;  %v2790_v29 = vrot.slane %v2788_v14, 6  ;;  %v2793_v40 = vrot.slane %v2791_v62, 7 }
 0x256   : > { %4019 = vmatmul.mubr.bf16.gmra.mrb[44].mxu0 %v13333_v60  ;;  %v10397_v59 = vpop.f32.mrb[3].mxu1  ;;  %v9102_v60 = vld [vmem:[%s13082_s3 + $0x78] sm:$0xff]   ;;  %vm1379_vm9 = vcmp.ne.s32.totalorder %v10497_v50, 0  ;;  %vm1415_vm10 = vcmp.lt.s32.totalorder %v10497_v50, 0  ;;  %v1487_v8 = vadd.s32 18, %v10497_v50 }
 0x257   : > { %4026 = vmatprep.mubr.bf16.mxu0 %v2496_v31  ;;  %v2665_v31 = vrot.slane %v2663_v19, 6  ;;  %6710 = vmatpush1.bf16.msra.mxu1 %v9102_v60  ;;  %v2794_v49 = vor.u32 %v2793_v40, %v2790_v29  ;;  %v10528_v34 = vmul.u32.u64.low 3817748708, %v10506_v44  ;;  %v10529_v60 = vmul.u32.u64.high 3817748708, %v10506_v44, %v10528_v34  ;;  %vm10553_vm12 = vmand %vm1415_vm10, %vm1379_vm9 }
 0x258   : > { %6856 = vmatprep.subr.bf16.mxu1 %v13276_v12 }
 0x259   : > { %v2669_v7 = vor.u32 %v2668_v56, %v2665_v31  ;;  %v9107_v31 = vld [vmem:[%s13082_s3 + $0x228] sm:$0xff]   ;;  %v1054_v29 = vshrl.u32 %v10529_v60, 4  ;;  %v13163_v60 = vmov 0.0  }
 0x25a   : > { %8315 = vmatprep.subr.bf16.mxu0 %v9107_v31 }
 0x25b   : > { %v2670_v16 = vsel %vm1673_vm1, %v2611_v17, %v2669_v7  ;;  %8316 = vmatpush3.bf16.msra.mxu0 %v9107_v31  ;;  %v10614_v31 = vadd.s32 88, %v10400_v21 }
 0x25c   : > { %8317 = vmatprep.subr.bf16.mxu0 %v9109_v37 }
 0x25d   : > { %v10424_v24 = vpop.f32.mrb[4].mxu1 }
 0x25e   : > { %4027 = vmatmul.mubr.bf16.gmra.mrb[48].mxu0 %v13334_v47  ;;  %v10431_v39 = vpop.f32.mrb[5].mxu1  ;;  %v675_v47 = vrot.slane %v10264_v33, 2  ;;  %v990_v33 = vsub.s32 %v10400_v21, %v989_v53 }
 0x25f   : > { %4034 = vmatprep.mubr.bf16.mxu0 %v2554_v61  ;;  %v10437_v52 = vpop.f32.mrb[6].mxu1  ;;  %v2727_v61 = vor.u32 %v2726_v26, %v2723_v0  ;;  %v10540_v26 = vadd.s32 64, %v10400_v21  ;;  %8318 = vmatpush3.bf16.msra.mxu0 %v9109_v37 }
 0x260   : > { %v10446_v23 = vpop.f32.mrb[7].mxu1  ;;  %v676_v6 = vsel %vm13167_vm3, %v672_v15, %v675_v47  ;;  %v10514_v15 = vadd.s32 56, %v10400_v21  ;;  %vm1378_vm7 = vcmp.ne.s32.totalorder %v990_v33, 0  ;;  %vm1414_vm8 = vcmp.lt.s32.totalorder %v990_v33, 0  ;;  %8319 = vmatprep.subr.bf16.mxu0 %v9110_v32 }
 0x261   : > { %v2728_v17 = vsel %vm1673_vm1, %v2669_v7, %v2727_v61  ;;  %v2779_v56 = vshrl.u32 %v676_v6, 16  ;;  %v2782_v2 = vshll.u32 %v676_v6, 16  ;;  %v1486_v42 = vadd.s32 18, %v990_v33  ;;  %vm10531_vm11 = vmand %vm1414_vm8, %vm1378_vm7 }
 0x262   : > { %v10536_v7 = vmul.u32.u64.low 3817748708, %v10514_v15  ;;  %v10537_v0 = vmul.u32.u64.high 3817748708, %v10514_v15, %v10536_v7  ;;  %v2795_v20 = vsel %vm1673_vm1, %v2727_v61, %v2794_v49  ;;  %v10569_v47 = vadd.s32 72, %v10400_v21  ;;  %vm10587_vm7 = vmand %vm1416_vm14, %vm1380_vm13 }
 0x263   : > { %v2781_v45 = vrot.slane %v2779_v56, 6  ;;  %v2784_v48 = vrot.slane %v2782_v2, 7  ;;  %v10565_v14 = vmul.u32.u64.low 3817748708, %v10540_v26  ;;  %v10566_v62 = vmul.u32.u64.high 3817748708, %v10540_v26, %v10565_v14  ;;  %8320 = vmatpush3.bf16.msra.mxu0 %v9110_v32 }
 0x264   : > { %v1065_v6 = vshrl.u32 %v10537_v0, 4  ;;  %v10600_v57 = vmul.u32.u64.low 3817748708, %v10569_v47  ;;  %v10601_v30 = vmul.u32.u64.high 3817748708, %v10569_v47, %v10600_v57  ;;  %v4986_v32 = vrot.slane %v13276_v12, 6 }
 0x265   : > { %v2785_v9 = vor.u32 %v2784_v48, %v2781_v45  ;;  %v1076_v7 = vshrl.u32 %v10566_v62, 4  ;;  %v10711_v57 = vadd.s32 112, %v10400_v21 }
 0x266   : > { %4035 = vmatmul.mubr.bf16.gmra.mrb[52].mxu0 %v10199_v46  ;;  %v10461_v46 = vadd.s32 24, %v10400_v21 }
 0x267   : > { %4042 = vmatprep.mubr.bf16.mxu0 %v2612_v13  ;;  %v10510_v36 = vmul.u32.u64.low 3817748708, %v10485_v22  ;;  %v10511_v13 = vmul.u32.u64.high 3817748708, %v10485_v22, %v10510_v36  ;;  %v2786_v49 = vsel %vm1673_vm1, %v10247_v58, %v2785_v9  ;;  %v1066_v58 = vmul.u32 18, %v1065_v6 }
 0x268   : > { %v10472_v35 = vmul.u32.u64.low 3817748708, %v10461_v46  ;;  %v10473_v25 = vmul.u32.u64.high 3817748708, %v10461_v46, %v10472_v35  ;;  %v10680_v9 = vadd.s32 96, %v10400_v21  ;;  %v10703_v6 = vadd.s32 104, %v10400_v21 }
 0x269   : > { %v1043_v53 = vshrl.u32 %v10511_v13, 4  ;;  %v10611_v13 = vrot.slane %v13276_v12, 1  ;;  %v10670_v14 = vsub.s32 %v10514_v15, %v1066_v58  ;;  %v10725_v58 = vadd.s32 120, %v10400_v21 }
 0x26a   : > { %v1021_v5 = vshrl.u32 %v10473_v25, 4  ;;  %v1032_v25 = vshrl.u32 %v10503_v3, 4  ;;  %v10604_v3 = vadd.s32 80, %v10400_v21 }
 0x26b   : > { %v1044_v40 = vmul.u32 18, %v1043_v53  ;;  %v4997_v53 = vshll.u32 %v10611_v13, 16 }
 0x26e   : > { %4043 = vmatmul.mubr.bf16.gmra.mrb[56].mxu0 %v10228_v51  ;;  %v10487_v51 = vpop.f32.mrb[8].mxu1 }
 0x26f   : > { %4050 = vmatprep.mubr.bf16.mxu0 %v2670_v16  ;;  %v10491_v19 = vpop.f32.mrb[9].mxu1  ;;  %v1522_v16 = vsel %vm10531_vm11, %v1486_v42, %v990_v33  ;;  %v4987_v33 = vrot.slane %v13276_v12, 7 }
 0x270   : > { %v10499_v27 = vpop.f32.mrb[10].mxu1  ;;  %vm10579_vm15 = vcmp.lt.s32.totalorder %v1522_v16, 16  ;;  %v10660_v16 = vmul.u32.u64.low 3817748708, %v10614_v31  ;;  %v10661_v35 = vmul.u32.u64.high 3817748708, %v10614_v31, %v10660_v16 }
 0x271   : > { %v10516_v1 = vpop.f32.mrb[11].mxu1  ;;  %v10632_v38 = vsel %vm10579_vm15, 1.0, %v13163_v60  ;;  %v10750_v16 = vadd.s32 128, %v10400_v21 }
 0x276   : > { %4051 = vmatmul.mubr.bf16.gmra.mrb[60].mxu0 %v10234_v10  ;;  %v1022_v10 = vmul.u32 18, %v1021_v5  ;;  %v1524_v5 = vsel %vm10587_vm7, %v1488_v4, %v10525_v18  ;;  %v1055_v18 = vmul.u32 18, %v1054_v29 }
 0x277   : > { %4058 = vmatprep.mubr.bf16.mxu0 %v2728_v17 }
 0x278   : > { %v10561_v61 = vsub.s32 %v10461_v46, %v1022_v10  ;;  %v1523_v46 = vsel %vm10553_vm12, %v1487_v8, %v10497_v50  ;;  %v10635_v10 = vsub.s32 %v10485_v22, %v1044_v40  ;;  %vm10645_vm12 = vcmp.lt.s32.totalorder %v1524_v5, 16 }
 0x279   : > { %vm10595_vm10 = vcmp.lt.s32.totalorder %v1523_v46, 16  ;;  %v4994_v8 = vshrl.u32 %v10611_v13, 16  ;;  %v10675_v62 = vsel %vm10645_vm12, 1.0, %v13163_v60  ;;  %v4999_v40 = vrot.slane %v4997_v53, 7 }
 0x27a   : > { %vm1381_vm8 = vcmp.ne.s32.totalorder %v10561_v61, 0  ;;  %vm1417_vm9 = vcmp.lt.s32.totalorder %v10561_v61, 0  ;;  %v1489_v36 = vadd.s32 18, %v10561_v61  ;;  %vm1383_vm15 = vcmp.ne.s32.totalorder %v10635_v10, 0 }
 0x27b   : > { %vm10622_vm11 = vmand %vm1417_vm9, %vm1381_vm8  ;;  %vm1419_vm7 = vcmp.lt.s32.totalorder %v10635_v10, 0  ;;  %v1491_v15 = vadd.s32 18, %v10635_v10  ;;  %v4996_v17 = vrot.slane %v4994_v8, 6  ;;  %v10841_v53 = vadd.s32 144, %v10400_v21 }
 0x27c   : > { %v10616_v56 = vpop.f32.mrb[12].mxu1  ;;  %v1525_v48 = vsel %vm10622_vm11, %v1489_v36, %v10561_v61  ;;  %v1077_v61 = vmul.u32 18, %v1076_v7 }
 0x27d   : > { %13345 = vst [vmem:[#allocation38_spill] sm:$0xff] %v10616_v56  ;;  %v10627_v34 = vpop.f32.mrb[13].mxu1  ;;  %vm10688_vm9 = vcmp.lt.s32.totalorder %v1525_v48, 16  ;;  %v10746_v48 = vmul.u32.u64.low 3817748708, %v10711_v57  ;;  %v10747_v8 = vmul.u32.u64.high 3817748708, %v10711_v57, %v10746_v48 }
 0x27e   : > { %4059 = vmatmul.mubr.bf16.gmra.mrb[64].mxu0 %v10254_v63  ;;  %v1033_v63 = vmul.u32 18, %v1032_v25  ;;  %v10638_v0 = vpop.f32.mrb[14].mxu1  ;;  %v10664_v25 = vsub.s32 %v10506_v44, %v1055_v18  ;;  %v1087_v44 = vshrl.u32 %v10601_v30, 4  ;;  %v10708_v50 = vsub.s32 %v10540_v26, %v1077_v61 }
 0x27f   : > { %4066 = vmatprep.mubr.bf16.mxu0 %v2795_v20  ;;  %13348 = vst [vmem:[#allocation7_spill] sm:$0xff] %v10638_v0  ;;  %v10650_v20 = vmul.u32.u64.low 3817748708, %v10604_v3  ;;  %v10651_v45 = vmul.u32.u64.high 3817748708, %v10604_v3, %v10650_v20  ;;  %v10653_v22 = vpop.f32.mrb[15].mxu1  ;;  %v1109_v26 = vshrl.u32 %v10661_v35, 4  ;;  %v10753_v35 = vadd.s32 136, %v10400_v21 }
 0x280   : > { %v1034_v42 = vsub.s32 %v10479_v43, %v1033_v63  ;;  %v10643_v43 = vsel %vm10595_vm10, 1.0, %v13163_v60  ;;  %13351 = vst [vmem:[#allocation40_spill] sm:$0xff] %v10653_v22  ;;  %vm10696_vm10 = vmand %vm1419_vm7, %vm1383_vm15  ;;  %vm1384_vm11 = vcmp.ne.s32.totalorder %v10664_v25, 0  ;;  %vm1420_vm12 = vcmp.lt.s32.totalorder %v10664_v25, 0 }
 0x281   : > { %v1088_v30 = vmul.u32 18, %v1087_v44  ;;  %v1098_v5 = vshrl.u32 %v10651_v45, 4  ;;  %v1527_v18 = vsel %vm10696_vm10, %v1491_v15, %v10635_v10  ;;  %vm10729_vm15 = vmand %vm1420_vm12, %vm1384_vm11  ;;  %v1492_v37 = vadd.s32 18, %v10664_v25 }
 0x282   : > { %vm1382_vm13 = vcmp.ne.s32.totalorder %v1034_v42, 0  ;;  %vm1418_vm14 = vcmp.lt.s32.totalorder %v1034_v42, 0  ;;  %v1490_v4 = vadd.s32 18, %v1034_v42  ;;  %v1493_v20 = vadd.s32 18, %v10670_v14 }
 0x283   : > { %vm10682_vm8 = vmand %vm1418_vm14, %vm1382_vm13  ;;  %vm1385_vm13 = vcmp.ne.s32.totalorder %v10670_v14, 0  ;;  %vm1421_vm14 = vcmp.lt.s32.totalorder %v10670_v14, 0  ;;  %vm1386_vm10 = vcmp.ne.s32.totalorder %v10708_v50, 0  ;;  %v1089_v61 = vsub.s32 %v10569_v47, %v1088_v30 }
 0x284   : > { %v1526_v2 = vsel %vm10682_vm8, %v1490_v4, %v1034_v42  ;;  %v10736_v42 = vmul.u32.u64.low 3817748708, %v10703_v6  ;;  %v10737_v45 = vmul.u32.u64.high 3817748708, %v10703_v6, %v10736_v42  ;;  %vm10741_vm7 = vmand %vm1421_vm14, %vm1385_vm13  ;;  %v1099_v44 = vmul.u32 18, %v1098_v5 }
 0x285   : > { %vm10755_vm8 = vcmp.lt.s32.totalorder %v1526_v2, 16  ;;  %vm1422_vm11 = vcmp.lt.s32.totalorder %v10708_v50, 0  ;;  %v1110_v46 = vmul.u32 18, %v1109_v26  ;;  %vm10768_vm12 = vcmp.lt.s32.totalorder %v1527_v18, 16 }
 0x286   : > { %4067 = vmatmul.mubr.bf16.gmra.mrb[68].mxu0 %v2786_v49  ;;  %v10715_v36 = vmul.u32.u64.low 3817748708, %v10680_v9  ;;  %v10716_v49 = vmul.u32.u64.high 3817748708, %v10680_v9, %v10715_v36  ;;  %v10763_v4 = vmul.u32.u64.low 3817748708, %v10725_v58  ;;  %v10764_v15 = vmul.u32.u64.high 3817748708, %v10725_v58, %v10763_v4  ;;  %vm10793_vm13 = vmand %vm1422_vm11, %vm1386_vm10 }
 0x287   : > { %v1528_v2 = vsel %vm10729_vm15, %v1492_v37, %v10664_v25  ;;  %v1529_v47 = vsel %vm10741_vm7, %v1493_v20, %v10670_v14  ;;  %v1494_v30 = vadd.s32 18, %v10708_v50  ;;  %vm1387_vm14 = vcmp.ne.s32.totalorder %v1089_v61, 0 }
 0x288   : > { %v10782_v26 = vmul.u32.u64.low 3817748708, %v10750_v16  ;;  %v10783_v42 = vmul.u32.u64.high 3817748708, %v10750_v16, %v10782_v26  ;;  %v10788_v48 = vmul.u32.u64.low 3817748708, %v10753_v35  ;;  %v10789_v4 = vmul.u32.u64.high 3817748708, %v10753_v35, %v10788_v48 }
 0x289   : > { %v10766_v29 = vpop.f32.mrb[16].mxu1  ;;  %vm1423_vm15 = vcmp.lt.s32.totalorder %v1089_v61, 0  ;;  %v1100_v14 = vsub.s32 %v10604_v3, %v1099_v44  ;;  %v1120_v7 = vshrl.u32 %v10716_v49, 4  ;;  %v10804_v20 = vsel %vm10688_vm9, 1.0, %v13163_v60 }
 0x28a   : > { %13364 = vst [vmem:[#allocation10_spill] sm:$0xff] %v10766_v29  ;;  %v10779_v5 = vpop.f32.mrb[17].mxu1  ;;  %v10806_v10 = vor.u32 %v4999_v40, %v4996_v17  ;;  %v10808_v26 = vor.u32 %v4987_v33, %v4986_v32  ;;  %v1111_v48 = vsub.s32 %v10614_v31, %v1110_v46  ;;  %v10814_v28 = vsel %vm10755_vm8, 1.0, %v13163_v60  ;;  %vm10835_vm8 = vmand %vm1423_vm15, %vm1387_vm14 }
 0x28b   : > { %13367 = vst [vmem:[#allocation41_spill] sm:$0xff] %v10779_v5  ;;  %v10785_v18 = vpop.f32.mrb[18].mxu1  ;;  %v10819_v3 = vsel %vm10768_vm12, 1.0, %v13163_v60  ;;  %v1495_v49 = vadd.s32 18, %v1089_v61  ;;  %v1131_v63 = vshrl.u32 %v10737_v45, 4  ;;  %vm10822_vm9 = vcmp.lt.s32.totalorder %v1528_v2, 16 }
 0x28c   : > { %13368 = vst [vmem:[#allocation42_spill] sm:$0xff] %v10785_v18  ;;  %v10799_v37 = vpop.f32.mrb[19].mxu1  ;;  %vm10826_vm7 = vcmp.lt.s32.totalorder %v1529_v47, 16  ;;  %v1530_v31 = vsel %vm10793_vm13, %v1494_v30, %v10708_v50  ;;  %v1142_v40 = vshrl.u32 %v10747_v8, 4  ;;  %vm1388_vm10 = vcmp.ne.s32.totalorder %v1100_v14, 0 }
 0x28d   : > { %13371 = vst [vmem:[#allocation20_spill] sm:$0xff] %v10799_v37  ;;  %vm1424_vm11 = vcmp.lt.s32.totalorder %v1100_v14, 0  ;;  %v1121_v45 = vmul.u32 18, %v1120_v7  ;;  %vm1389_vm12 = vcmp.ne.s32.totalorder %v1111_v48, 0  ;;  %vm1425_vm6 = vcmp.lt.s32.totalorder %v1111_v48, 0 }
 0x28e   : > { %v1153_v44 = vshrl.u32 %v10764_v15, 4  ;;  %v10845_v50 = vadd.s32 152, %v10400_v21  ;;  %v1531_v46 = vsel %vm10835_vm8, %v1495_v49, %v1089_v61  ;;  %v1496_v36 = vadd.s32 18, %v1100_v14  ;;  %vm10852_vm13 = vmand %vm1424_vm11, %vm1388_vm10 }
 0x28f   : > { %v1132_v2 = vmul.u32 18, %v1131_v63  ;;  %v10850_v8 = vadd.s32 160, %v10400_v21  ;;  %v1497_v30 = vadd.s32 18, %v1111_v48  ;;  %v1143_v25 = vmul.u32 18, %v1142_v40  ;;  %vm10862_vm15 = vmand %vm1425_vm6, %vm1389_vm12 }
 0x290   : > { %v1164_v7 = vshrl.u32 %v10783_v42, 4  ;;  %v1175_v15 = vshrl.u32 %v10789_v4, 4  ;;  %vm10858_vm14 = vcmp.lt.s32.totalorder %v1530_v31, 16  ;;  %v1122_v49 = vsub.s32 %v10680_v9, %v1121_v45 }
 0x291   : > { %v10868_v63 = vmul.u32.u64.low 3817748708, %v10841_v53  ;;  %v10869_v33 = vmul.u32.u64.high 3817748708, %v10841_v53, %v10868_v63  ;;  %vm10871_vm8 = vcmp.lt.s32.totalorder %v1531_v46, 16  ;;  %v1154_v42 = vmul.u32 18, %v1153_v44 }
 0x292   : > { %v10876_v4 = vmul.u32.u64.low 3817748708, %v10845_v50  ;;  %v10877_v31 = vmul.u32.u64.high 3817748708, %v10845_v50, %v10876_v4  ;;  %v1532_v41 = vsel %vm10852_vm13, %v1496_v36, %v1100_v14  ;;  %v10882_v18 = vsub.s32 %v10703_v6, %v1132_v2 }
 0x293   : > { %v10885_v9 = vmul.u32.u64.low 3817748708, %v10850_v8  ;;  %v10886_v45 = vmul.u32.u64.high 3817748708, %v10850_v8, %v10885_v9  ;;  %v1533_v46 = vsel %vm10862_vm15, %v1497_v30, %v1111_v48  ;;  %v10891_v63 = vsub.s32 %v10711_v57, %v1143_v25 }
 0x294   : > { %v1165_v44 = vmul.u32 18, %v1164_v7  ;;  %v1176_v29 = vmul.u32 18, %v1175_v15  ;;  %v13386_v37 = vmov 0.0   ;;  %vm1390_vm6 = vcmp.ne.s32.totalorder %v1122_v49, 0 }
 0x295   : > { %v10896_v47 = vsel %vm10822_vm9, 1.0, %v13386_v37  ;;  %vm1426_vm10 = vcmp.lt.s32.totalorder %v1122_v49, 0  ;;  %v10899_v6 = vadd.s32 168, %v10400_v21  ;;  %v10904_v14 = vsel %vm10826_vm7, 1.0, %v13386_v37 }
 0x296   : > { %v10909_v57 = vsel %vm10858_vm14, 1.0, %v13386_v37  ;;  %v10914_v48 = vsel %vm10871_vm8, 1.0, %v13386_v37  ;;  %v10917_v17 = vsub.s32 %v10725_v58, %v1154_v42  ;;  %vm10921_vm9 = vcmp.lt.s32.totalorder %v1532_v41, 16  ;;  %vm10935_vm13 = vmand %vm1426_vm10, %vm1390_vm6 }
 0x297   : > { %v10919_v36 = vpop.f32.mrb[20].mxu1  ;;  %vm10925_vm7 = vcmp.lt.s32.totalorder %v1533_v46, 16  ;;  %v1498_v60 = vadd.s32 18, %v1122_v49  ;;  %vm1391_vm11 = vcmp.ne.s32.totalorder %v10882_v18, 0  ;;  %vm1427_vm12 = vcmp.lt.s32.totalorder %v10882_v18, 0 }
 0x298   : > { %13387 = vst [vmem:[#allocation18_spill] sm:$0xff] %v10919_v36  ;;  %v10931_v30 = vpop.f32.mrb[21].mxu1  ;;  %vm1392_vm14 = vcmp.ne.s32.totalorder %v10891_v63, 0  ;;  %vm1428_vm15 = vcmp.lt.s32.totalorder %v10891_v63, 0  ;;  %v10942_v41 = vsub.s32 %v10750_v16, %v1165_v44  ;;  %v10945_v25 = vsub.s32 %v10753_v35, %v1176_v29  ;;  %vm10971_vm10 = vmand %vm1427_vm12, %vm1391_vm11 }
 0x299   : > { %13392 = vst [vmem:[#allocation14_spill] sm:$0xff] %v10931_v30  ;;  %v10947_v7 = vpop.f32.mrb[22].mxu1  ;;  %v1186_v15 = vshrl.u32 %v10869_v33, 4  ;;  %v10951_v61 = vmul.u32.u64.low 3817748708, %v10899_v6  ;;  %v10952_v40 = vmul.u32.u64.high 3817748708, %v10899_v6, %v10951_v61  ;;  %v10957_v4 = vadd.s32 176, %v10400_v21  ;;  %vm10982_vm4 = vmand %vm1428_vm15, %vm1392_vm14 }
 0x29a   : > { %13395 = vst [vmem:[#allocation17_spill] sm:$0xff] %v10947_v7  ;;  %v10954_v42 = vpop.f32.mrb[23].mxu1  ;;  %vm1393_vm8 = vcmp.ne.s32.totalorder %v10917_v17, 0  ;;  %vm1429_vm6 = vcmp.lt.s32.totalorder %v10917_v17, 0  ;;  %v1197_v16 = vshrl.u32 %v10877_v31, 4  ;;  %v10963_v35 = vadd.s32 184, %v10400_v21 }
 0x29b   : > { %13396 = vst [vmem:[#allocation15_spill] sm:$0xff] %v10954_v42  ;;  %v1534_v29 = vsel %vm10935_vm13, %v1498_v60, %v1122_v49  ;;  %v1499_v9 = vadd.s32 18, %v10882_v18  ;;  %v1500_v46 = vadd.s32 18, %v10891_v63  ;;  %v1208_v31 = vshrl.u32 %v10886_v45, 4  ;;  %vm10990_vm3 = vmand %vm1429_vm6, %vm1393_vm8 }
 0x29c   : > { %v1501_v44 = vadd.s32 18, %v10917_v17  ;;  %vm1394_vm11 = vcmp.ne.s32.totalorder %v10942_v41, 0  ;;  %vm1430_vm12 = vcmp.lt.s32.totalorder %v10942_v41, 0  ;;  %vm1395_vm13 = vcmp.ne.s32.totalorder %v10945_v25, 0 }
 0x29d   : > { %vm1431_vm2 = vcmp.lt.s32.totalorder %v10945_v25, 0  ;;  %v1187_v45 = vmul.u32 18, %v1186_v15  ;;  %v10996_v58 = vmul.u32.u64.low 3817748708, %v10957_v4  ;;  %v10997_v61 = vmul.u32.u64.high 3817748708, %v10957_v4, %v10996_v58  ;;  %vm11023_vm15 = vmand %vm1430_vm12, %vm1394_vm11 }
 0x29e   : > { %v1198_v7 = vmul.u32 18, %v1197_v16  ;;  %v11000_v36 = vmul.u32.u64.low 3817748708, %v10963_v35  ;;  %v11001_v42 = vmul.u32.u64.high 3817748708, %v10963_v35, %v11000_v36  ;;  %v11004_v30 = vadd.s32 192, %v10400_v21 }
 0x29f   : > { %vm11006_vm14 = vcmp.lt.s32.totalorder %v1534_v29, 16  ;;  %v1535_v15 = vsel %vm10971_vm10, %v1499_v9, %v10882_v18  ;;  %v1536_v58 = vsel %vm10982_vm4, %v1500_v46, %v10891_v63  ;;  %v1209_v16 = vmul.u32 18, %v1208_v31 }
 0x2a0   : > { %v1537_v36 = vsel %vm10990_vm3, %v1501_v44, %v10917_v17  ;;  %v1502_v33 = vadd.s32 18, %v10942_v41  ;;  %v1503_v18 = vadd.s32 18, %v10945_v25  ;;  %v11030_v9 = vadd.s32 200, %v10400_v21  ;;  %vm11036_vm3 = vmand %vm1431_vm2, %vm1395_vm13 }
 0x2a1   : > { %v11041_v17 = vsub.s32 %v10841_v53, %v1187_v45  ;;  %v1219_v46 = vshrl.u32 %v10952_v40, 4  ;;  %v11045_v31 = vmul.u32.u64.low 3817748708, %v11004_v30  ;;  %v11046_v49 = vmul.u32.u64.high 3817748708, %v11004_v30, %v11045_v31 }
 0x2a2   : > { %v11051_v44 = vsel %vm10921_vm9, 1.0, %v13386_v37  ;;  %v11056_v60 = vsel %vm10925_vm7, 1.0, %v13386_v37  ;;  %v11061_v53 = vsel %vm11006_vm14, 1.0, %v13386_v37  ;;  %v1199_v40 = vsub.s32 %v10845_v50, %v1198_v7 }
 0x2a3   : > { %13409 = vst [vmem:[#allocation26_spill] sm:$0xff] %v11061_v53  ;;  %vm11064_vm2 = vcmp.lt.s32.totalorder %v1535_v15, 16  ;;  %v11069_v2 = vsub.s32 %v10850_v8, %v1209_v16  ;;  %v11072_v31 = vmul.u32.u64.low 3817748708, %v11030_v9  ;;  %v11073_v0 = vmul.u32.u64.high 3817748708, %v11030_v9, %v11072_v31 }
 0x2a4   : > { %vm11075_vm4 = vcmp.lt.s32.totalorder %v1536_v58, 16  ;;  %vm11079_vm9 = vcmp.lt.s32.totalorder %v1537_v36, 16  ;;  %v1538_v50 = vsel %vm11023_vm15, %v1502_v33, %v10942_v41  ;;  %v1539_v8 = vsel %vm11036_vm3, %v1503_v18, %v10945_v25 }
 0x2a5   : > { %vm1396_vm7 = vcmp.ne.s32.totalorder %v11041_v17, 0  ;;  %vm1432_vm8 = vcmp.lt.s32.totalorder %v11041_v17, 0  ;;  %v1220_v7 = vmul.u32 18, %v1219_v46  ;;  %v1230_v15 = vshrl.u32 %v10997_v61, 4 }
 0x2a6   : > { %vm1397_vm6 = vcmp.ne.s32.totalorder %v1199_v40, 0  ;;  %vm1433_vm10 = vcmp.lt.s32.totalorder %v1199_v40, 0  ;;  %v1241_v58 = vshrl.u32 %v11001_v42, 4  ;;  %v11093_v16 = vpop.f32.mrb[24].mxu1  ;;  %v972_v36 = vadd.s32 208, %v10400_v21  ;;  %vm11103_vm13 = vmand %vm1432_vm8, %vm1396_vm7 }
 0x2a7   : > { %13416 = vst [vmem:[#allocation22_spill] sm:$0xff] %v11093_v16  ;;  %v1504_v41 = vadd.s32 18, %v11041_v17  ;;  %v1505_v29 = vadd.s32 18, %v1199_v40  ;;  %vm1398_vm11 = vcmp.ne.s32.totalorder %v11069_v2, 0  ;;  %vm1434_vm12 = vcmp.lt.s32.totalorder %v11069_v2, 0  ;;  %v11099_v25 = vpop.f32.mrb[25].mxu1  ;;  %vm11117_vm14 = vmand %vm1433_vm10, %vm1397_vm6 }
 0x2a8   : > { %13417 = vst [vmem:[#allocation31_spill] sm:$0xff] %v11099_v25  ;;  %v1252_v42 = vshrl.u32 %v11046_v49, 4  ;;  %v11108_v33 = vpop.f32.mrb[26].mxu1  ;;  %v11110_v18 = vmul.u32.u64.low 3817748708, %v972_v36  ;;  %v11111_v63 = vmul.u32.u64.high 3817748708, %v972_v36, %v11110_v18  ;;  %v11114_v46 = vadd.s32 216, %v10400_v21  ;;  %vm11135_vm15 = vmand %vm1434_vm12, %vm1398_vm11 }
 0x2a9   : > { %13420 = vst [vmem:[#allocation29_spill] sm:$0xff] %v11108_v33  ;;  %v1506_v16 = vadd.s32 18, %v11069_v2  ;;  %v11123_v25 = vsub.s32 %v10899_v6, %v1220_v7  ;;  %v1231_v56 = vmul.u32 18, %v1230_v15  ;;  %v1263_v49 = vshrl.u32 %v11073_v0, 4  ;;  %v11126_v33 = vpop.f32.mrb[27].mxu1 }
 0x2aa   : > { %13423 = vst [vmem:[#allocation25_spill] sm:$0xff] %v11126_v33  ;;  %v11131_v18 = vsel %vm11064_vm2, 1.0, %v13386_v37  ;;  %v1242_v22 = vmul.u32 18, %v1241_v58  ;;  %v11140_v6 = vmul.u32.u64.low 3817748708, %v11114_v46  ;;  %v11141_v7 = vmul.u32.u64.high 3817748708, %v11114_v46, %v11140_v6 }
 0x2ab   : > { %v11146_v0 = vsel %vm11075_vm4, 1.0, %v13386_v37  ;;  %v11151_v45 = vsel %vm11079_vm9, 1.0, %v13386_v37  ;;  %vm1574_vm3 = vcmp.lt.s32.totalorder %v1538_v50, 16  ;;  %vm1575_vm2 = vcmp.lt.s32.totalorder %v1539_v8, 16 }
 0x2ac   : > { %13426 = vst [vmem:[#allocation32_spill] sm:$0xff] %v11146_v0  ;;  %13427 = vst [vmem:[#allocation23_spill] sm:$0xff] %v11151_v45  ;;  %v1540_v15 = vsel %vm11103_vm13, %v1504_v41, %v11041_v17  ;;  %v1541_v58 = vsel %vm11117_vm14, %v1505_v29, %v1199_v40  ;;  %v1253_v6 = vmul.u32 18, %v1252_v42  ;;  %v1274_v33 = vshrl.u32 %v11111_v63, 4 }
 0x2ad   : > { %v1542_v32 = vsel %vm11135_vm15, %v1506_v16, %v11069_v2  ;;  %vm1399_vm4 = vcmp.ne.s32.totalorder %v11123_v25, 0  ;;  %vm1435_vm9 = vcmp.lt.s32.totalorder %v11123_v25, 0  ;;  %v1264_v5 = vmul.u32 18, %v1263_v49 }
 0x2ae   : > { %v11165_v50 = vsub.s32 %v10957_v4, %v1231_v56  ;;  %v11168_v17 = vsub.s32 %v10963_v35, %v1242_v22  ;;  %v1275_v8 = vmul.u32 18, %v1274_v33  ;;  %v974_v40 = vadd.s32 224, %v10400_v21  ;;  %vm11201_vm10 = vmand %vm1435_vm9, %vm1399_vm4 }
 0x2af   : > { %v11172_v41 = vsel %vm1574_vm3, 1.0, %v13386_v37  ;;  %v11175_v53 = vsel %vm1575_vm2, 1.0, %v13386_v37  ;;  %vm11177_vm7 = vcmp.lt.s32.totalorder %v1540_v15, 16  ;;  %v1285_v16 = vshrl.u32 %v11141_v7, 4 }
 0x2b0   : > { %13428 = vst [vmem:[#allocation28_spill] sm:$0xff] %v11172_v41  ;;  %13429 = vst [vmem:[#allocation35_spill] sm:$0xff] %v11175_v53  ;;  %vm11182_vm8 = vcmp.lt.s32.totalorder %v1541_v58, 16  ;;  %v1507_v22 = vadd.s32 18, %v11123_v25  ;;  %v11188_v4 = vsub.s32 %v11004_v30, %v1253_v6  ;;  %v11191_v35 = vadd.s32 232, %v10400_v21 }
 0x2b1   : > { %vm11193_vm6 = vcmp.lt.s32.totalorder %v1542_v32, 16  ;;  %v11206_v42 = vsub.s32 %v11030_v9, %v1264_v5  ;;  %v11208_v30 = vmul.u32.u64.low 3817748708, %v974_v40  ;;  %v11209_v33 = vmul.u32.u64.high 3817748708, %v974_v40, %v11208_v30 }
 0x2b2   : > { %vm1400_vm11 = vcmp.ne.s32.totalorder %v11165_v50, 0  ;;  %vm1436_vm12 = vcmp.lt.s32.totalorder %v11165_v50, 0  ;;  %vm1401_vm13 = vcmp.ne.s32.totalorder %v11168_v17, 0  ;;  %v11214_v63 = vsub.s32 %v972_v36, %v1275_v8 }
 0x2b3   : > { %vm1437_vm14 = vcmp.lt.s32.totalorder %v11168_v17, 0  ;;  %v1286_v31 = vmul.u32 18, %v1285_v16  ;;  %v11218_v49 = vmul.u32.u64.low 3817748708, %v11191_v35  ;;  %v11219_v7 = vmul.u32.u64.high 3817748708, %v11191_v35, %v11218_v49  ;;  %vm11227_vm2 = vmand %vm1436_vm12, %vm1400_vm11 }
 0x2b4   : > { %v1543_v9 = vsel %vm11201_vm10, %v1507_v22, %v11123_v25  ;;  %v1508_v15 = vadd.s32 18, %v11165_v50  ;;  %vm1402_vm15 = vcmp.ne.s32.totalorder %v11188_v4, 0  ;;  %vm1438_vm3 = vcmp.lt.s32.totalorder %v11188_v4, 0  ;;  %vm11237_vm10 = vmand %vm1437_vm14, %vm1401_vm13 }
 0x2b5   : > { %v1509_v58 = vadd.s32 18, %v11168_v17  ;;  %vm1403_vm4 = vcmp.ne.s32.totalorder %v11206_v42, 0  ;;  %vm1439_vm9 = vcmp.lt.s32.totalorder %v11206_v42, 0  ;;  %v1296_v6 = vshrl.u32 %v11209_v33, 4  ;;  %vm11247_vm5 = vmand %vm1438_vm3, %vm1402_vm15 }
 0x2b6   : > { %v1510_v32 = vadd.s32 18, %v11188_v4  ;;  %vm1404_vm11 = vcmp.ne.s32.totalorder %v11214_v63, 0  ;;  %vm1440_vm12 = vcmp.lt.s32.totalorder %v11214_v63, 0  ;;  %v976_v8 = vadd.s32 240, %v10400_v21  ;;  %vm11260_vm13 = vmand %vm1439_vm9, %vm1403_vm4 }
 0x2b7   : > { %v1511_v22 = vadd.s32 18, %v11206_v42  ;;  %v1512_v61 = vadd.s32 18, %v11214_v63  ;;  %v1287_v30 = vsub.s32 %v11114_v46, %v1286_v31  ;;  %v1297_v33 = vmul.u32 18, %v1296_v6  ;;  %vm11290_vm14 = vmand %vm1440_vm12, %vm1404_vm11 }
 0x2b8   : > { %v1307_v41 = vshrl.u32 %v11219_v7, 4  ;;  %v11267_v45 = vmul.u32.u64.low 3817748708, %v976_v8  ;;  %v11268_v0 = vmul.u32.u64.high 3817748708, %v976_v8, %v11267_v45  ;;  %v977_v46 = vadd.s32 248, %v10400_v21 }
 0x2b9   : > { %v11274_v31 = vsel %vm11177_vm7, 1.0, %v13386_v37  ;;  %v11279_v6 = vsel %vm11182_vm8, 1.0, %v13386_v37  ;;  %v1298_v2 = vsub.s32 %v974_v40, %v1297_v33  ;;  %vm1579_vm7 = vcmp.lt.s32.totalorder %v1543_v9, 16 }
 0x2ba   : > { %v11244_v5 = vpop.f32.mrb[28].mxu1  ;;  %13449 = vst [vmem:[#allocation44_spill] sm:$0xff] %v11279_v6  ;;  %v1544_v56 = vsel %vm11227_vm2, %v1508_v15, %v11165_v50  ;;  %v1546_v6 = vsel %vm11247_vm5, %v1510_v32, %v11188_v4  ;;  %vm1405_vm8 = vcmp.ne.s32.totalorder %v1287_v30, 0  ;;  %v1547_v40 = vsel %vm11260_vm13, %v1511_v22, %v11206_v42 }
 0x2bb   : > { %13442 = vst [vmem:[#allocation37_spill] sm:$0xff] %v11244_v5  ;;  %v11254_v49 = vpop.f32.mrb[29].mxu1  ;;  %v1548_v50 = vsel %vm11290_vm14, %v1512_v61, %v11214_v63  ;;  %v1308_v9 = vmul.u32 18, %v1307_v41  ;;  %v1318_v15 = vshrl.u32 %v11268_v0, 4  ;;  %v11316_v36 = vsel %vm1579_vm7, 1.0, %v13386_v37 }
 0x2bc   : > { %13445 = vst [vmem:[#allocation34_spill] sm:$0xff] %v11254_v49  ;;  %v11264_v53 = vpop.f32.mrb[30].mxu1  ;;  %v11299_v49 = vmul.u32.u64.low 3817748708, %v977_v46  ;;  %v11300_v29 = vmul.u32.u64.high 3817748708, %v977_v46, %v11299_v49  ;;  %vm11318_vm15 = vcmp.lt.s32.totalorder %v1544_v56, 16  ;;  %v1513_v4 = vadd.s32 18, %v1287_v30 }
 0x2bd   : > { %13448 = vst [vmem:[#allocation43_spill] sm:$0xff] %v11264_v53  ;;  %v11284_v53 = vsel %vm11193_vm6, 1.0, %v13386_v37  ;;  %v11294_v7 = vpop.f32.mrb[31].mxu1  ;;  %vm1441_vm6 = vcmp.lt.s32.totalorder %v1287_v30, 0  ;;  %vm1406_vm5 = vcmp.ne.s32.totalorder %v1298_v2, 0  ;;  %vm1442_vm2 = vcmp.lt.s32.totalorder %v1298_v2, 0 }
 0x2be   : > { %13450 = vst [vmem:[#allocation45_spill] sm:$0xff] %v11284_v53  ;;  %13453 = vst [vmem:[#allocation46_spill] sm:$0xff] %v11294_v7  ;;  %v1545_v53 = vsel %vm11237_vm10, %v1509_v58, %v11168_v17  ;;  %v1319_v42 = vmul.u32 18, %v1318_v15  ;;  %v1329_v63 = vshrl.u32 %v11300_v29, 4  ;;  %v978_v41 = vadd.s32 256, %v10400_v21 }
 0x2bf   : > { %vm11322_vm3 = vmand %vm1441_vm6, %vm1405_vm8  ;;  %vm1581_vm4 = vcmp.lt.s32.totalorder %v1545_v53, 16  ;;  %vm1582_vm9 = vcmp.lt.s32.totalorder %v1546_v6, 16  ;;  %vm1583_vm10 = vcmp.lt.s32.totalorder %v1547_v40, 16  ;;  %vm1584_vm11 = vcmp.lt.s32.totalorder %v1548_v50, 16 }
 0x2c0   : > { %v1514_v0 = vadd.s32 18, %v1298_v2  ;;  %v11329_v25 = vsub.s32 %v11191_v35, %v1308_v9  ;;  %v1330_v32 = vmul.u32 18, %v1329_v63  ;;  %v979_v5 = vadd.s32 264, %v10400_v21  ;;  %vm11335_vm12 = vmand %vm1442_vm2, %vm1406_vm5 }
 0x2c1   : > { %v1549_v16 = vsel %vm11322_vm3, %v1513_v4, %v1287_v30  ;;  %v11339_v61 = vsub.s32 %v976_v8, %v1319_v42  ;;  %v11341_v53 = vmul.u32.u64.low 3817748708, %v978_v41  ;;  %v11342_v33 = vmul.u32.u64.high 3817748708, %v978_v41, %v11341_v53  ;;  %v11360_v8 = vld [vmem:[%s13081_s2] ss:$0 sm:$0xff] }
 0x2c2   : > { %v11347_v35 = vsel %vm11318_vm15, 1.0, %v13386_v37  ;;  %v11350_v49 = vsel %vm1581_vm4, 1.0, %v13386_v37  ;;  %v11353_v30 = vsel %vm1582_vm9, 1.0, %v13386_v37  ;;  %v11355_v6 = vsub.s32 %v977_v46, %v1330_v32 }
 0x2c3   : > { %13460 = vst [vmem:[#allocation47_spill] sm:$0xff] %v11347_v35  ;;  %13461 = vst [vmem:[#allocation48_spill] sm:$0xff] %v11350_v49  ;;  %v11363_v45 = vsel %vm1583_vm10, 1.0, %v13386_v37  ;;  %v11366_v56 = vsel %vm1584_vm11, 1.0, %v13386_v37  ;;  %v11368_v29 = vmul.u32.u64.low 3817748708, %v979_v5  ;;  %v11369_v40 = vmul.u32.u64.high 3817748708, %v979_v5, %v11368_v29 }
 0x2c4   : > { %13462 = vst [vmem:[#allocation49_spill] sm:$0xff] %v11353_v30  ;;  %13463 = vst [vmem:[#allocation50_spill] sm:$0xff] %v11363_v45  ;;  %vm11371_vm13 = vcmp.lt.s32.totalorder %v1549_v16, 16  ;;  %v1550_v46 = vsel %vm11335_vm12, %v1514_v0, %v1298_v2  ;;  %vm1407_vm14 = vcmp.ne.s32.totalorder %v11329_v25, 0  ;;  %vm1443_vm7 = vcmp.lt.s32.totalorder %v11329_v25, 0 }
 0x2c5   : > { %13464 = vst [vmem:[#allocation51_spill] sm:$0xff] %v11366_v56  ;;  %v1515_v15 = vadd.s32 18, %v11329_v25  ;;  %vm1408_vm8 = vcmp.ne.s32.totalorder %v11339_v61, 0  ;;  %vm1444_vm6 = vcmp.lt.s32.totalorder %v11339_v61, 0  ;;  %v1340_v17 = vshrl.u32 %v11342_v33, 4  ;;  %vm11399_vm2 = vmand %vm1443_vm7, %vm1407_vm14 }
 0x2c6   : > { %vm1409_vm15 = vcmp.ne.s32.totalorder %v11355_v6, 0  ;;  %vm1445_vm5 = vcmp.lt.s32.totalorder %v11355_v6, 0  ;;  %v11389_v42 = vadd.s32 272, %v10400_v21  ;;  %vm11391_vm3 = vcmp.lt.s32.totalorder %v1550_v46, 16  ;;  %vm11413_vm4 = vmand %vm1444_vm6, %vm1408_vm8 }
 0x2c7   : > { %v1516_v16 = vadd.s32 18, %v11339_v61  ;;  %v1341_v22 = vmul.u32 18, %v1340_v17  ;;  %v1351_v33 = vshrl.u32 %v11369_v40, 4  ;;  %vm11425_vm9 = vmand %vm1445_vm5, %vm1409_vm15 }
 0x2c9   : > { %v1342_v40 = vsub.s32 %v978_v41, %v1341_v22  ;;  %v1551_v41 = vsel %vm11399_vm2, %v1515_v15, %v11329_v25  ;;  %v1552_v22 = vsel %vm11413_vm4, %v1516_v16, %v11339_v61  ;;  %v11461_v16 = vsel %vm11371_vm13, 1.0, %v13386_v37 }
 0x2ca   : > { %v11386_v2 = vpop.f32.mrb[32].mxu1  ;;  %vm1587_vm8 = vcmp.lt.s32.totalorder %v1551_v41, 16  ;;  %vm1588_vm13 = vcmp.lt.s32.totalorder %v1552_v22, 16 }
 0x2cb   : > { %13467 = vst [vmem:[#allocation52_spill] sm:$0xff] %v11386_v2  ;;  %v11404_v53 = vpop.f32.mrb[33].mxu1  ;;  %v1517_v2 = vadd.s32 18, %v11355_v6  ;;  %vm1410_vm10 = vcmp.ne.s32.totalorder %v1342_v40, 0  ;;  %vm1446_vm11 = vcmp.lt.s32.totalorder %v1342_v40, 0  ;;  %v1518_v30 = vadd.s32 18, %v1342_v40 }
 0x2cc   : > { %13472 = vst [vmem:[#allocation53_spill] sm:$0xff] %v11404_v53  ;;  %v11418_v17 = vpop.f32.mrb[34].mxu1  ;;  %v981_v53 = vadd.s32 280, %v10400_v21  ;;  %vm11448_vm12 = vmand %vm1446_vm11, %vm1410_vm10 }
 0x2cd   : > { %13475 = vst [vmem:[#allocation54_spill] sm:$0xff] %v11418_v17 }
 0x2ce   : > { %v11436_v21 = vmul.u32.u64.low 3817748708, %v981_v53  ;;  %v11437_v45 = vmul.u32.u64.high 3817748708, %v981_v53, %v11436_v21 }
 0x2d1   : > { %v3932_v9 = vpop.f32.mrb[0].mxu0 }
 0x2d2   : > { %v8425_v4 = vadd.f32 %v11360_v8, %v3932_v9  ;;  %v3934_v58 = vpop.f32.mrb[1].mxu0 }
 0x2d3   : > { %v3935_v63 = vpop.f32.mrb[2].mxu0 }
 0x2d4   : > { %v4110_v29 = vadd.f32 %v8425_v4, %v10393_v11  ;;  %v8426_v46 = vadd.f32 %v11360_v8, %v3935_v63  ;;  %v3937_v9 = vpop.f32.mrb[3].mxu0  ;;  %v1352_v4 = vmul.u32 18, %v1351_v33  ;;  %v11429_v63 = vpop.f32.mrb[35].mxu1 }
 0x2d5   : > { %v11432_v9 = vmul.u32.u64.low 3817748708, %v11389_v42  ;;  %v11433_v7 = vmul.u32.u64.high 3817748708, %v11389_v42, %v11432_v9 }
 0x2d6   : > { %v4252_v56 = vmax.f32 %v4110_v29, 0.0  ;;  %v4113_v17 = vadd.f32 %v8426_v46, %v10397_v59  ;;  %v1353_v49 = vsub.s32 %v979_v5, %v1352_v4  ;;  %v1553_v59 = vsel %vm11425_vm9, %v1517_v2, %v11355_v6 }
 0x2d7   : > { %v1554_v46 = vsel %vm11448_vm12, %v1518_v30, %v1342_v40  ;;  %v1362_v6 = vshrl.u32 %v11433_v7, 4  ;;  %vm1589_vm15 = vcmp.lt.s32.totalorder %v1553_v59, 16  ;;  %v11490_v9 = vsel %vm1588_vm13, 1.0, %v13386_v37 }
 0x2d8   : > { %v4253_v35 = vmax.f32 %v4113_v17, 0.0  ;;  %v4288_v29 = vmul.f32 %v10632_v38, %v4252_v56  ;;  %vm1411_vm14 = vcmp.ne.s32.totalorder %v1353_v49, 0  ;;  %vm1447_vm7 = vcmp.lt.s32.totalorder %v1353_v49, 0 }
 0x2d9   : > { %v3940_v5 = vpop.f32.mrb[4].mxu0  ;;  %v1519_v32 = vadd.s32 18, %v1353_v49  ;;  %v11466_v38 = vsel %vm11391_vm3, 1.0, %v13386_v37  ;;  %vm11468_vm6 = vmand %vm1447_vm7, %vm1411_vm14  ;;  %vm1590_vm5 = vcmp.lt.s32.totalorder %v1554_v46, 16  ;;  %v1363_v0 = vmul.u32 18, %v1362_v6 }
 0x2da   : > { %v4289_v25 = vmul.f32 %v10643_v43, %v4253_v35  ;;  %v8427_v61 = vadd.f32 %v11360_v8, %v3940_v5  ;;  %v3942_v15 = vpop.f32.mrb[5].mxu0  ;;  %v1373_v35 = vshrl.u32 %v11437_v45, 4  ;;  %v11484_v45 = vsel %vm1587_vm8, 1.0, %v13386_v37 }
 0x2db   : > { %v3943_v2 = vpop.f32.mrb[6].mxu0  ;;  %v11493_v21 = vsub.s32 %v11389_v42, %v1363_v0  ;;  %v11498_v59 = vsel %vm1589_vm15, 1.0, %v13386_v37  ;;  %v11501_v33 = vsel %vm1590_vm5, 1.0, %v13386_v37  ;;  %vm13489_vm14 = vcmask 1044480  }
 0x2dc   : > { %v11473_v30 = vpack.c.bf16 %v4289_v25, %v4288_v29  ;;  %v4118_v7 = vadd.f32 %v8427_v61, %v10388_v54  ;;  %v8428_v56 = vadd.f32 %v11360_v8, %v3943_v2  ;;  %v3945_v50 = vpop.f32.mrb[7].mxu0  ;;  %v1374_v58 = vmul.u32 18, %v1373_v35  ;;  %vm13494_vm8 = vmmov %vm13489_vm14 }
 0x2dd   : > { %v1555_v54 = vsel %vm11468_vm6, %v1519_v32, %v1353_v49  ;;  %vm1412_vm2 = vcmp.ne.s32.totalorder %v11493_v21, 0  ;;  %vm1448_vm4 = vcmp.lt.s32.totalorder %v11493_v21, 0  ;;  %v1520_v50 = vadd.s32 18, %v11493_v21  ;;  %vm13497_vm6 = vmmov %vm13494_vm8 }
 0x2de   : > { %v11478_v17 = vshll.u32 %v11473_v30, 16  ;;  %v11481_v11 = vshrl.u32 %v11473_v30, 16  ;;  %v4254_v40 = vmax.f32 %v4118_v7, 0.0  ;;  %v4121_v4 = vadd.f32 %v8428_v56, %v10395_v55  ;;  %vm11533_vm9 = vmand %vm1448_vm4, %vm1412_vm2 }
 0x2df   : > { %vm11504_vm3 = vcmp.lt.s32.totalorder %v1555_v54, 16  ;;  %v11508_v42 = vsub.s32 %v981_v53, %v1374_v58  ;;  %vm13502_vm13 = vmmov %vm13497_vm6 }
 0x2e0   : > { %v4404_v41 = vrot.slane %v11478_v17, 1  ;;  %v5121_v22 = vrot.slane %v11481_v11, 6  ;;  %v4255_v49 = vmax.f32 %v4121_v4, 0.0  ;;  %v5122_v55 = vrot.slane %v11478_v17, 7  ;;  %vm13508_vm15 = vmmov %vm13497_vm6 }
 0x2e1   : > { %v3948_v29 = vpop.f32.mrb[8].mxu0  ;;  %v4290_v15 = vmul.f32 %v10675_v62, %v4254_v40  ;;  %v11527_v62 = vsel %vm11504_vm3, 1.0, %v13386_v37  ;;  %vm1413_vm10 = vcmp.ne.s32.totalorder %v11508_v42, 0  ;;  %vm1449_vm11 = vcmp.lt.s32.totalorder %v11508_v42, 0  ;;  %vm13515_vm5 = vmmov %vm13497_vm6 }
 0x2e2   : > { %v8429_v46 = vadd.f32 %v11360_v8, %v3948_v29  ;;  %v3950_v25 = vpop.f32.mrb[9].mxu0  ;;  %v4405_v61 = vsel %vm346_vm0, %v10611_v13, %v4404_v41  ;;  %v4291_v32 = vmul.f32 %v10804_v20, %v4255_v49  ;;  %v11519_v56 = vor.u32 %v5122_v55, %v5121_v22  ;;  %vm11622_vm7 = vmand %vm1449_vm11, %vm1413_vm10 }
 0x2e3   : > { %v3951_v6 = vpop.f32.mrb[10].mxu0  ;;  %v5002_v2 = vshrl.u32 %v4405_v61, 16  ;;  %v5005_v43 = vshll.u32 %v4405_v61, 16  ;;  %v4408_v22 = vor.u32 %v11481_v11, %v4404_v41  ;;  %v1556_v61 = vsel %vm11533_vm9, %v1520_v50, %v11493_v21  ;;  %vm13521_vm3 = vmmov %vm13515_vm5 }
 0x2e4   : > { %v4126_v53 = vadd.f32 %v8429_v46, %v10431_v39  ;;  %v8430_v35 = vadd.f32 %v11360_v8, %v3951_v6  ;;  %v3953_v7 = vpop.f32.mrb[11].mxu0  ;;  %v11522_v0 = vpack.c.bf16 %v4291_v32, %v4290_v15  ;;  %v11557_v41 = vsel %vm1673_vm1, %v10808_v26, %v11519_v56  ;;  %vm13528_vm2 = vmmov %vm13521_vm3 }
 0x2e5   : > { %v5004_v58 = vrot.slane %v5002_v2, 6  ;;  %v5007_v54 = vrot.slane %v5005_v43, 7  ;;  %vm1592_vm12 = vcmp.lt.s32.totalorder %v1556_v61, 16  ;;  %vm13534_vm4 = vmmov %vm13528_vm2 }
 0x2e6   : > { %v4256_v40 = vmax.f32 %v4126_v53, 0.0  ;;  %v4129_v4 = vadd.f32 %v8430_v35, %v10446_v23  ;;  %v11541_v49 = vshll.u32 %v11522_v0, 16  ;;  %v11544_v29 = vshrl.u32 %v11522_v0, 16  ;;  %v9104_v23 = vld [vmem:[%s13082_s3 + $0x80] sm:$0xff]   ;;  %vm13541_vm9 = vmmov %vm13528_vm2 }
 0x2e7   : > { %v11546_v55 = vor.u32 %v5007_v54, %v5004_v58  ;;  %v4798_v5 = vrot.slane %v11522_v0, 3  ;;  %vm13547_vm10 = vmmov %vm13528_vm2 }
 0x2e8   : > { %13486 = vst [vmem:[#allocation55_spill] sm:$0xff] %v11541_v49  ;;  %v4292_v46 = vmul.f32 %v10814_v28, %v4256_v40  ;;  %v4257_v25 = vmax.f32 %v4129_v4, 0.0  ;;  %v4412_v28 = vrot.slane %v11541_v49, 1  ;;  %v5180_v7 = vrot.slane %v11544_v29, 6  ;;  %vm13550_vm11 = vmmov %vm13528_vm2 }
 0x2e9   : > { %v3956_v15 = vpop.f32.mrb[12].mxu0  ;;  %v5009_v32 = vsel %vm1673_vm1, %v10806_v10, %v11546_v55  ;;  %v5105_v6 = vshrl.u32 %v4798_v5, 16  ;;  %v5108_v2 = vshll.u32 %v4798_v5, 16  ;;  %v5181_v58 = vrot.slane %v11541_v49, 7 }
 0x2ea   : > { %v4293_v43 = vmul.f32 %v10819_v3, %v4257_v25  ;;  %v8431_v53 = vadd.f32 %v11360_v8, %v3956_v15  ;;  %v3958_v35 = vpop.f32.mrb[13].mxu0  ;;  %6711 = vmatprep.mubr.bf16.mxu1 %v5009_v32  ;;  %v4413_v50 = vsel %vm346_vm0, %v4408_v22, %v4412_v28 }
 0x2eb   : > { %v3959_v21 = vpop.f32.mrb[14].mxu0  ;;  %6712 = vmatmul.mubr.bf16.vlgmr.msra.gmra.mrb[36].mxu1 %v10808_v26  ;;  %v11572_v54 = vrot.slane %v5105_v6, 6  ;;  %v11574_v39 = vrot.slane %v5108_v2, 7  ;;  %v5126_v15 = vshrl.u32 %v4413_v50, 16  ;;  %v9108_v26 = vld [vmem:[%s13082_s3 + $0x88] sm:$0xff]   ;;  %v5129_v22 = vshll.u32 %v4413_v50, 16 }
 0x2ec   : > { %v11577_v3 = vpack.c.bf16 %v4293_v43, %v4292_v46  ;;  %v4134_v40 = vadd.f32 %v8431_v53, %v10424_v24  ;;  %v8432_v4 = vadd.f32 %v11360_v8, %v3959_v21  ;;  %v3961_v25 = vpop.f32.mrb[15].mxu0  ;;  %6857 = vmatpush1.bf16.msra.mxu1 %v9104_v23  ;;  %v11585_v32 = vor.u32 %v5181_v58, %v5180_v7 }
 0x2ed   : > { %6858 = vmatprep.subr.bf16.mxu1 %v13276_v12  ;;  %v11588_v46 = vadd.s32 18, %v11508_v42  ;;  %v4416_v2 = vor.u32 %v11544_v29, %v4412_v28  ;;  %v5128_v53 = vrot.slane %v5126_v15, 6  ;;  %v5131_v35 = vrot.slane %v5129_v22, 7 }
 0x2ee   : > { %v11591_v24 = vshll.u32 %v11577_v3, 16  ;;  %v4258_v6 = vmax.f32 %v4134_v40, 0.0  ;;  %v4137_v23 = vadd.f32 %v8432_v4, %v10437_v52  ;;  %v11596_v43 = vshrl.u32 %v11577_v3, 16  ;;  %v9111_v52 = vld [vmem:[%s13082_s3 + $0x90] sm:$0xff]  }
 0x2ef   : > { %v4799_v7 = vrot.slane %v11577_v3, 3  ;;  %v5111_v61 = vor.u32 %v11574_v39, %v11572_v54  ;;  %v11606_v28 = vsel %vm1592_vm12, 1.0, %v13386_v37  ;;  %v5132_v4 = vor.u32 %v5131_v35, %v5128_v53 }
 0x2f0   : > { %13487 = vst [vmem:[#allocation56_spill] sm:$0xff] %v11591_v24  ;;  %13488 = vst [vmem:[#allocation57_spill] sm:$0xff] %v11596_v43  ;;  %v4259_v58 = vmax.f32 %v4137_v23, 0.0  ;;  %6859 = vmatpush1.bf16.msra.mxu1 %v9108_v26  ;;  %v4420_v21 = vrot.slane %v11591_v24, 1  ;;  %v4294_v50 = vmul.f32 %v10896_v47, %v4258_v6  ;;  %v11613_v15 = vsel %vm1673_vm1, %v11519_v56, %v11585_v32 }
 0x2f1   : > { %v3964_v40 = vpop.f32.mrb[16].mxu0  ;;  %v4800_v25 = vsel %vm13489_vm14, %v4798_v5, %v4799_v7  ;;  %6860 = vmatprep.subr.bf16.mxu1 %v13276_v12  ;;  %v5133_v56 = vsel %vm1673_vm1, %v11546_v55, %v5132_v4  ;;  %v5239_v53 = vrot.slane %v11591_v24, 7  ;;  %v9112_v55 = vld [vmem:[%s13082_s3 + $0x98] sm:$0xff]   ;;  %v9113_v24 = vld [vmem:[%s13082_s3 + $0xa0] sm:$0xff]   ;;  %vm13556_vm14 = vmmov %vm13528_vm2 }
 0x2f2   : > { %v4295_v54 = vmul.f32 %v10904_v14, %v4259_v58  ;;  %v8433_v39 = vadd.f32 %v11360_v8, %v3964_v40  ;;  %v3966_v26 = vpop.f32.mrb[17].mxu0  ;;  %v5113_v22 = vshrl.u32 %v4800_v25, 16  ;;  %v5116_v23 = vshll.u32 %v4800_v25, 16  ;;  %6719 = vmatprep.mubr.bf16.mxu1 %v5133_v56 }
 0x2f3   : > { %v3967_v5 = vpop.f32.mrb[18].mxu0  ;;  %v4421_v6 = vsel %vm346_vm0, %v4416_v2, %v4420_v21  ;;  %v5238_v14 = vrot.slane %v11596_v43, 6  ;;  %6720 = vmatmul.mubr.bf16.gmra.mrb[40].mxu1 %v11557_v41 }
 0x2f4   : > { %v11631_v35 = vpack.c.bf16 %v4295_v54, %v4294_v50  ;;  %v4142_v58 = vadd.f32 %v8433_v39, %v10491_v19  ;;  %v8434_v40 = vadd.f32 %v11360_v8, %v3967_v5  ;;  %v3969_v25 = vpop.f32.mrb[19].mxu0  ;;  %v5115_v26 = vrot.slane %v5113_v22, 6  ;;  %6861 = vmatpush1.bf16.msra.mxu1 %v9111_v52 }
 0x2f5   : > { %v5118_v2 = vrot.slane %v5116_v23, 7  ;;  %v5185_v20 = vshrl.u32 %v4421_v6, 16  ;;  %v5188_v49 = vshll.u32 %v4421_v6, 16  ;;  %6862 = vmatprep.subr.bf16.mxu1 %v13276_v12  ;;  %v4424_v6 = vor.u32 %v11596_v43, %v4420_v21 }
 0x2f6   : > { %v11645_v50 = vshll.u32 %v11631_v35, 16  ;;  %v11648_v52 = vshrl.u32 %v11631_v35, 16  ;;  %v4260_v54 = vmax.f32 %v4142_v58, 0.0  ;;  %v4145_v39 = vadd.f32 %v8434_v40, %v10516_v1 }
 0x2f7   : > { %v5119_v41 = vor.u32 %v5118_v2, %v5115_v26  ;;  %v5187_v22 = vrot.slane %v5185_v20, 6  ;;  %v5190_v23 = vrot.slane %v5188_v49, 7  ;;  %v4801_v56 = vrot.slane %v11631_v35, 3 }
 0x2f8   : > { %13492 = vst [vmem:[#allocation58_spill] sm:$0xff] %v11645_v50  ;;  %13493 = vst [vmem:[#allocation59_spill] sm:$0xff] %v11648_v52  ;;  %v4261_v5 = vmax.f32 %v4145_v39, 0.0  ;;  %v4428_v25 = vrot.slane %v11645_v50, 1  ;;  %v11654_v19 = vor.u32 %v5239_v53, %v5238_v14  ;;  %6863 = vmatpush1.bf16.msra.mxu1 %v9112_v55  ;;  %v4296_v58 = vmul.f32 %v10909_v57, %v4260_v54 }
 0x2f9   : > { %v5120_v1 = vsel %vm1673_vm1, %v5111_v61, %v5119_v41  ;;  %v3972_v20 = vpop.f32.mrb[20].mxu0  ;;  %v5191_v49 = vor.u32 %v5190_v23, %v5187_v22  ;;  %v4802_v40 = vsel %vm13494_vm8, %v4799_v7, %v4801_v56  ;;  %6864 = vmatprep.subr.bf16.mxu1 %v13276_v12  ;;  %v5296_v61 = vrot.slane %v11648_v52, 6  ;;  %vm13561_vm8 = vmmov %vm13528_vm2 }
 0x2fa   : > { %v4297_v21 = vmul.f32 %v10914_v48, %v4261_v5  ;;  %8321 = vmatprep.mubr.bf16.mxu0 %v5120_v1  ;;  %v8435_v14 = vadd.f32 %v11360_v8, %v3972_v20  ;;  %v3974_v53 = vpop.f32.mrb[21].mxu0  ;;  %v5172_v26 = vshrl.u32 %v4802_v40, 16  ;;  %v5175_v55 = vshll.u32 %v4802_v40, 16 }
 0x2fb   : > { %v5192_v2 = vsel %vm1673_vm1, %v5132_v4, %v5191_v49  ;;  %v3975_v39 = vpop.f32.mrb[22].mxu0  ;;  %v4429_v57 = vsel %vm346_vm0, %v4424_v6, %v4428_v25  ;;  %v5297_v54 = vrot.slane %v11645_v50, 7  ;;  %v9114_v4 = vld [vmem:[%s13082_s3 + $0xa8] sm:$0xff]  }
 0x2fc   : > { %v11669_v7 = vpack.c.bf16 %v4297_v21, %v4296_v58  ;;  %v4150_v22 = vadd.f32 %v8435_v14, %v10487_v51  ;;  %6727 = vmatprep.mubr.bf16.mxu1 %v5192_v2  ;;  %v8436_v48 = vadd.f32 %v11360_v8, %v3975_v39  ;;  %v3977_v23 = vpop.f32.mrb[23].mxu0  ;;  %v5174_v5 = vrot.slane %v5172_v26, 6  ;;  %6865 = vmatpush1.bf16.msra.mxu1 %v9113_v24 }
 0x2fd   : > { %6728 = vmatmul.mubr.bf16.gmra.mrb[44].mxu1 %v11613_v15  ;;  %v5177_v6 = vrot.slane %v5175_v55, 7  ;;  %v5243_v1 = vshrl.u32 %v4429_v57, 16  ;;  %v5246_v20 = vshll.u32 %v4429_v57, 16  ;;  %v5241_v58 = vsel %vm1673_vm1, %v11585_v32, %v11654_v19  ;;  %6866 = vmatprep.subr.bf16.mxu1 %v13276_v12  ;;  %v9115_v57 = vld [vmem:[%s13082_s3 + $0xb0] sm:$0xff]  }
 0x2fe   : > { %v11682_v51 = vshll.u32 %v11669_v7, 16  ;;  %v11685_v24 = vshrl.u32 %v11669_v7, 16  ;;  %v4262_v40 = vmax.f32 %v4150_v22, 0.0  ;;  %v4153_v21 = vadd.f32 %v8436_v48, %v10499_v27 }
 0x2ff   : > { %v5178_v14 = vor.u32 %v5177_v6, %v5174_v5  ;;  %v5245_v15 = vrot.slane %v5243_v1, 6  ;;  %v5248_v53 = vrot.slane %v5246_v20, 7  ;;  %v4803_v26 = vrot.slane %v11669_v7, 3 }
 0x300   : > { %13495 = vst [vmem:[#allocation60_spill] sm:$0xff] %v11682_v51  ;;  %13496 = vst [vmem:[#allocation61_spill] sm:$0xff] %v11685_v24  ;;  %v4263_v55 = vmax.f32 %v4153_v21, 0.0  ;;  %v4432_v2 = vor.u32 %v11648_v52, %v4428_v25  ;;  %v4436_v32 = vrot.slane %v11682_v51, 1  ;;  %v11691_v39 = vor.u32 %v5297_v54, %v5296_v61  ;;  %6867 = vmatpush1.bf16.msra.mxu1 %v9114_v4 }
 0x301   : > { %v4298_v22 = vmul.f32 %v11051_v44, %v4262_v40  ;;  %v5179_v27 = vsel %vm1673_vm1, %v5119_v41, %v5178_v14  ;;  %v3980_v48 = vpop.f32.mrb[24].mxu0  ;;  %v5249_v23 = vor.u32 %v5248_v53, %v5245_v15  ;;  %v4804_v5 = vsel %vm13497_vm6, %v4801_v56, %v4803_v26  ;;  %6868 = vmatprep.subr.bf16.mxu1 %v13276_v12  ;;  %vm13564_vm6 = vmmov %vm13528_vm2 }
 0x302   : > { %v4299_v25 = vmul.f32 %v11056_v60, %v4263_v55  ;;  %8322 = vmatmul.mubr.bf16.vlgmr.msra.gmra.mrb[72].mxu0 %v5179_v27  ;;  %v8437_v61 = vadd.f32 %v11360_v8, %v3980_v48  ;;  %v3982_v54 = vpop.f32.mrb[25].mxu0  ;;  %v5230_v4 = vshrl.u32 %v4804_v5, 16  ;;  %v5233_v6 = vshll.u32 %v4804_v5, 16  ;;  %v13500_v5 = vld [vmem:[#allocation40_spill] sm:$0xff] }
 0x303   : > { %v5250_v1 = vsel %vm1673_vm1, %v5191_v49, %v5249_v23  ;;  %v3983_v20 = vpop.f32.mrb[26].mxu0  ;;  %v4437_v44 = vsel %vm346_vm0, %v4432_v2, %v4436_v32  ;;  %v5354_v41 = vrot.slane %v11685_v24, 6  ;;  %v5355_v40 = vrot.slane %v11682_v51, 7  ;;  %v9116_v49 = vld [vmem:[%s13082_s3 + $0xb8] sm:$0xff]  }
 0x304   : > { %v11706_v56 = vpack.c.bf16 %v4299_v25, %v4298_v22  ;;  %v4158_v21 = vadd.f32 %v8437_v61, %v10627_v34  ;;  %6735 = vmatprep.mubr.bf16.mxu1 %v5250_v1  ;;  %v8438_v60 = vadd.f32 %v11360_v8, %v3983_v20  ;;  %v3985_v15 = vpop.f32.mrb[27].mxu0  ;;  %v5232_v53 = vrot.slane %v5230_v4, 6  ;;  %6869 = vmatpush1.bf16.msra.mxu1 %v9115_v57 }
 0x305   : > { %6736 = vmatmul.mubr.bf16.gmra.mrb[48].mxu1 %v5241_v58  ;;  %v5235_v55 = vrot.slane %v5233_v6, 7  ;;  %v5301_v2 = vshrl.u32 %v4437_v44, 16  ;;  %v5304_v27 = vshll.u32 %v4437_v44, 16  ;;  %v5299_v22 = vsel %vm1673_vm1, %v11654_v19, %v11691_v39  ;;  %6870 = vmatprep.subr.bf16.mxu1 %v13276_v12  ;;  %v9117_v44 = vld [vmem:[%s13082_s3 + $0xc0] sm:$0xff]  }
 0x306   : > { %v11718_v34 = vshll.u32 %v11706_v56, 16  ;;  %v11721_v48 = vshrl.u32 %v11706_v56, 16  ;;  %v4264_v57 = vmax.f32 %v4158_v21, 0.0  ;;  %v4161_v25 = vadd.f32 %v8438_v60, %v13500_v5  ;;  %v13501_v21 = vld [vmem:[#allocation26_spill] sm:$0xff] }
 0x307   : > { %v5236_v61 = vor.u32 %v5235_v55, %v5232_v53  ;;  %v5303_v58 = vrot.slane %v5301_v2, 6  ;;  %v5306_v54 = vrot.slane %v5304_v27, 7  ;;  %v4805_v4 = vrot.slane %v11706_v56, 3 }
 0x308   : > { %13498 = vst [vmem:[#allocation62_spill] sm:$0xff] %v11718_v34  ;;  %13499 = vst [vmem:[#allocation63_spill] sm:$0xff] %v11721_v48  ;;  %v4265_v6 = vmax.f32 %v4161_v25, 0.0  ;;  %v4440_v1 = vor.u32 %v11685_v24, %v4436_v32  ;;  %v4444_v19 = vrot.slane %v11718_v34, 1  ;;  %v11727_v20 = vor.u32 %v5355_v40, %v5354_v41  ;;  %6871 = vmatpush1.bf16.msra.mxu1 %v9116_v49 }
 0x309   : > { %v4300_v15 = vmul.f32 %v13501_v21, %v4264_v57  ;;  %v5237_v60 = vsel %vm1673_vm1, %v5178_v14, %v5236_v61  ;;  %v3988_v53 = vpop.f32.mrb[28].mxu0  ;;  %v5307_v55 = vor.u32 %v5306_v54, %v5303_v58  ;;  %v4806_v2 = vsel %vm13502_vm13, %v4803_v26, %v4805_v4  ;;  %6872 = vmatprep.subr.bf16.mxu1 %v13276_v12  ;;  %v13503_v54 = vld [vmem:[#allocation38_spill] sm:$0xff]  ;;  %vm13565_vm13 = vmmov %vm13528_vm2 }
 0x30a   : > { %v4301_v32 = vmul.f32 %v11131_v18, %v4265_v6  ;;  %8325 = vmatprep.mubr.bf16.mxu0 %v5237_v60  ;;  %v8439_v41 = vadd.f32 %v11360_v8, %v3988_v53  ;;  %v3990_v40 = vpop.f32.mrb[29].mxu0  ;;  %v5288_v49 = vshrl.u32 %v4806_v2, 16  ;;  %v5291_v27 = vshll.u32 %v4806_v2, 16 }
 0x30b   : > { %v5308_v5 = vsel %vm1673_vm1, %v5249_v23, %v5307_v55  ;;  %v3991_v25 = vpop.f32.mrb[30].mxu0  ;;  %v4445_v57 = vsel %vm346_vm0, %v4440_v1, %v4444_v19  ;;  %v5412_v14 = vrot.slane %v11721_v48, 6  ;;  %v5413_v58 = vrot.slane %v11718_v34, 7  ;;  %v9118_v23 = vld [vmem:[%s13082_s3 + $0xc8] sm:$0xff]   ;;  %v13506_v40 = vld [vmem:[#allocation7_spill] sm:$0xff]  ;;  %v9119_v34 = vld [vmem:[%s13082_s3 + $0xd0] sm:$0xff]  }
 0x30c   : > { %v11742_v26 = vpack.c.bf16 %v4301_v32, %v4300_v15  ;;  %v4166_v21 = vadd.f32 %v8439_v41, %v13503_v54  ;;  %6743 = vmatprep.mubr.bf16.mxu1 %v5308_v5  ;;  %v8440_v18 = vadd.f32 %v11360_v8, %v3991_v25  ;;  %v3993_v6 = vpop.f32.mrb[31].mxu0  ;;  %v5290_v60 = vrot.slane %v5288_v49, 6  ;;  %6873 = vmatpush1.bf16.msra.mxu1 %v9117_v44 }
 0x30d   : > { %6744 = vmatmul.mubr.bf16.gmra.mrb[52].mxu1 %v5299_v22  ;;  %v5293_v1 = vrot.slane %v5291_v27, 7  ;;  %v5359_v53 = vshrl.u32 %v4445_v57, 16  ;;  %v5362_v2 = vshll.u32 %v4445_v57, 16  ;;  %v5357_v15 = vsel %vm1673_vm1, %v11691_v39, %v11727_v20  ;;  %6874 = vmatprep.subr.bf16.mxu1 %v13276_v12 }
 0x30e   : > { %v11754_v32 = vshll.u32 %v11742_v26, 16  ;;  %v11757_v41 = vshrl.u32 %v11742_v26, 16  ;;  %v4266_v44 = vmax.f32 %v4166_v21, 0.0  ;;  %v4169_v49 = vadd.f32 %v8440_v18, %v13506_v40  ;;  %v13507_v21 = vld [vmem:[#allocation32_spill] sm:$0xff] }
 0x30f   : > { %v5294_v5 = vor.u32 %v5293_v1, %v5290_v60  ;;  %v5361_v22 = vrot.slane %v5359_v53, 6  ;;  %v5364_v27 = vrot.slane %v5362_v2, 7  ;;  %v4807_v25 = vrot.slane %v11742_v26, 3 }
 0x310   : > { %13504 = vst [vmem:[#allocation40_spill] sm:$0xff] %v11754_v32  ;;  %13505 = vst [vmem:[#allocation26_spill] sm:$0xff] %v11757_v41  ;;  %v4267_v57 = vmax.f32 %v4169_v49, 0.0  ;;  %v4448_v54 = vor.u32 %v11721_v48, %v4444_v19  ;;  %v4452_v39 = vrot.slane %v11754_v32, 1  ;;  %v11763_v6 = vor.u32 %v5413_v58, %v5412_v14  ;;  %6875 = vmatpush1.bf16.msra.mxu1 %v9118_v23  ;;  %v13509_v19 = vld [vmem:[#allocation23_spill] sm:$0xff] }
 0x311   : > { %v4302_v51 = vmul.f32 %v13507_v21, %v4266_v44  ;;  %v5295_v18 = vsel %vm1673_vm1, %v5236_v61, %v5294_v5  ;;  %v3996_v60 = vpop.f32.mrb[32].mxu0  ;;  %v5365_v1 = vor.u32 %v5364_v27, %v5361_v22  ;;  %v4808_v53 = vsel %vm13508_vm15, %v4805_v4, %v4807_v25  ;;  %6876 = vmatprep.subr.bf16.mxu1 %v13276_v12  ;;  %v13510_v27 = vld [vmem:[#allocation41_spill] sm:$0xff] }
 0x312   : > { %v4303_v2 = vmul.f32 %v13509_v19, %v4267_v57  ;;  %8326 = vmatmul.mubr.bf16.gmra.mrb[76].mxu0 %v5295_v18  ;;  %v8441_v14 = vadd.f32 %v11360_v8, %v3996_v60  ;;  %v3998_v58 = vpop.f32.mrb[33].mxu0  ;;  %v5346_v23 = vshrl.u32 %v4808_v53, 16  ;;  %v5349_v40 = vshll.u32 %v4808_v53, 16 }
 0x313   : > { %v5366_v49 = vsel %vm1673_vm1, %v5307_v55, %v5365_v1  ;;  %v3999_v48 = vpop.f32.mrb[34].mxu0  ;;  %v4453_v44 = vsel %vm346_vm0, %v4448_v54, %v4452_v39  ;;  %v5470_v61 = vrot.slane %v11757_v41, 6  ;;  %v5471_v22 = vrot.slane %v11754_v32, 7  ;;  %v9120_v55 = vld [vmem:[%s13082_s3 + $0xd8] sm:$0xff]   ;;  %v9121_v32 = vld [vmem:[%s13082_s3 + $0xe0] sm:$0xff]  }
 0x314   : > { %v11778_v4 = vpack.c.bf16 %v4303_v2, %v4302_v51  ;;  %v4174_v21 = vadd.f32 %v8441_v14, %v13510_v27  ;;  %6751 = vmatprep.mubr.bf16.mxu1 %v5366_v49  ;;  %v8442_v57 = vadd.f32 %v11360_v8, %v3999_v48  ;;  %v4001_v18 = vpop.f32.mrb[35].mxu0  ;;  %v5348_v60 = vrot.slane %v5346_v23, 6  ;;  %6877 = vmatpush1.bf16.msra.mxu1 %v9119_v34  ;;  %v13513_v14 = vld [vmem:[#allocation20_spill] sm:$0xff] }
 0x315   : > { %6752 = vmatmul.mubr.bf16.gmra.mrb[56].mxu1 %v5357_v15  ;;  %v5351_v54 = vrot.slane %v5349_v40, 7  ;;  %v5417_v53 = vshrl.u32 %v4453_v44, 16  ;;  %v5420_v19 = vshll.u32 %v4453_v44, 16  ;;  %v5415_v51 = vsel %vm1673_vm1, %v11727_v20, %v11763_v6  ;;  %6878 = vmatprep.subr.bf16.mxu1 %v13276_v12 }
 0x316   : > { %v11790_v2 = vshll.u32 %v11778_v4, 16  ;;  %v11793_v48 = vshrl.u32 %v11778_v4, 16  ;;  %v4268_v34 = vmax.f32 %v4174_v21, 0.0  ;;  %v4177_v58 = vadd.f32 %v8442_v57, %v13513_v14  ;;  %v13514_v21 = vld [vmem:[#allocation28_spill] sm:$0xff] }
 0x317   : > { %v5352_v23 = vor.u32 %v5351_v54, %v5348_v60  ;;  %v5419_v15 = vrot.slane %v5417_v53, 6  ;;  %v5422_v40 = vrot.slane %v5420_v19, 7  ;;  %v4809_v49 = vrot.slane %v11778_v4, 3 }
 0x318   : > { %13511 = vst [vmem:[#allocation38_spill] sm:$0xff] %v11790_v2  ;;  %13512 = vst [vmem:[#allocation7_spill] sm:$0xff] %v11793_v48  ;;  %v4269_v44 = vmax.f32 %v4177_v58, 0.0  ;;  %v4456_v27 = vor.u32 %v11757_v41, %v4452_v39  ;;  %v4460_v20 = vrot.slane %v11790_v2, 1  ;;  %v11799_v18 = vor.u32 %v5471_v22, %v5470_v61  ;;  %6879 = vmatpush1.bf16.msra.mxu1 %v9120_v55  ;;  %v13516_v39 = vld [vmem:[#allocation35_spill] sm:$0xff] }
 0x319   : > { %v4304_v24 = vmul.f32 %v13514_v21, %v4268_v34  ;;  %v5353_v57 = vsel %vm1673_vm1, %v5294_v5, %v5352_v23  ;;  %v4004_v60 = vpop.f32.mrb[36].mxu0  ;;  %v5423_v54 = vor.u32 %v5422_v40, %v5419_v15  ;;  %v4810_v53 = vsel %vm13515_vm5, %v4807_v25, %v4809_v49  ;;  %6880 = vmatprep.subr.bf16.mxu1 %v13276_v12  ;;  %v13517_v40 = vld [vmem:[#allocation10_spill] sm:$0xff] }
 0x31a   : > { %v4305_v19 = vmul.f32 %v13516_v39, %v4269_v44  ;;  %8329 = vmatprep.mubr.bf16.mxu0 %v5353_v57  ;;  %v8443_v61 = vadd.f32 %v11360_v8, %v4004_v60  ;;  %v4006_v22 = vpop.f32.mrb[37].mxu0  ;;  %v5404_v55 = vshrl.u32 %v4810_v53, 16  ;;  %v5407_v14 = vshll.u32 %v4810_v53, 16 }
 0x31b   : > { %v5424_v58 = vsel %vm1673_vm1, %v5365_v1, %v5423_v54  ;;  %v4007_v41 = vpop.f32.mrb[38].mxu0  ;;  %v4461_v34 = vsel %vm346_vm0, %v4456_v27, %v4460_v20  ;;  %v5528_v5 = vrot.slane %v11793_v48, 6  ;;  %v5529_v15 = vrot.slane %v11790_v2, 7  ;;  %v9122_v1 = vld [vmem:[%s13082_s3 + $0xe8] sm:$0xff]   ;;  %v9123_v2 = vld [vmem:[%s13082_s3 + $0xf0] sm:$0xff]  }
 0x31c   : > { %v11814_v25 = vpack.c.bf16 %v4305_v19, %v4304_v24  ;;  %v4182_v21 = vadd.f32 %v8443_v61, %v13517_v40  ;;  %6759 = vmatprep.mubr.bf16.mxu1 %v5424_v58  ;;  %v8444_v44 = vadd.f32 %v11360_v8, %v4007_v41  ;;  %v4009_v57 = vpop.f32.mrb[39].mxu0  ;;  %v5406_v60 = vrot.slane %v5404_v55, 6  ;;  %6881 = vmatpush1.bf16.msra.mxu1 %v9121_v32  ;;  %v13520_v61 = vld [vmem:[#allocation42_spill] sm:$0xff] }
 0x31d   : > { %6760 = vmatmul.mubr.bf16.gmra.mrb[60].mxu1 %v5415_v51  ;;  %v5409_v27 = vrot.slane %v5407_v14, 7  ;;  %v5475_v53 = vshrl.u32 %v4461_v34, 16  ;;  %v5478_v39 = vshll.u32 %v4461_v34, 16  ;;  %v5473_v24 = vsel %vm1673_vm1, %v11763_v6, %v11799_v18  ;;  %6882 = vmatprep.subr.bf16.mxu1 %v13276_v12 }
 0x31e   : > { %v11826_v19 = vshll.u32 %v11814_v25, 16  ;;  %v11829_v41 = vshrl.u32 %v11814_v25, 16  ;;  %v4270_v32 = vmax.f32 %v4182_v21, 0.0  ;;  %v4185_v22 = vadd.f32 %v8444_v44, %v13520_v61 }
 0x31f   : > { %v5410_v55 = vor.u32 %v5409_v27, %v5406_v60  ;;  %v5477_v51 = vrot.slane %v5475_v53, 6  ;;  %v5480_v14 = vrot.slane %v5478_v39, 7  ;;  %v4811_v58 = vrot.slane %v11814_v25, 3 }
 0x320   : > { %13518 = vst [vmem:[#allocation32_spill] sm:$0xff] %v11826_v19  ;;  %13519 = vst [vmem:[#allocation23_spill] sm:$0xff] %v11829_v41  ;;  %v4271_v34 = vmax.f32 %v4185_v22, 0.0  ;;  %v4464_v40 = vor.u32 %v11793_v48, %v4460_v20  ;;  %v4468_v6 = vrot.slane %v11826_v19, 1  ;;  %v11835_v57 = vor.u32 %v5529_v15, %v5528_v5  ;;  %6883 = vmatpush1.bf16.msra.mxu1 %v9122_v1  ;;  %v13522_v20 = vld [vmem:[#allocation44_spill] sm:$0xff] }
 0x321   : > { %v4306_v21 = vmul.f32 %v11274_v31, %v4270_v32  ;;  %v5411_v44 = vsel %vm1673_vm1, %v5352_v23, %v5410_v55  ;;  %v4012_v60 = vpop.f32.mrb[40].mxu0  ;;  %v5481_v27 = vor.u32 %v5480_v14, %v5477_v51  ;;  %v4812_v53 = vsel %vm13521_vm3, %v4809_v49, %v4811_v58  ;;  %6884 = vmatprep.subr.bf16.mxu1 %v13276_v12  ;;  %v13523_v51 = vld [vmem:[#allocation14_spill] sm:$0xff] }
 0x322   : > { %v4307_v39 = vmul.f32 %v13522_v20, %v4271_v34  ;;  %8330 = vmatmul.mubr.bf16.gmra.mrb[80].mxu0 %v5411_v44  ;;  %v8445_v5 = vadd.f32 %v11360_v8, %v4012_v60  ;;  %v4014_v15 = vpop.f32.mrb[41].mxu0  ;;  %v5462_v1 = vshrl.u32 %v4812_v53, 16  ;;  %v5465_v61 = vshll.u32 %v4812_v53, 16 }
 0x323   : > { %v5482_v22 = vsel %vm1673_vm1, %v5423_v54, %v5481_v27  ;;  %v4015_v48 = vpop.f32.mrb[42].mxu0  ;;  %v4469_v31 = vsel %vm346_vm0, %v4464_v40, %v4468_v6  ;;  %v5586_v23 = vrot.slane %v11829_v41, 6  ;;  %v5587_v32 = vrot.slane %v11826_v19, 7  ;;  %v9124_v54 = vld [vmem:[%s13082_s3 + $0xf8] sm:$0xff]   ;;  %v13527_v19 = vld [vmem:[#allocation45_spill] sm:$0xff] }
 0x324   : > { %v11850_v49 = vpack.c.bf16 %v4307_v39, %v4306_v21  ;;  %v4190_v14 = vadd.f32 %v8445_v5, %v13523_v51  ;;  %6767 = vmatprep.mubr.bf16.mxu1 %v5482_v22  ;;  %v8446_v34 = vadd.f32 %v11360_v8, %v4015_v48  ;;  %v4017_v44 = vpop.f32.mrb[43].mxu0  ;;  %v5464_v60 = vrot.slane %v5462_v1, 6  ;;  %6885 = vmatpush1.bf16.msra.mxu1 %v9123_v2  ;;  %v13526_v5 = vld [vmem:[#allocation15_spill] sm:$0xff] }
 0x325   : > { %6768 = vmatmul.mubr.bf16.gmra.mrb[64].mxu1 %v5473_v24  ;;  %v5467_v40 = vrot.slane %v5465_v61, 7  ;;  %v5533_v53 = vshrl.u32 %v4469_v31, 16  ;;  %v5536_v20 = vshll.u32 %v4469_v31, 16  ;;  %v5531_v21 = vsel %vm1673_vm1, %v11799_v18, %v11835_v57  ;;  %6886 = vmatprep.subr.bf16.mxu1 %v13276_v12 }
 0x326   : > { %v11862_v39 = vshll.u32 %v11850_v49, 16  ;;  %v11865_v48 = vshrl.u32 %v11850_v49, 16  ;;  %v4272_v2 = vmax.f32 %v4190_v14, 0.0  ;;  %v4193_v15 = vadd.f32 %v8446_v34, %v13526_v5 }
 0x327   : > { %v5468_v1 = vor.u32 %v5467_v40, %v5464_v60  ;;  %v5535_v24 = vrot.slane %v5533_v53, 6  ;;  %v5538_v61 = vrot.slane %v5536_v20, 7  ;;  %v4813_v22 = vrot.slane %v11850_v49, 3 }
 0x328   : > { %13524 = vst [vmem:[#allocation41_spill] sm:$0xff] %v11862_v39  ;;  %13525 = vst [vmem:[#allocation20_spill] sm:$0xff] %v11865_v48  ;;  %v4273_v31 = vmax.f32 %v4193_v15, 0.0  ;;  %v4472_v51 = vor.u32 %v11829_v41, %v4468_v6  ;;  %v4476_v18 = vrot.slane %v11862_v39, 1  ;;  %v11871_v44 = vor.u32 %v5587_v32, %v5586_v23  ;;  %6887 = vmatpush1.bf16.msra.mxu1 %v9124_v54 }
 0x329   : > { %v4308_v50 = vmul.f32 %v13527_v19, %v4272_v2  ;;  %v5469_v52 = vsel %vm1673_vm1, %v5410_v55, %v5468_v1  ;;  %v4020_v14 = vpop.f32.mrb[44].mxu0  ;;  %v5539_v43 = vor.u32 %v5538_v61, %v5535_v24  ;;  %v4814_v34 = vsel %vm13528_vm2, %v4811_v58, %v4813_v22  ;;  %7033 = vmatprep.subr.bf16.mxu1 %v13276_v12  ;;  %v13529_v2 = vld [vmem:[#allocation18_spill] sm:$0xff] }
 0x32a   : > { %v4309_v60 = vmul.f32 %v11316_v36, %v4273_v31  ;;  %8333 = vmatprep.mubr.bf16.mxu0 %v5469_v52  ;;  %v8447_v6 = vadd.f32 %v11360_v8, %v4020_v14  ;;  %v4022_v40 = vpop.f32.mrb[45].mxu0  ;;  %v5520_v53 = vshrl.u32 %v4814_v34, 16  ;;  %v5523_v23 = vshll.u32 %v4814_v34, 16  ;;  %v13532_v34 = vld [vmem:[#allocation17_spill] sm:$0xff] }
 0x32b   : > { %v5540_v32 = vsel %vm1673_vm1, %v5481_v27, %v5539_v43  ;;  %v4023_v54 = vpop.f32.mrb[46].mxu0  ;;  %v4477_v19 = vsel %vm346_vm0, %v4472_v51, %v4476_v18  ;;  %v5644_v55 = vrot.slane %v11865_v48, 6  ;;  %v5645_v20 = vrot.slane %v11862_v39, 7 }
 0x32c   : > { %v11883_v58 = vpack.c.bf16 %v4309_v60, %v4308_v50  ;;  %v4198_v5 = vadd.f32 %v8447_v6, %v13529_v2  ;;  %6775 = vmatprep.mubr.bf16.mxu1 %v5540_v32  ;;  %v8448_v36 = vadd.f32 %v11360_v8, %v4023_v54  ;;  %v4025_v52 = vpop.f32.mrb[47].mxu0  ;;  %v5522_v15 = vrot.slane %v5520_v53, 6  ;;  %v13533_v54 = vld [vmem:[#allocation47_spill] sm:$0xff] }
 0x32d   : > { %6776 = vmatmul.mubr.bf16.gmra.mrb[68].mxu1 %v5531_v21  ;;  %v5525_v24 = vrot.slane %v5523_v23, 7  ;;  %v5591_v61 = vshrl.u32 %v4477_v19, 16  ;;  %v5594_v27 = vshll.u32 %v4477_v19, 16  ;;  %v5589_v31 = vsel %vm1673_vm1, %v11835_v57, %v11871_v44 }
 0x32e   : > { %v11891_v51 = vshll.u32 %v11883_v58, 16  ;;  %v11894_v50 = vshrl.u32 %v11883_v58, 16  ;;  %v4274_v14 = vmax.f32 %v4198_v5, 0.0  ;;  %v4201_v60 = vadd.f32 %v8448_v36, %v13532_v34 }
 0x32f   : > { %v5526_v8 = vor.u32 %v5525_v24, %v5522_v15  ;;  %v5593_v6 = vrot.slane %v5591_v61, 6  ;;  %v5596_v40 = vrot.slane %v5594_v27, 7  ;;  %v4815_v21 = vrot.slane %v11883_v58, 3  ;;  %v13535_v15 = vld [vmem:[#allocation48_spill] sm:$0xff]  ;;  %v11909_v61 = vld [vmem:[%s13081_s2] ss:$0 sm:$0xff] }
 0x330   : > { %13530 = vst [vmem:[#allocation28_spill] sm:$0xff] %v11891_v51  ;;  %13531 = vst [vmem:[#allocation35_spill] sm:$0xff] %v11894_v50  ;;  %v4275_v53 = vmax.f32 %v4201_v60, 0.0  ;;  %v4480_v23 = vor.u32 %v11865_v48, %v4476_v18  ;;  %v4484_v32 = vrot.slane %v11891_v51, 1  ;;  %v11900_v57 = vor.u32 %v5645_v20, %v5644_v55 }
 0x331   : > { %v4310_v19 = vmul.f32 %v13533_v54, %v4274_v14  ;;  %v5527_v2 = vsel %vm1673_vm1, %v5468_v1, %v5526_v8  ;;  %v4028_v52 = vpop.f32.mrb[48].mxu0  ;;  %v5597_v5 = vor.u32 %v5596_v40, %v5593_v6  ;;  %v4816_v36 = vsel %vm13534_vm4, %v4813_v22, %v4815_v21  ;;  %v13536_v40 = vld [vmem:[#allocation31_spill] sm:$0xff] }
 0x332   : > { %v4311_v24 = vmul.f32 %v13535_v15, %v4275_v53  ;;  %8334 = vmatmul.mubr.bf16.gmra.mrb[84].mxu0 %v5527_v2  ;;  %v8449_v18 = vadd.f32 %v11909_v61, %v4028_v52  ;;  %v4030_v55 = vpop.f32.mrb[49].mxu0  ;;  %v5578_v20 = vshrl.u32 %v4816_v36, 16  ;;  %v5581_v27 = vshll.u32 %v4816_v36, 16 }
 0x333   : > { %v5598_v14 = vsel %vm1673_vm1, %v5539_v43, %v5597_v5  ;;  %v4031_v1 = vpop.f32.mrb[50].mxu0  ;;  %v4485_v34 = vsel %vm346_vm0, %v4480_v23, %v4484_v32  ;;  %v5702_v22 = vrot.slane %v11894_v50, 6  ;;  %v5703_v60 = vrot.slane %v11891_v51, 7  ;;  %v13540_v51 = vld [vmem:[#allocation49_spill] sm:$0xff] }
 0x334   : > { %v11916_v6 = vpack.c.bf16 %v4311_v24, %v4310_v19  ;;  %v4206_v53 = vadd.f32 %v8449_v18, %v13536_v40  ;;  %6783 = vmatprep.mubr.bf16.mxu1 %v5598_v14  ;;  %v8450_v54 = vadd.f32 %v11909_v61, %v4031_v1  ;;  %v4033_v2 = vpop.f32.mrb[51].mxu0  ;;  %v5580_v52 = vrot.slane %v5578_v20, 6  ;;  %v13539_v18 = vld [vmem:[#allocation25_spill] sm:$0xff] }
 0x335   : > { %6784 = vmatmul.mubr.bf16.gmra.mrb[72].mxu1 %v5589_v31  ;;  %v5583_v36 = vrot.slane %v5581_v27, 7  ;;  %v5649_v15 = vshrl.u32 %v4485_v34, 16  ;;  %v5652_v43 = vshll.u32 %v4485_v34, 16  ;;  %v5647_v23 = vsel %vm1673_vm1, %v11871_v44, %v11900_v57 }
 0x336   : > { %v11924_v55 = vshll.u32 %v11916_v6, 16  ;;  %v11927_v19 = vshrl.u32 %v11916_v6, 16  ;;  %v4276_v24 = vmax.f32 %v4206_v53, 0.0  ;;  %v4209_v14 = vadd.f32 %v8450_v54, %v13539_v18 }
 0x337   : > { %v5584_v1 = vor.u32 %v5583_v36, %v5580_v52  ;;  %v5651_v40 = vrot.slane %v5649_v15, 6  ;;  %v5654_v20 = vrot.slane %v5652_v43, 7  ;;  %v4817_v31 = vrot.slane %v11916_v6, 3  ;;  %v13542_v52 = vld [vmem:[#allocation50_spill] sm:$0xff] }
 0x338   : > { %13537 = vst [vmem:[#allocation10_spill] sm:$0xff] %v11924_v55  ;;  %13538 = vst [vmem:[#allocation42_spill] sm:$0xff] %v11927_v19  ;;  %v4277_v27 = vmax.f32 %v4209_v14, 0.0  ;;  %v4488_v34 = vor.u32 %v11894_v50, %v4484_v32  ;;  %v4492_v2 = vrot.slane %v11924_v55, 1  ;;  %v11933_v44 = vor.u32 %v5703_v60, %v5702_v22 }
 0x339   : > { %v4312_v39 = vmul.f32 %v13540_v51, %v4276_v24  ;;  %v5585_v48 = vsel %vm1673_vm1, %v5526_v8, %v5584_v1  ;;  %v4036_v41 = vpop.f32.mrb[52].mxu0  ;;  %v5655_v53 = vor.u32 %v5654_v20, %v5651_v40  ;;  %v4818_v54 = vsel %vm13541_vm9, %v4815_v21, %v4817_v31  ;;  %v13543_v21 = vld [vmem:[#allocation22_spill] sm:$0xff] }
 0x33a   : > { %v4313_v36 = vmul.f32 %v13542_v52, %v4277_v27  ;;  %8337 = vmatprep.mubr.bf16.mxu0 %v5585_v48  ;;  %v8451_v15 = vadd.f32 %v11909_v61, %v4036_v41  ;;  %v4038_v43 = vpop.f32.mrb[53].mxu0  ;;  %v5636_v18 = vshrl.u32 %v4818_v54, 16  ;;  %v5639_v32 = vshll.u32 %v4818_v54, 16 }
 0x33b   : > { %v5656_v14 = vsel %vm1673_vm1, %v5597_v5, %v5655_v53  ;;  %v4039_v22 = vpop.f32.mrb[54].mxu0  ;;  %v4493_v60 = vsel %vm346_vm0, %v4488_v34, %v4492_v2  ;;  %v5760_v51 = vrot.slane %v11927_v19, 6  ;;  %v5761_v8 = vrot.slane %v11924_v55, 7 }
 0x33c   : > { %v11944_v24 = vpack.c.bf16 %v4313_v36, %v4312_v39  ;;  %v4214_v40 = vadd.f32 %v8451_v15, %v13543_v21  ;;  %6791 = vmatprep.mubr.bf16.mxu1 %v5656_v14  ;;  %v8452_v48 = vadd.f32 %v11909_v61, %v4039_v22  ;;  %v4041_v41 = vpop.f32.mrb[55].mxu0  ;;  %v5638_v20 = vrot.slane %v5636_v18, 6  ;;  %v13545_v36 = vld [vmem:[#allocation29_spill] sm:$0xff] }
 0x33d   : > { %6792 = vmatmul.mubr.bf16.gmra.mrb[76].mxu1 %v5647_v23  ;;  %v5641_v27 = vrot.slane %v5639_v32, 7  ;;  %v5707_v54 = vshrl.u32 %v4493_v60, 16  ;;  %v5710_v5 = vshll.u32 %v4493_v60, 16  ;;  %v4496_v52 = vor.u32 %v11927_v19, %v4492_v2  ;;  %v13546_v23 = vld [vmem:[#allocation51_spill] sm:$0xff] }
 0x33e   : > { %v11950_v34 = vshll.u32 %v11944_v24, 16  ;;  %v11953_v43 = vshrl.u32 %v11944_v24, 16  ;;  %v4278_v39 = vmax.f32 %v4214_v40, 0.0  ;;  %v4217_v15 = vadd.f32 %v8452_v48, %v13545_v36 }
 0x33f   : > { %v5642_v14 = vor.u32 %v5641_v27, %v5638_v20  ;;  %v5709_v21 = vrot.slane %v5707_v54, 6  ;;  %v5712_v22 = vrot.slane %v5710_v5, 7  ;;  %v4819_v18 = vrot.slane %v11944_v24, 3 }
 0x340   : > { %13544 = vst [vmem:[#allocation44_spill] sm:$0xff] %v11950_v34  ;;  %v4314_v32 = vmul.f32 %v13546_v23, %v4278_v39  ;;  %v4279_v41 = vmax.f32 %v4217_v15, 0.0  ;;  %v4500_v60 = vrot.slane %v11950_v34, 1  ;;  %v5818_v2 = vrot.slane %v11953_v43, 6  ;;  %v13548_v23 = vld [vmem:[#allocation34_spill] sm:$0xff] }
 0x341   : > { %v5643_v55 = vsel %vm1673_vm1, %v5584_v1, %v5642_v14  ;;  %v4044_v19 = vpop.f32.mrb[56].mxu0  ;;  %v5713_v50 = vor.u32 %v5712_v22, %v5709_v21  ;;  %v4820_v40 = vsel %vm13547_vm10, %v4817_v31, %v4819_v18  ;;  %v5819_v48 = vrot.slane %v11950_v34, 7 }
 0x342   : > { %v4315_v20 = vmul.f32 %v11461_v16, %v4279_v41  ;;  %8338 = vmatmul.mubr.bf16.gmra.mrb[88].mxu0 %v5643_v55  ;;  %v8453_v27 = vadd.f32 %v11909_v61, %v4044_v19  ;;  %v4046_v54 = vpop.f32.mrb[57].mxu0  ;;  %v5694_v5 = vshrl.u32 %v4820_v40, 16  ;;  %v5697_v39 = vshll.u32 %v4820_v40, 16 }
 0x343   : > { %v5714_v36 = vsel %vm1673_vm1, %v5655_v53, %v5713_v50  ;;  %v4047_v15 = vpop.f32.mrb[58].mxu0  ;;  %v5705_v1 = vsel %vm1673_vm1, %v11900_v57, %v11933_v44  ;;  %v4501_v21 = vsel %vm346_vm0, %v4496_v52, %v4500_v60  ;;  %v5762_v31 = vor.u32 %v5761_v8, %v5760_v51  ;;  %v13549_v52 = vld [vmem:[#allocation46_spill] sm:$0xff] }
 0x344   : > { %v11970_v22 = vpack.c.bf16 %v4315_v20, %v4314_v32  ;;  %v4222_v16 = vadd.f32 %v8453_v27, %v13548_v23  ;;  %6799 = vmatprep.mubr.bf16.mxu1 %v5714_v36  ;;  %v8454_v55 = vadd.f32 %v11909_v61, %v4047_v15  ;;  %v4049_v19 = vpop.f32.mrb[59].mxu0  ;;  %v5696_v41 = vrot.slane %v5694_v5, 6 }
 0x345   : > { %6800 = vmatmul.mubr.bf16.gmra.mrb[80].mxu1 %v5705_v1  ;;  %v5699_v40 = vrot.slane %v5697_v39, 7  ;;  %v5765_v53 = vshrl.u32 %v4501_v21, 16  ;;  %v5768_v54 = vshll.u32 %v4501_v21, 16  ;;  %v11974_v34 = vor.u32 %v5819_v48, %v5818_v2 }
 0x346   : > { %v11977_v57 = vshll.u32 %v11970_v22, 16  ;;  %v11980_v51 = vshrl.u32 %v11970_v22, 16  ;;  %v4280_v8 = vmax.f32 %v4222_v16, 0.0  ;;  %v4225_v32 = vadd.f32 %v8454_v55, %v13549_v52 }
 0x347   : > { %v5700_v20 = vor.u32 %v5699_v40, %v5696_v41  ;;  %v5767_v27 = vrot.slane %v5765_v53, 6  ;;  %v5770_v36 = vrot.slane %v5768_v54, 7  ;;  %v4821_v5 = vrot.slane %v11970_v22, 3 }
 0x348   : > { %v4281_v15 = vmax.f32 %v4225_v32, 0.0  ;;  %v5763_v39 = vsel %vm1673_vm1, %v11933_v44, %v5762_v31  ;;  %v4504_v2 = vor.u32 %v11953_v43, %v4500_v60  ;;  %v4508_v48 = vrot.slane %v11977_v57, 1 }
 0x349   : > { %v4316_v1 = vmul.f32 %v11466_v38, %v4280_v8  ;;  %v5701_v21 = vsel %vm1673_vm1, %v5642_v14, %v5700_v20  ;;  %v4052_v23 = vpop.f32.mrb[60].mxu0  ;;  %v5771_v16 = vor.u32 %v5770_v36, %v5767_v27  ;;  %v4822_v55 = vsel %vm13550_vm11, %v4819_v18, %v4821_v5  ;;  %v13551_v18 = vld [vmem:[#allocation37_spill] sm:$0xff] }
 0x34a   : > { %v4317_v19 = vmul.f32 %v11484_v45, %v4281_v15  ;;  %8341 = vmatprep.mubr.bf16.mxu0 %v5701_v21  ;;  %v8455_v41 = vadd.f32 %v11909_v61, %v4052_v23  ;;  %v4054_v40 = vpop.f32.mrb[61].mxu0  ;;  %v5752_v53 = vshrl.u32 %v4822_v55, 16  ;;  %v5755_v44 = vshll.u32 %v4822_v55, 16  ;;  %v13552_v55 = vld [vmem:[#allocation43_spill] sm:$0xff] }
 0x34b   : > { %v5772_v60 = vsel %vm1673_vm1, %v5713_v50, %v5771_v16  ;;  %v4055_v54 = vpop.f32.mrb[62].mxu0  ;;  %v4509_v52 = vsel %vm346_vm0, %v4504_v2, %v4508_v48  ;;  %v5821_v38 = vsel %vm1673_vm1, %v5762_v31, %v11974_v34  ;;  %v5876_v14 = vrot.slane %v11980_v51, 6 }
 0x34c   : > { %v11998_v8 = vpack.c.bf16 %v4317_v19, %v4316_v1  ;;  %v4230_v45 = vadd.f32 %v8455_v41, %v13551_v18  ;;  %6807 = vmatprep.mubr.bf16.mxu1 %v5772_v60  ;;  %v8456_v32 = vadd.f32 %v11909_v61, %v4055_v54  ;;  %v4057_v27 = vpop.f32.mrb[63].mxu0  ;;  %v5754_v36 = vrot.slane %v5752_v53, 6 }
 0x34d   : > { %6808 = vmatmul.mubr.bf16.gmra.mrb[84].mxu1 %v5763_v39  ;;  %v5757_v15 = vrot.slane %v5755_v44, 7  ;;  %v5823_v50 = vshrl.u32 %v4509_v52, 16  ;;  %v5826_v21 = vshll.u32 %v4509_v52, 16  ;;  %v5877_v2 = vrot.slane %v11977_v57, 7 }
 0x34e   : > { %v12004_v23 = vshll.u32 %v11998_v8, 16  ;;  %v12007_v31 = vshrl.u32 %v11998_v8, 16  ;;  %v4282_v1 = vmax.f32 %v4230_v45, 0.0  ;;  %v4233_v19 = vadd.f32 %v8456_v32, %v13552_v55 }
 0x34f   : > { %v5758_v41 = vor.u32 %v5757_v15, %v5754_v36  ;;  %v5825_v40 = vrot.slane %v5823_v50, 6  ;;  %v5828_v60 = vrot.slane %v5826_v21, 7  ;;  %v4823_v53 = vrot.slane %v11998_v8, 3 }
 0x350   : > { %v4283_v39 = vmax.f32 %v4233_v19, 0.0  ;;  %v4512_v44 = vor.u32 %v11980_v51, %v4508_v48  ;;  %v4516_v54 = vrot.slane %v12004_v23, 1  ;;  %v13553_v52 = vsel %vm11622_vm7, %v11588_v46, %v11508_v42  ;;  %vm13558_vm7 = vmmov %vm13528_vm2 }
 0x351   : > { %vm12018_vm12 = vcmp.lt.s32.totalorder %v13553_v52, 16  ;;  %v4318_v45 = vmul.f32 %v11490_v9, %v4282_v1  ;;  %v5759_v32 = vsel %vm1673_vm1, %v5700_v20, %v5758_v41  ;;  %v4060_v27 = vpop.f32.mrb[64].mxu0  ;;  %v5829_v36 = vor.u32 %v5828_v60, %v5825_v40  ;;  %v13557_v40 = vld [vmem:[#allocation53_spill] sm:$0xff] }
 0x352   : > { %v4824_v15 = vsel %vm13556_vm14, %v4821_v5, %v4823_v53  ;;  %v4319_v48 = vmul.f32 %v11498_v59, %v4283_v39  ;;  %8342 = vmatmul.mubr.bf16.gmra.mrb[92].mxu0 %v5759_v32  ;;  %v8457_v47 = vadd.f32 %v11909_v61, %v4060_v27  ;;  %v4062_v50 = vpop.f32.mrb[65].mxu0  ;;  %v4517_v19 = vsel %vm346_vm0, %v4512_v44, %v4516_v54 }
 0x353   : > { %v5810_v21 = vshrl.u32 %v4824_v15, 16  ;;  %v5813_v42 = vshll.u32 %v4824_v15, 16  ;;  %v5830_v46 = vsel %vm1673_vm1, %v5771_v16, %v5829_v36  ;;  %v4063_v55 = vpop.f32.mrb[66].mxu0  ;;  %v5878_v9 = vor.u32 %v5877_v2, %v5876_v14 }
 0x354   : > { %v5934_v20 = vrot.slane %v12007_v31, 6  ;;  %v12030_v1 = vpack.c.bf16 %v4319_v48, %v4318_v45  ;;  %v4238_v5 = vadd.f32 %v8457_v47, %v13557_v40  ;;  %6815 = vmatprep.mubr.bf16.mxu1 %v5830_v46  ;;  %v8458_v59 = vadd.f32 %v11909_v61, %v4063_v55  ;;  %v4065_v60 = vpop.f32.mrb[67].mxu0 }
 0x355   : > { %v5812_v39 = vrot.slane %v5810_v21, 6  ;;  %6816 = vmatmul.mubr.bf16.gmra.mrb[88].mxu1 %v5821_v38  ;;  %v5815_v52 = vrot.slane %v5813_v42, 7  ;;  %v5881_v32 = vshrl.u32 %v4517_v19, 16  ;;  %v5884_v27 = vshll.u32 %v4517_v19, 16 }
 0x356   : > { %v5935_v16 = vrot.slane %v12004_v23, 7  ;;  %v12036_v44 = vshll.u32 %v12030_v1, 16  ;;  %v4284_v14 = vmax.f32 %v4238_v5, 0.0  ;;  %v4241_v2 = vadd.f32 %v8458_v59, %v11429_v63 }
 0x357   : > { %v4520_v45 = vor.u32 %v12007_v31, %v4516_v54  ;;  %v5816_v15 = vor.u32 %v5815_v52, %v5812_v39  ;;  %v5883_v48 = vrot.slane %v5881_v32, 6  ;;  %v5886_v47 = vrot.slane %v5884_v27, 7 }
 0x358   : > { %v4825_v50 = vrot.slane %v12030_v1, 3  ;;  %v12042_v38 = vshrl.u32 %v12030_v1, 16  ;;  %v4320_v21 = vmul.f32 %v11501_v33, %v4284_v14  ;;  %v4285_v42 = vmax.f32 %v4241_v2, 0.0 }
 0x359   : > { %v4524_v46 = vrot.slane %v12036_v44, 1  ;;  %v5817_v55 = vsel %vm1673_vm1, %v5758_v41, %v5816_v15  ;;  %v4068_v19 = vpop.f32.mrb[68].mxu0  ;;  %v5887_v40 = vor.u32 %v5886_v47, %v5883_v48  ;;  %v12048_v54 = vor.u32 %v5935_v16, %v5934_v20 }
 0x35a   : > { %v4826_v63 = vsel %vm13558_vm7, %v4823_v53, %v4825_v50  ;;  %v4321_v5 = vmul.f32 %v11527_v62, %v4285_v42  ;;  %8345 = vmatprep.mubr.bf16.mxu0 %v5817_v55  ;;  %v8459_v59 = vadd.f32 %v11909_v61, %v4068_v19  ;;  %v4070_v60 = vpop.f32.mrb[69].mxu0  ;;  %v8017_v41 = vsel %vm12018_vm12, 1.0, %v13386_v37  ;;  %v13559_v62 = vld [vmem:[#allocation52_spill] sm:$0xff]  ;;  %v13560_v55 = vld [vmem:[#allocation54_spill] sm:$0xff] }
 0x35b   : > { %v5868_v39 = vshrl.u32 %v4826_v63, 16  ;;  %v5871_v52 = vshll.u32 %v4826_v63, 16  ;;  %v5888_v33 = vsel %vm1673_vm1, %v5829_v36, %v5887_v40  ;;  %v4071_v32 = vpop.f32.mrb[70].mxu0  ;;  %v5879_v53 = vsel %vm1673_vm1, %v11974_v34, %v5878_v9 }
 0x35c   : > { %v4525_v20 = vsel %vm346_vm0, %v4520_v45, %v4524_v46  ;;  %v12059_v27 = vpack.c.bf16 %v4321_v5, %v4320_v21  ;;  %v4246_v16 = vadd.f32 %v8459_v59, %v13559_v62  ;;  %6823 = vmatprep.mubr.bf16.mxu1 %v5888_v33  ;;  %v8460_v14 = vadd.f32 %v11909_v61, %v4071_v32  ;;  %v4073_v2 = vpop.f32.mrb[71].mxu0 }
 0x35d   : > { %v5870_v48 = vrot.slane %v5868_v39, 6  ;;  %6824 = vmatmul.mubr.bf16.gmra.mrb[92].mxu1 %v5879_v53  ;;  %v5873_v36 = vrot.slane %v5871_v52, 7  ;;  %v5939_v47 = vshrl.u32 %v4525_v20, 16  ;;  %v5942_v18 = vshll.u32 %v4525_v20, 16 }
 0x35e   : > { %v5992_v37 = vrot.slane %v12042_v38, 6  ;;  %v12065_v42 = vshll.u32 %v12059_v27, 16  ;;  %v4286_v34 = vmax.f32 %v4246_v16, 0.0  ;;  %v5937_v45 = vsel %vm1673_vm1, %v5878_v9, %v12048_v54 }
 0x35f   : > { %v5993_v21 = vrot.slane %v12036_v44, 7  ;;  %v4249_v19 = vadd.f32 %v8460_v14, %v13560_v55  ;;  %v5874_v61 = vor.u32 %v5873_v36, %v5870_v48  ;;  %v5941_v63 = vrot.slane %v5939_v47, 6 }
 0x360   : > { %v5944_v5 = vrot.slane %v5942_v18, 7  ;;  %v12072_v59 = vshrl.u32 %v12059_v27, 16  ;;  %v4827_v60 = vrot.slane %v12059_v27, 3  ;;  %v4528_v39 = vor.u32 %v12042_v38, %v4524_v46 }
 0x361   : > { %v4532_v52 = vrot.slane %v12065_v42, 1  ;;  %v4322_v33 = vmul.f32 %v11606_v28, %v4286_v34  ;;  %v4287_v32 = vmax.f32 %v4249_v19, 0.0  ;;  %v5875_v9 = vsel %vm1673_vm1, %v5816_v15, %v5874_v61 }
 0x362   : > { %v5945_v53 = vor.u32 %v5944_v5, %v5941_v63  ;;  %8346 = vmatmul.mubr.bf16.gmra.mrb[96].mxu0 %v5875_v9  ;;  %v4828_v20 = vsel %vm13561_vm8, %v4825_v50, %v4827_v60  ;;  %v12081_v16 = vor.u32 %v5993_v21, %v5992_v37  ;;  %v12088_v37 = vrot.slane %v13276_v12, 3 }
 0x363   : > { %v4533_v62 = vsel %vm346_vm0, %v4528_v39, %v4532_v52  ;;  %v4536_v14 = vor.u32 %v12072_v59, %v4532_v52  ;;  %v4323_v2 = vmul.f32 %v8017_v41, %v4287_v32  ;;  %v5926_v48 = vshrl.u32 %v4828_v20, 16 }
 0x364   : > { %v5946_v46 = vsel %vm1673_vm1, %v5887_v40, %v5945_v53  ;;  %v5929_v36 = vshll.u32 %v4828_v20, 16  ;;  %v5997_v28 = vshrl.u32 %v4533_v62, 16  ;;  %v6000_v47 = vshll.u32 %v4533_v62, 16 }
 0x365   : > { %6831 = vmatprep.mubr.bf16.mxu1 %v5946_v46  ;;  %v6055_v18 = vshrl.u32 %v4536_v14, 16  ;;  %v6058_v15 = vshll.u32 %v4536_v14, 16  ;;  %v12085_v34 = vpack.c.bf16 %v4323_v2, %v4322_v33  ;;  %v5928_v50 = vrot.slane %v5926_v48, 6 }
 0x366   : > { %6832 = vmatmul.mubr.bf16.gmra.mrb[96].mxu1 %v5937_v45  ;;  %v5931_v55 = vrot.slane %v5929_v36, 7  ;;  %v5999_v21 = vrot.slane %v5997_v28, 6  ;;  %v6002_v19 = vrot.slane %v6000_v47, 7  ;;  %v5995_v5 = vsel %vm1673_vm1, %v12048_v54, %v12081_v16 }
 0x367   : > { %v6057_v41 = vrot.slane %v6055_v18, 6  ;;  %v6060_v63 = vrot.slane %v6058_v15, 7  ;;  %v4829_v39 = vrot.slane %v12085_v34, 3  ;;  %v13562_v52 = vrot.slane %v11473_v30, 1 }
 0x368   : > { %v5932_v40 = vor.u32 %v5931_v55, %v5928_v50  ;;  %vm13563_vm0 = vcmask 1046528   ;;  %v6003_v33 = vor.u32 %v6002_v19, %v5999_v21  ;;  %v4561_v9 = vrot.slane %v11522_v0, 1 }
 0x369   : > { %v4560_v45 = vsel %vm13563_vm0, %v10611_v13, %v13562_v52  ;;  %v6061_v32 = vor.u32 %v6060_v63, %v6057_v41  ;;  %v4830_v14 = vsel %vm13564_vm6, %v4827_v60, %v4829_v39  ;;  %v4832_v2 = vsel %vm13565_vm13, %v4829_v39, %v12088_v37  ;;  %vm13567_vm15 = vmmov %vm13563_vm0 }
 0x36a   : > { %v5019_v20 = vshrl.u32 %v4560_v45, 16  ;;  %v5933_v62 = vsel %vm1673_vm1, %v5874_v61, %v5932_v40  ;;  %v6050_v54 = vrot.slane %v12072_v59, 6  ;;  %v6004_v46 = vsel %vm1673_vm1, %v5945_v53, %v6003_v33  ;;  %vm13568_vm5 = vmmov %vm13563_vm0 }
 0x36b   : > { %8349 = vmatprep.mubr.bf16.mxu0 %v5933_v62  ;;  %v5984_v48 = vshrl.u32 %v4830_v14, 16  ;;  %v5987_v36 = vshll.u32 %v4830_v14, 16  ;;  %v6051_v13 = vrot.slane %v12065_v42, 7  ;;  %6839 = vmatprep.mubr.bf16.mxu1 %v6004_v46  ;;  %v6062_v28 = vsel %vm1673_vm1, %v6003_v33, %v6061_v32  ;;  %vm13569_vm3 = vmmov %vm13563_vm0 }
 0x36c   : > { %v6042_v47 = vshrl.u32 %v4832_v2, 16  ;;  %v6045_v18 = vshll.u32 %v4832_v2, 16  ;;  %v13566_v61 = vmov %v13562_v52  ;;  %v5021_v55 = vrot.slane %v5019_v20, 6  ;;  %vm13571_vm2 = vmmov %vm13563_vm0 }
 0x36d   : > { %v4562_v60 = vsel %vm13567_vm15, %v13566_v61, %v4561_v9  ;;  %v5986_v15 = vrot.slane %v5984_v48, 6  ;;  %v5989_v50 = vrot.slane %v5987_v36, 7  ;;  %v5022_v21 = vshll.u32 %v4560_v45, 16  ;;  %vm13572_vm4 = vmmov %vm13563_vm0 }
 0x36e   : > { %6840 = vmatmul.mubr.bf16.gmra.mrb[100].mxu1 %v5995_v5  ;;  %v6044_v19 = vrot.slane %v6042_v47, 6  ;;  %v6047_v53 = vrot.slane %v6045_v18, 7  ;;  %v5028_v41 = vshrl.u32 %v4562_v60, 16  ;;  %v5031_v63 = vshll.u32 %v4562_v60, 16  ;;  %vm13573_vm9 = vmmov %vm13563_vm0 }
 0x36f   : > { %6847 = vmatprep.mubr.bf16.mxu1 %v6062_v28  ;;  %v5990_v39 = vor.u32 %v5989_v50, %v5986_v15  ;;  %v5024_v52 = vrot.slane %v5022_v21, 7  ;;  %v6109_v33 = vshrl.u32 %v12088_v37, 16  ;;  %v6112_v32 = vshll.u32 %v12088_v37, 16  ;;  %vm13574_vm10 = vmmov %vm13563_vm0 }
 0x370   : > { %v6048_v62 = vor.u32 %v6047_v53, %v6044_v19  ;;  %v5030_v14 = vrot.slane %v5028_v41, 6  ;;  %v5033_v2 = vrot.slane %v5031_v63, 7  ;;  %v4563_v46 = vrot.slane %v11577_v3, 1  ;;  %vm13575_vm11 = vmmov %vm13563_vm0 }
 0x371   : > { %v5991_v20 = vsel %vm1673_vm1, %v5932_v40, %v5990_v39  ;;  %v6052_v45 = vor.u32 %v6051_v13, %v6050_v54  ;;  %v6111_v5 = vrot.slane %v6109_v33, 6  ;;  %v6114_v48 = vrot.slane %v6112_v32, 7  ;;  %vm13576_vm12 = vmmov %vm13563_vm0 }
 0x372   : > { %8350 = vmatmul.mubr.bf16.gmra.mrb[100].mxu0 %v5991_v20  ;;  %v6049_v36 = vsel %vm1673_vm1, %v5990_v39, %v6048_v62  ;;  %v5034_v28 = vor.u32 %v5033_v2, %v5030_v14  ;;  %v4564_v47 = vsel %vm13568_vm5, %v4561_v9, %v4563_v46  ;;  %v4565_v60 = vrot.slane %v11631_v35, 1  ;;  %v13570_v39 = vld [vmem:[#allocation3_spill] sm:$0xff]  ;;  %v9126_v14 = vld [vmem:[%s13082_s3 + $0x108] sm:$0xff]   ;;  %vm13577_vm14 = vmmov %vm13563_vm0 }
 0x373   : > { %8353 = vmatprep.mubr.bf16.mxu0 %v6049_v36  ;;  %v5135_v18 = vshrl.u32 %v4564_v47, 16  ;;  %v5138_v61 = vshll.u32 %v4564_v47, 16  ;;  %v5025_v15 = vor.u32 %v5024_v52, %v5021_v55  ;;  %v6053_v50 = vsel %vm1673_vm1, %v12081_v16, %v6052_v45  ;;  %v9125_v55 = vld [vmem:[%s13082_s3 + $0x100] sm:$0xff]   ;;  %vm13578_vm7 = vmmov %vm13563_vm0 }
 0x374   : > { %v6115_v21 = vor.u32 %v6114_v48, %v6111_v5  ;;  %v4566_v19 = vsel %vm13569_vm3, %v4563_v46, %v4565_v60  ;;  %v4567_v16 = vrot.slane %v11669_v7, 1  ;;  %v4569_v5 = vrot.slane %v11706_v56, 1  ;;  %vm13579_vm8 = vmmov %vm13563_vm0 }
 0x375   : > { %v5035_v40 = vsel %vm1673_vm1, %v5025_v15, %v5034_v28  ;;  %v5137_v54 = vrot.slane %v5135_v18, 6  ;;  %v5140_v13 = vrot.slane %v5138_v61, 7  ;;  %v5194_v41 = vshrl.u32 %v4566_v19, 16  ;;  %v9128_v18 = vld [vmem:[%s13082_s3 + $0x118] sm:$0xff]   ;;  %vm13580_vm6 = vmmov %vm13563_vm0 }
 0x376   : > { %6848 = vmatmul.mubr.bf16.gmra.mrb[104].mxu1 %v6053_v50  ;;  %v6116_v9 = vsel %vm1673_vm1, %v6048_v62, %v6115_v21  ;;  %v5197_v63 = vshll.u32 %v4566_v19, 16  ;;  %v5026_v52 = vsel %vm1673_vm1, %v10806_v10, %v5025_v15  ;;  %v4568_v2 = vsel %vm13571_vm2, %v4565_v60, %v4567_v16  ;;  %v9127_v10 = vld [vmem:[%s13082_s3 + $0x110] sm:$0xff]   ;;  %v9129_v21 = vld [vmem:[%s13082_s3 + $0x120] sm:$0xff]   ;;  %vm13583_vm13 = vmmov %vm13563_vm0 }
 0x377   : > { %6888 = vmatprep.mubr.bf16.mxu1 %v5035_v40  ;;  %v5141_v53 = vor.u32 %v5140_v13, %v5137_v54  ;;  %v5196_v32 = vrot.slane %v5194_v41, 6  ;;  %v5252_v20 = vshrl.u32 %v4568_v2, 16  ;;  %v5255_v45 = vshll.u32 %v4568_v2, 16  ;;  %vm13586_vm15 = vmmov %vm13563_vm0 }
 0x378   : > { %v5199_v62 = vrot.slane %v5197_v63, 7  ;;  %v4570_v47 = vsel %vm13572_vm4, %v4567_v16, %v4569_v5  ;;  %v4571_v50 = vrot.slane %v11742_v26, 1  ;;  %v4597_v41 = vrot.slane %v11478_v17, 2  ;;  %vm13589_vm5 = vmmov %vm13563_vm0 }
 0x379   : > { %v5142_v33 = vsel %vm1673_vm1, %v5034_v28, %v5141_v53  ;;  %v5254_v36 = vrot.slane %v5252_v20, 6  ;;  %v5257_v28 = vrot.slane %v5255_v45, 7  ;;  %v5310_v60 = vshrl.u32 %v4570_v47, 16 }
 0x37a   : > { %8354 = vmatmul.mubr.bf16.gmra.mrb[104].mxu0 %v6116_v9  ;;  %v5200_v46 = vor.u32 %v5199_v62, %v5196_v32  ;;  %v5313_v15 = vshll.u32 %v4570_v47, 16  ;;  %v4572_v19 = vsel %vm13573_vm9, %v4569_v5, %v4571_v50  ;;  %v9130_v9 = vld [vmem:[%s13082_s3 + $0x128] sm:$0xff]   ;;  %v4575_v45 = vrot.slane %v11814_v25, 1 }
 0x37b   : > { %8373 = vmatprep.mubr.bf16.mxu0 %v13570_v39  ;;  %v5258_v61 = vor.u32 %v5257_v28, %v5254_v36  ;;  %v5312_v54 = vrot.slane %v5310_v60, 6  ;;  %v5371_v16 = vshll.u32 %v4572_v19, 16  ;;  %v4573_v39 = vrot.slane %v11778_v4, 1  ;;  %v9134_v47 = vld [vmem:[%s13082_s3 + $0x148] sm:$0xff]  }
 0x37c   : > { %v5201_v48 = vsel %vm1673_vm1, %v5141_v53, %v5200_v46  ;;  %v5315_v13 = vrot.slane %v5313_v15, 7  ;;  %v4596_v53 = vrot.slane %v11481_v11, 1  ;;  %v4577_v15 = vrot.slane %v11850_v49, 1 }
 0x37d   : > { %v5373_v62 = vrot.slane %v5371_v16, 7  ;;  %v4574_v17 = vsel %vm13574_vm10, %v4571_v50, %v4573_v39  ;;  %v4576_v28 = vsel %vm13575_vm11, %v4573_v39, %v4575_v45  ;;  %v9135_v50 = vld [vmem:[%s13082_s3 + $0x150] sm:$0xff]   ;;  %vm13593_vm3 = vcmask 1045504  }
 0x37e   : > { %6889 = vmatmul.mubr.bf16.vlgmr.msra.gmra.mrb[36].mxu1 %v5026_v52  ;;  %v5316_v63 = vor.u32 %v5315_v13, %v5312_v54  ;;  %v9131_v52 = vld [vmem:[%s13082_s3 + $0x130] sm:$0xff]   ;;  %v5429_v20 = vshll.u32 %v4574_v17, 16  ;;  %v5487_v60 = vshll.u32 %v4576_v28, 16  ;;  %v4578_v13 = vsel %vm13576_vm12, %v4575_v45, %v4577_v15  ;;  %vm13602_vm4 = vmmov %vm13593_vm3 }
 0x37f   : > { %6896 = vmatprep.mubr.bf16.mxu1 %v5142_v33  ;;  %7034 = vmatpush1.bf16.msra.mxu1 %v9125_v55  ;;  %v5368_v55 = vshrl.u32 %v4572_v19, 16  ;;  %v9136_v19 = vld [vmem:[%s13082_s3 + $0x158] sm:$0xff]   ;;  %vm13601_vm2 = vsmask.f32 6400  ;;  %vm13603_vm9 = vmmov %vm13593_vm3 }
 0x380   : > { %7035 = vmatprep.subr.bf16.mxu1 %v13276_v12  ;;  %v5317_v32 = vsel %vm1673_vm1, %v5258_v61, %v5316_v63  ;;  %v5431_v36 = vrot.slane %v5429_v20, 7  ;;  %v5489_v54 = vrot.slane %v5487_v60, 7  ;;  %vm13604_vm10 = vmmov %vm13601_vm2 }
 0x381   : > { %v5370_v11 = vrot.slane %v5368_v55, 6  ;;  %v9137_v55 = vld [vmem:[%s13082_s3 + $0x160] sm:$0xff]   ;;  %vm13613_vm11 = vmmov %vm13601_vm2 }
 0x382   : > { %vm13618_vm12 = vmmov %vm13593_vm3 }
 0x383   : > { %7036 = vmatpush1.bf16.msra.mxu1 %v9126_v14  ;;  %v9132_v14 = vld [vmem:[%s13082_s3 + $0x138] sm:$0xff]   ;;  %v5374_v2 = vor.u32 %v5373_v62, %v5370_v11  ;;  %v9138_v11 = vld [vmem:[%s13082_s3 + $0x168] sm:$0xff]  }
 0x384   : > { %7037 = vmatprep.subr.bf16.mxu1 %v13276_v12 }
 0x385   : > { %v5375_v5 = vsel %vm1673_vm1, %v5316_v63, %v5374_v2  ;;  %v4579_v63 = vrot.slane %v11883_v58, 1 }
 0x386   : > { %6897 = vmatmul.mubr.bf16.gmra.mrb[40].mxu1 %v5035_v40  ;;  %v5259_v40 = vsel %vm1673_vm1, %v5200_v46, %v5258_v61  ;;  %v5426_v46 = vshrl.u32 %v4574_v17, 16  ;;  %v5484_v61 = vshrl.u32 %v4576_v28, 16 }
 0x387   : > { %6904 = vmatprep.mubr.bf16.mxu1 %v5201_v48  ;;  %7038 = vmatpush1.bf16.msra.mxu1 %v9127_v10  ;;  %v9133_v10 = vld [vmem:[%s13082_s3 + $0x140] sm:$0xff]  }
 0x388   : > { %7039 = vmatprep.subr.bf16.mxu1 %v13276_v12 }
 0x38b   : > { %7040 = vmatpush1.bf16.msra.mxu1 %v9128_v18 }
 0x38c   : > { %7041 = vmatprep.subr.bf16.mxu1 %v13276_v12 }
 0x38e   : > { %6905 = vmatmul.mubr.bf16.gmra.mrb[44].mxu1 %v5142_v33  ;;  %v12164_v33 = vor.u32 %v4597_v41, %v4596_v53  ;;  %v5542_v53 = vshrl.u32 %v4578_v13, 16  ;;  %v5545_v41 = vshll.u32 %v4578_v13, 16  ;;  %v4585_v13 = vrot.slane %v11970_v22, 1 }
 0x38f   : > { %6912 = vmatprep.mubr.bf16.mxu1 %v5259_v40  ;;  %7042 = vmatpush1.bf16.msra.mxu1 %v9129_v21 }
 0x390   : > { %7043 = vmatprep.subr.bf16.mxu1 %v13276_v12  ;;  %v5544_v39 = vrot.slane %v5542_v53, 6 }
 0x393   : > { %7044 = vmatpush1.bf16.msra.mxu1 %v9130_v9 }
 0x394   : > { %7045 = vmatprep.subr.bf16.mxu1 %v13276_v12 }
 0x396   : > { %6913 = vmatmul.mubr.bf16.gmra.mrb[48].mxu1 %v5201_v48  ;;  %v5428_v48 = vrot.slane %v5426_v46, 6  ;;  %v9139_v46 = vld [vmem:[%s13082_s3 + $0x170] sm:$0xff]  }
 0x397   : > { %6920 = vmatprep.mubr.bf16.mxu1 %v5317_v32  ;;  %7046 = vmatpush1.bf16.msra.mxu1 %v9131_v52  ;;  %v5547_v52 = vrot.slane %v5545_v41, 7 }
 0x398   : > { %7047 = vmatprep.subr.bf16.mxu1 %v13276_v12  ;;  %v5432_v18 = vor.u32 %v5431_v36, %v5428_v48  ;;  %v9140_v48 = vld [vmem:[%s13082_s3 + $0x178] sm:$0xff]  }
 0x399   : > { %v5548_v62 = vor.u32 %v5547_v52, %v5544_v39  ;;  %v4587_v39 = vrot.slane %v11998_v8, 1 }
 0x39a   : > { %v5433_v21 = vsel %vm1673_vm1, %v5374_v2, %v5432_v18  ;;  %v4581_v2 = vrot.slane %v11916_v6, 1 }
 0x39b   : > { %7048 = vmatpush1.bf16.msra.mxu1 %v9132_v14 }
 0x39c   : > { %7049 = vmatprep.subr.bf16.mxu1 %v13276_v12 }
 0x39e   : > { %6921 = vmatmul.mubr.bf16.gmra.mrb[52].mxu1 %v5259_v40  ;;  %v5486_v40 = vrot.slane %v5484_v61, 6 }
 0x39f   : > { %6928 = vmatprep.mubr.bf16.mxu1 %v5375_v5  ;;  %7050 = vmatpush1.bf16.msra.mxu1 %v9133_v10 }
 0x3a0   : > { %7051 = vmatprep.subr.bf16.mxu1 %v13276_v12  ;;  %v5490_v9 = vor.u32 %v5489_v54, %v5486_v40 }
 0x3a2   : > { %v5491_v16 = vsel %vm1673_vm1, %v5432_v18, %v5490_v9  ;;  %v5549_v20 = vsel %vm1673_vm1, %v5490_v9, %v5548_v62  ;;  %v4583_v18 = vrot.slane %v11944_v24, 1 }
 0x3a3   : > { %7052 = vmatpush1.bf16.msra.mxu1 %v9134_v47 }
 0x3a4   : > { %7053 = vmatprep.subr.bf16.mxu1 %v13276_v12  ;;  %v4586_v41 = vsel %vm13563_vm0, %v4583_v18, %v4585_v13  ;;  %vm13627_vm0 = vmmov %vm13601_vm2 }
 0x3a6   : > { %6929 = vmatmul.mubr.bf16.gmra.mrb[56].mxu1 %v5317_v32  ;;  %v4580_v32 = vsel %vm13577_vm14, %v4577_v15, %v4579_v63  ;;  %vm13620_vm14 = vmmov %vm13593_vm3 }
 0x3a7   : > { %6936 = vmatprep.mubr.bf16.mxu1 %v5433_v21  ;;  %7054 = vmatpush1.bf16.msra.mxu1 %v9135_v50  ;;  %v5600_v17 = vshrl.u32 %v4580_v32, 16  ;;  %v5603_v14 = vshll.u32 %v4580_v32, 16  ;;  %v4584_v50 = vsel %vm13579_vm8, %v4581_v2, %v4583_v18 }
 0x3a8   : > { %7055 = vmatprep.subr.bf16.mxu1 %v13276_v12  ;;  %v5716_v40 = vshrl.u32 %v4584_v50, 16  ;;  %v5719_v54 = vshll.u32 %v4584_v50, 16 }
 0x3a9   : > { %v5602_v45 = vrot.slane %v5600_v17, 6  ;;  %v5605_v10 = vrot.slane %v5603_v14, 7 }
 0x3aa   : > { %v5718_v9 = vrot.slane %v5716_v40, 6  ;;  %v5721_v53 = vrot.slane %v5719_v54, 7 }
 0x3ab   : > { %7056 = vmatpush1.bf16.msra.mxu1 %v9136_v19  ;;  %v5606_v36 = vor.u32 %v5605_v10, %v5602_v45 }
 0x3ac   : > { %7057 = vmatprep.subr.bf16.mxu1 %v13276_v12 }
 0x3ad   : > { %v5607_v61 = vsel %vm1673_vm1, %v5548_v62, %v5606_v36  ;;  %v4588_v62 = vsel %vm13580_vm6, %v4585_v13, %v4587_v39  ;;  %vm13633_vm6 = vmmov %vm13593_vm3 }
 0x3ae   : > { %6937 = vmatmul.mubr.bf16.gmra.mrb[60].mxu1 %v5375_v5  ;;  %v4582_v5 = vsel %vm13578_vm7, %v4579_v63, %v4581_v2  ;;  %v5722_v63 = vor.u32 %v5721_v53, %v5718_v9  ;;  %v5832_v14 = vshrl.u32 %v4588_v62, 16  ;;  %v5835_v2 = vshll.u32 %v4588_v62, 16 }
 0x3af   : > { %6944 = vmatprep.mubr.bf16.mxu1 %v5491_v16  ;;  %7058 = vmatpush1.bf16.msra.mxu1 %v9137_v55  ;;  %v5658_v28 = vshrl.u32 %v4582_v5, 16  ;;  %v5661_v47 = vshll.u32 %v4582_v5, 16  ;;  %v5774_v55 = vshrl.u32 %v4586_v41, 16  ;;  %v4594_v53 = vrot.slane %v12085_v34, 1 }
 0x3b0   : > { %7059 = vmatprep.subr.bf16.mxu1 %v13276_v12  ;;  %v5834_v10 = vrot.slane %v5832_v14, 6  ;;  %v5837_v5 = vrot.slane %v5835_v2, 7  ;;  %vm13625_vm7 = vsmask.f32 5376 }
 0x3b1   : > { %v5660_v60 = vrot.slane %v5658_v28, 6  ;;  %v5663_v15 = vrot.slane %v5661_v47, 7  ;;  %v5776_v32 = vrot.slane %v5774_v55, 6  ;;  %vm13626_vm8 = vmmov %vm13625_vm7 }
 0x3b2   : > { %v5838_v18 = vor.u32 %v5837_v5, %v5834_v10  ;;  %v12256_v10 = vrot.slane %v11522_v0, 2 }
 0x3b3   : > { %7060 = vmatpush1.bf16.msra.mxu1 %v9138_v11 }
 0x3b4   : > { %7061 = vmatprep.subr.bf16.mxu1 %v13276_v12  ;;  %13592 = vst [vmem:[#allocation25_spill] sm:$0xff] %v12256_v10 }
 0x3b6   : > { %6945 = vmatmul.mubr.bf16.gmra.mrb[64].mxu1 %v5433_v21  ;;  %v5664_v21 = vor.u32 %v5663_v15, %v5660_v60  ;;  %v4591_v15 = vrot.slane %v12059_v27, 1 }
 0x3b7   : > { %6952 = vmatprep.mubr.bf16.mxu1 %v5549_v20  ;;  %7062 = vmatpush1.bf16.msra.mxu1 %v9139_v46  ;;  %v4589_v46 = vrot.slane %v12030_v1, 1 }
 0x3b8   : > { %7063 = vmatprep.subr.bf16.mxu1 %v13276_v12  ;;  %v5665_v19 = vsel %vm1673_vm1, %v5606_v36, %v5664_v21  ;;  %v5723_v52 = vsel %vm1673_vm1, %v5664_v21, %v5722_v63 }
 0x3b9   : > { %v4590_v36 = vsel %vm13583_vm13, %v4587_v39, %v4589_v46  ;;  %v4592_v54 = vsel %vm13586_vm15, %v4589_v46, %v4591_v15  ;;  %vm13640_vm13 = vmmov %vm13627_vm0 }
 0x3ba   : > { %v5893_v60 = vshll.u32 %v4590_v36, 16  ;;  %v5951_v9 = vshll.u32 %v4592_v54, 16  ;;  %vm13645_vm15 = vmmov %vm13593_vm3 }
 0x3bb   : > { %7064 = vmatpush1.bf16.msra.mxu1 %v9140_v48 }
 0x3bc   : > { %7210 = vmatprep.subr.bf16.mxu1 %v13276_v12  ;;  %v5895_v40 = vrot.slane %v5893_v60, 7 }
 0x3be   : > { %6953 = vmatmul.mubr.bf16.gmra.mrb[68].mxu1 %v5491_v16  ;;  %v5777_v16 = vshll.u32 %v4586_v41, 16 }
 0x3bf   : > { %6960 = vmatprep.mubr.bf16.mxu1 %v5607_v61 }
 0x3c0   : > { %v5779_v11 = vrot.slane %v5777_v16, 7  ;;  %v5953_v16 = vrot.slane %v5951_v9, 7  ;;  %v6064_v9 = vshrl.u32 %v4591_v15, 16 }
 0x3c2   : > { %v5780_v17 = vor.u32 %v5779_v11, %v5776_v32 }
 0x3c4   : > { %v5781_v45 = vsel %vm1673_vm1, %v5722_v63, %v5780_v17  ;;  %v5839_v50 = vsel %vm1673_vm1, %v5780_v17, %v5838_v18 }
 0x3c6   : > { %6961 = vmatmul.mubr.bf16.gmra.mrb[72].mxu1 %v5549_v20 }
 0x3c7   : > { %6968 = vmatprep.mubr.bf16.mxu1 %v5665_v19 }
 0x3ce   : > { %6969 = vmatmul.mubr.bf16.gmra.mrb[76].mxu1 %v5607_v61  ;;  %v5890_v61 = vshrl.u32 %v4590_v36, 16  ;;  %v6073_v36 = vshrl.u32 %v4594_v53, 16 }
 0x3cf   : > { %6976 = vmatprep.mubr.bf16.mxu1 %v5723_v52 }
 0x3d0   : > { %v5892_v21 = vrot.slane %v5890_v61, 6  ;;  %v4673_v61 = vrot.slane %v11473_v30, 2  ;;  %v6075_v0 = vrot.slane %v6073_v36, 6  ;;  %v6067_v30 = vshll.u32 %v4591_v15, 16 }
 0x3d2   : > { %v5896_v13 = vor.u32 %v5895_v40, %v5892_v21  ;;  %v4675_v60 = vsel %vm13593_vm3, %v4673_v61, %v12256_v10  ;;  %v4599_v21 = vrot.slane %v11544_v29, 1  ;;  %v5054_v36 = vshrl.u32 %v4673_v61, 16 }
 0x3d4   : > { %v5897_v63 = vsel %vm1673_vm1, %v5838_v18, %v5896_v13  ;;  %v6076_v18 = vshll.u32 %v4594_v53, 16 }
 0x3d5   : > { %v12227_v20 = vpop.f32.mrb[72].mxu0 }
 0x3d6   : > { %6977 = vmatmul.mubr.bf16.gmra.mrb[80].mxu1 %v5665_v19  ;;  %13581 = vst [vmem:[#allocation14_spill] sm:$0xff] %v12227_v20  ;;  %v12230_v48 = vpop.f32.mrb[73].mxu0  ;;  %v5948_v19 = vshrl.u32 %v4592_v54, 16 }
 0x3d7   : > { %6984 = vmatprep.mubr.bf16.mxu1 %v5781_v45  ;;  %13582 = vst [vmem:[#allocation15_spill] sm:$0xff] %v12230_v48  ;;  %v12233_v28 = vpop.f32.mrb[74].mxu0 }
 0x3d8   : > { %13584 = vst [vmem:[#allocation45_spill] sm:$0xff] %v12233_v28  ;;  %v12235_v47 = vpop.f32.mrb[75].mxu0  ;;  %v5950_v55 = vrot.slane %v5948_v19, 6  ;;  %v6078_v19 = vrot.slane %v6076_v18, 7  ;;  %v6069_v18 = vrot.slane %v6067_v30, 7 }
 0x3d9   : > { %13585 = vst [vmem:[#allocation18_spill] sm:$0xff] %v12235_v47 }
 0x3da   : > { %v12251_v62 = vor.u32 %v5953_v16, %v5950_v55  ;;  %v5062_v16 = vshrl.u32 %v4675_v60, 16 }
 0x3dc   : > { %v5955_v2 = vsel %vm1673_vm1, %v5896_v13, %v12251_v62 }
 0x3de   : > { %6985 = vmatmul.mubr.bf16.gmra.mrb[84].mxu1 %v5723_v52  ;;  %v4595_v52 = vsel %vm13589_vm5, %v4591_v15, %v4594_v53  ;;  %v13214_v15 = vrot.slane %v11631_v35, 2  ;;  %vm13648_vm5 = vmmov %vm13627_vm0 }
 0x3df   : > { %6992 = vmatprep.mubr.bf16.mxu1 %v5839_v50  ;;  %v6006_v17 = vshrl.u32 %v4595_v52, 16  ;;  %v6009_v14 = vshll.u32 %v4595_v52, 16  ;;  %v5065_v52 = vshll.u32 %v4675_v60, 16 }
 0x3e1   : > { %v6008_v46 = vrot.slane %v6006_v17, 6 }
 0x3e5   : > { %v12241_v41 = vpop.f32.mrb[76].mxu0 }
 0x3e6   : > { %6993 = vmatmul.mubr.bf16.gmra.mrb[88].mxu1 %v5781_v45  ;;  %13587 = vst [vmem:[#allocation17_spill] sm:$0xff] %v12241_v41  ;;  %v12244_v39 = vpop.f32.mrb[77].mxu0  ;;  %v6011_v45 = vrot.slane %v6009_v14, 7  ;;  %v6066_v41 = vrot.slane %v6064_v9, 6  ;;  %v12288_v9 = vld [vmem:[%s13084_s5] sm:$0xff]  }
 0x3e7   : > { %7000 = vmatprep.mubr.bf16.mxu1 %v5897_v63  ;;  %13588 = vst [vmem:[#allocation47_spill] sm:$0xff] %v12244_v39  ;;  %v12247_v32 = vpop.f32.mrb[78].mxu0  ;;  %8357 = vmatprep.subr.bf16.mxu0 %v12288_v9 }
 0x3e8   : > { %13590 = vst [vmem:[#allocation48_spill] sm:$0xff] %v12247_v32  ;;  %v12249_v11 = vpop.f32.mrb[79].mxu0  ;;  %v6012_v5 = vor.u32 %v6011_v45, %v6008_v46  ;;  %v13600_v45 = vld [vmem:[#allocation56_spill] sm:$0xff]  ;;  %v6079_v32 = vor.u32 %v6078_v19, %v6075_v0  ;;  %v6070_v0 = vor.u32 %v6069_v18, %v6066_v41  ;;  %v5037_v41 = vshrl.u32 %v12164_v33, 16  ;;  %8358 = vmatpush3.bf16.msra.mxu0 %v12288_v9 }
 0x3e9   : > { %13591 = vst [vmem:[#allocation31_spill] sm:$0xff] %v12249_v11  ;;  %v5057_v11 = vshll.u32 %v4673_v61, 16 }
 0x3ea   : > { %v6013_v13 = vsel %vm1673_vm1, %v12251_v62, %v6012_v5 }
 0x3eb   : > { %v5059_v19 = vrot.slane %v5057_v11, 7  ;;  %v5040_v11 = vshll.u32 %v12164_v33, 16 }
 0x3ee   : > { %7001 = vmatmul.mubr.bf16.gmra.mrb[92].mxu1 %v5839_v50  ;;  %v13594_v50 = vld [vmem:[#allocation55_spill] sm:$0xff] }
 0x3ef   : > { %7008 = vmatprep.mubr.bf16.mxu1 %v5955_v2  ;;  %v4600_v40 = vrot.slane %v13594_v50, 2 }
 0x3f1   : > { %v4601_v14 = vor.u32 %v4600_v40, %v4599_v21  ;;  %v6080_v21 = vsel %vm1673_vm1, %v6012_v5, %v6079_v32  ;;  %v5056_v40 = vrot.slane %v5054_v36, 6  ;;  %v9155_v32 = vld [vmem:[%s13084_s5 + $0x8] sm:$0xff]  }
 0x3f2   : > { %8359 = vmatprep.subr.bf16.mxu0 %v9155_v32 }
 0x3f3   : > { %v4602_v60 = vsel %vm13601_vm2, %v12164_v33, %v4601_v14  ;;  %v5060_v33 = vor.u32 %v5059_v19, %v5056_v40  ;;  %8360 = vmatpush3.bf16.msra.mxu0 %v9155_v32  ;;  %v12316_v19 = vld [vmem:[%s13084_s5 + $0x10] sm:$0xff]   ;;  %vm13656_vm2 = vmmov %vm13627_vm0 }
 0x3f4   : > { %v5045_v5 = vshrl.u32 %v4602_v60, 16  ;;  %13609 = vst [vmem:[#allocation46_spill] sm:$0xff] %v12316_v19  ;;  %8361 = vmatprep.subr.bf16.mxu0 %v12316_v19 }
 0x3f5   : > { %v12263_v54 = vpop.f32.mrb[80].mxu0 }
 0x3f6   : > { %7009 = vmatmul.mubr.bf16.gmra.mrb[96].mxu1 %v5897_v63  ;;  %13595 = vst [vmem:[#allocation49_spill] sm:$0xff] %v12263_v54  ;;  %v12267_v53 = vpop.f32.mrb[81].mxu0  ;;  %v13599_v63 = vld [vmem:[#allocation57_spill] sm:$0xff]  ;;  %v4604_v54 = vrot.slane %v13600_v45, 2  ;;  %v5047_v20 = vrot.slane %v5045_v5, 6 }
 0x3f7   : > { %7016 = vmatprep.mubr.bf16.mxu1 %v6013_v13  ;;  %13596 = vst [vmem:[#allocation50_spill] sm:$0xff] %v12267_v53  ;;  %v12269_v55 = vpop.f32.mrb[82].mxu0  ;;  %v4603_v46 = vrot.slane %v13599_v63, 1  ;;  %v4676_v13 = vrot.slane %v11577_v3, 2  ;;  %v5064_v53 = vrot.slane %v5062_v16, 6  ;;  %v13605_v16 = vld [vmem:[#allocation59_spill] sm:$0xff]  ;;  %8362 = vmatpush3.bf16.msra.mxu0 %v12316_v19 }
 0x3f8   : > { %13597 = vst [vmem:[#allocation22_spill] sm:$0xff] %v12269_v55  ;;  %v12271_v17 = vpop.f32.mrb[83].mxu0  ;;  %v5067_v55 = vrot.slane %v5065_v52, 7  ;;  %v4607_v52 = vrot.slane %v13605_v16, 1  ;;  %v13632_v16 = vrot.slane %v11669_v7, 2 }
 0x3f9   : > { %13598 = vst [vmem:[#allocation29_spill] sm:$0xff] %v12271_v17  ;;  %v4605_v17 = vor.u32 %v4604_v54, %v4603_v46  ;;  %v4677_v61 = vsel %vm13602_vm4, %v12256_v10, %v4676_v13  ;;  %v4679_v3 = vsel %vm13603_vm9, %v4676_v13, %v13214_v15  ;;  %v5048_v54 = vshll.u32 %v4602_v60, 16  ;;  %v13606_v46 = vld [vmem:[#allocation58_spill] sm:$0xff]  ;;  %vm13659_vm4 = vmmov %vm13593_vm3 }
 0x3fa   : > { %v4608_v36 = vrot.slane %v13606_v46, 2  ;;  %v5079_v18 = vshrl.u32 %v4677_v61, 16  ;;  %v5082_v13 = vshll.u32 %v4677_v61, 16  ;;  %v5157_v15 = vshll.u32 %v4679_v3, 16  ;;  %vm13660_vm9 = vmmov %vm13627_vm0 }
 0x3fb   : > { %v4606_v30 = vsel %vm13604_vm10, %v4601_v14, %v4605_v17  ;;  %v5042_v60 = vrot.slane %v5040_v11, 7  ;;  %v5050_v47 = vrot.slane %v5048_v54, 7  ;;  %v13218_v11 = vshrl.u32 %v12085_v34, 16  ;;  %vm13665_vm10 = vmmov %vm13593_vm3 }
 0x3fc   : > { %v5144_v14 = vshrl.u32 %v4606_v30, 16  ;;  %v5147_v39 = vshll.u32 %v4606_v30, 16  ;;  %v12306_v48 = vor.u32 %v4608_v36, %v4607_v52  ;;  %v5084_v10 = vrot.slane %v5082_v13, 7 }
 0x3fd   : > { %v13219_v54 = vshll.u32 %v12085_v34, 16  ;;  %v5051_v52 = vor.u32 %v5050_v47, %v5047_v20  ;;  %v12334_v13 = vrot.slane %v13276_v12, 2  ;;  %v9141_v20 = vld [vmem:[%s13082_s3 + $0x180] sm:$0xff]   ;;  %v13617_v47 = vrot.slane %v11631_v35, 2 }
 0x3fe   : > { %7017 = vmatmul.mubr.bf16.gmra.mrb[100].mxu1 %v5955_v2  ;;  %v12293_v2 = vor.u32 %v5067_v55, %v5064_v53  ;;  %v6071_v53 = vsel %vm1673_vm1, %v12251_v62, %v6070_v0  ;;  %v5039_v55 = vrot.slane %v5037_v41, 6  ;;  %v5159_v62 = vrot.slane %v5157_v15, 7  ;;  %v12321_v41 = vld [vmem:[%s13084_s5 + $0x18] sm:$0xff]  }
 0x3ff   : > { %7024 = vmatprep.mubr.bf16.mxu1 %v6080_v21  ;;  %v5154_v21 = vshrl.u32 %v4679_v3, 16  ;;  %v5081_v3 = vrot.slane %v5079_v18, 6  ;;  %v13217_v0 = vrot.slane %v11669_v7, 2  ;;  %13610 = vst [vmem:[#allocation37_spill] sm:$0xff] %v12321_v41  ;;  %v5149_v32 = vrot.slane %v5147_v39, 7  ;;  %v13615_v39 = vld [vmem:[#allocation61_spill] sm:$0xff]  ;;  %8363 = vmatprep.subr.bf16.mxu0 %v12321_v41 }
 0x400   : > { %v5069_v28 = vsel %vm1673_vm1, %v5060_v33, %v12293_v2  ;;  %v5043_v15 = vor.u32 %v5042_v60, %v5039_v55  ;;  %v4610_v36 = vsel %vm13613_vm11, %v4605_v17, %v12306_v48  ;;  %v4611_v33 = vrot.slane %v13615_v39, 1  ;;  %v13616_v55 = vld [vmem:[#allocation60_spill] sm:$0xff]  ;;  %8364 = vmatpush3.bf16.msra.mxu0 %v12321_v41  ;;  %v12435_v7 = vld [vmem:[%s13084_s5 + $0x30] sm:$0xff]   ;;  %vm13668_vm11 = vmmov %vm13627_vm0 }
 0x401   : > { %v5156_v46 = vrot.slane %v5154_v21, 6  ;;  %v12336_v21 = vor.u32 %v5084_v10, %v5081_v3  ;;  %v4612_v60 = vrot.slane %v13616_v55, 2  ;;  %v4681_v17 = vsel %vm13618_vm12, %v13617_v47, %v13217_v0  ;;  %vm13672_vm12 = vmmov %vm13593_vm3 }
 0x402   : > { %v4772_v10 = vrot.slane %v12072_v59, 2  ;;  %v4777_v18 = vrot.slane %v13219_v54, 3  ;;  %v5206_v35 = vshll.u32 %v4610_v36, 16  ;;  %v13619_v47 = vrot.slane %v12085_v34, 2 }
 0x403   : > { %13614 = vst [vmem:[#allocation52_spill] sm:$0xff] %v12336_v21 }
 0x404   : > { %v4709_v0 = vsel %vm13620_vm14, %v13619_v47, %v12334_v13  ;;  %v5208_v54 = vrot.slane %v5206_v35, 7  ;;  %vm13674_vm14 = vmmov %vm13627_vm0 }
 0x405   : > { %v12308_v61 = vpop.f32.mrb[84].mxu0 }
 0x406   : > { %7025 = vmatmul.mubr.bf16.gmra.mrb[104].mxu1 %v6071_v53  ;;  %13607 = vst [vmem:[#allocation51_spill] sm:$0xff] %v12308_v61  ;;  %v12310_v40 = vpop.f32.mrb[85].mxu0  ;;  %v12338_v53 = vor.u32 %v5159_v62, %v5156_v46  ;;  %v4773_v46 = vrot.slane %v12065_v42, 3  ;;  %v5203_v62 = vshrl.u32 %v4610_v36, 16  ;;  %v12367_v61 = vor.u32 %v12088_v37, %v12334_v13  ;;  %v9142_v37 = vld [vmem:[%s13082_s3 + $0x188] sm:$0xff]  }
 0x407   : > { %7065 = vmatprep.mubr.bf16.mxu1 %v5069_v28  ;;  %13608 = vst [vmem:[#allocation34_spill] sm:$0xff] %v12310_v40  ;;  %v12324_v5 = vpop.f32.mrb[86].mxu0  ;;  %v5146_v28 = vrot.slane %v5144_v14, 6  ;;  %v4776_v14 = vrot.slane %v13218_v11, 2  ;;  %v12372_v11 = vor.u32 %v4612_v60, %v4611_v33  ;;  %v12391_v36 = vld [vmem:[%s13084_s5 + $0x28] sm:$0xff]  }
 0x408   : > { %13611 = vst [vmem:[#allocation43_spill] sm:$0xff] %v12324_v5  ;;  %v12327_v30 = vpop.f32.mrb[87].mxu0  ;;  %v5052_v5 = vsel %vm1673_vm1, %v5043_v15, %v5051_v52  ;;  %v12378_v15 = vsel %vm1673_vm1, %v12336_v21, %v12338_v53  ;;  %13623 = vst [vmem:[#allocation57_spill] sm:$0xff] %v12391_v36  ;;  %v12393_v33 = vor.u32 %v4773_v46, %v4772_v10  ;;  %v5205_v47 = vrot.slane %v5203_v62, 6  ;;  %v13628_v46 = vld [vmem:[#allocation63_spill] sm:$0xff] }
 0x409   : > { %13612 = vst [vmem:[#allocation53_spill] sm:$0xff] %v12327_v30  ;;  %v12356_v3 = vor.u32 %v5149_v32, %v5146_v28  ;;  %v5152_v28 = vsel %vm1673_vm1, %v12293_v2, %v12336_v21  ;;  %v5212_v32 = vshrl.u32 %v4681_v17, 16  ;;  %13621 = vst [vmem:[#allocation54_spill] sm:$0xff] %v12378_v15  ;;  %v12386_v2 = vld [vmem:[%s13084_s5 + $0x20] sm:$0xff]   ;;  %v4778_v60 = vor.u32 %v4777_v18, %v4776_v14 }
 0x40a   : > { %13622 = vst [vmem:[#allocation3_spill] sm:$0xff] %v12386_v2  ;;  %13624 = vst [vmem:[#allocation56_spill] sm:$0xff] %v12393_v33  ;;  %v6027_v30 = vshll.u32 %v4709_v0, 16  ;;  %8365 = vmatprep.subr.bf16.mxu0 %v12386_v2  ;;  %v4615_v14 = vrot.slane %v13628_v46, 1 }
 0x40b   : > { %v4779_v40 = vsel %vm13625_vm7, %v12393_v33, %v4778_v60  ;;  %v4788_v10 = vsel %vm13626_vm8, %v4778_v60, %v12367_v61  ;;  %v5214_v18 = vrot.slane %v5212_v32, 6  ;;  %8366 = vmatpush3.bf16.msra.mxu0 %v12386_v2  ;;  %v6091_v32 = vshrl.u32 %v12334_v13, 16  ;;  %vm13680_vm7 = vmmov %vm13593_vm3 }
 0x40c   : > { %v5975_v62 = vshrl.u32 %v4779_v40, 16  ;;  %8367 = vmatprep.subr.bf16.mxu0 %v12391_v36  ;;  %v5978_v35 = vshll.u32 %v4779_v40, 16  ;;  %v6036_v60 = vshll.u32 %v4788_v10, 16  ;;  %v6100_v2 = vshrl.u32 %v12367_v61, 16  ;;  %vm13683_vm8 = vmmov %vm13627_vm0 }
 0x40e   : > { %7066 = vmatmul.mubr.bf16.vlgmr.msra.gmra.mrb[36].mxu1 %v5052_v5  ;;  %v5215_v5 = vshll.u32 %v4681_v17, 16  ;;  %v6033_v17 = vshrl.u32 %v4788_v10, 16  ;;  %v5977_v19 = vrot.slane %v5975_v62, 6  ;;  %v5980_v21 = vrot.slane %v5978_v35, 7 }
 0x40f   : > { %7073 = vmatprep.mubr.bf16.mxu1 %v5152_v28  ;;  %7211 = vmatpush1.bf16.msra.mxu1 %v9141_v20  ;;  %v5151_v20 = vsel %vm1673_vm1, %v5051_v52, %v12356_v3  ;;  %v6024_v28 = vshrl.u32 %v4709_v0, 16  ;;  %v4614_v52 = vsel %vm13627_vm0, %v12306_v48, %v12372_v11  ;;  %v9143_v0 = vld [vmem:[%s13082_s3 + $0x190] sm:$0xff]   ;;  %v13629_v48 = vld [vmem:[#allocation62_spill] sm:$0xff]  ;;  %v6038_v55 = vrot.slane %v6036_v60, 7  ;;  %vm13688_vm0 = vmmov %vm13593_vm3 }
 0x410   : > { %7212 = vmatprep.subr.bf16.mxu1 %v13276_v12  ;;  %v4616_v33 = vrot.slane %v13629_v48, 2  ;;  %v6035_v46 = vrot.slane %v6033_v17, 6  ;;  %v5217_v40 = vrot.slane %v5215_v5, 7  ;;  %v13631_v10 = vrot.slane %v11706_v56, 2  ;;  %8368 = vmatpush3.bf16.msra.mxu0 %v12391_v36  ;;  %v9144_v5 = vld [vmem:[%s13082_s3 + $0x198] sm:$0xff]  }
 0x411   : > { %v6026_v41 = vrot.slane %v6024_v28, 6  ;;  %v6102_v28 = vrot.slane %v6100_v2, 6  ;;  %v6103_v62 = vshll.u32 %v12367_v61, 16  ;;  %v12442_v61 = vor.u32 %v5980_v21, %v5977_v19  ;;  %8369 = vmatprep.subr.bf16.mxu0 %v12435_v7 }
 0x412   : > { %v4683_v50 = vsel %vm13633_vm6, %v13632_v16, %v13631_v10  ;;  %v12440_v16 = vld [vmem:[%s13084_s5 + $0x38] sm:$0xff]   ;;  %v6039_v2 = vor.u32 %v6038_v55, %v6035_v46  ;;  %v6094_v17 = vshll.u32 %v12334_v13, 16  ;;  %v5209_v35 = vor.u32 %v5208_v54, %v5205_v47  ;;  %vm13690_vm6 = vmmov %vm13656_vm2 }
 0x413   : > { %7213 = vmatpush1.bf16.msra.mxu1 %v9142_v37  ;;  %v6029_v37 = vrot.slane %v6027_v30, 7  ;;  %13635 = vst [vmem:[#allocation65_spill] sm:$0xff] %v12442_v61  ;;  %v5261_v60 = vshrl.u32 %v4614_v52, 16  ;;  %v5264_v10 = vshll.u32 %v4614_v52, 16  ;;  %v4617_v36 = vor.u32 %v4616_v33, %v4615_v14 }
 0x414   : > { %7214 = vmatprep.subr.bf16.mxu1 %v13276_v12  ;;  %v12455_v19 = vsel %vm1673_vm1, %v12442_v61, %v6039_v2  ;;  %v6096_v13 = vrot.slane %v6094_v17, 7  ;;  %v5218_v21 = vor.u32 %v5217_v40, %v5214_v18  ;;  %v5270_v55 = vshrl.u32 %v4683_v50, 16  ;;  %8370 = vmatpush3.bf16.msra.mxu0 %v12435_v7 }
 0x415   : > { %v12417_v39 = vpop.f32.mrb[88].mxu0  ;;  %13638 = vst [vmem:[#allocation68_spill] sm:$0xff] %v12455_v19  ;;  %v5273_v54 = vshll.u32 %v4683_v50, 16  ;;  %v4684_v52 = vrot.slane %v11742_v26, 2  ;;  %8371 = vmatprep.subr.bf16.mxu0 %v12440_v16  ;;  %v5210_v46 = vsel %vm1673_vm1, %v12356_v3, %v5209_v35  ;;  %v5263_v14 = vrot.slane %v5261_v60, 6 }
 0x416   : > { %7074 = vmatmul.mubr.bf16.gmra.mrb[40].mxu1 %v5151_v20  ;;  %13630 = vst [vmem:[#allocation62_spill] sm:$0xff] %v12417_v39  ;;  %v12427_v30 = vpop.f32.mrb[89].mxu0  ;;  %v6093_v20 = vrot.slane %v6091_v32, 6  ;;  %v6105_v39 = vrot.slane %v6103_v62, 7  ;;  %v5266_v18 = vrot.slane %v5264_v10, 7  ;;  %v4618_v26 = vsel %vm13640_vm13, %v12372_v11, %v4617_v36  ;;  %vm13691_vm13 = vmmov %vm13688_vm0 }
 0x417   : > { %7081 = vmatprep.mubr.bf16.mxu1 %v12378_v15  ;;  %13634 = vst [vmem:[#allocation64_spill] sm:$0xff] %v12427_v30  ;;  %7215 = vmatpush1.bf16.msra.mxu1 %v9143_v0  ;;  %v12445_v0 = vpop.f32.mrb[90].mxu0  ;;  %v12450_v15 = vor.u32 %v6029_v37, %v6026_v41  ;;  %v9145_v41 = vld [vmem:[%s13082_s3 + $0x1a0] sm:$0xff]   ;;  %v13642_v37 = vld [vmem:[#allocation40_spill] sm:$0xff]  ;;  %v12479_v3 = vsel %vm1673_vm1, %v12338_v53, %v5218_v21  ;;  %v5272_v62 = vrot.slane %v5270_v55, 6  ;;  %v13644_v11 = vrot.slane %v11706_v56, 2 }
 0x418   : > { %13636 = vst [vmem:[#allocation66_spill] sm:$0xff] %v12445_v0  ;;  %7216 = vmatprep.subr.bf16.mxu1 %v13276_v12  ;;  %v12448_v30 = vpop.f32.mrb[91].mxu0  ;;  %v6106_v47 = vor.u32 %v6105_v39, %v6102_v28  ;;  %v6097_v33 = vor.u32 %v6096_v13, %v6093_v20  ;;  %v13641_v39 = vld [vmem:[#allocation26_spill] sm:$0xff]  ;;  %v4620_v40 = vrot.slane %v13642_v37, 2  ;;  %8372 = vmatpush3.bf16.msra.mxu0 %v12440_v16  ;;  %v9146_v20 = vld [vmem:[%s13082_s3 + $0x1a8] sm:$0xff]   ;;  %v5319_v17 = vshrl.u32 %v4618_v26, 16 }
 0x419   : > { %13637 = vst [vmem:[#allocation67_spill] sm:$0xff] %v12448_v30  ;;  %v4619_v32 = vrot.slane %v13641_v39, 1  ;;  %v5322_v60 = vshll.u32 %v4618_v26, 16  ;;  %v5267_v53 = vor.u32 %v5266_v18, %v5263_v14  ;;  %v13646_v13 = vld [vmem:[#allocation4_spill] sm:$0xff]  ;;  %v4686_v56 = vrot.slane %v11778_v4, 2 }
 0x41a   : > { %v12467_v50 = vsel %vm1673_vm1, %v6039_v2, %v6106_v47  ;;  %v12475_v28 = vsel %vm1673_vm1, %v12450_v15, %v6097_v33  ;;  %v4685_v2 = vsel %vm13645_vm15, %v13644_v11, %v4684_v52  ;;  %v13647_v33 = vld [vmem:[#allocation5_spill] sm:$0xff]  ;;  %vm13692_vm15 = vmmov %vm13656_vm2 }
 0x41b   : > { %7217 = vmatpush1.bf16.msra.mxu1 %v9144_v5  ;;  %13639 = vst [vmem:[#allocation69_spill] sm:$0xff] %v12467_v50  ;;  %13643 = vst [vmem:[#allocation26_spill] sm:$0xff] %v12475_v28  ;;  %v5275_v5 = vrot.slane %v5273_v54, 7  ;;  %v4621_v10 = vor.u32 %v4620_v40, %v4619_v32  ;;  %8374 = vmatmul.mubr.bf16.vlgmr.msra.gmra.mrb[108].mxu0 %v13646_v13  ;;  %v5328_v54 = vshrl.u32 %v4685_v2, 16  ;;  %v5331_v47 = vshll.u32 %v4685_v2, 16  ;;  %v13649_v32 = vld [vmem:[#allocation7_spill] sm:$0xff] }
 0x41c   : > { %7218 = vmatprep.subr.bf16.mxu1 %v13276_v12  ;;  %8377 = vmatprep.mubr.bf16.mxu0 %v13647_v33  ;;  %v5324_v26 = vrot.slane %v5322_v60, 7  ;;  %v5268_v14 = vsel %vm1673_vm1, %v5209_v35, %v5267_v53  ;;  %v4623_v40 = vrot.slane %v13649_v32, 1  ;;  %v4687_v35 = vsel %vm13593_vm3, %v4684_v52, %v4686_v56  ;;  %vm13694_vm3 = vmmov %vm13688_vm0 }
 0x41d   : > { %v5276_v55 = vor.u32 %v5275_v5, %v5272_v62  ;;  %v4622_v18 = vsel %vm13648_vm5, %v4617_v36, %v4621_v10  ;;  %v13650_v62 = vld [vmem:[#allocation38_spill] sm:$0xff]  ;;  %v5330_v2 = vrot.slane %v5328_v54, 6  ;;  %v5389_v52 = vshll.u32 %v4687_v35, 16  ;;  %vm13693_vm5 = vmmov %vm13688_vm0 }
 0x41e   : > { %7082 = vmatmul.mubr.bf16.gmra.mrb[44].mxu1 %v5210_v46  ;;  %v5321_v46 = vrot.slane %v5319_v17, 6  ;;  %v4624_v5 = vrot.slane %v13650_v62, 2  ;;  %v9148_v36 = vld [vmem:[%s13082_s3 + $0x1b8] sm:$0xff]   ;;  %v5377_v33 = vshrl.u32 %v4622_v18, 16  ;;  %v5380_v54 = vshll.u32 %v4622_v18, 16 }
 0x41f   : > { %7089 = vmatprep.mubr.bf16.mxu1 %v12479_v3  ;;  %7219 = vmatpush1.bf16.msra.mxu1 %v9145_v41  ;;  %v9147_v41 = vld [vmem:[%s13082_s3 + $0x1b0] sm:$0xff]   ;;  %v12504_v4 = vsel %vm1673_vm1, %v5218_v21, %v5276_v55 }
 0x420   : > { %7220 = vmatprep.subr.bf16.mxu1 %v13276_v12  ;;  %v5325_v13 = vor.u32 %v5324_v26, %v5321_v46  ;;  %v5379_v26 = vrot.slane %v5377_v33, 6  ;;  %v9150_v33 = vld [vmem:[%s13082_s3 + $0x1c8] sm:$0xff]  }
 0x422   : > { %v5326_v46 = vsel %vm1673_vm1, %v5267_v53, %v5325_v13 }
 0x423   : > { %7221 = vmatpush1.bf16.msra.mxu1 %v9146_v20  ;;  %v5333_v20 = vrot.slane %v5331_v47, 7  ;;  %v4625_v47 = vor.u32 %v4624_v5, %v4623_v40  ;;  %v13657_v40 = vld [vmem:[#allocation23_spill] sm:$0xff] }
 0x424   : > { %7222 = vmatprep.subr.bf16.mxu1 %v13276_v12  ;;  %v4627_v5 = vrot.slane %v13657_v40, 1 }
 0x425   : > { %v12501_v11 = vpop.f32.mrb[92].mxu0  ;;  %v4626_v18 = vsel %vm13656_vm2, %v4621_v10, %v4625_v47 }
 0x426   : > { %7090 = vmatmul.mubr.bf16.gmra.mrb[48].mxu1 %v5268_v14  ;;  %13651 = vst [vmem:[#allocation40_spill] sm:$0xff] %v12501_v11  ;;  %v12507_v17 = vpop.f32.mrb[93].mxu0  ;;  %v13655_v14 = vld [vmem:[#allocation6_spill] sm:$0xff]  ;;  %v5334_v11 = vor.u32 %v5333_v20, %v5330_v2  ;;  %v13658_v2 = vld [vmem:[#allocation32_spill] sm:$0xff]  ;;  %v5435_v10 = vshrl.u32 %v4626_v18, 16 }
 0x427   : > { %7097 = vmatprep.mubr.bf16.mxu1 %v12504_v4  ;;  %13652 = vst [vmem:[#allocation4_spill] sm:$0xff] %v12507_v17  ;;  %7223 = vmatpush1.bf16.msra.mxu1 %v9147_v41  ;;  %v12513_v60 = vpop.f32.mrb[94].mxu0  ;;  %v5386_v17 = vshrl.u32 %v4687_v35, 16  ;;  %v4688_v41 = vrot.slane %v11814_v25, 2  ;;  %v4628_v20 = vrot.slane %v13658_v2, 2 }
 0x428   : > { %13653 = vst [vmem:[#allocation5_spill] sm:$0xff] %v12513_v60  ;;  %7224 = vmatprep.subr.bf16.mxu1 %v13276_v12  ;;  %v12516_v21 = vpop.f32.mrb[95].mxu0  ;;  %8378 = vmatmul.mubr.bf16.gmra.mrb[112].mxu0 %v13655_v14  ;;  %v9149_v60 = vld [vmem:[%s13082_s3 + $0x1c0] sm:$0xff]   ;;  %v12529_v25 = vsel %vm1673_vm1, %v5276_v55, %v5334_v11 }
 0x429   : > { %13654 = vst [vmem:[#allocation7_spill] sm:$0xff] %v12516_v21  ;;  %v5382_v21 = vrot.slane %v5380_v54, 7  ;;  %v5388_v35 = vrot.slane %v5386_v17, 6  ;;  %v4689_v53 = vsel %vm13659_vm4, %v4686_v56, %v4688_v41  ;;  %v5438_v54 = vshll.u32 %v4626_v18, 16  ;;  %v9151_v56 = vld [vmem:[%s13082_s3 + $0x1d0] sm:$0xff]   ;;  %vm13695_vm4 = vmmov %vm13656_vm2 }
 0x42a   : > { %v5444_v55 = vshrl.u32 %v4689_v53, 16  ;;  %v5447_v30 = vshll.u32 %v4689_v53, 16  ;;  %v4690_v17 = vrot.slane %v11850_v49, 2 }
 0x42b   : > { %7225 = vmatpush1.bf16.msra.mxu1 %v9148_v36  ;;  %v5391_v36 = vrot.slane %v5389_v52, 7  ;;  %v5383_v14 = vor.u32 %v5382_v21, %v5379_v26  ;;  %v5440_v52 = vrot.slane %v5438_v54, 7  ;;  %v13661_v21 = vld [vmem:[#allocation20_spill] sm:$0xff] }
 0x42c   : > { %7226 = vmatprep.subr.bf16.mxu1 %v13276_v12  ;;  %v4631_v26 = vrot.slane %v13661_v21, 1  ;;  %v5449_v53 = vrot.slane %v5447_v30, 7 }
 0x42d   : > { %v5392_v0 = vor.u32 %v5391_v36, %v5388_v35  ;;  %v5384_v18 = vsel %vm1673_vm1, %v5325_v13, %v5383_v14  ;;  %v5446_v36 = vrot.slane %v5444_v55, 6  ;;  %v4691_v13 = vsel %vm13665_vm10, %v4688_v41, %v4690_v17  ;;  %vm13697_vm10 = vmmov %vm13656_vm2 }
 0x42e   : > { %7098 = vmatmul.mubr.bf16.gmra.mrb[52].mxu1 %v5326_v46  ;;  %v4629_v46 = vor.u32 %v4628_v20, %v4627_v5  ;;  %v13662_v5 = vld [vmem:[#allocation41_spill] sm:$0xff]  ;;  %v5502_v50 = vshrl.u32 %v4691_v13, 16  ;;  %v4692_v41 = vrot.slane %v11883_v58, 2 }
 0x42f   : > { %7105 = vmatprep.mubr.bf16.mxu1 %v12529_v25  ;;  %7227 = vmatpush1.bf16.msra.mxu1 %v9149_v60  ;;  %v5437_v60 = vrot.slane %v5435_v10, 6  ;;  %v4632_v20 = vrot.slane %v13662_v5, 2  ;;  %v12549_v49 = vsel %vm1673_vm1, %v5334_v11, %v5392_v0 }
 0x430   : > { %7228 = vmatprep.subr.bf16.mxu1 %v13276_v12  ;;  %v4630_v28 = vsel %vm13660_vm9, %v4625_v47, %v4629_v46  ;;  %v9152_v47 = vld [vmem:[%s13082_s3 + $0x1d8] sm:$0xff]   ;;  %vm13696_vm9 = vmmov %vm13688_vm0 }
 0x431   : > { %v5441_v54 = vor.u32 %v5440_v52, %v5437_v60  ;;  %v5496_v30 = vshll.u32 %v4630_v28, 16  ;;  %v4633_v55 = vor.u32 %v4632_v20, %v4631_v26  ;;  %v13670_v20 = vld [vmem:[#allocation28_spill] sm:$0xff] }
 0x433   : > { %7229 = vmatpush1.bf16.msra.mxu1 %v9150_v33  ;;  %v5498_v52 = vrot.slane %v5496_v30, 7 }
 0x434   : > { %7230 = vmatprep.subr.bf16.mxu1 %v13276_v12 }
 0x435   : > { %v12546_v35 = vpop.f32.mrb[96].mxu0 }
 0x436   : > { %7106 = vmatmul.mubr.bf16.gmra.mrb[56].mxu1 %v5384_v18  ;;  %13663 = vst [vmem:[#allocation38_spill] sm:$0xff] %v12546_v35  ;;  %v12552_v33 = vpop.f32.mrb[97].mxu0  ;;  %v5493_v18 = vshrl.u32 %v4630_v28, 16  ;;  %v5450_v35 = vor.u32 %v5449_v53, %v5446_v36  ;;  %v13669_v28 = vld [vmem:[#allocation35_spill] sm:$0xff]  ;;  %v4636_v36 = vrot.slane %v13670_v20, 2  ;;  %v5504_v53 = vrot.slane %v5502_v50, 6 }
 0x437   : > { %7113 = vmatprep.mubr.bf16.mxu1 %v12549_v49  ;;  %13664 = vst [vmem:[#allocation6_spill] sm:$0xff] %v12552_v33  ;;  %7231 = vmatpush1.bf16.msra.mxu1 %v9151_v56  ;;  %v12558_v10 = vpop.f32.mrb[98].mxu0  ;;  %v5505_v33 = vshll.u32 %v4691_v13, 16  ;;  %v9153_v56 = vld [vmem:[%s13082_s3 + $0x1e0] sm:$0xff]   ;;  %v4635_v26 = vrot.slane %v13669_v28, 1  ;;  %v4694_v50 = vrot.slane %v11916_v6, 2 }
 0x438   : > { %13666 = vst [vmem:[#allocation23_spill] sm:$0xff] %v12558_v10  ;;  %7232 = vmatprep.subr.bf16.mxu1 %v13276_v12  ;;  %v12561_v11 = vpop.f32.mrb[99].mxu0  ;;  %v5442_v10 = vsel %vm1673_vm1, %v5383_v14, %v5441_v54  ;;  %v5495_v60 = vrot.slane %v5493_v18, 6  ;;  %v12573_v58 = vsel %vm1673_vm1, %v5392_v0, %v5450_v35  ;;  %v4693_v14 = vsel %vm13672_vm12, %v4690_v17, %v4692_v41  ;;  %v9159_v17 = vld [vmem:[%s13082_s3 + $0x1f0] sm:$0xff]   ;;  %vm13702_vm12 = vmmov %vm13656_vm2 }
 0x439   : > { %13667 = vst [vmem:[#allocation32_spill] sm:$0xff] %v12561_v11  ;;  %v4634_v11 = vsel %vm13668_vm11, %v4629_v46, %v4633_v55  ;;  %13671 = vst [vmem:[#allocation20_spill] sm:$0xff] %v12573_v58  ;;  %v5507_v13 = vrot.slane %v5505_v33, 7  ;;  %v5560_v0 = vshrl.u32 %v4693_v14, 16  ;;  %v5563_v61 = vshll.u32 %v4693_v14, 16 }
 0x43a   : > { %v5551_v46 = vshrl.u32 %v4634_v11, 16  ;;  %v5554_v18 = vshll.u32 %v4634_v11, 16  ;;  %v5499_v30 = vor.u32 %v5498_v52, %v5495_v60  ;;  %v13675_v52 = vld [vmem:[#allocation42_spill] sm:$0xff]  ;;  %vm13701_vm11 = vmmov %vm13688_vm0 }
 0x43b   : > { %7233 = vmatpush1.bf16.msra.mxu1 %v9152_v47  ;;  %v9156_v47 = vld [vmem:[%s13082_s3 + $0x1e8] sm:$0xff]   ;;  %v5508_v19 = vor.u32 %v5507_v13, %v5504_v53  ;;  %v5562_v14 = vrot.slane %v5560_v0, 6 }
 0x43c   : > { %7234 = vmatprep.subr.bf16.mxu1 %v13276_v12  ;;  %v5553_v33 = vrot.slane %v5551_v46, 6  ;;  %v5500_v11 = vsel %vm1673_vm1, %v5441_v54, %v5499_v30  ;;  %v4695_v54 = vsel %vm13680_vm7, %v4692_v41, %v4694_v50 }
 0x43d   : > { %v12593_v6 = vsel %vm1673_vm1, %v5450_v35, %v5508_v19 }
 0x43e   : > { %7114 = vmatmul.mubr.bf16.gmra.mrb[60].mxu1 %v5442_v10  ;;  %v4637_v10 = vor.u32 %v4636_v36, %v4635_v26  ;;  %v4639_v26 = vrot.slane %v13675_v52, 1  ;;  %v13676_v36 = vld [vmem:[#allocation10_spill] sm:$0xff]  ;;  %13677 = vst [vmem:[#allocation35_spill] sm:$0xff] %v12593_v6 }
 0x43f   : > { %7121 = vmatprep.mubr.bf16.mxu1 %v12573_v58  ;;  %7235 = vmatpush1.bf16.msra.mxu1 %v9153_v56  ;;  %v5556_v56 = vrot.slane %v5554_v18, 7  ;;  %v4640_v53 = vrot.slane %v13676_v36, 2 }
 0x440   : > { %7236 = vmatprep.subr.bf16.mxu1 %v13276_v12  ;;  %v4638_v60 = vsel %vm13674_vm14, %v4633_v55, %v4637_v10  ;;  %v9162_v55 = vld [vmem:[%s13082_s3 + $0x1f8] sm:$0xff]   ;;  %vm13704_vm14 = vsmask.f32 5376 }
 0x441   : > { %v5609_v35 = vshrl.u32 %v4638_v60, 16  ;;  %v4641_v0 = vor.u32 %v4640_v53, %v4639_v26  ;;  %vm13707_vm7 = vmmov %vm13704_vm14 }
 0x443   : > { %7237 = vmatpush1.bf16.msra.mxu1 %v9156_v47  ;;  %v5565_v47 = vrot.slane %v5563_v61, 7 }
 0x444   : > { %7238 = vmatprep.subr.bf16.mxu1 %v13276_v12 }
 0x445   : > { %v12587_v58 = vpop.f32.mrb[100].mxu0  ;;  %v5566_v61 = vor.u32 %v5565_v47, %v5562_v14 }
 0x446   : > { %13673 = vst [vmem:[#allocation41_spill] sm:$0xff] %v12587_v58  ;;  %7122 = vmatmul.mubr.bf16.gmra.mrb[64].mxu1 %v5500_v11  ;;  %v12595_v13 = vpop.f32.mrb[101].mxu0  ;;  %v5557_v11 = vor.u32 %v5556_v56, %v5553_v33  ;;  %v5612_v58 = vshll.u32 %v4638_v60, 16  ;;  %v4642_v33 = vsel %vm13683_vm8, %v4637_v10, %v4641_v0  ;;  %v13684_v56 = vld [vmem:[#allocation44_spill] sm:$0xff]  ;;  %vm13711_vm8 = vmmov %vm13707_vm7 }
 0x447   : > { %13678 = vst [vmem:[#allocation28_spill] sm:$0xff] %v12595_v13  ;;  %7129 = vmatprep.mubr.bf16.mxu1 %v12593_v6  ;;  %v12598_v46 = vpop.f32.mrb[102].mxu0  ;;  %7239 = vmatpush1.bf16.msra.mxu1 %v9159_v17  ;;  %v5618_v13 = vshrl.u32 %v4695_v54, 16  ;;  %v5621_v6 = vshll.u32 %v4695_v54, 16  ;;  %v5611_v17 = vrot.slane %v5609_v35, 6  ;;  %v4644_v60 = vrot.slane %v13684_v56, 2 }
 0x448   : > { %13679 = vst [vmem:[#allocation42_spill] sm:$0xff] %v12598_v46  ;;  %v12604_v18 = vpop.f32.mrb[103].mxu0  ;;  %7240 = vmatprep.subr.bf16.mxu1 %v13276_v12  ;;  %v4696_v46 = vrot.slane %v11944_v24, 2  ;;  %v5558_v41 = vsel %vm1673_vm1, %v5499_v30, %v5557_v11  ;;  %v4643_v12 = vrot.slane %v11953_v43, 1  ;;  %v12616_v26 = vsel %vm1673_vm1, %v5508_v19, %v5566_v61 }
 0x449   : > { %13681 = vst [vmem:[#allocation70_spill] sm:$0xff] %v12604_v18  ;;  %v5614_v18 = vrot.slane %v5612_v58, 7  ;;  %13685 = vst [vmem:[#allocation44_spill] sm:$0xff] %v12616_v26  ;;  %v5620_v53 = vrot.slane %v5618_v13, 6  ;;  %v5623_v30 = vrot.slane %v5621_v6, 7  ;;  %v5667_v10 = vshrl.u32 %v4642_v33, 16 }
 0x44a   : > { %v4697_v58 = vsel %vm13688_vm0, %v4694_v50, %v4696_v46  ;;  %v5670_v47 = vshll.u32 %v4642_v33, 16  ;;  %v4648_v50 = vrot.slane %v11977_v57, 2  ;;  %vm13714_vm0 = vmmov %vm13707_vm7 }
 0x44b   : > { %7241 = vmatpush1.bf16.msra.mxu1 %v9162_v55  ;;  %v5615_v54 = vor.u32 %v5614_v18, %v5611_v17  ;;  %v4645_v55 = vor.u32 %v4644_v60, %v4643_v12  ;;  %v5624_v35 = vor.u32 %v5623_v30, %v5620_v53  ;;  %v5679_v19 = vshll.u32 %v4697_v58, 16 }
 0x44c   : > { %8409 = vmatprep.subr.bf16.mxu1 %v12288_v9  ;;  %v5672_v13 = vrot.slane %v5670_v47, 7 }
 0x44d   : > { %v12610_v36 = vpop.f32.mrb[104].mxu0  ;;  %v5616_v6 = vsel %vm1673_vm1, %v5557_v11, %v5615_v54  ;;  %v12632_v33 = vsel %vm1673_vm1, %v5566_v61, %v5624_v35  ;;  %v5681_v17 = vrot.slane %v5679_v19, 7 }
 0x44e   : > { %13682 = vst [vmem:[#allocation71_spill] sm:$0xff] %v12610_v36  ;;  %7130 = vmatmul.mubr.bf16.gmra.mrb[68].mxu1 %v5558_v41  ;;  %v12618_v24 = vpop.f32.mrb[105].mxu0  ;;  %v5676_v41 = vshrl.u32 %v4697_v58, 16  ;;  %v4698_v36 = vrot.slane %v11970_v22, 2 }
 0x44f   : > { %13686 = vst [vmem:[#allocation72_spill] sm:$0xff] %v12618_v24  ;;  %7137 = vmatprep.mubr.bf16.mxu1 %v12616_v26  ;;  %v12621_v9 = vpop.f32.mrb[106].mxu0  ;;  %v5669_v24 = vrot.slane %v5667_v10, 6  ;;  %v4646_v26 = vsel %vm13690_vm6, %v4641_v0, %v4645_v55  ;;  %v4700_v10 = vrot.slane %v11998_v8, 2  ;;  %vm13717_vm6 = vmmov %vm13714_vm0 }
 0x450   : > { %13687 = vst [vmem:[#allocation73_spill] sm:$0xff] %v12621_v9  ;;  %v12624_v14 = vpop.f32.mrb[107].mxu0  ;;  %v4647_v9 = vrot.slane %v11980_v51, 1  ;;  %v5678_v18 = vrot.slane %v5676_v41, 6  ;;  %v4699_v12 = vsel %vm13691_vm13, %v4696_v46, %v4698_v36  ;;  %v5725_v60 = vshrl.u32 %v4646_v26, 16  ;;  %vm13720_vm13 = vmmov %vm13714_vm0 }
 0x451   : > { %13689 = vst [vmem:[#allocation74_spill] sm:$0xff] %v12624_v14  ;;  %v5673_v22 = vor.u32 %v5672_v13, %v5669_v24  ;;  %v5728_v53 = vshll.u32 %v4646_v26, 16  ;;  %v5734_v11 = vshrl.u32 %v4699_v12, 16  ;;  %v5737_v30 = vshll.u32 %v4699_v12, 16 }
 0x452   : > { %v4649_v0 = vor.u32 %v4648_v50, %v4647_v9  ;;  %v5682_v58 = vor.u32 %v5681_v17, %v5678_v18  ;;  %v4701_v26 = vsel %vm13693_vm5, %v4698_v36, %v4700_v10  ;;  %v4651_v24 = vrot.slane %v12007_v31, 1  ;;  %vm13723_vm5 = vmmov %vm13714_vm0 }
 0x453   : > { %v5674_v47 = vsel %vm1673_vm1, %v5615_v54, %v5673_v22  ;;  %v5730_v61 = vrot.slane %v5728_v53, 7  ;;  %v5736_v14 = vrot.slane %v5734_v11, 6  ;;  %v5739_v41 = vrot.slane %v5737_v30, 7 }
 0x454   : > { %v4650_v19 = vsel %vm13692_vm15, %v4645_v55, %v4649_v0  ;;  %v12640_v46 = vsel %vm1673_vm1, %v5624_v35, %v5682_v58  ;;  %v4652_v9 = vrot.slane %v12004_v23, 2  ;;  %v5792_v18 = vshrl.u32 %v4701_v26, 16  ;;  %vm13722_vm15 = vmmov %vm13714_vm0 }
 0x455   : > { %v5783_v8 = vshrl.u32 %v4650_v19, 16  ;;  %v5786_v54 = vshll.u32 %v4650_v19, 16  ;;  %v5740_v50 = vor.u32 %v5739_v41, %v5736_v14  ;;  %v4702_v17 = vrot.slane %v12030_v1, 2 }
 0x456   : > { %7138 = vmatmul.mubr.bf16.gmra.mrb[72].mxu1 %v5616_v6  ;;  %v5727_v6 = vrot.slane %v5725_v60, 6  ;;  %v5795_v55 = vshll.u32 %v4701_v26, 16  ;;  %v4653_v12 = vor.u32 %v4652_v9, %v4651_v24  ;;  %v5794_v11 = vrot.slane %v5792_v18, 6 }
 0x457   : > { %7145 = vmatprep.mubr.bf16.mxu1 %v12632_v33  ;;  %v5785_v60 = vrot.slane %v5783_v8, 6  ;;  %v5788_v35 = vrot.slane %v5786_v54, 7  ;;  %v12649_v36 = vsel %vm1673_vm1, %v5682_v58, %v5740_v50  ;;  %v4703_v30 = vsel %vm13694_vm3, %v4700_v10, %v4702_v17  ;;  %vm13724_vm3 = vmmov %vm13714_vm0 }
 0x458   : > { %v5731_v13 = vor.u32 %v5730_v61, %v5727_v6  ;;  %v4654_v6 = vsel %vm13656_vm2, %v4649_v0, %v4653_v12  ;;  %v4655_v14 = vrot.slane %v12042_v38, 1  ;;  %v4656_v1 = vrot.slane %v12036_v44, 2  ;;  %vm13727_vm2 = vmmov %vm13714_vm0 }
 0x459   : > { %v5789_v61 = vor.u32 %v5788_v35, %v5785_v60  ;;  %v5850_v41 = vshrl.u32 %v4703_v30, 16  ;;  %v5853_v19 = vshll.u32 %v4703_v30, 16  ;;  %v5844_v26 = vshll.u32 %v4654_v6, 16 }
 0x45a   : > { %v5732_v53 = vsel %vm1673_vm1, %v5673_v22, %v5731_v13  ;;  %v5841_v22 = vshrl.u32 %v4654_v6, 16  ;;  %v4657_v24 = vor.u32 %v4656_v1, %v4655_v14  ;;  %v4704_v9 = vrot.slane %v12059_v27, 2 }
 0x45b   : > { %v5790_v10 = vsel %vm1673_vm1, %v5731_v13, %v5789_v61  ;;  %v5852_v8 = vrot.slane %v5850_v41, 6  ;;  %v5855_v54 = vrot.slane %v5853_v19, 7  ;;  %v5846_v18 = vrot.slane %v5844_v26, 7 }
 0x45c   : > { %v5843_v0 = vrot.slane %v5841_v22, 6  ;;  %v4658_v35 = vsel %vm13695_vm4, %v4653_v12, %v4657_v24  ;;  %v4705_v27 = vsel %vm13696_vm9, %v4702_v17, %v4704_v9  ;;  %v13698_v17 = vshrl.u32 %v12085_v34, 16  ;;  %vm13729_vm4 = vmmov %vm13714_vm0 }
 0x45d   : > { %v5899_v30 = vshrl.u32 %v4658_v35, 16  ;;  %v5908_v14 = vshrl.u32 %v4705_v27, 16  ;;  %v5911_v1 = vshll.u32 %v4705_v27, 16  ;;  %vm13731_vm9 = vmmov %vm13714_vm0 }
 0x45e   : > { %7146 = vmatmul.mubr.bf16.gmra.mrb[76].mxu1 %v5674_v47  ;;  %v5797_v47 = vrot.slane %v5795_v55, 7  ;;  %v4659_v55 = vrot.slane %v12072_v59, 1  ;;  %v5847_v13 = vor.u32 %v5846_v18, %v5843_v0  ;;  %v4666_v26 = vrot.slane %v13698_v17, 1 }
 0x45f   : > { %7153 = vmatprep.mubr.bf16.mxu1 %v12640_v46  ;;  %v5910_v19 = vrot.slane %v5908_v14, 6  ;;  %v5913_v22 = vrot.slane %v5911_v1, 7 }
 0x460   : > { %v5798_v58 = vor.u32 %v5797_v47, %v5794_v11  ;;  %v5856_v11 = vor.u32 %v5855_v54, %v5852_v8  ;;  %v5902_v47 = vshll.u32 %v4658_v35, 16 }
 0x462   : > { %v12661_v60 = vsel %vm1673_vm1, %v5740_v50, %v5798_v58  ;;  %v12667_v59 = vsel %vm1673_vm1, %v5798_v58, %v5856_v11  ;;  %v5901_v50 = vrot.slane %v5899_v30, 6  ;;  %v5904_v41 = vrot.slane %v5902_v47, 7 }
 0x463   : > { %v13700_v58 = vrot.slane %v12085_v34, 2 }
 0x464   : > { %v5905_v18 = vor.u32 %v5904_v41, %v5901_v50  ;;  %v4717_v50 = vrot.slane %v13600_v45, 3  ;;  %v13705_v45 = vld [vmem:[#allocation59_spill] sm:$0xff] }
 0x465   : > { %v4707_v54 = vsel %vm13701_vm11, %v4704_v9, %v13700_v58  ;;  %v4716_v9 = vrot.slane %v13599_v63, 2  ;;  %vm13733_vm11 = vmmov %vm13714_vm0 }
 0x466   : > { %7154 = vmatmul.mubr.bf16.gmra.mrb[80].mxu1 %v5732_v53  ;;  %v4660_v53 = vrot.slane %v12065_v42, 2  ;;  %v5848_v42 = vsel %vm1673_vm1, %v5789_v61, %v5847_v13  ;;  %v5906_v47 = vsel %vm1673_vm1, %v5847_v13, %v5905_v18  ;;  %v13703_v13 = vld [vmem:[#allocation55_spill] sm:$0xff] }
 0x467   : > { %7161 = vmatprep.mubr.bf16.mxu1 %v12649_v36  ;;  %v4714_v17 = vrot.slane %v13703_v13, 3 }
 0x468   : > { %v4661_v6 = vor.u32 %v4660_v53, %v4659_v55  ;;  %v5914_v55 = vor.u32 %v5913_v22, %v5910_v19  ;;  %v5969_v53 = vshll.u32 %v4707_v54, 16  ;;  %v4713_v22 = vrot.slane %v11544_v29, 2  ;;  %v13706_v29 = vld [vmem:[#allocation58_spill] sm:$0xff] }
 0x46a   : > { %v4662_v12 = vsel %vm13697_vm10, %v4657_v24, %v4661_v6  ;;  %v5966_v24 = vshrl.u32 %v4707_v54, 16  ;;  %v12681_v14 = vsel %vm1673_vm1, %v5856_v11, %v5914_v55  ;;  %v4718_v11 = vor.u32 %v4717_v50, %v4716_v9  ;;  %vm13732_vm10 = vmmov %vm13714_vm0 }
 0x46b   : > { %v5957_v61 = vshrl.u32 %v4662_v12, 16  ;;  %v5960_v0 = vshll.u32 %v4662_v12, 16 }
 0x46c   : > { %v5968_v1 = vrot.slane %v5966_v24, 6 }
 0x46d   : > { %v5959_v27 = vrot.slane %v5957_v61, 6  ;;  %v5962_v30 = vrot.slane %v5960_v0, 7  ;;  %v4720_v61 = vrot.slane %v13705_v45, 2  ;;  %v4721_v0 = vrot.slane %v13706_v29, 3 }
 0x46e   : > { %7162 = vmatmul.mubr.bf16.gmra.mrb[84].mxu1 %v5790_v10  ;;  %v13699_v10 = vshll.u32 %v12085_v34, 16 }
 0x46f   : > { %7169 = vmatprep.mubr.bf16.mxu1 %v12661_v60  ;;  %v5963_v41 = vor.u32 %v5962_v30, %v5959_v27 }
 0x470   : > { %v4669_v8 = vrot.slane %v13699_v10, 2 }
 0x471   : > { %v5964_v10 = vsel %vm1673_vm1, %v5905_v18, %v5963_v41 }
 0x472   : > { %v4670_v35 = vor.u32 %v4669_v8, %v4666_v26 }
 0x474   : > { %v4671_v34 = vsel %vm13702_vm12, %v4661_v6, %v4670_v35  ;;  %v4715_v6 = vor.u32 %v4714_v17, %v4713_v22  ;;  %v6085_v27 = vshll.u32 %v4670_v35, 16  ;;  %v13708_v22 = vld [vmem:[#allocation61_spill] sm:$0xff]  ;;  %v13709_v17 = vld [vmem:[#allocation60_spill] sm:$0xff]  ;;  %vm13735_vm12 = vmmov %vm13714_vm0 }
 0x475   : > { %v6015_v12 = vshrl.u32 %v4671_v34, 16  ;;  %v6018_v19 = vshll.u32 %v4671_v34, 16  ;;  %v4724_v13 = vrot.slane %v13708_v22, 2 }
 0x476   : > { %7170 = vmatmul.mubr.bf16.gmra.mrb[88].mxu1 %v5848_v42  ;;  %v5971_v42 = vrot.slane %v5969_v53, 7  ;;  %v4719_v63 = vsel %vm13704_vm14, %v4715_v6, %v4718_v11  ;;  %v6082_v53 = vshrl.u32 %v4670_v35, 16  ;;  %v6087_v9 = vrot.slane %v6085_v27, 7 }
 0x477   : > { %7177 = vmatprep.mubr.bf16.mxu1 %v12667_v59  ;;  %v6017_v8 = vrot.slane %v6015_v12, 6  ;;  %v6020_v58 = vrot.slane %v6018_v19, 7  ;;  %v5096_v30 = vshrl.u32 %v4719_v63, 16  ;;  %v5099_v18 = vshll.u32 %v4719_v63, 16  ;;  %v13710_v63 = vld [vmem:[#allocation25_spill] sm:$0xff] }
 0x478   : > { %v5972_v26 = vor.u32 %v5971_v42, %v5968_v1  ;;  %v5088_v1 = vshrl.u32 %v4715_v6, 16  ;;  %v5091_v42 = vshll.u32 %v4715_v6, 16  ;;  %v5071_v45 = vshrl.u32 %v13710_v63, 16 }
 0x479   : > { %v6021_v24 = vor.u32 %v6020_v58, %v6017_v8  ;;  %v5098_v12 = vrot.slane %v5096_v30, 6  ;;  %v5101_v19 = vrot.slane %v5099_v18, 7 }
 0x47a   : > { %v12691_v54 = vsel %vm1673_vm1, %v5914_v55, %v5972_v26  ;;  %v6084_v55 = vrot.slane %v6082_v53, 6  ;;  %v12700_v50 = vsel %vm1673_vm1, %v5972_v26, %v12450_v15  ;;  %v5090_v8 = vrot.slane %v5088_v1, 6 }
 0x47b   : > { %v6022_v34 = vsel %vm1673_vm1, %v5963_v41, %v6021_v24  ;;  %v5093_v58 = vrot.slane %v5091_v42, 7  ;;  %v5102_v6 = vor.u32 %v5101_v19, %v5098_v12  ;;  %v5074_v15 = vshll.u32 %v13710_v63, 16 }
 0x47c   : > { %v6088_v41 = vor.u32 %v6087_v9, %v6084_v55  ;;  %v5073_v27 = vrot.slane %v5071_v45, 6  ;;  %v4729_v9 = vrot.slane %v13629_v48, 3  ;;  %v4733_v63 = vrot.slane %v13642_v37, 3  ;;  %v9167_v45 = vld [vmem:[%s13084_s5 + $0x8] sm:$0xff]  }
 0x47d   : > { %v5076_v1 = vrot.slane %v5074_v15, 7 }
 0x47e   : > { %7178 = vmatmul.mubr.bf16.gmra.mrb[92].mxu1 %v5906_v47  ;;  %v4722_v47 = vor.u32 %v4721_v0, %v4720_v61  ;;  %v5094_v0 = vor.u32 %v5093_v58, %v5090_v8  ;;  %v6089_v53 = vsel %vm1673_vm1, %v6021_v24, %v6088_v41  ;;  %v13713_v24 = vld [vmem:[#allocation52_spill] sm:$0xff]  ;;  %v4732_v41 = vrot.slane %v13641_v39, 2 }
 0x47f   : > { %7185 = vmatprep.mubr.bf16.mxu1 %v12681_v14  ;;  %v5077_v22 = vor.u32 %v5076_v1, %v5073_v27  ;;  %v4736_v27 = vrot.slane %v13649_v32, 2 }
 0x480   : > { %v4723_v35 = vsel %vm13707_vm7, %v4718_v11, %v4722_v47  ;;  %v5103_v11 = vsel %vm1673_vm1, %v5094_v0, %v5102_v6  ;;  %v4734_v15 = vor.u32 %v4733_v63, %v4732_v41  ;;  %v13715_v0 = vld [vmem:[#allocation46_spill] sm:$0xff]  ;;  %v4745_v41 = vrot.slane %v13662_v5, 3 }
 0x481   : > { %v5163_v61 = vshrl.u32 %v4723_v35, 16  ;;  %v5166_v29 = vshll.u32 %v4723_v35, 16  ;;  %v4748_v5 = vrot.slane %v13669_v28, 2 }
 0x483   : > { %v5165_v30 = vrot.slane %v5163_v61, 6  ;;  %v5168_v18 = vrot.slane %v5166_v29, 7 }
 0x485   : > { %v5169_v12 = vor.u32 %v5168_v18, %v5165_v30  ;;  %v4737_v30 = vrot.slane %v13650_v62, 3  ;;  %v13718_v18 = vld [vmem:[#allocation37_spill] sm:$0xff] }
 0x486   : > { %7186 = vmatmul.mubr.bf16.gmra.mrb[96].mxu1 %v5964_v10  ;;  %v4725_v10 = vrot.slane %v13709_v17, 3  ;;  %v5086_v17 = vsel %vm1673_vm1, %v5077_v22, %v13713_v24  ;;  %v4740_v22 = vrot.slane %v13657_v40, 2  ;;  %v13721_v24 = vld [vmem:[#allocation57_spill] sm:$0xff] }
 0x487   : > { %7193 = vmatprep.mubr.bf16.mxu1 %v12691_v54 }
 0x488   : > { %v4726_v26 = vor.u32 %v4725_v10, %v4724_v13  ;;  %v5170_v10 = vsel %vm1673_vm1, %v5102_v6, %v5169_v12 }
 0x48a   : > { %v4727_v42 = vsel %vm13711_vm8, %v4722_v47, %v4726_v26  ;;  %v9166_v47 = vld [vmem:[%s13084_s5] sm:$0xff]  }
 0x48b   : > { %v5221_v19 = vshrl.u32 %v4727_v42, 16  ;;  %v5224_v35 = vshll.u32 %v4727_v42, 16 }
 0x48d   : > { %v5223_v8 = vrot.slane %v5221_v19, 6  ;;  %v5226_v58 = vrot.slane %v5224_v35, 7 }
 0x48e   : > { %7194 = vmatmul.mubr.bf16.gmra.mrb[100].mxu1 %v6022_v34  ;;  %v13712_v34 = vld [vmem:[#allocation63_spill] sm:$0xff] }
 0x48f   : > { %7201 = vmatprep.mubr.bf16.mxu1 %v12700_v50  ;;  %v4728_v55 = vrot.slane %v13712_v34, 2  ;;  %v5227_v6 = vor.u32 %v5226_v58, %v5223_v8 }
 0x491   : > { %v4730_v13 = vor.u32 %v4729_v9, %v4728_v55  ;;  %v4738_v55 = vor.u32 %v4737_v30, %v4736_v27  ;;  %v9168_v9 = vld [vmem:[%s13084_s5 + $0x18] sm:$0xff]   ;;  %v4752_v27 = vrot.slane %v13675_v52, 2 }
 0x492   : > { %v13725_v30 = vld [vmem:[#allocation10_spill] sm:$0xff] }
 0x493   : > { %v4731_v48 = vsel %vm13714_vm0, %v4726_v26, %v4730_v13  ;;  %v5228_v26 = vsel %vm1673_vm1, %v5169_v12, %v5227_v6  ;;  %v4735_v37 = vsel %vm13717_vm6, %v4730_v13, %v4734_v15  ;;  %v13719_v12 = vld [vmem:[#allocation3_spill] sm:$0xff]  ;;  %v4739_v35 = vsel %vm13720_vm13, %v4734_v15, %v4738_v55 }
 0x494   : > { %v5279_v61 = vshrl.u32 %v4731_v48, 16  ;;  %v5282_v29 = vshll.u32 %v4731_v48, 16  ;;  %v5337_v42 = vshrl.u32 %v4735_v37, 16  ;;  %v5340_v34 = vshll.u32 %v4735_v37, 16 }
 0x495   : > { %v4741_v13 = vrot.slane %v13658_v2, 3  ;;  %v5398_v8 = vshll.u32 %v4739_v35, 16  ;;  %v4744_v48 = vrot.slane %v13661_v21, 2 }
 0x496   : > { %7202 = vmatmul.mubr.bf16.gmra.mrb[104].mxu1 %v6089_v53  ;;  %v13716_v53 = vld [vmem:[#allocation54_spill] sm:$0xff]  ;;  %v5284_v39 = vrot.slane %v5282_v29, 7  ;;  %v5339_v62 = vrot.slane %v5337_v42, 6  ;;  %v5342_v19 = vrot.slane %v5340_v34, 7  ;;  %v13726_v34 = vld [vmem:[#allocation20_spill] sm:$0xff] }
 0x497   : > { %7242 = vmatprep.mubr.bf16.mxu1 %v5103_v11  ;;  %v5281_v11 = vrot.slane %v5279_v61, 6  ;;  %v4742_v58 = vor.u32 %v4741_v13, %v4740_v22  ;;  %v5400_v40 = vrot.slane %v5398_v8, 7  ;;  %v4746_v61 = vor.u32 %v4745_v41, %v4744_v48  ;;  %v13728_v13 = vld [vmem:[#allocation35_spill] sm:$0xff] }
 0x499   : > { %v5285_v1 = vor.u32 %v5284_v39, %v5281_v11  ;;  %v4743_v2 = vsel %vm13722_vm15, %v4738_v55, %v4742_v58  ;;  %v4747_v21 = vsel %vm13723_vm5, %v4742_v58, %v4746_v61  ;;  %v4760_v58 = vrot.slane %v11980_v51, 2 }
 0x49b   : > { %v5286_v32 = vsel %vm1673_vm1, %v5227_v6, %v5285_v1  ;;  %v5456_v6 = vshll.u32 %v4743_v2, 16 }
 0x49d   : > { %v5458_v15 = vrot.slane %v5456_v6, 7  ;;  %v4764_v6 = vrot.slane %v12007_v31, 2 }
 0x49e   : > { %7243 = vmatmul.mubr.bf16.vlgmr.msra.gmra.mrb[36].mxu1 %v5086_v17  ;;  %v5343_v17 = vor.u32 %v5342_v19, %v5339_v62  ;;  %v4757_v62 = vrot.slane %v13684_v56, 3 }
 0x49f   : > { %7250 = vmatprep.mubr.bf16.mxu1 %v5170_v10  ;;  %8417 = vmatpush3.bf16.msra.mxu1 %v9166_v47  ;;  %v5395_v10 = vshrl.u32 %v4739_v35, 16 }
 0x4a0   : > { %8410 = vmatprep.subr.bf16.mxu1 %v9167_v45 }
 0x4a1   : > { %v5397_v47 = vrot.slane %v5395_v10, 6 }
 0x4a3   : > { %8418 = vmatpush3.bf16.msra.mxu1 %v9167_v45  ;;  %v5401_v63 = vor.u32 %v5400_v40, %v5397_v47  ;;  %v5453_v45 = vshrl.u32 %v4743_v2, 16  ;;  %v13730_v2 = vld [vmem:[#allocation44_spill] sm:$0xff] }
 0x4a4   : > { %8411 = vmatprep.subr.bf16.mxu1 %v13715_v0 }
 0x4a5   : > { %v5455_v29 = vrot.slane %v5453_v45, 6 }
 0x4a6   : > { %7251 = vmatmul.mubr.bf16.gmra.mrb[40].mxu1 %v13716_v53  ;;  %v5511_v53 = vshrl.u32 %v4747_v21, 16 }
 0x4a7   : > { %7258 = vmatprep.mubr.bf16.mxu1 %v5228_v26  ;;  %8419 = vmatpush3.bf16.msra.mxu1 %v13715_v0  ;;  %v5459_v0 = vor.u32 %v5458_v15, %v5455_v29  ;;  %v5514_v26 = vshll.u32 %v4747_v21, 16 }
 0x4a8   : > { %8412 = vmatprep.subr.bf16.mxu1 %v13718_v18  ;;  %v4753_v18 = vrot.slane %v13725_v30, 3 }
 0x4a9   : > { %v5516_v39 = vrot.slane %v5514_v26, 7 }
 0x4aa   : > { %v4754_v42 = vor.u32 %v4753_v18, %v4752_v27 }
 0x4ab   : > { %8420 = vmatpush3.bf16.msra.mxu1 %v9168_v9 }
 0x4ac   : > { %8413 = vmatprep.subr.bf16.mxu1 %v13719_v12 }
 0x4ae   : > { %7259 = vmatmul.mubr.bf16.gmra.mrb[44].mxu1 %v12479_v3  ;;  %v5344_v3 = vsel %vm1673_vm1, %v5285_v1, %v5343_v17 }
 0x4af   : > { %7266 = vmatprep.mubr.bf16.mxu1 %v5286_v32  ;;  %8421 = vmatpush3.bf16.msra.mxu1 %v13719_v12  ;;  %v4756_v32 = vrot.slane %v11953_v43, 2 }
 0x4b0   : > { %8414 = vmatprep.subr.bf16.mxu1 %v13721_v24 }
 0x4b1   : > { %v4758_v22 = vor.u32 %v4757_v62, %v4756_v32 }
 0x4b3   : > { %8422 = vmatpush3.bf16.msra.mxu1 %v13721_v24  ;;  %v4759_v8 = vsel %vm13729_vm4, %v4754_v42, %v4758_v22 }
 0x4b4   : > { %8415 = vmatprep.subr.bf16.mxu1 %v12435_v7  ;;  %v5685_v47 = vshrl.u32 %v4759_v8, 16  ;;  %v5688_v56 = vshll.u32 %v4759_v8, 16  ;;  %v13740_v8 = vld [vmem:[#allocation8_spill] sm:$0xff] }
 0x4b6   : > { %7267 = vmatmul.mubr.bf16.gmra.mrb[48].mxu1 %v12504_v4  ;;  %v5402_v4 = vsel %vm1673_vm1, %v5343_v17, %v5401_v63  ;;  %v5687_v41 = vrot.slane %v5685_v47, 6  ;;  %v13745_v47 = vld [vmem:[#allocation16_spill] sm:$0xff] }
 0x4b7   : > { %7274 = vmatprep.mubr.bf16.mxu1 %v5344_v3  ;;  %8423 = vmatpush3.bf16.msra.mxu1 %v12435_v7  ;;  %v4749_v7 = vrot.slane %v13670_v20, 3  ;;  %v4761_v3 = vrot.slane %v11977_v57, 3 }
 0x4b8   : > { %8416 = vmatprep.subr.bf16.mxu1 %v12440_v16 }
 0x4b9   : > { %v4750_v11 = vor.u32 %v4749_v7, %v4748_v5  ;;  %v4762_v40 = vor.u32 %v4761_v3, %v4760_v58  ;;  %v13741_v58 = vld [vmem:[#allocation9_spill] sm:$0xff]  ;;  %v13742_v3 = vld [vmem:[#allocation11_spill] sm:$0xff] }
 0x4bb   : > { %8424 = vmatpush3.bf16.msra.mxu1 %v12440_v16  ;;  %v5460_v16 = vsel %vm1673_vm1, %v5401_v63, %v5459_v0  ;;  %v4751_v37 = vsel %vm13724_vm3, %v4746_v61, %v4750_v11  ;;  %v4755_v12 = vsel %vm13727_vm2, %v4750_v11, %v4754_v42  ;;  %v5690_v63 = vrot.slane %v5688_v56, 7  ;;  %v13748_v56 = vld [vmem:[#allocation24_spill] sm:$0xff] }
 0x4bc   : > { %v5569_v1 = vshrl.u32 %v4751_v37, 16  ;;  %v5572_v20 = vshll.u32 %v4751_v37, 16  ;;  %v5627_v19 = vshrl.u32 %v4755_v12, 16  ;;  %v5630_v35 = vshll.u32 %v4755_v12, 16 }
 0x4bd   : > { %v4763_v45 = vsel %vm13731_vm9, %v4758_v22, %v4762_v40  ;;  %v4765_v61 = vrot.slane %v12004_v23, 3  ;;  %v5691_v51 = vor.u32 %v5690_v63, %v5687_v41  ;;  %v13752_v41 = vld [vmem:[#allocation36_spill] sm:$0xff]  ;;  %v13753_v63 = vld [vmem:[#allocation39_spill] sm:$0xff] }
 0x4be   : > { %7275 = vmatmul.mubr.bf16.gmra.mrb[52].mxu1 %v12529_v25  ;;  %v5513_v25 = vrot.slane %v5511_v53, 6  ;;  %v5574_v9 = vrot.slane %v5572_v20, 7  ;;  %v5629_v17 = vrot.slane %v5627_v19, 6  ;;  %v5632_v10 = vrot.slane %v5630_v35, 7 }
 0x4bf   : > { %7282 = vmatprep.mubr.bf16.mxu1 %v5402_v4  ;;  %v5743_v4 = vshrl.u32 %v4763_v45, 16  ;;  %v5746_v57 = vshll.u32 %v4763_v45, 16  ;;  %v4766_v29 = vor.u32 %v4765_v61, %v4764_v6  ;;  %v4769_v53 = vrot.slane %v12036_v44, 3  ;;  %v12830_v45 = vld [vmem:[%s13083_s4] ss:$0 sm:$0xff] }
 0x4c0   : > { %v5517_v28 = vor.u32 %v5516_v39, %v5513_v25  ;;  %v5633_v43 = vor.u32 %v5632_v10, %v5629_v17  ;;  %v13737_v17 = vld [vmem:[#allocation68_spill] sm:$0xff]  ;;  %v13739_v10 = vld [vmem:[#allocation26_spill] sm:$0xff]  ;;  %v12835_v6 = vld [vmem:[%s13085_s6] ss:$0 sm:$0xff] }
 0x4c1   : > { %v5745_v21 = vrot.slane %v5743_v4, 6  ;;  %v5748_v5 = vrot.slane %v5746_v57, 7  ;;  %v4767_v7 = vsel %vm13732_vm10, %v4762_v40, %v4766_v29  ;;  %v13749_v40 = vld [vmem:[#allocation27_spill] sm:$0xff] }
 0x4c2   : > { %v5518_v55 = vsel %vm1673_vm1, %v5459_v0, %v5517_v28  ;;  %v5692_v15 = vsel %vm1673_vm1, %v5633_v43, %v5691_v51  ;;  %v4768_v0 = vrot.slane %v12042_v38, 2  ;;  %v5801_v26 = vshrl.u32 %v4767_v7, 16 }
 0x4c3   : > { %v5749_v31 = vor.u32 %v5748_v5, %v5745_v21  ;;  %v5804_v23 = vshll.u32 %v4767_v7, 16 }
 0x4c4   : > { %v4770_v11 = vor.u32 %v4769_v53, %v4768_v0  ;;  %v13755_v53 = vld [vmem:[#allocation18_spill] sm:$0xff] }
 0x4c5   : > { %v5806_v25 = vrot.slane %v5804_v23, 7 }
 0x4c6   : > { %7283 = vmatmul.mubr.bf16.gmra.mrb[56].mxu1 %v12549_v49  ;;  %v5571_v49 = vrot.slane %v5569_v1, 6  ;;  %v4771_v39 = vsel %vm13733_vm11, %v4766_v29, %v4770_v11 }
 0x4c7   : > { %7290 = vmatprep.mubr.bf16.mxu1 %v5460_v16  ;;  %v5750_v16 = vsel %vm1673_vm1, %v5691_v51, %v5749_v31  ;;  %v5859_v27 = vshrl.u32 %v4771_v39, 16  ;;  %v5862_v30 = vshll.u32 %v4771_v39, 16 }
 0x4c8   : > { %v5575_v52 = vor.u32 %v5574_v9, %v5571_v49 }
 0x4c9   : > { %v5861_v38 = vrot.slane %v5859_v27, 6 }
 0x4ca   : > { %v5576_v24 = vsel %vm1673_vm1, %v5517_v28, %v5575_v52  ;;  %v5634_v48 = vsel %vm1673_vm1, %v5575_v52, %v5633_v43  ;;  %v5864_v28 = vrot.slane %v5862_v30, 7  ;;  %v13744_v43 = vld [vmem:[#allocation13_spill] sm:$0xff] }
 0x4cc   : > { %v5865_v42 = vor.u32 %v5864_v28, %v5861_v38 }
 0x4ce   : > { %7291 = vmatmul.mubr.bf16.gmra.mrb[60].mxu1 %v13726_v34 }
 0x4cf   : > { %7298 = vmatprep.mubr.bf16.mxu1 %v5518_v55 }
 0x4d6   : > { %7299 = vmatmul.mubr.bf16.gmra.mrb[64].mxu1 %v13728_v13 }
 0x4d7   : > { %7306 = vmatprep.mubr.bf16.mxu1 %v5576_v24 }
 0x4de   : > { %7307 = vmatmul.mubr.bf16.gmra.mrb[68].mxu1 %v13730_v2  ;;  %v13750_v2 = vld [vmem:[#allocation30_spill] sm:$0xff] }
 0x4df   : > { %7314 = vmatprep.mubr.bf16.mxu1 %v5634_v48  ;;  %v13751_v48 = vld [vmem:[#allocation33_spill] sm:$0xff] }
 0x4e6   : > { %7315 = vmatmul.mubr.bf16.gmra.mrb[72].mxu1 %v12632_v33  ;;  %v5803_v33 = vrot.slane %v5801_v26, 6 }
 0x4e7   : > { %7322 = vmatprep.mubr.bf16.mxu1 %v5692_v15  ;;  %v13754_v15 = vld [vmem:[#allocation15_spill] sm:$0xff] }
 0x4e8   : > { %v5807_v37 = vor.u32 %v5806_v25, %v5803_v33 }
 0x4ea   : > { %v5808_v44 = vsel %vm1673_vm1, %v5749_v31, %v5807_v37  ;;  %v5866_v12 = vsel %vm1673_vm1, %v5807_v37, %v5865_v42 }
 0x4ee   : > { %7323 = vmatmul.mubr.bf16.gmra.mrb[76].mxu1 %v12640_v46  ;;  %v12787_v18 = vpop.f32.mrb[108].mxu0  ;;  %v13734_v46 = vld [vmem:[#allocation56_spill] sm:$0xff] }
 0x4ef   : > { %7330 = vmatprep.mubr.bf16.mxu1 %v5750_v16  ;;  %v7669_v1 = vpop.f32.mrb[109].mxu0  ;;  %v4775_v20 = vsel %vm13735_vm12, %v4770_v11, %v13734_v46  ;;  %v7678_v33 = vadd.f32 %v12787_v18, %v12835_v6 }
 0x4f0   : > { %v5917_v34 = vshrl.u32 %v4775_v20, 16  ;;  %v5920_v55 = vshll.u32 %v4775_v20, 16  ;;  %v8376_v49 = vpop.f32.mrb[110].mxu0  ;;  %v7670_v57 = vadd.f32 %v12835_v6, %v7669_v1  ;;  %v13757_v20 = vld [vmem:[#allocation45_spill] sm:$0xff] }
 0x4f1   : > { %v7672_v9 = vpop.f32.mrb[111].mxu0  ;;  %v7681_v30 = vadd.f32 %v8376_v49, %v12835_v6 }
 0x4f2   : > { %v5919_v32 = vrot.slane %v5917_v34, 6  ;;  %v7673_v0 = vadd.f32 %v12835_v6, %v7672_v9 }
 0x4f6   : > { %7331 = vmatmul.mubr.bf16.gmra.mrb[80].mxu1 %v12649_v36  ;;  %v5922_v36 = vrot.slane %v5920_v55, 7 }
 0x4f7   : > { %7338 = vmatprep.mubr.bf16.mxu1 %v5808_v44  ;;  %v13756_v44 = vld [vmem:[#allocation14_spill] sm:$0xff] }
 0x4f8   : > { %v5923_v62 = vor.u32 %v5922_v36, %v5919_v32 }
 0x4fa   : > { %v5924_v19 = vsel %vm1673_vm1, %v5865_v42, %v5923_v62 }
 0x4fb   : > { %v12795_v52 = vpop.f32.mrb[112].mxu0 }
 0x4fc   : > { %v12799_v35 = vpop.f32.mrb[113].mxu0 }
 0x4fd   : > { %v12801_v22 = vpop.f32.mrb[114].mxu0  ;;  %v7686_v49 = vadd.f32 %v12835_v6, %v12799_v35  ;;  %v7694_v35 = vadd.f32 %v12795_v52, %v12835_v6 }
 0x4fe   : > { %7339 = vmatmul.mubr.bf16.gmra.mrb[84].mxu1 %v12661_v60  ;;  %v12803_v13 = vpop.f32.mrb[115].mxu0  ;;  %v13736_v60 = vld [vmem:[#allocation65_spill] sm:$0xff] }
 0x4ff   : > { %7346 = vmatprep.mubr.bf16.mxu1 %v5866_v12  ;;  %v5982_v24 = vsel %vm1673_vm1, %v5923_v62, %v13736_v60  ;;  %v13758_v62 = vld [vmem:[#allocation47_spill] sm:$0xff] }
 0x506   : > { %7347 = vmatmul.mubr.bf16.gmra.mrb[88].mxu1 %v12667_v59  ;;  %v13738_v59 = vld [vmem:[#allocation69_spill] sm:$0xff] }
 0x507   : > { %7354 = vmatprep.mubr.bf16.mxu1 %v5924_v19 }
 0x50e   : > { %7355 = vmatmul.mubr.bf16.gmra.mrb[92].mxu1 %v12681_v14  ;;  %v13743_v14 = vld [vmem:[#allocation12_spill] sm:$0xff] }
 0x50f   : > { %7362 = vmatprep.mubr.bf16.mxu1 %v5982_v24 }
 0x516   : > { %7363 = vmatmul.mubr.bf16.gmra.mrb[96].mxu1 %v12691_v54  ;;  %v13746_v54 = vld [vmem:[#allocation19_spill] sm:$0xff] }
 0x517   : > { %7370 = vmatprep.mubr.bf16.mxu1 %v13737_v17  ;;  %v7689_v17 = vadd.f32 %v12835_v6, %v12803_v13  ;;  %v7697_v13 = vadd.f32 %v12801_v22, %v12835_v6  ;;  %v13762_v22 = vld [vmem:[#allocation50_spill] sm:$0xff] }
 0x51e   : > { %7371 = vmatmul.mubr.bf16.gmra.mrb[100].mxu1 %v12700_v50  ;;  %v13747_v50 = vld [vmem:[#allocation21_spill] sm:$0xff] }
 0x51f   : > { %7378 = vmatprep.mubr.bf16.mxu1 %v13738_v59  ;;  %v13759_v59 = vld [vmem:[#allocation31_spill] sm:$0xff] }
 0x526   : > { %7379 = vmatmul.mubr.bf16.gmra.mrb[104].mxu1 %v13739_v10 }
 0x527   : > { %8381 = vmatprep.mubr.bf16.mxu1 %v13740_v8 }
 0x52e   : > { %8382 = vmatmul.mubr.bf16.vlgmr.msra.gmra.mrb[108].mxu1 %v13741_v58 }
 0x52f   : > { %8385 = vmatprep.mubr.bf16.mxu1 %v13742_v3 }
 0x536   : > { %8386 = vmatmul.mubr.bf16.gmra.mrb[112].mxu1 %v13743_v14 }
 0x537   : > { %8389 = vmatprep.mubr.bf16.mxu1 %v13744_v43 }
 0x53e   : > { %8390 = vmatmul.mubr.bf16.gmra.mrb[116].mxu1 %v13745_v47 }
 0x53f   : > { %8393 = vmatprep.mubr.bf16.mxu1 %v13746_v54 }
 0x546   : > { %8394 = vmatmul.mubr.bf16.gmra.mrb[120].mxu1 %v13747_v50 }
 0x547   : > { %8397 = vmatprep.mubr.bf16.mxu1 %v13748_v56  ;;  %v13760_v56 = vld [vmem:[#allocation17_spill] sm:$0xff] }
 0x54e   : > { %8398 = vmatmul.mubr.bf16.gmra.mrb[124].mxu1 %v13749_v40 }
 0x54f   : > { %8401 = vmatprep.mubr.bf16.mxu1 %v13750_v2 }
 0x556   : > { %8402 = vmatmul.mubr.bf16.gmra.mrb[128].mxu1 %v13751_v48 }
 0x557   : > { %8405 = vmatprep.mubr.bf16.mxu1 %v13752_v41 }
 0x55e   : > { %8406 = vmatmul.mubr.bf16.gmra.mrb[132].mxu1 %v13753_v63  ;;  %v13761_v63 = vld [vmem:[#allocation48_spill] sm:$0xff] }
 0x571   : > { %v7244_v61 = vpop.f32.mrb[36].mxu1 }
 0x572   : > { %v8461_v51 = vadd.f32 %v12830_v45, %v7244_v61  ;;  %v7246_v4 = vpop.f32.mrb[37].mxu1 }
 0x573   : > { %v7247_v29 = vpop.f32.mrb[38].mxu1 }
 0x574   : > { %v7422_v21 = vadd.f32 %v8461_v51, %v13754_v15  ;;  %v8462_v5 = vadd.f32 %v12830_v45, %v7247_v29  ;;  %v7249_v7 = vpop.f32.mrb[39].mxu1 }
 0x576   : > { %v7425_v31 = vadd.f32 %v8462_v5, %v13755_v53  ;;  %v7812_v26 = vadd.f32 %v7670_v57, %v7422_v21  ;;  %v13763_v53 = vld [vmem:[#allocation29_spill] sm:$0xff] }
 0x578   : > { %v7848_v23 = vmax.f32 %v7812_v26, 0.0  ;;  %v7813_v11 = vadd.f32 %v7673_v0, %v7425_v31 }
 0x579   : > { %v7252_v16 = vpop.f32.mrb[40].mxu1 }
 0x57a   : > { %7884 = vst [vmem:[%s12847_s19] sm:$0xff] %v7848_v23  ;;  %v7849_v25 = vmax.f32 %v7813_v11, 0.0  ;;  %v8463_v39 = vadd.f32 %v12830_v45, %v7252_v16  ;;  %v7254_v37 = vpop.f32.mrb[41].mxu1 }
 0x57b   : > { %v7255_v27 = vpop.f32.mrb[42].mxu1 }
 0x57c   : > { %7885 = vst [vmem:[%s12847_s19 + $0x8] sm:$0xff] %v7849_v25  ;;  %v7430_v38 = vadd.f32 %v8463_v39, %v13756_v44  ;;  %v8464_v28 = vadd.f32 %v12830_v45, %v7255_v27  ;;  %v7257_v1 = vpop.f32.mrb[43].mxu1  ;;  %v13765_v27 = vld [vmem:[#allocation22_spill] sm:$0xff] }
 0x57e   : > { %v7814_v46 = vadd.f32 %v7678_v33, %v7430_v38  ;;  %v7433_v42 = vadd.f32 %v8464_v28, %v13757_v20  ;;  %v13764_v33 = vld [vmem:[#allocation49_spill] sm:$0xff] }
 0x580   : > { %v7850_v18 = vmax.f32 %v7814_v46, 0.0  ;;  %v7815_v34 = vadd.f32 %v7681_v30, %v7433_v42  ;;  %v13766_v46 = vld [vmem:[#allocation34_spill] sm:$0xff] }
 0x581   : > { %v7260_v55 = vpop.f32.mrb[44].mxu1 }
 0x582   : > { %7886 = vst [vmem:[%s12847_s19 + $0x10] sm:$0xff] %v7850_v18  ;;  %v7851_v9 = vmax.f32 %v7815_v34, 0.0  ;;  %v8465_v12 = vadd.f32 %v12830_v45, %v7260_v55  ;;  %v7262_v32 = vpop.f32.mrb[45].mxu1  ;;  %v13767_v34 = vld [vmem:[#allocation53_spill] sm:$0xff] }
 0x583   : > { %v7263_v36 = vpop.f32.mrb[46].mxu1 }
 0x584   : > { %7887 = vst [vmem:[%s12847_s19 + $0x18] sm:$0xff] %v7851_v9  ;;  %v7438_v19 = vadd.f32 %v8465_v12, %v13758_v62  ;;  %v8466_v60 = vadd.f32 %v12830_v45, %v7263_v36  ;;  %v7265_v24 = vpop.f32.mrb[47].mxu1  ;;  %v13768_v36 = vld [vmem:[#allocation51_spill] sm:$0xff] }
 0x585   : > { %v13769_v24 = vld [vmem:[#allocation43_spill] sm:$0xff] }
 0x586   : > { %v7441_v10 = vadd.f32 %v8466_v60, %v13759_v59  ;;  %v7816_v8 = vadd.f32 %v7686_v49, %v7438_v19 }
 0x588   : > { %v7852_v58 = vmax.f32 %v7816_v8, 0.0  ;;  %v7817_v3 = vadd.f32 %v7689_v17, %v7441_v10 }
 0x589   : > { %v7268_v14 = vpop.f32.mrb[48].mxu1 }
 0x58a   : > { %7888 = vst [vmem:[%s12847_s19 + $0x20] sm:$0xff] %v7852_v58  ;;  %v7853_v43 = vmax.f32 %v7817_v3, 0.0  ;;  %v8467_v47 = vadd.f32 %v12830_v45, %v7268_v14  ;;  %v7270_v54 = vpop.f32.mrb[49].mxu1  ;;  %v13770_v3 = vld [vmem:[#allocation64_spill] sm:$0xff] }
 0x58b   : > { %v7271_v50 = vpop.f32.mrb[50].mxu1 }
 0x58c   : > { %7889 = vst [vmem:[%s12847_s19 + $0x28] sm:$0xff] %v7853_v43  ;;  %v7446_v40 = vadd.f32 %v8467_v47, %v13760_v56  ;;  %v8468_v2 = vadd.f32 %v12830_v45, %v7271_v50  ;;  %v7273_v48 = vpop.f32.mrb[51].mxu1  ;;  %v13771_v47 = vld [vmem:[#allocation67_spill] sm:$0xff] }
 0x58e   : > { %v7818_v41 = vadd.f32 %v7694_v35, %v7446_v40  ;;  %v7449_v52 = vadd.f32 %v8468_v2, %v13761_v63  ;;  %v13772_v2 = vld [vmem:[#allocation62_spill] sm:$0xff] }
 0x590   : > { %v7854_v61 = vmax.f32 %v7818_v41, 0.0  ;;  %v7819_v51 = vadd.f32 %v7697_v13, %v7449_v52  ;;  %v13773_v52 = vld [vmem:[#allocation66_spill] sm:$0xff] }
 0x591   : > { %v7276_v4 = vpop.f32.mrb[52].mxu1 }
 0x592   : > { %7890 = vst [vmem:[%s12847_s19 + $0x30] sm:$0xff] %v7854_v61  ;;  %v7855_v57 = vmax.f32 %v7819_v51, 0.0  ;;  %v8469_v29 = vadd.f32 %v12830_v45, %v7276_v4  ;;  %v7278_v15 = vpop.f32.mrb[53].mxu1 }
 0x593   : > { %v7279_v21 = vpop.f32.mrb[54].mxu1  ;;  %v13774_v15 = vld [vmem:[#allocation4_spill] sm:$0xff] }
 0x594   : > { %7891 = vst [vmem:[%s12847_s19 + $0x38] sm:$0xff] %v7855_v57  ;;  %v12882_v5 = vadd.f32 %v8469_v29, %v13762_v22  ;;  %v8470_v7 = vadd.f32 %v12830_v45, %v7279_v21  ;;  %v7281_v0 = vpop.f32.mrb[55].mxu1 }
 0x595   : > { %v13775_v0 = vld [vmem:[#allocation7_spill] sm:$0xff] }
 0x596   : > { %v12886_v31 = vadd.f32 %v8470_v7, %v13763_v53 }
 0x599   : > { %v7284_v26 = vpop.f32.mrb[56].mxu1 }
 0x59a   : > { %v8471_v23 = vadd.f32 %v12830_v45, %v7284_v26  ;;  %v7286_v11 = vpop.f32.mrb[57].mxu1 }
 0x59b   : > { %v7287_v16 = vpop.f32.mrb[58].mxu1 }
 0x59c   : > { %v12890_v25 = vadd.f32 %v8471_v23, %v13764_v33  ;;  %v8472_v39 = vadd.f32 %v12830_v45, %v7287_v16  ;;  %v7289_v37 = vpop.f32.mrb[59].mxu1  ;;  %v13776_v33 = vld [vmem:[#allocation40_spill] sm:$0xff] }
 0x59e   : > { %v12894_v30 = vadd.f32 %v8472_v39, %v13765_v27 }
 0x5a1   : > { %v7292_v44 = vpop.f32.mrb[60].mxu1 }
 0x5a2   : > { %v8473_v38 = vadd.f32 %v12830_v45, %v7292_v44  ;;  %v7294_v28 = vpop.f32.mrb[61].mxu1  ;;  %v13777_v44 = vld [vmem:[#allocation5_spill] sm:$0xff] }
 0x5a3   : > { %v7295_v1 = vpop.f32.mrb[62].mxu1 }
 0x5a4   : > { %v12898_v20 = vadd.f32 %v8473_v38, %v13766_v46  ;;  %v8474_v42 = vadd.f32 %v12830_v45, %v7295_v1  ;;  %v7297_v18 = vpop.f32.mrb[63].mxu1 }
 0x5a5   : > { %v13778_v18 = vld [vmem:[#allocation6_spill] sm:$0xff] }
 0x5a6   : > { %v12902_v55 = vadd.f32 %v8474_v42, %v13767_v34 }
 0x5a9   : > { %v7300_v9 = vpop.f32.mrb[64].mxu1 }
 0x5aa   : > { %v8475_v12 = vadd.f32 %v12830_v45, %v7300_v9  ;;  %v7302_v32 = vpop.f32.mrb[65].mxu1 }
 0x5ab   : > { %v7303_v49 = vpop.f32.mrb[66].mxu1  ;;  %v13779_v32 = vld [vmem:[#allocation32_spill] sm:$0xff] }
 0x5ac   : > { %v12906_v62 = vadd.f32 %v8475_v12, %v13768_v36  ;;  %v8476_v19 = vadd.f32 %v12830_v45, %v7303_v49  ;;  %v7305_v60 = vpop.f32.mrb[67].mxu1 }
 0x5ae   : > { %v12910_v17 = vadd.f32 %v8476_v19, %v13769_v24 }
 0x5b1   : > { %v7308_v59 = vpop.f32.mrb[68].mxu1 }
 0x5b2   : > { %v8477_v10 = vadd.f32 %v12830_v45, %v7308_v59  ;;  %v7310_v8 = vpop.f32.mrb[69].mxu1  ;;  %v13780_v59 = vld [vmem:[#allocation38_spill] sm:$0xff] }
 0x5b3   : > { %v7311_v58 = vpop.f32.mrb[70].mxu1 }
 0x5b4   : > { %v12914_v14 = vadd.f32 %v8477_v10, %v13770_v3  ;;  %v8478_v35 = vadd.f32 %v12830_v45, %v7311_v58  ;;  %v7313_v43 = vpop.f32.mrb[71].mxu1  ;;  %v13781_v3 = vld [vmem:[#allocation23_spill] sm:$0xff] }
 0x5b6   : > { %v12918_v54 = vadd.f32 %v8478_v35, %v13771_v47 }
 0x5b9   : > { %v7316_v50 = vpop.f32.mrb[72].mxu1 }
 0x5ba   : > { %v8479_v13 = vadd.f32 %v12830_v45, %v7316_v50  ;;  %v7318_v56 = vpop.f32.mrb[73].mxu1 }
 0x5bb   : > { %v7319_v40 = vpop.f32.mrb[74].mxu1  ;;  %v13782_v56 = vld [vmem:[#allocation28_spill] sm:$0xff] }
 0x5bc   : > { %v12922_v48 = vadd.f32 %v8479_v13, %v13772_v2  ;;  %v8480_v41 = vadd.f32 %v12830_v45, %v7319_v40  ;;  %v7321_v63 = vpop.f32.mrb[75].mxu1 }
 0x5bd   : > { %v13783_v63 = vld [vmem:[#allocation70_spill] sm:$0xff] }
 0x5be   : > { %v12926_v61 = vadd.f32 %v8480_v41, %v13773_v52 }
 0x5c1   : > { %v7324_v51 = vpop.f32.mrb[76].mxu1 }
 0x5c2   : > { %v8481_v4 = vadd.f32 %v12830_v45, %v7324_v51  ;;  %v7326_v57 = vpop.f32.mrb[77].mxu1 }
 0x5c3   : > { %v7327_v29 = vpop.f32.mrb[78].mxu1 }
 0x5c4   : > { %v12930_v21 = vadd.f32 %v8481_v4, %v13774_v15  ;;  %v8482_v22 = vadd.f32 %v12830_v45, %v7327_v29  ;;  %v7329_v7 = vpop.f32.mrb[79].mxu1  ;;  %v13784_v15 = vld [vmem:[#allocation41_spill] sm:$0xff] }
 0x5c6   : > { %v12934_v53 = vadd.f32 %v8482_v22, %v13775_v0 }
 0x5c9   : > { %v7332_v26 = vpop.f32.mrb[80].mxu1 }
 0x5ca   : > { %v8483_v23 = vadd.f32 %v12830_v45, %v7332_v26  ;;  %v7334_v11 = vpop.f32.mrb[81].mxu1  ;;  %v13785_v26 = vld [vmem:[#allocation42_spill] sm:$0xff] }
 0x5cb   : > { %v7335_v16 = vpop.f32.mrb[82].mxu1 }
 0x5cc   : > { %v12938_v39 = vadd.f32 %v8483_v23, %v13776_v33  ;;  %v8484_v37 = vadd.f32 %v12830_v45, %v7335_v16  ;;  %v7337_v27 = vpop.f32.mrb[83].mxu1 }
 0x5cd   : > { %v13786_v27 = vld [vmem:[#allocation72_spill] sm:$0xff] }
 0x5ce   : > { %v12942_v38 = vadd.f32 %v8484_v37, %v13777_v44 }
 0x5d1   : > { %v7340_v28 = vpop.f32.mrb[84].mxu1 }
 0x5d2   : > { %v8485_v1 = vadd.f32 %v12830_v45, %v7340_v28  ;;  %v7342_v46 = vpop.f32.mrb[85].mxu1 }
 0x5d3   : > { %v7343_v42 = vpop.f32.mrb[86].mxu1  ;;  %v13787_v46 = vld [vmem:[#allocation74_spill] sm:$0xff] }
 0x5d4   : > { %v12946_v34 = vadd.f32 %v8485_v1, %v13778_v18  ;;  %v8486_v9 = vadd.f32 %v12830_v45, %v7343_v42  ;;  %v7345_v12 = vpop.f32.mrb[87].mxu1 }
 0x5d6   : > { %v12950_v49 = vadd.f32 %v8486_v9, %v13779_v32 }
 0x5d9   : > { %v7348_v36 = vpop.f32.mrb[88].mxu1 }
 0x5da   : > { %v8487_v19 = vadd.f32 %v12830_v45, %v7348_v36  ;;  %v7350_v60 = vpop.f32.mrb[89].mxu1  ;;  %v13788_v36 = vld [vmem:[#allocation71_spill] sm:$0xff] }
 0x5db   : > { %v7351_v24 = vpop.f32.mrb[90].mxu1 }
 0x5dc   : > { %v12954_v10 = vadd.f32 %v8487_v19, %v13780_v59  ;;  %v8488_v8 = vadd.f32 %v12830_v45, %v7351_v24  ;;  %v7353_v58 = vpop.f32.mrb[91].mxu1  ;;  %v13789_v59 = vld [vmem:[#allocation73_spill] sm:$0xff] }
 0x5de   : > { %v12958_v35 = vadd.f32 %v8488_v8, %v13781_v3 }
 0x5e1   : > { %v7356_v43 = vpop.f32.mrb[92].mxu1 }
 0x5e2   : > { %v8489_v47 = vadd.f32 %v12830_v45, %v7356_v43  ;;  %v7358_v50 = vpop.f32.mrb[93].mxu1 }
 0x5e3   : > { %v7359_v13 = vpop.f32.mrb[94].mxu1 }
 0x5e4   : > { %v12962_v40 = vadd.f32 %v8489_v47, %v13782_v56  ;;  %v8490_v2 = vadd.f32 %v12830_v45, %v7359_v13  ;;  %v7361_v41 = vpop.f32.mrb[95].mxu1 }
 0x5e6   : > { %v12966_v52 = vadd.f32 %v8490_v2, %v13783_v63 }
 0x5e9   : > { %v7364_v51 = vpop.f32.mrb[96].mxu1 }
 0x5ea   : > { %v8491_v4 = vadd.f32 %v12830_v45, %v7364_v51  ;;  %v7366_v57 = vpop.f32.mrb[97].mxu1 }
 0x5eb   : > { %v7367_v29 = vpop.f32.mrb[98].mxu1 }
 0x5ec   : > { %v12970_v22 = vadd.f32 %v8491_v4, %v13784_v15  ;;  %v8492_v7 = vadd.f32 %v12830_v45, %v7367_v29  ;;  %v7369_v0 = vpop.f32.mrb[99].mxu1 }
 0x5ee   : > { %v12974_v23 = vadd.f32 %v8492_v7, %v13785_v26 }
 0x5f1   : > { %v7372_v11 = vpop.f32.mrb[100].mxu1 }
 0x5f2   : > { %v8493_v16 = vadd.f32 %v12830_v45, %v7372_v11  ;;  %v7374_v33 = vpop.f32.mrb[101].mxu1 }
 0x5f3   : > { %v7375_v37 = vpop.f32.mrb[102].mxu1 }
 0x5f4   : > { %v12978_v44 = vadd.f32 %v8493_v16, %v13786_v27  ;;  %v8494_v28 = vadd.f32 %v12830_v45, %v7375_v37  ;;  %v7377_v1 = vpop.f32.mrb[103].mxu1 }
 0x5f6   : > { %v12982_v42 = vadd.f32 %v8494_v28, %v13787_v46 }
 0x5f9   : > { %v7380_v18 = vpop.f32.mrb[104].mxu1 }
 0x5fa   : > { %v8495_v9 = vadd.f32 %v12830_v45, %v7380_v18  ;;  %v7382_v12 = vpop.f32.mrb[105].mxu1 }
 0x5fb   : > { %v7383_v32 = vpop.f32.mrb[106].mxu1 }
 0x5fc   : > { %v12986_v19 = vadd.f32 %v8495_v9, %v13788_v36  ;;  %v8496_v60 = vadd.f32 %v12830_v45, %v7383_v32  ;;  %v7385_v24 = vpop.f32.mrb[107].mxu1 }
 0x5fe   : > { %v12990_v8 = vadd.f32 %v8496_v60, %v13789_v59 }
 0x601   : > { %v8383_v58 = vpop.f32.mrb[108].mxu1 }
 0x602   : > { %v7710_v3 = vadd.f32 %v8383_v58, %v12835_v6  ;;  %v7701_v43 = vpop.f32.mrb[109].mxu1 }
 0x603   : > { %v7702_v47 = vadd.f32 %v12835_v6, %v7701_v43  ;;  %v8384_v50 = vpop.f32.mrb[110].mxu1 }
 0x604   : > { %v7822_v13 = vadd.f32 %v7710_v3, %v12890_v25  ;;  %v7713_v56 = vadd.f32 %v8384_v50, %v12835_v6  ;;  %v7704_v45 = vpop.f32.mrb[111].mxu1 }
 0x605   : > { %v7820_v2 = vadd.f32 %v7702_v47, %v12882_v5  ;;  %v7705_v41 = vadd.f32 %v12835_v6, %v7704_v45 }
 0x606   : > { %v7858_v63 = vmax.f32 %v7822_v13, 0.0  ;;  %v7823_v51 = vadd.f32 %v7713_v56, %v12894_v30 }
 0x607   : > { %v7856_v4 = vmax.f32 %v7820_v2, 0.0  ;;  %v7821_v57 = vadd.f32 %v7705_v41, %v12886_v31 }
 0x608   : > { %7894 = vst [vmem:[%s12847_s19 + $0x50] sm:$0xff] %v7858_v63  ;;  %v7859_v29 = vmax.f32 %v7823_v51, 0.0 }
 0x609   : > { %7892 = vst [vmem:[%s12847_s19 + $0x40] sm:$0xff] %v7856_v4  ;;  %v7857_v15 = vmax.f32 %v7821_v57, 0.0  ;;  %v8387_v7 = vpop.f32.mrb[112].mxu1 }
 0x60a   : > { %7895 = vst [vmem:[%s12847_s19 + $0x58] sm:$0xff] %v7859_v29  ;;  %v7726_v25 = vadd.f32 %v8387_v7, %v12835_v6  ;;  %v7717_v0 = vpop.f32.mrb[113].mxu1 }
 0x60b   : > { %7893 = vst [vmem:[%s12847_s19 + $0x48] sm:$0xff] %v7857_v15  ;;  %v7718_v5 = vadd.f32 %v12835_v6, %v7717_v0  ;;  %v8388_v26 = vpop.f32.mrb[114].mxu1 }
 0x60c   : > { %v7826_v30 = vadd.f32 %v7726_v25, %v12906_v62  ;;  %v7729_v31 = vadd.f32 %v8388_v26, %v12835_v6  ;;  %v7720_v11 = vpop.f32.mrb[115].mxu1 }
 0x60d   : > { %v7824_v16 = vadd.f32 %v7718_v5, %v12898_v20  ;;  %v7721_v33 = vadd.f32 %v12835_v6, %v7720_v11 }
 0x60e   : > { %v7862_v37 = vmax.f32 %v7826_v30, 0.0  ;;  %v7827_v27 = vadd.f32 %v7729_v31, %v12910_v17 }
 0x60f   : > { %v7860_v28 = vmax.f32 %v7824_v16, 0.0  ;;  %v7825_v1 = vadd.f32 %v7721_v33, %v12902_v55 }
 0x610   : > { %7898 = vst [vmem:[%s12847_s19 + $0x70] sm:$0xff] %v7862_v37  ;;  %v7863_v46 = vmax.f32 %v7827_v27, 0.0 }
 0x611   : > { %7896 = vst [vmem:[%s12847_s19 + $0x60] sm:$0xff] %v7860_v28  ;;  %v7861_v18 = vmax.f32 %v7825_v1, 0.0  ;;  %v8391_v9 = vpop.f32.mrb[116].mxu1 }
 0x612   : > { %7899 = vst [vmem:[%s12847_s19 + $0x78] sm:$0xff] %v7863_v46  ;;  %v7742_v62 = vadd.f32 %v8391_v9, %v12835_v6  ;;  %v7733_v12 = vpop.f32.mrb[117].mxu1 }
 0x613   : > { %7897 = vst [vmem:[%s12847_s19 + $0x68] sm:$0xff] %v7861_v18  ;;  %v7734_v20 = vadd.f32 %v12835_v6, %v7733_v12  ;;  %v8392_v32 = vpop.f32.mrb[118].mxu1 }
 0x614   : > { %v7830_v17 = vadd.f32 %v7742_v62, %v12922_v48  ;;  %v7745_v55 = vadd.f32 %v8392_v32, %v12835_v6  ;;  %v7736_v36 = vpop.f32.mrb[119].mxu1 }
 0x615   : > { %v7828_v60 = vadd.f32 %v7734_v20, %v12914_v14  ;;  %v7737_v24 = vadd.f32 %v12835_v6, %v7736_v36 }
 0x616   : > { %v7866_v59 = vmax.f32 %v7830_v17, 0.0  ;;  %v7831_v58 = vadd.f32 %v7745_v55, %v12926_v61 }
 0x617   : > { %v7864_v3 = vmax.f32 %v7828_v60, 0.0  ;;  %v7829_v43 = vadd.f32 %v7737_v24, %v12918_v54 }
 0x618   : > { %7902 = vst [vmem:[%s12847_s19 + $0x90] sm:$0xff] %v7866_v59  ;;  %v7867_v47 = vmax.f32 %v7831_v58, 0.0 }
 0x619   : > { %7900 = vst [vmem:[%s12847_s19 + $0x80] sm:$0xff] %v7864_v3  ;;  %v7865_v50 = vmax.f32 %v7829_v43, 0.0  ;;  %v8395_v13 = vpop.f32.mrb[120].mxu1 }
 0x61a   : > { %7903 = vst [vmem:[%s12847_s19 + $0x98] sm:$0xff] %v7867_v47  ;;  %v7758_v48 = vadd.f32 %v8395_v13, %v12835_v6  ;;  %v7749_v56 = vpop.f32.mrb[121].mxu1 }
 0x61b   : > { %7901 = vst [vmem:[%s12847_s19 + $0x88] sm:$0xff] %v7865_v50  ;;  %v7750_v14 = vadd.f32 %v12835_v6, %v7749_v56  ;;  %v8396_v45 = vpop.f32.mrb[122].mxu1 }
 0x61c   : > { %v7834_v61 = vadd.f32 %v7758_v48, %v12938_v39  ;;  %v7761_v54 = vadd.f32 %v8396_v45, %v12835_v6  ;;  %v7752_v2 = vpop.f32.mrb[123].mxu1 }
 0x61d   : > { %v7832_v41 = vadd.f32 %v7750_v14, %v12930_v21  ;;  %v7753_v63 = vadd.f32 %v12835_v6, %v7752_v2 }
 0x61e   : > { %v7870_v51 = vmax.f32 %v7834_v61, 0.0  ;;  %v7835_v4 = vadd.f32 %v7761_v54, %v12942_v38 }
 0x61f   : > { %v7868_v57 = vmax.f32 %v7832_v41, 0.0  ;;  %v7833_v29 = vadd.f32 %v7753_v63, %v12934_v53 }
 0x620   : > { %7906 = vst [vmem:[%s12847_s19 + $0xb0] sm:$0xff] %v7870_v51  ;;  %v7871_v15 = vmax.f32 %v7835_v4, 0.0 }
 0x621   : > { %7904 = vst [vmem:[%s12847_s19 + $0xa0] sm:$0xff] %v7868_v57  ;;  %v7869_v7 = vmax.f32 %v7833_v29, 0.0  ;;  %v8399_v25 = vpop.f32.mrb[124].mxu1 }
 0x622   : > { %7907 = vst [vmem:[%s12847_s19 + $0xb8] sm:$0xff] %v7871_v15  ;;  %v7774_v39 = vadd.f32 %v8399_v25, %v12835_v6  ;;  %v7765_v0 = vpop.f32.mrb[125].mxu1 }
 0x623   : > { %7905 = vst [vmem:[%s12847_s19 + $0xa8] sm:$0xff] %v7869_v7  ;;  %v7766_v21 = vadd.f32 %v12835_v6, %v7765_v0  ;;  %v8400_v5 = vpop.f32.mrb[126].mxu1 }
 0x624   : > { %v7838_v38 = vadd.f32 %v7774_v39, %v12954_v10  ;;  %v7777_v53 = vadd.f32 %v8400_v5, %v12835_v6  ;;  %v7768_v26 = vpop.f32.mrb[127].mxu1 }
 0x625   : > { %v7836_v30 = vadd.f32 %v7766_v21, %v12946_v34  ;;  %v7769_v31 = vadd.f32 %v12835_v6, %v7768_v26 }
 0x626   : > { %v7874_v11 = vmax.f32 %v7838_v38, 0.0  ;;  %v7839_v16 = vadd.f32 %v7777_v53, %v12958_v35 }
 0x627   : > { %v7872_v33 = vmax.f32 %v7836_v30, 0.0  ;;  %v7837_v37 = vadd.f32 %v7769_v31, %v12950_v49 }
 0x628   : > { %7910 = vst [vmem:[%s12847_s19 + $0xd0] sm:$0xff] %v7874_v11  ;;  %v7875_v27 = vmax.f32 %v7839_v16, 0.0 }
 0x629   : > { %7908 = vst [vmem:[%s12847_s19 + $0xc0] sm:$0xff] %v7872_v33  ;;  %v7873_v28 = vmax.f32 %v7837_v37, 0.0  ;;  %v8403_v1 = vpop.f32.mrb[128].mxu1 }
 0x62a   : > { %7911 = vst [vmem:[%s12847_s19 + $0xd8] sm:$0xff] %v7875_v27  ;;  %v7790_v10 = vadd.f32 %v8403_v1, %v12835_v6  ;;  %v7781_v46 = vpop.f32.mrb[129].mxu1 }
 0x62b   : > { %7909 = vst [vmem:[%s12847_s19 + $0xc8] sm:$0xff] %v7873_v28  ;;  %v7782_v34 = vadd.f32 %v12835_v6, %v7781_v46  ;;  %v8404_v18 = vpop.f32.mrb[130].mxu1 }
 0x62c   : > { %v7842_v35 = vadd.f32 %v7790_v10, %v12970_v22  ;;  %v7793_v49 = vadd.f32 %v8404_v18, %v12835_v6  ;;  %v7784_v9 = vpop.f32.mrb[131].mxu1 }
 0x62d   : > { %v7840_v62 = vadd.f32 %v7782_v34, %v12962_v40  ;;  %v7785_v12 = vadd.f32 %v12835_v6, %v7784_v9 }
 0x62e   : > { %v7878_v20 = vmax.f32 %v7842_v35, 0.0  ;;  %v7843_v32 = vadd.f32 %v7793_v49, %v12974_v23 }
 0x62f   : > { %v7876_v17 = vmax.f32 %v7840_v62, 0.0  ;;  %v7841_v55 = vadd.f32 %v7785_v12, %v12966_v52 }
 0x630   : > { %7914 = vst [vmem:[%s12847_s19 + $0xf0] sm:$0xff] %v7878_v20  ;;  %v7879_v36 = vmax.f32 %v7843_v32, 0.0 }
 0x631   : > { %7912 = vst [vmem:[%s12847_s19 + $0xe0] sm:$0xff] %v7876_v17  ;;  %v7877_v60 = vmax.f32 %v7841_v55, 0.0  ;;  %v8407_v24 = vpop.f32.mrb[132].mxu1 }
 0x632   : > { %7915 = vst [vmem:[%s12847_s19 + $0xf8] sm:$0xff] %v7879_v36  ;;  %v7806_v22 = vadd.f32 %v8407_v24, %v12835_v6  ;;  %v7797_v59 = vpop.f32.mrb[133].mxu1 }
 0x633   : > { %7913 = vst [vmem:[%s12847_s19 + $0xe8] sm:$0xff] %v7877_v60  ;;  %v7798_v40 = vadd.f32 %v12835_v6, %v7797_v59  ;;  %v8408_v23 = vpop.f32.mrb[134].mxu1 }
 0x634   : > { %v7846_v58 = vadd.f32 %v7806_v22, %v12986_v19  ;;  %v7809_v52 = vadd.f32 %v8408_v23, %v12835_v6  ;;  %v7800_v3 = vpop.f32.mrb[135].mxu1 }
 0x635   : > { %v7844_v43 = vadd.f32 %v7798_v40, %v12978_v44  ;;  %v7801_v47 = vadd.f32 %v12835_v6, %v7800_v3 }
 0x636   : > { %v7882_v50 = vmax.f32 %v7846_v58, 0.0  ;;  %v7847_v13 = vadd.f32 %v7809_v52, %v12990_v8 }
 0x637   : > { %v7880_v48 = vmax.f32 %v7844_v43, 0.0  ;;  %v7845_v56 = vadd.f32 %v7801_v47, %v12982_v42 }
 0x638   : > { %7918 = vst [vmem:[%s12847_s19 + $0x110] sm:$0xff] %v7882_v50  ;;  %v7883_v14 = vmax.f32 %v7847_v13, 0.0 }
 0x639   : > { %7916 = vst [vmem:[%s12847_s19 + $0x100] sm:$0xff] %v7880_v48  ;;  %v7881_v45 = vmax.f32 %v7845_v56, 0.0 }
 0x63a   : > { %7919 = vst [vmem:[%s12847_s19 + $0x118] sm:$0xff] %v7883_v14 }
 0x63b   : > { %7917 = vst [vmem:[%s12847_s19 + $0x108] sm:$0xff] %v7881_v45 }
 0x63c PF: > { %s17_s24 = sadd.s32 1, %s9175_s24  }
 0x63d   : > { %p14_p4 = scmp.ge.s32.totalorder %s17_s24, 4  }
 0x63f   :  { %16 = sbr.rel (!%p14_p4) target bundleno = 1 (0x1), region = 78 }

</bundles_post_ra>
